<compile_context>
chip_gen: v6e
topology: v6e:2x2x1
jax: 0.10.0
libtpu: 0.0.40
codegen_flags: <defaults>
</compile_context>

<pallas_src>
import jax
import jax.numpy as jnp
from jax import lax
from jax.experimental import pallas as pl
from jax.experimental.pallas import tpu as pltpu


# ----------------------------- fused Pallas kernel ----------------------------

def _make_fused_kernel(B, Ho, Wo, Cin, Cinner, Cout, use_concat):
    """LeakyReLU + down-conv GEMM + ReLU + 4-phase transposed-conv GEMMs + BN moments."""
    K = 4
    M = B * Ho * Wo

    def kernel(xs_ref, wd_ref, wu_ref, u_ref, mom_ref, dp_ref):
        # xs_ref : (B, 4, Ho+1, Wo+1, Cin) f32 -- parity sub-images of the 1-padded input
        #          for B batch elements (parity p = 2*(row%2) + (col%2)).
        # wd_ref : down-conv weight, bf16:
        #          concat path (K*K*Cin, Cinner) / accumulated path (16, Cin, Cinner).
        # wu_ref : transposed-conv weight, bf16, per output-parity phase:
        #          concat path (4, 4*Cinner, Cout) / accumulated path (4, 4, Cinner, Cout).
        # u_ref  : (1, 4, M, Cout) f32 -- pre-BN up-conv output, phase-major, GEMM row layout.
        # mom_ref: (1, 2, Cout) f32    -- per-grid-step [sum, sum of squares].
        # dp_ref : (B, Ho+2, Wo+2, Cinner) bf16 scratch -- 1-padded ReLU(down-conv) output.

        # Zero only the 1-pixel halo (not the interior: it is fully overwritten below).
        # Done every step (cheap stripes) rather than once under pl.when(pid==0) so the
        # kernel stays correct when a "parallel" grid axis is sharded across TensorCores.
        zr = jnp.zeros((B, 1, Wo + 2, Cinner), jnp.bfloat16)
        zc = jnp.zeros((B, Ho + 2, 1, Cinner), jnp.bfloat16)
        dp_ref[:, 0:1, :, :] = zr
        dp_ref[:, Ho + 1:Ho + 2, :, :] = zr
        dp_ref[:, :, 0:1, :] = zc
        dp_ref[:, :, Wo + 1:Wo + 2, :] = zc

        xs = xs_ref[...]
        xs = jnp.where(xs >= 0.0, xs, 0.2 * xs)            # LeakyReLU(0.2) in f32
        xs = xs.astype(jnp.bfloat16)                        # MXU operand dtype

        # ---- down conv (k=4, s=2, p=1) as GEMM over the stride-2 parity slices ----
        if use_concat:
            cols = []
            for kh in range(K):
                for kw in range(K):
                    p = (kh % 2) * 2 + (kw % 2)
                    r0, c0 = kh // 2, kw // 2
                    cols.append(xs[:, p, r0:r0 + Ho, c0:c0 + Wo, :])
            patches = jnp.concatenate(cols, axis=-1).reshape(M, K * K * Cin)
            d = jnp.dot(patches, wd_ref[...],
                        preferred_element_type=jnp.float32)          # (M, Cinner) f32
        else:
            d = jnp.zeros((M, Cinner), jnp.float32)
            t = 0
            for kh in range(K):
                for kw in range(K):
                    p = (kh % 2) * 2 + (kw % 2)
                    r0, c0 = kh // 2, kw // 2
                    sl = xs[:, p, r0:r0 + Ho, c0:c0 + Wo, :].reshape(M, Cin)
                    d = d + jnp.dot(sl, wd_ref[t],
                                    preferred_element_type=jnp.float32)
                    t += 1

        # ---- ReLU, stash the 1-padded activation (bf16) for the up-phase taps ----
        r = jnp.maximum(d, 0.0)
        dp_ref[:, 1:Ho + 1, 1:Wo + 1, :] = (
            r.reshape(B, Ho, Wo, Cinner).astype(jnp.bfloat16))

        # ---- transposed conv (k=4, s=2, p=1) as 4 output-parity phases ----
        # out[2a+ph, 2b+pw] = sum over taps (kh,kw) with kh%2 != ph, kw%2 != pw of
        #   dp[a + (ph+3-kh)//2, b + (pw+3-kw)//2] @ W[:, :, kh, kw]
        s1 = jnp.zeros((1, Cout), jnp.float32)
        s2 = jnp.zeros((1, Cout), jnp.float32)
        for ph in range(2):
            for pw in range(2):
                idx = 2 * ph + pw
                if use_concat:
                    taps = []
                    for kh in range(K):
                        if kh % 2 == ph:
                            continue
                        for kw in range(K):
                            if kw % 2 == pw:
                                continue
                            rs = (ph + 3 - kh) // 2
                            cs = (pw + 3 - kw) // 2
                            taps.append(dp_ref[:, rs:rs + Ho, cs:cs + Wo, :])
                    pp = jnp.concatenate(taps, axis=-1).reshape(M, 4 * Cinner)
                    up = jnp.dot(pp, wu_ref[idx],
                                 preferred_element_type=jnp.float32)  # (M, Cout) f32
                else:
                    up = jnp.zeros((M, Cout), jnp.float32)
                    t = 0
                    for kh in range(K):
                        if kh % 2 == ph:
                            continue
                        for kw in range(K):
                            if kw % 2 == pw:
                                continue
                            rs = (ph + 3 - kh) // 2
                            cs = (pw + 3 - kw) // 2
                            sl = dp_ref[:, rs:rs + Ho, cs:cs + Wo, :].reshape(M, Cinner)
                            up = up + jnp.dot(sl, wu_ref[idx, t],
                                              preferred_element_type=jnp.float32)
                            t += 1
                # Lane-dense direct GEMM store; (Ho,Wo) interleave happens in the wrapper.
                u_ref[0, idx] = up
                # Incremental BN moments (XLU reductions, no extra f32 copy of u).
                s1 = s1 + jnp.sum(up, axis=0, keepdims=True)
                s2 = s2 + jnp.sum(up * up, axis=0, keepdims=True)

        mom_ref[0] = jnp.concatenate([s1, s2], axis=0)

    return kernel


def _pick_b_tile(n, rows_per_item, target_m=256, max_m=4096):
    """Smallest divisor of n whose GEMM M dim reaches target_m (else largest under max_m)."""
    divs = [d for d in range(1, n + 1) if n % d == 0]
    for d in divs:
        if d * rows_per_item >= target_m:
            return d
    ok = [d for d in divs if d * rows_per_item <= max_m]
    return ok[-1] if ok else 1


# ------------------------------ JAX wrapper ------------------------------------

def unet_skip_block(x_nchw, params):
    """Innermost UnetSkipConnectionBlock forward: cat([x, model(x)], dim=1) (NCHW)."""
    N, Cin, H, W = x_nchw.shape
    Cinner = params["w_down"].shape[0]
    Cout = params["w_up"].shape[1]
    assert H % 2 == 0 and W % 2 == 0
    Ho, Wo = H // 2, W // 2
    K = 4

    # Fill the MXU M dimension by batching several batch elements per grid step.
    B_TILE = _pick_b_tile(N, Ho * Wo)
    NB = N // B_TILE
    M = B_TILE * Ho * Wo

    x_nhwc = jnp.transpose(x_nchw, (0, 2, 3, 1)).astype(jnp.float32)
    xp = jnp.pad(x_nhwc, ((0, 0), (1, 1), (1, 1), (0, 0)))
    # Compact parity sub-images of the padded input: same total bytes as x, so the
    # kernel can build the stride-2 im2col from contiguous slices (no 4x HBM inflation).
    xs = jnp.stack([xp[:, 0::2, 0::2, :], xp[:, 0::2, 1::2, :],
                    xp[:, 1::2, 0::2, :], xp[:, 1::2, 1::2, :]], axis=1)
    # xs: (N, 4, Ho+1, Wo+1, Cin) f32

    # Concat path only for tiny channel counts; at real UNet sizes use accumulated dots.
    use_concat = (Cin < 128) and (Cinner < 128)

    # Down-conv weight (Cinner, Cin, K, K) -> (kh, kw, ci) ordering, bf16 for the MXU.
    wd4 = jnp.transpose(params["w_down"], (2, 3, 1, 0))          # (K, K, Cin, Cinner)
    if use_concat:
        wd = wd4.reshape(K * K * Cin, Cinner).astype(jnp.bfloat16)
    else:
        wd = wd4.reshape(K * K, Cin, Cinner).astype(jnp.bfloat16)

    # Transposed-conv weight (Cinner, Cout, K, K) -> per-output-parity-phase matrices,
    # taps ordered exactly as the kernel gathers them.
    w_up = params["w_up"]
    phase_w = []
    for ph in range(2):
        for pw in range(2):
            taps = []
            for kh in range(K):
                if kh % 2 == ph:
                    continue
                for kw in range(K):
                    if kw % 2 == pw:
                        continue
                    taps.append(w_up[:, :, kh, kw])               # (Cinner, Cout)
            if use_concat:
                phase_w.append(jnp.concatenate(taps, axis=0))     # (4*Cinner, Cout)
            else:
                phase_w.append(jnp.stack(taps, axis=0))           # (4, Cinner, Cout)
    wu = jnp.stack(phase_w, axis=0).astype(jnp.bfloat16)

    m_rows = N * Ho * Wo
    flops = 2 * m_rows * (K * K * Cin) * Cinner + 2 * m_rows * 4 * (4 * Cinner) * Cout
    bytes_accessed = (xs.size * 4 + wd.size * 2 + wu.size * 2
                      + 4 * m_rows * Cout * 4 + NB * 2 * Cout * 4)

    # Per-chip VMEM limit with headroom (~96 MiB on v5e/v6e, ~48 MiB on v7x).
    try:
        vmem_cap = pltpu.get_tpu_info().vmem_capacity_bytes
    except Exception:
        vmem_cap = 64 * 1024 * 1024
    vmem_limit = int(vmem_cap * 3 // 4)

    kernel = _make_fused_kernel(B_TILE, Ho, Wo, Cin, Cinner, Cout, use_concat)
    u_ph, mom = pl.pallas_call(
        kernel,
        out_shape=(jax.ShapeDtypeStruct((NB, 4, M, Cout), jnp.float32),
                   jax.ShapeDtypeStruct((NB, 2, Cout), jnp.float32)),
        grid_spec=pltpu.PrefetchScalarGridSpec(
            num_scalar_prefetch=0,
            grid=(NB,),
            in_specs=[
                pl.BlockSpec((B_TILE, 4, Ho + 1, Wo + 1, Cin),
                             lambda n: (n, 0, 0, 0, 0)),
                pl.BlockSpec(wd.shape, lambda n: (0,) * wd.ndim),
                pl.BlockSpec(wu.shape, lambda n: (0,) * wu.ndim),
            ],
            out_specs=[
                pl.BlockSpec((1, 4, M, Cout), lambda n: (n, 0, 0, 0)),
                pl.BlockSpec((1, 2, Cout), lambda n: (n, 0, 0)),
            ],
            scratch_shapes=[pltpu.VMEM((B_TILE, Ho + 2, Wo + 2, Cinner), jnp.bfloat16)],
        ),
        compiler_params=pltpu.CompilerParams(
            dimension_semantics=("parallel",),
            vmem_limit_bytes=vmem_limit,
        ),
        cost_estimate=pl.CostEstimate(flops=flops, transcendentals=0,
                                      bytes_accessed=bytes_accessed),
    )(xs, wd, wu)

    # ---- BatchNorm finalize: global batch stats from the tiny per-step moments ----
    mom = jnp.sum(mom, axis=0)                              # (2, Cout)
    cnt = jnp.float32(N * H * W)
    mean = mom[0] / cnt
    # TODO(synk): one-pass E[x^2]-mean^2 can cancel for |mean| >> std; clamp to >= 0 here,
    # switch to a centered second pass / Welford combine if used beyond this block.
    var = jnp.maximum(mom[1] / cnt - mean * mean, 0.0)
    scale = params["gamma"] * lax.rsqrt(var + 1e-5)
    shift = params["beta"] - mean * scale

    # Phase interleave + (Ho,Wo) reshape + BN affine + channel concat (cheap XLA epilogue).
    u = u_ph.reshape(NB, 2, 2, B_TILE, Ho, Wo, Cout)        # (nb, ph, pw, b, oh, ow, c)
    u = jnp.transpose(u, (0, 3, 4, 1, 5, 2, 6))             # (nb, b, oh, ph, ow, pw, c)
    u = u.reshape(N, H, W, Cout)
    u = u * scale + shift
    u_nchw = jnp.transpose(u, (0, 3, 1, 2))
    return jnp.concatenate([x_nchw, u_nchw], axis=1)
    # TODO(synk): non-innermost variants (submodule recursion, outermost Tanh path,
    # Dropout) are not exercised by this innermost configuration.


# ---------------------------- pure-JAX reference --------------------------------
# Mirrors the kernel's MXU precision (bf16 conv operands, f32 accumulation) so the
# check validates the im2col / phase-decomposition / BN structure tightly.

def reference(x, params):
    lrelu = jnp.where(x >= 0, x, 0.2 * x)
    d = lax.conv_general_dilated(
        lrelu.astype(jnp.bfloat16), params["w_down"].astype(jnp.bfloat16),
        (2, 2), ((1, 1), (1, 1)),
        dimension_numbers=('NCHW', 'OIHW', 'NCHW'),
        preferred_element_type=jnp.float32)
    r = jnp.maximum(d, 0.0)
    wt = params["w_up"]                                     # (in, out, 4, 4)
    w_eq = jnp.transpose(wt[:, :, ::-1, ::-1], (1, 0, 2, 3))
    t = lax.conv_general_dilated(
        r.astype(jnp.bfloat16), w_eq.astype(jnp.bfloat16),
        (1, 1), ((2, 2), (2, 2)), lhs_dilation=(2, 2),
        dimension_numbers=('NCHW', 'OIHW', 'NCHW'),
        preferred_element_type=jnp.float32)
    mean = jnp.mean(t, axis=(0, 2, 3), keepdims=True)
    var = jnp.mean((t - mean) ** 2, axis=(0, 2, 3), keepdims=True)
    bn = (t - mean) * lax.rsqrt(var + 1e-5)
    bn = bn * params["gamma"].reshape(1, -1, 1, 1) + params["beta"].reshape(1, -1, 1, 1)
    return jnp.concatenate([x, bn], axis=1)


# --------------------------------- main -----------------------------------------

if __name__ == "__main__":
    N, H, W = 2, 16, 16
    outer_nc, inner_nc = 4, 8
    input_nc = outer_nc                                      # input_nc=None in the PyTorch ctor

    key = jax.random.PRNGKey(0)
    k_x, k_wd, k_wu, k_g, k_b = jax.random.split(key, 5)

    x = jax.random.normal(k_x, (N, input_nc, H, W), dtype=jnp.float32)
    params = {
        # Conv2d weight: (out=inner_nc, in=input_nc, 4, 4), bias=False
        "w_down": 0.1 * jax.random.normal(k_wd, (inner_nc, input_nc, 4, 4), dtype=jnp.float32),
        # ConvTranspose2d weight: (in=inner_nc, out=outer_nc, 4, 4), bias=False
        "w_up": 0.1 * jax.random.normal(k_wu, (inner_nc, outer_nc, 4, 4), dtype=jnp.float32),
        # BatchNorm2d affine params
        "gamma": 1.0 + 0.1 * jax.random.normal(k_g, (outer_nc,), dtype=jnp.float32),
        "beta": 0.1 * jax.random.normal(k_b, (outer_nc,), dtype=jnp.float32),
    }

    out = jax.jit(unet_skip_block)(x, params)
    out = jax.block_until_ready(out)

    ref = reference(x, params)
    assert out.shape == (N, input_nc + outer_nc, H, W), out.shape
    max_err = float(jnp.max(jnp.abs(out - ref)))
    assert jnp.allclose(out, ref, rtol=1e-2, atol=1e-2), max_err

    print("KERNEL_OK")
</pallas_src>

<mosaic_0001>
module attributes {stable_mosaic.version = 11 : i64} {
  func.func @kernel(%arg0: i32, %arg1: memref<2x4x9x9x4xf32, #tpu.memory_space<vmem>>, %arg2: memref<64x8xbf16, #tpu.memory_space<vmem>>, %arg3: memref<4x32x4xbf16, #tpu.memory_space<vmem>>, %arg4: memref<1x4x128x4xf32, #tpu.memory_space<vmem>>, %arg5: memref<1x2x4xf32, #tpu.memory_space<vmem>>, %arg6: memref<2x10x10x8xbf16, #tpu.memory_space<vmem>>) attributes {dimension_semantics = [#tpu.dimension_semantics<parallel>], iteration_bounds = array<i64: 1>, scalar_prefetch = 0 : i64, scratch_operands = 1 : i64, tpu.core_type = #tpu.core_type<tc>, window_params = [{transform_indices = @transform_0, window_bounds = array<i64: 2, 4, 9, 9, 4>}, {pipeline_mode = #tpu.pipeline_mode<synchronous>, transform_indices = @transform_1, window_bounds = array<i64: 64, 8>}, {pipeline_mode = #tpu.pipeline_mode<synchronous>, transform_indices = @transform_2, window_bounds = array<i64: 4, 32, 4>}, {transform_indices = @transform_3, window_bounds = array<i64: 1, 4, 128, 4>}, {transform_indices = @transform_4, window_bounds = array<i64: 1, 2, 4>}]} {
    %cst = arith.constant 0.000000e+00 : bf16
    %0 = vector.broadcast %cst : bf16 to vector<2x1x10x8xbf16>
    %cst_0 = arith.constant 0.000000e+00 : bf16
    %1 = vector.broadcast %cst_0 : bf16 to vector<2x10x1x8xbf16>
    %c0 = arith.constant 0 : index
    %c0_1 = arith.constant 0 : index
    %c0_2 = arith.constant 0 : index
    %c0_3 = arith.constant 0 : index
    %2 = vector.load %arg6[%c0, %c0_1, %c0_2, %c0_3] : memref<2x10x10x8xbf16, #tpu.memory_space<vmem>>, vector<2x1x10x8xbf16>
    tpu.vector_store %arg6[%c0, %c0_1, %c0_2, %c0_3], %0 {strides = array<i32>} : memref<2x10x10x8xbf16, #tpu.memory_space<vmem>>, vector<2x1x10x8xbf16>,
    %c0_4 = arith.constant 0 : index
    %c9 = arith.constant 9 : index
    %c0_5 = arith.constant 0 : index
    %c0_6 = arith.constant 0 : index
    %3 = vector.load %arg6[%c0_4, %c9, %c0_5, %c0_6] : memref<2x10x10x8xbf16, #tpu.memory_space<vmem>>, vector<2x1x10x8xbf16>
    tpu.vector_store %arg6[%c0_4, %c9, %c0_5, %c0_6], %0 {strides = array<i32>} : memref<2x10x10x8xbf16, #tpu.memory_space<vmem>>, vector<2x1x10x8xbf16>,
    %c0_7 = arith.constant 0 : index
    %c0_8 = arith.constant 0 : index
    %c0_9 = arith.constant 0 : index
    %c0_10 = arith.constant 0 : index
    %4 = vector.load %arg6[%c0_7, %c0_8, %c0_9, %c0_10] : memref<2x10x10x8xbf16, #tpu.memory_space<vmem>>, vector<2x10x1x8xbf16>
    tpu.vector_store %arg6[%c0_7, %c0_8, %c0_9, %c0_10], %1 {strides = array<i32>} : memref<2x10x10x8xbf16, #tpu.memory_space<vmem>>, vector<2x10x1x8xbf16>,
    %c0_11 = arith.constant 0 : index
    %c0_12 = arith.constant 0 : index
    %c9_13 = arith.constant 9 : index
    %c0_14 = arith.constant 0 : index
    %5 = vector.load %arg6[%c0_11, %c0_12, %c9_13, %c0_14] : memref<2x10x10x8xbf16, #tpu.memory_space<vmem>>, vector<2x10x1x8xbf16>
    tpu.vector_store %arg6[%c0_11, %c0_12, %c9_13, %c0_14], %1 {strides = array<i32>} : memref<2x10x10x8xbf16, #tpu.memory_space<vmem>>, vector<2x10x1x8xbf16>,
    %c0_15 = arith.constant 0 : index
    %c0_16 = arith.constant 0 : index
    %c0_17 = arith.constant 0 : index
    %c0_18 = arith.constant 0 : index
    %c0_19 = arith.constant 0 : index
    %6 = vector.load %arg1[%c0_15, %c0_16, %c0_17, %c0_18, %c0_19] : memref<2x4x9x9x4xf32, #tpu.memory_space<vmem>>, vector<2x4x9x9x4xf32>
    %cst_20 = arith.constant 0.000000e+00 : f32
    %7 = vector.broadcast %cst_20 : f32 to vector<2x4x9x9x4xf32>
    %8 = arith.cmpf oge, %6, %7 : vector<2x4x9x9x4xf32>
    %cst_21 = arith.constant 2.000000e-01 : f32
    %9 = vector.broadcast %cst_21 : f32 to vector<2x4x9x9x4xf32>
    %10 = arith.mulf %9, %6 : vector<2x4x9x9x4xf32>
    %11 = arith.select %8, %6, %10 : vector<2x4x9x9x4xi1>, vector<2x4x9x9x4xf32>
    %12 = arith.truncf %11 : vector<2x4x9x9x4xf32> to vector<2x4x9x9x4xbf16>
    %13 = vector.extract_strided_slice %12 {offsets = [0, 0, 0, 0, 0], sizes = [2, 1, 8, 8, 4], strides = [1, 1, 1, 1, 1]} : vector<2x4x9x9x4xbf16> to vector<2x1x8x8x4xbf16>
    %14 = vector.shape_cast %13 : vector<2x1x8x8x4xbf16> to vector<2x8x8x4xbf16>
    %15 = vector.extract_strided_slice %12 {offsets = [0, 1, 0, 0, 0], sizes = [2, 1, 8, 8, 4], strides = [1, 1, 1, 1, 1]} : vector<2x4x9x9x4xbf16> to vector<2x1x8x8x4xbf16>
    %16 = vector.shape_cast %15 : vector<2x1x8x8x4xbf16> to vector<2x8x8x4xbf16>
    %17 = vector.extract_strided_slice %12 {offsets = [0, 0, 0, 1, 0], sizes = [2, 1, 8, 8, 4], strides = [1, 1, 1, 1, 1]} : vector<2x4x9x9x4xbf16> to vector<2x1x8x8x4xbf16>
    %18 = vector.shape_cast %17 : vector<2x1x8x8x4xbf16> to vector<2x8x8x4xbf16>
    %19 = vector.extract_strided_slice %12 {offsets = [0, 1, 0, 1, 0], sizes = [2, 1, 8, 8, 4], strides = [1, 1, 1, 1, 1]} : vector<2x4x9x9x4xbf16> to vector<2x1x8x8x4xbf16>
    %20 = vector.shape_cast %19 : vector<2x1x8x8x4xbf16> to vector<2x8x8x4xbf16>
    %21 = vector.extract_strided_slice %12 {offsets = [0, 2, 0, 0, 0], sizes = [2, 1, 8, 8, 4], strides = [1, 1, 1, 1, 1]} : vector<2x4x9x9x4xbf16> to vector<2x1x8x8x4xbf16>
    %22 = vector.shape_cast %21 : vector<2x1x8x8x4xbf16> to vector<2x8x8x4xbf16>
    %23 = vector.extract_strided_slice %12 {offsets = [0, 3, 0, 0, 0], sizes = [2, 1, 8, 8, 4], strides = [1, 1, 1, 1, 1]} : vector<2x4x9x9x4xbf16> to vector<2x1x8x8x4xbf16>
    %24 = vector.shape_cast %23 : vector<2x1x8x8x4xbf16> to vector<2x8x8x4xbf16>
    %25 = vector.extract_strided_slice %12 {offsets = [0, 2, 0, 1, 0], sizes = [2, 1, 8, 8, 4], strides = [1, 1, 1, 1, 1]} : vector<2x4x9x9x4xbf16> to vector<2x1x8x8x4xbf16>
    %26 = vector.shape_cast %25 : vector<2x1x8x8x4xbf16> to vector<2x8x8x4xbf16>
    %27 = vector.extract_strided_slice %12 {offsets = [0, 3, 0, 1, 0], sizes = [2, 1, 8, 8, 4], strides = [1, 1, 1, 1, 1]} : vector<2x4x9x9x4xbf16> to vector<2x1x8x8x4xbf16>
    %28 = vector.shape_cast %27 : vector<2x1x8x8x4xbf16> to vector<2x8x8x4xbf16>
    %29 = vector.extract_strided_slice %12 {offsets = [0, 0, 1, 0, 0], sizes = [2, 1, 8, 8, 4], strides = [1, 1, 1, 1, 1]} : vector<2x4x9x9x4xbf16> to vector<2x1x8x8x4xbf16>
    %30 = vector.shape_cast %29 : vector<2x1x8x8x4xbf16> to vector<2x8x8x4xbf16>
    %31 = vector.extract_strided_slice %12 {offsets = [0, 1, 1, 0, 0], sizes = [2, 1, 8, 8, 4], strides = [1, 1, 1, 1, 1]} : vector<2x4x9x9x4xbf16> to vector<2x1x8x8x4xbf16>
    %32 = vector.shape_cast %31 : vector<2x1x8x8x4xbf16> to vector<2x8x8x4xbf16>
    %33 = vector.extract_strided_slice %12 {offsets = [0, 0, 1, 1, 0], sizes = [2, 1, 8, 8, 4], strides = [1, 1, 1, 1, 1]} : vector<2x4x9x9x4xbf16> to vector<2x1x8x8x4xbf16>
    %34 = vector.shape_cast %33 : vector<2x1x8x8x4xbf16> to vector<2x8x8x4xbf16>
    %35 = vector.extract_strided_slice %12 {offsets = [0, 1, 1, 1, 0], sizes = [2, 1, 8, 8, 4], strides = [1, 1, 1, 1, 1]} : vector<2x4x9x9x4xbf16> to vector<2x1x8x8x4xbf16>
    %36 = vector.shape_cast %35 : vector<2x1x8x8x4xbf16> to vector<2x8x8x4xbf16>
    %37 = vector.extract_strided_slice %12 {offsets = [0, 2, 1, 0, 0], sizes = [2, 1, 8, 8, 4], strides = [1, 1, 1, 1, 1]} : vector<2x4x9x9x4xbf16> to vector<2x1x8x8x4xbf16>
    %38 = vector.shape_cast %37 : vector<2x1x8x8x4xbf16> to vector<2x8x8x4xbf16>
    %39 = vector.extract_strided_slice %12 {offsets = [0, 3, 1, 0, 0], sizes = [2, 1, 8, 8, 4], strides = [1, 1, 1, 1, 1]} : vector<2x4x9x9x4xbf16> to vector<2x1x8x8x4xbf16>
    %40 = vector.shape_cast %39 : vector<2x1x8x8x4xbf16> to vector<2x8x8x4xbf16>
    %41 = vector.extract_strided_slice %12 {offsets = [0, 2, 1, 1, 0], sizes = [2, 1, 8, 8, 4], strides = [1, 1, 1, 1, 1]} : vector<2x4x9x9x4xbf16> to vector<2x1x8x8x4xbf16>
    %42 = vector.shape_cast %41 : vector<2x1x8x8x4xbf16> to vector<2x8x8x4xbf16>
    %43 = vector.extract_strided_slice %12 {offsets = [0, 3, 1, 1, 0], sizes = [2, 1, 8, 8, 4], strides = [1, 1, 1, 1, 1]} : vector<2x4x9x9x4xbf16> to vector<2x1x8x8x4xbf16>
    %44 = vector.shape_cast %43 : vector<2x1x8x8x4xbf16> to vector<2x8x8x4xbf16>
    %45 = tpu.concatenate %14, %16, %18, %20, %22, %24, %26, %28, %30, %32, %34, %36, %38, %40, %42, %44 in 3 : vector<2x8x8x4xbf16>, vector<2x8x8x4xbf16>, vector<2x8x8x4xbf16>, vector<2x8x8x4xbf16>, vector<2x8x8x4xbf16>, vector<2x8x8x4xbf16>, vector<2x8x8x4xbf16>, vector<2x8x8x4xbf16>, vector<2x8x8x4xbf16>, vector<2x8x8x4xbf16>, vector<2x8x8x4xbf16>, vector<2x8x8x4xbf16>, vector<2x8x8x4xbf16>, vector<2x8x8x4xbf16>, vector<2x8x8x4xbf16>, vector<2x8x8x4xbf16> -> vector<2x8x8x64xbf16>
    %46 = vector.shape_cast %45 : vector<2x8x8x64xbf16> to vector<128x64xbf16>
    %c0_22 = arith.constant 0 : index
    %c0_23 = arith.constant 0 : index
    %47 = vector.load %arg2[%c0_22, %c0_23] : memref<64x8xbf16, #tpu.memory_space<vmem>>, vector<64x8xbf16>
    %cst_24 = arith.constant dense<0.000000e+00> : vector<128x8xf32>
    %48 = tpu.matmul %46, %47, %cst_24 {dimension_numbers = #tpu.dot_dimension_numbers<[1], [0], [0], [1], [0, 0, 1, 1], [], []>} : vector<128x64xbf16>, vector<64x8xbf16>, vector<128x8xf32> -> vector<128x8xf32>
    %cst_25 = arith.constant 0.000000e+00 : f32
    %49 = vector.broadcast %cst_25 : f32 to vector<128x8xf32>
    %50 = arith.maximumf %48, %49 : vector<128x8xf32>
    %51 = vector.shape_cast %50 : vector<128x8xf32> to vector<2x8x8x8xf32>
    %52 = arith.truncf %51 : vector<2x8x8x8xf32> to vector<2x8x8x8xbf16>
    %c0_26 = arith.constant 0 : index
    %c1 = arith.constant 1 : index
    %c1_27 = arith.constant 1 : index
    %c0_28 = arith.constant 0 : index
    %53 = vector.load %arg6[%c0_26, %c1, %c1_27, %c0_28] : memref<2x10x10x8xbf16, #tpu.memory_space<vmem>>, vector<2x8x8x8xbf16>
    tpu.vector_store %arg6[%c0_26, %c1, %c1_27, %c0_28], %52 {strides = array<i32>} : memref<2x10x10x8xbf16, #tpu.memory_space<vmem>>, vector<2x8x8x8xbf16>,
    %cst_29 = arith.constant 0.000000e+00 : f32
    %54 = vector.broadcast %cst_29 : f32 to vector<1x4xf32>
    %cst_30 = arith.constant 0.000000e+00 : f32
    %55 = vector.broadcast %cst_30 : f32 to vector<1x4xf32>
    %c0_31 = arith.constant 0 : index
    %c1_32 = arith.constant 1 : index
    %c1_33 = arith.constant 1 : index
    %c0_34 = arith.constant 0 : index
    %56 = vector.load %arg6[%c0_31, %c1_32, %c1_33, %c0_34] : memref<2x10x10x8xbf16, #tpu.memory_space<vmem>>, vector<2x8x8x8xbf16>
    %c0_35 = arith.constant 0 : index
    %c1_36 = arith.constant 1 : index
    %c0_37 = arith.constant 0 : index
    %c0_38 = arith.constant 0 : index
    %57 = vector.load %arg6[%c0_35, %c1_36, %c0_37, %c0_38] : memref<2x10x10x8xbf16, #tpu.memory_space<vmem>>, vector<2x8x8x8xbf16>
    %c0_39 = arith.constant 0 : index
    %c0_40 = arith.constant 0 : index
    %c1_41 = arith.constant 1 : index
    %c0_42 = arith.constant 0 : index
    %58 = vector.load %arg6[%c0_39, %c0_40, %c1_41, %c0_42] : memref<2x10x10x8xbf16, #tpu.memory_space<vmem>>, vector<2x8x8x8xbf16>
    %c0_43 = arith.constant 0 : index
    %c0_44 = arith.constant 0 : index
    %c0_45 = arith.constant 0 : index
    %c0_46 = arith.constant 0 : index
    %59 = vector.load %arg6[%c0_43, %c0_44, %c0_45, %c0_46] : memref<2x10x10x8xbf16, #tpu.memory_space<vmem>>, vector<2x8x8x8xbf16>
    %60 = tpu.concatenate %56, %57, %58, %59 in 3 : vector<2x8x8x8xbf16>, vector<2x8x8x8xbf16>, vector<2x8x8x8xbf16>, vector<2x8x8x8xbf16> -> vector<2x8x8x32xbf16>
    %61 = vector.shape_cast %60 : vector<2x8x8x32xbf16> to vector<128x32xbf16>
    %c0_47 = arith.constant 0 : index
    %c0_48 = arith.constant 0 : index
    %c0_49 = arith.constant 0 : index
    %62 = vector.load %arg3[%c0_47, %c0_48, %c0_49] : memref<4x32x4xbf16, #tpu.memory_space<vmem>>, vector<1x32x4xbf16>
    %63 = vector.shape_cast %62 : vector<1x32x4xbf16> to vector<32x4xbf16>
    %cst_50 = arith.constant dense<0.000000e+00> : vector<128x4xf32>
    %64 = tpu.matmul %61, %63, %cst_50 {dimension_numbers = #tpu.dot_dimension_numbers<[1], [0], [0], [1], [0, 0, 1, 1], [], []>} : vector<128x32xbf16>, vector<32x4xbf16>, vector<128x4xf32> -> vector<128x4xf32>
    %c0_51 = arith.constant 0 : index
    %c0_52 = arith.constant 0 : index
    %c0_53 = arith.constant 0 : index
    %c0_54 = arith.constant 0 : index
    %65 = vector.load %arg4[%c0_51, %c0_52, %c0_53, %c0_54] : memref<1x4x128x4xf32, #tpu.memory_space<vmem>>, vector<1x1x128x4xf32>
    %66 = vector.shape_cast %65 : vector<1x1x128x4xf32> to vector<128x4xf32>
    %67 = vector.shape_cast %64 : vector<128x4xf32> to vector<1x1x128x4xf32>
    tpu.vector_store %arg4[%c0_51, %c0_52, %c0_53, %c0_54], %67 {strides = array<i32>} : memref<1x4x128x4xf32, #tpu.memory_space<vmem>>, vector<1x1x128x4xf32>,
    %cst_55 = arith.constant dense<0.000000e+00> : vector<4xf32>
    %68 = vector.multi_reduction <add>, %64, %cst_55 [0] : vector<128x4xf32> to vector<4xf32>
    %69 = vector.shape_cast %68 : vector<4xf32> to vector<1x4xf32>
    %70 = arith.addf %54, %69 : vector<1x4xf32>
    %71 = arith.mulf %64, %64 : vector<128x4xf32>
    %cst_56 = arith.constant dense<0.000000e+00> : vector<4xf32>
    %72 = vector.multi_reduction <add>, %71, %cst_56 [0] : vector<128x4xf32> to vector<4xf32>
    %73 = vector.shape_cast %72 : vector<4xf32> to vector<1x4xf32>
    %74 = arith.addf %55, %73 : vector<1x4xf32>
    %c0_57 = arith.constant 0 : index
    %c1_58 = arith.constant 1 : index
    %c2 = arith.constant 2 : index
    %c0_59 = arith.constant 0 : index
    %75 = vector.load %arg6[%c0_57, %c1_58, %c2, %c0_59] : memref<2x10x10x8xbf16, #tpu.memory_space<vmem>>, vector<2x8x8x8xbf16>
    %c0_60 = arith.constant 0 : index
    %c1_61 = arith.constant 1 : index
    %c1_62 = arith.constant 1 : index
    %c0_63 = arith.constant 0 : index
    %76 = vector.load %arg6[%c0_60, %c1_61, %c1_62, %c0_63] : memref<2x10x10x8xbf16, #tpu.memory_space<vmem>>, vector<2x8x8x8xbf16>
    %c0_64 = arith.constant 0 : index
    %c0_65 = arith.constant 0 : index
    %c2_66 = arith.constant 2 : index
    %c0_67 = arith.constant 0 : index
    %77 = vector.load %arg6[%c0_64, %c0_65, %c2_66, %c0_67] : memref<2x10x10x8xbf16, #tpu.memory_space<vmem>>, vector<2x8x8x8xbf16>
    %c0_68 = arith.constant 0 : index
    %c0_69 = arith.constant 0 : index
    %c1_70 = arith.constant 1 : index
    %c0_71 = arith.constant 0 : index
    %78 = vector.load %arg6[%c0_68, %c0_69, %c1_70, %c0_71] : memref<2x10x10x8xbf16, #tpu.memory_space<vmem>>, vector<2x8x8x8xbf16>
    %79 = tpu.concatenate %75, %76, %77, %78 in 3 : vector<2x8x8x8xbf16>, vector<2x8x8x8xbf16>, vector<2x8x8x8xbf16>, vector<2x8x8x8xbf16> -> vector<2x8x8x32xbf16>
    %80 = vector.shape_cast %79 : vector<2x8x8x32xbf16> to vector<128x32xbf16>
    %c1_72 = arith.constant 1 : index
    %c0_73 = arith.constant 0 : index
    %c0_74 = arith.constant 0 : index
    %81 = vector.load %arg3[%c1_72, %c0_73, %c0_74] : memref<4x32x4xbf16, #tpu.memory_space<vmem>>, vector<1x32x4xbf16>
    %82 = vector.shape_cast %81 : vector<1x32x4xbf16> to vector<32x4xbf16>
    %cst_75 = arith.constant dense<0.000000e+00> : vector<128x4xf32>
    %83 = tpu.matmul %80, %82, %cst_75 {dimension_numbers = #tpu.dot_dimension_numbers<[1], [0], [0], [1], [0, 0, 1, 1], [], []>} : vector<128x32xbf16>, vector<32x4xbf16>, vector<128x4xf32> -> vector<128x4xf32>
    %c0_76 = arith.constant 0 : index
    %c1_77 = arith.constant 1 : index
    %c0_78 = arith.constant 0 : index
    %c0_79 = arith.constant 0 : index
    %84 = vector.load %arg4[%c0_76, %c1_77, %c0_78, %c0_79] : memref<1x4x128x4xf32, #tpu.memory_space<vmem>>, vector<1x1x128x4xf32>
    %85 = vector.shape_cast %84 : vector<1x1x128x4xf32> to vector<128x4xf32>
    %86 = vector.shape_cast %83 : vector<128x4xf32> to vector<1x1x128x4xf32>
    tpu.vector_store %arg4[%c0_76, %c1_77, %c0_78, %c0_79], %86 {strides = array<i32>} : memref<1x4x128x4xf32, #tpu.memory_space<vmem>>, vector<1x1x128x4xf32>,
    %cst_80 = arith.constant dense<0.000000e+00> : vector<4xf32>
    %87 = vector.multi_reduction <add>, %83, %cst_80 [0] : vector<128x4xf32> to vector<4xf32>
    %88 = vector.shape_cast %87 : vector<4xf32> to vector<1x4xf32>
    %89 = arith.addf %70, %88 : vector<1x4xf32>
    %90 = arith.mulf %83, %83 : vector<128x4xf32>
    %cst_81 = arith.constant dense<0.000000e+00> : vector<4xf32>
    %91 = vector.multi_reduction <add>, %90, %cst_81 [0] : vector<128x4xf32> to vector<4xf32>
    %92 = vector.shape_cast %91 : vector<4xf32> to vector<1x4xf32>
    %93 = arith.addf %74, %92 : vector<1x4xf32>
    %c0_82 = arith.constant 0 : index
    %c2_83 = arith.constant 2 : index
    %c1_84 = arith.constant 1 : index
    %c0_85 = arith.constant 0 : index
    %94 = vector.load %arg6[%c0_82, %c2_83, %c1_84, %c0_85] : memref<2x10x10x8xbf16, #tpu.memory_space<vmem>>, vector<2x8x8x8xbf16>
    %c0_86 = arith.constant 0 : index
    %c2_87 = arith.constant 2 : index
    %c0_88 = arith.constant 0 : index
    %c0_89 = arith.constant 0 : index
    %95 = vector.load %arg6[%c0_86, %c2_87, %c0_88, %c0_89] : memref<2x10x10x8xbf16, #tpu.memory_space<vmem>>, vector<2x8x8x8xbf16>
    %c0_90 = arith.constant 0 : index
    %c1_91 = arith.constant 1 : index
    %c1_92 = arith.constant 1 : index
    %c0_93 = arith.constant 0 : index
    %96 = vector.load %arg6[%c0_90, %c1_91, %c1_92, %c0_93] : memref<2x10x10x8xbf16, #tpu.memory_space<vmem>>, vector<2x8x8x8xbf16>
    %c0_94 = arith.constant 0 : index
    %c1_95 = arith.constant 1 : index
    %c0_96 = arith.constant 0 : index
    %c0_97 = arith.constant 0 : index
    %97 = vector.load %arg6[%c0_94, %c1_95, %c0_96, %c0_97] : memref<2x10x10x8xbf16, #tpu.memory_space<vmem>>, vector<2x8x8x8xbf16>
    %98 = tpu.concatenate %94, %95, %96, %97 in 3 : vector<2x8x8x8xbf16>, vector<2x8x8x8xbf16>, vector<2x8x8x8xbf16>, vector<2x8x8x8xbf16> -> vector<2x8x8x32xbf16>
    %99 = vector.shape_cast %98 : vector<2x8x8x32xbf16> to vector<128x32xbf16>
    %c2_98 = arith.constant 2 : index
    %c0_99 = arith.constant 0 : index
    %c0_100 = arith.constant 0 : index
    %100 = vector.load %arg3[%c2_98, %c0_99, %c0_100] : memref<4x32x4xbf16, #tpu.memory_space<vmem>>, vector<1x32x4xbf16>
    %101 = vector.shape_cast %100 : vector<1x32x4xbf16> to vector<32x4xbf16>
    %cst_101 = arith.constant dense<0.000000e+00> : vector<128x4xf32>
    %102 = tpu.matmul %99, %101, %cst_101 {dimension_numbers = #tpu.dot_dimension_numbers<[1], [0], [0], [1], [0, 0, 1, 1], [], []>} : vector<128x32xbf16>, vector<32x4xbf16>, vector<128x4xf32> -> vector<128x4xf32>
    %c0_102 = arith.constant 0 : index
    %c2_103 = arith.constant 2 : index
    %c0_104 = arith.constant 0 : index
    %c0_105 = arith.constant 0 : index
    %103 = vector.load %arg4[%c0_102, %c2_103, %c0_104, %c0_105] : memref<1x4x128x4xf32, #tpu.memory_space<vmem>>, vector<1x1x128x4xf32>
    %104 = vector.shape_cast %103 : vector<1x1x128x4xf32> to vector<128x4xf32>
    %105 = vector.shape_cast %102 : vector<128x4xf32> to vector<1x1x128x4xf32>
    tpu.vector_store %arg4[%c0_102, %c2_103, %c0_104, %c0_105], %105 {strides = array<i32>} : memref<1x4x128x4xf32, #tpu.memory_space<vmem>>, vector<1x1x128x4xf32>,
    %cst_106 = arith.constant dense<0.000000e+00> : vector<4xf32>
    %106 = vector.multi_reduction <add>, %102, %cst_106 [0] : vector<128x4xf32> to vector<4xf32>
    %107 = vector.shape_cast %106 : vector<4xf32> to vector<1x4xf32>
    %108 = arith.addf %89, %107 : vector<1x4xf32>
    %109 = arith.mulf %102, %102 : vector<128x4xf32>
    %cst_107 = arith.constant dense<0.000000e+00> : vector<4xf32>
    %110 = vector.multi_reduction <add>, %109, %cst_107 [0] : vector<128x4xf32> to vector<4xf32>
    %111 = vector.shape_cast %110 : vector<4xf32> to vector<1x4xf32>
    %112 = arith.addf %93, %111 : vector<1x4xf32>
    %c0_108 = arith.constant 0 : index
    %c2_109 = arith.constant 2 : index
    %c2_110 = arith.constant 2 : index
    %c0_111 = arith.constant 0 : index
    %113 = vector.load %arg6[%c0_108, %c2_109, %c2_110, %c0_111] : memref<2x10x10x8xbf16, #tpu.memory_space<vmem>>, vector<2x8x8x8xbf16>
    %c0_112 = arith.constant 0 : index
    %c2_113 = arith.constant 2 : index
    %c1_114 = arith.constant 1 : index
    %c0_115 = arith.constant 0 : index
    %114 = vector.load %arg6[%c0_112, %c2_113, %c1_114, %c0_115] : memref<2x10x10x8xbf16, #tpu.memory_space<vmem>>, vector<2x8x8x8xbf16>
    %c0_116 = arith.constant 0 : index
    %c1_117 = arith.constant 1 : index
    %c2_118 = arith.constant 2 : index
    %c0_119 = arith.constant 0 : index
    %115 = vector.load %arg6[%c0_116, %c1_117, %c2_118, %c0_119] : memref<2x10x10x8xbf16, #tpu.memory_space<vmem>>, vector<2x8x8x8xbf16>
    %c0_120 = arith.constant 0 : index
    %c1_121 = arith.constant 1 : index
    %c1_122 = arith.constant 1 : index
    %c0_123 = arith.constant 0 : index
    %116 = vector.load %arg6[%c0_120, %c1_121, %c1_122, %c0_123] : memref<2x10x10x8xbf16, #tpu.memory_space<vmem>>, vector<2x8x8x8xbf16>
    %117 = tpu.concatenate %113, %114, %115, %116 in 3 : vector<2x8x8x8xbf16>, vector<2x8x8x8xbf16>, vector<2x8x8x8xbf16>, vector<2x8x8x8xbf16> -> vector<2x8x8x32xbf16>
    %118 = vector.shape_cast %117 : vector<2x8x8x32xbf16> to vector<128x32xbf16>
    %c3 = arith.constant 3 : index
    %c0_124 = arith.constant 0 : index
    %c0_125 = arith.constant 0 : index
    %119 = vector.load %arg3[%c3, %c0_124, %c0_125] : memref<4x32x4xbf16, #tpu.memory_space<vmem>>, vector<1x32x4xbf16>
    %120 = vector.shape_cast %119 : vector<1x32x4xbf16> to vector<32x4xbf16>
    %cst_126 = arith.constant dense<0.000000e+00> : vector<128x4xf32>
    %121 = tpu.matmul %118, %120, %cst_126 {dimension_numbers = #tpu.dot_dimension_numbers<[1], [0], [0], [1], [0, 0, 1, 1], [], []>} : vector<128x32xbf16>, vector<32x4xbf16>, vector<128x4xf32> -> vector<128x4xf32>
    %c0_127 = arith.constant 0 : index
    %c3_128 = arith.constant 3 : index
    %c0_129 = arith.constant 0 : index
    %c0_130 = arith.constant 0 : index
    %122 = vector.load %arg4[%c0_127, %c3_128, %c0_129, %c0_130] : memref<1x4x128x4xf32, #tpu.memory_space<vmem>>, vector<1x1x128x4xf32>
    %123 = vector.shape_cast %122 : vector<1x1x128x4xf32> to vector<128x4xf32>
    %124 = vector.shape_cast %121 : vector<128x4xf32> to vector<1x1x128x4xf32>
    tpu.vector_store %arg4[%c0_127, %c3_128, %c0_129, %c0_130], %124 {strides = array<i32>} : memref<1x4x128x4xf32, #tpu.memory_space<vmem>>, vector<1x1x128x4xf32>,
    %cst_131 = arith.constant dense<0.000000e+00> : vector<4xf32>
    %125 = vector.multi_reduction <add>, %121, %cst_131 [0] : vector<128x4xf32> to vector<4xf32>
    %126 = vector.shape_cast %125 : vector<4xf32> to vector<1x4xf32>
    %127 = arith.addf %108, %126 : vector<1x4xf32>
    %128 = arith.mulf %121, %121 : vector<128x4xf32>
    %cst_132 = arith.constant dense<0.000000e+00> : vector<4xf32>
    %129 = vector.multi_reduction <add>, %128, %cst_132 [0] : vector<128x4xf32> to vector<4xf32>
    %130 = vector.shape_cast %129 : vector<4xf32> to vector<1x4xf32>
    %131 = arith.addf %112, %130 : vector<1x4xf32>
    %132 = tpu.concatenate %127, %131 in 0 : vector<1x4xf32>, vector<1x4xf32> -> vector<2x4xf32>
    %c0_133 = arith.constant 0 : index
    %c0_134 = arith.constant 0 : index
    %c0_135 = arith.constant 0 : index
    %133 = vector.load %arg5[%c0_133, %c0_134, %c0_135] : memref<1x2x4xf32, #tpu.memory_space<vmem>>, vector<1x2x4xf32>
    %134 = vector.shape_cast %133 : vector<1x2x4xf32> to vector<2x4xf32>
    %135 = vector.shape_cast %132 : vector<2x4xf32> to vector<1x2x4xf32>
    tpu.vector_store %arg5[%c0_133, %c0_134, %c0_135], %135 {strides = array<i32>} : memref<1x2x4xf32, #tpu.memory_space<vmem>>, vector<1x2x4xf32>,
    return
  }
  func.func @transform_0(%arg0: i32) -> (i32, i32, i32, i32, i32) {
    %c0_i32 = arith.constant 0 : i32
    %c0_i32_0 = arith.constant 0 : i32
    %c0_i32_1 = arith.constant 0 : i32
    %c0_i32_2 = arith.constant 0 : i32
    %c0_i32_3 = arith.constant 0 : i32
    return %arg0, %c0_i32, %c0_i32_0, %c0_i32_1, %c0_i32_2 : i32, i32, i32, i32, i32
  }
  func.func @transform_1(%arg0: i32) -> (i32, i32) {
    %c0_i32 = arith.constant 0 : i32
    %c0_i32_0 = arith.constant 0 : i32
    %c0_i32_1 = arith.constant 0 : i32
    return %c0_i32, %c0_i32_0 : i32, i32
  }
  func.func @transform_2(%arg0: i32) -> (i32, i32, i32) {
    %c0_i32 = arith.constant 0 : i32
    %c0_i32_0 = arith.constant 0 : i32
    %c0_i32_1 = arith.constant 0 : i32
    %c0_i32_2 = arith.constant 0 : i32
    return %c0_i32, %c0_i32_0, %c0_i32_1 : i32, i32, i32
  }
  func.func @transform_3(%arg0: i32) -> (i32, i32, i32, i32) {
    %c0_i32 = arith.constant 0 : i32
    %c0_i32_0 = arith.constant 0 : i32
    %c0_i32_1 = arith.constant 0 : i32
    %c0_i32_2 = arith.constant 0 : i32
    return %arg0, %c0_i32, %c0_i32_0, %c0_i32_1 : i32, i32, i32, i32
  }
  func.func @transform_4(%arg0: i32) -> (i32, i32, i32) {
    %c0_i32 = arith.constant 0 : i32
    %c0_i32_0 = arith.constant 0 : i32
    %c0_i32_1 = arith.constant 0 : i32
    return %arg0, %c0_i32, %c0_i32_0 : i32, i32, i32
  }
}

</mosaic_0001>

<bundles_post_ra>
// kernel: unet_skip_block.1
= control target key start
LH: loop header
LB: loop body
LE: loop exit
PB: predicated region body
PF: predicated region fallthrough
CT: control target
= control target key end

     0   :  { %s8877_s7 = smov 4   ;;  %s8878_s29 = smov 8   ;;  %s13355_s0 = inlined_call_operand.vmem [shape: f32[2,4,9,9,4], index: 0, kind: input, shape index: {}]   ;;  %s13356_s1 = inlined_call_operand.vmem [shape: bf16[64,8], index: 1, kind: input, shape index: {}]   ;;  %s13357_s2 = inlined_call_operand.vmem [shape: bf16[4,32,4], index: 2, kind: input, shape index: {}]   ;;  %s13358_s3 = inlined_call_operand.vmem [shape: f32[1,4,128,4], index: 3, kind: output, shape index: {0}]   ;;  %s13359_s4 = inlined_call_operand.vmem [shape: f32[1,2,4], index: 4, kind: output, shape index: {1}]  }
   0x1   :  { %v175_v0 = vld [vmem:[%s13355_s0 + $0xb0] sm:$0xff]  ;;  %v176_v1 = vld [vmem:[%s13355_s0 + $0xb8] sm:$0x1]  ;;  %v177_v7 = vld [vmem:[%s13355_s0 + $0xc0] sm:$0xff]  ;;  %s8879_s18 = smov 12   ;;  %s8880_s25 = smov 16  }
   0x2   :  { %v171_v2 = vld [vmem:[%s13355_s0 + $0x90] sm:$0xff]  ;;  %vm319_vm0 = vcmp.ge.f32.partialorder %v175_v0, 0.0  ;;  %vm320_vm1 = vcmp.ge.f32.partialorder %v176_v1, 0.0  ;;  %v463_v3 = vmul.f32 0.2, %v175_v0  ;;  %v173_v12 = vld [vmem:[%s13355_s0 + $0xa0] sm:$0xff] }
   0x3   :  { %v464_v4 = vmul.f32 0.2, %v176_v1  ;;  %v172_v5 = vld [vmem:[%s13355_s0 + $0x98] sm:$0x1]  ;;  %vm315_vm2 = vcmp.ge.f32.partialorder %v171_v2, 0.0  ;;  %vm321_vm4 = vcmp.ge.f32.partialorder %v177_v7, 0.0 }
   0x4   :  { %v459_v6 = vmul.f32 0.2, %v171_v2  ;;  %v607_v8 = vsel %vm319_vm0, %v175_v0, %v463_v3  ;;  %vm316_vm3 = vcmp.ge.f32.partialorder %v172_v5, 0.0  ;;  %v460_v10 = vmul.f32 0.2, %v172_v5  ;;  %v181_v16 = vld [vmem:[%s13355_s0 + $0xe0] sm:$0xff] }
   0x5   :  { %v608_v9 = vsel %vm320_vm1, %v176_v1, %v464_v4  ;;  %v178_v11 = vld [vmem:[%s13355_s0 + $0xc8] sm:$0x1]  ;;  %v465_v18 = vmul.f32 0.2, %v177_v7  ;;  %vm317_vm6 = vcmp.ge.f32.partialorder %v173_v12, 0.0  ;;  %v179_v23 = vld [vmem:[%s13355_s0 + $0xd0] sm:$0xff] }
   0x6   :  { %v8939_v13 = vpack.c.bf16 %v608_v9, %v607_v8  ;;  %v603_v14 = vsel %vm315_vm2, %v171_v2, %v459_v6  ;;  %vm322_vm5 = vcmp.ge.f32.partialorder %v178_v11, 0.0  ;;  %v174_v15 = vld [vmem:[%s13355_s0 + $0xa8] sm:$0x1]  ;;  %v604_v17 = vsel %vm316_vm3, %v172_v5, %v460_v10  ;;  %v185_v28 = vld [vmem:[%s13355_s0 + $0x100] sm:$0xff]  ;;  %v180_v32 = vld [vmem:[%s13355_s0 + $0xd8] sm:$0x1] }
   0x7   :  { %v466_v19 = vmul.f32 0.2, %v178_v11  ;;  %v8949_v20 = vpack.c.bf16 %v604_v17, %v603_v14  ;;  %vm318_vm7 = vcmp.ge.f32.partialorder %v174_v15, 0.0  ;;  %v461_v21 = vmul.f32 0.2, %v173_v12  ;;  %v183_v37 = vld [vmem:[%s13355_s0 + $0xf0] sm:$0xff] }
   0x8   :  { %821 = vrot.lane.b32.xlu1 %v8939_v13, %s8877_s7  ;;  %v462_v22 = vmul.f32 0.2, %v174_v15  ;;  %v609_v24 = vsel %vm321_vm4, %v177_v7, %v465_v18  ;;  %v182_v26 = vld [vmem:[%s13355_s0 + $0xe8] sm:$0x1]  ;;  %vm325_vm8 = vcmp.ge.f32.partialorder %v181_v16, 0.0  ;;  %vm323_vm10 = vcmp.ge.f32.partialorder %v179_v23, 0.0 }
   0x9   :  { %v610_v25 = vsel %vm322_vm5, %v178_v11, %v466_v19  ;;  %v469_v27 = vmul.f32 0.2, %v181_v16  ;;  %817 = vrot.lane.b32.xlu0 %v8949_v20, %s8877_s7  ;;  %v605_v30 = vsel %vm317_vm6, %v173_v12, %v461_v21  ;;  %vm326_vm9 = vcmp.ge.f32.partialorder %v182_v26, 0.0  ;;  %v186_v33 = vld [vmem:[%s13355_s0 + $0x108] sm:$0x1]  ;;  %v245_v44 = vld [vmem:[%s13355_s0 + $0x2e0] sm:$0xff] }
   0xa   :  { %v8962_v29 = vpack.c.bf16 %v610_v25, %v609_v24  ;;  %v606_v31 = vsel %vm318_vm7, %v174_v15, %v462_v22  ;;  %v470_v35 = vmul.f32 0.2, %v182_v26  ;;  %v184_v38 = vld [vmem:[%s13355_s0 + $0xf8] sm:$0x1]  ;;  %vm324_vm11 = vcmp.ge.f32.partialorder %v180_v32, 0.0  ;;  %v243_v49 = vld [vmem:[%s13355_s0 + $0x2d0] sm:$0xff] }
   0xb   :  { %v8971_v34 = vpack.c.bf16 %v606_v31, %v605_v30  ;;  %v613_v36 = vsel %vm325_vm8, %v181_v16, %v469_v27  ;;  %v467_v39 = vmul.f32 0.2, %v179_v23  ;;  %v468_v40 = vmul.f32 0.2, %v180_v32  ;;  %v246_v48 = vld [vmem:[%s13355_s0 + $0x2e8] sm:$0x1] }
   0xc   :  { %823 = vrot.lane.b32.xlu1 %v8962_v29, %s8877_s7  ;;  %vm329_vm12 = vcmp.ge.f32.partialorder %v185_v28, 0.0  ;;  %v614_v41 = vsel %vm326_vm9, %v182_v26, %v470_v35  ;;  %vm330_vm13 = vcmp.ge.f32.partialorder %v186_v33, 0.0  ;;  %v473_v42 = vmul.f32 0.2, %v185_v28  ;;  %v244_v53 = vld [vmem:[%s13355_s0 + $0x2d8] sm:$0x1] }
   0xd   :  { %v474_v43 = vmul.f32 0.2, %v186_v33  ;;  %819 = vrot.lane.b32.xlu0 %v8971_v34, %s8877_s7  ;;  %v8986_v45 = vpack.c.bf16 %v614_v41, %v613_v36  ;;  %v611_v46 = vsel %vm323_vm10, %v179_v23, %v467_v39  ;;  %v612_v47 = vsel %vm324_vm11, %v180_v32, %v468_v40  ;;  %v250_v54 = vld [vmem:[%s13355_s0 + $0x308] sm:$0x1]  ;;  %v249_v58 = vld [vmem:[%s13355_s0 + $0x300] sm:$0xff]  ;;  %v247_v0 = vld [vmem:[%s13355_s0 + $0x2f0] sm:$0xff] }
   0xe   :  { %vm327_vm14 = vcmp.ge.f32.partialorder %v183_v37, 0.0  ;;  %v8994_v50 = vpack.c.bf16 %v612_v47, %v611_v46  ;;  %v617_v51 = vsel %vm329_vm12, %v185_v28, %v473_v42  ;;  %vm328_vm15 = vcmp.ge.f32.partialorder %v184_v38, 0.0  ;;  %v248_v5 = vld [vmem:[%s13355_s0 + $0x2f8] sm:$0x1]  ;;  %v253_v6 = vld [vmem:[%s13355_s0 + $0x320] sm:$0xff]  ;;  %v251_v18 = vld [vmem:[%s13355_s0 + $0x310] sm:$0xff] }
   0xf   :  { %13470 = vst [vmem:[#allocation3_spill] sm:$0xff] %v8986_v45  ;;  %v618_v52 = vsel %vm330_vm13, %v186_v33, %v474_v43  ;;  %v471_v56 = vmul.f32 0.2, %v183_v37  ;;  %v472_v57 = vmul.f32 0.2, %v184_v38  ;;  %vm389_vm0 = vcmp.ge.f32.partialorder %v245_v44, 0.0 }
  0x10   :  { %827 = vrot.lane.b32.xlu1 %v8986_v45, %s8877_s7  ;;  %v9004_v55 = vpack.c.bf16 %v618_v52, %v617_v51  ;;  %vm390_vm1 = vcmp.ge.f32.partialorder %v246_v48, 0.0  ;;  %v533_v59 = vmul.f32 0.2, %v245_v44  ;;  %v534_v60 = vmul.f32 0.2, %v246_v48  ;;  %v257_v22 = vld [vmem:[%s13355_s0 + $0x340] sm:$0xff] }
  0x11   :  { %vm387_vm2 = vcmp.ge.f32.partialorder %v243_v49, 0.0  ;;  %825 = vrot.lane.b32.xlu0 %v8994_v50, %s8877_s7  ;;  %v615_v61 = vsel %vm327_vm14, %v183_v37, %v471_v56  ;;  %v616_v62 = vsel %vm328_vm15, %v184_v38, %v472_v57  ;;  %vm388_vm3 = vcmp.ge.f32.partialorder %v244_v53, 0.0  ;;  %v254_v9 = vld [vmem:[%s13355_s0 + $0x328] sm:$0x1]  ;;  %v252_v10 = vld [vmem:[%s13355_s0 + $0x318] sm:$0x1] }
  0x12   :  { %13471 = vst [vmem:[#allocation4_spill] sm:$0xff] %v9004_v55  ;;  %v531_v63 = vmul.f32 0.2, %v243_v49  ;;  %v9015_v1 = vpack.c.bf16 %v616_v62, %v615_v61  ;;  %v677_v2 = vsel %vm389_vm0, %v245_v44, %v533_v59  ;;  %v678_v3 = vsel %vm390_vm1, %v246_v48, %v534_v60  ;;  %v258_v27 = vld [vmem:[%s13355_s0 + $0x348] sm:$0x1]  ;;  %v255_v28 = vld [vmem:[%s13355_s0 + $0x330] sm:$0xff] }
  0x13   :  { %v532_v4 = vmul.f32 0.2, %v244_v53  ;;  %v9025_v7 = vpack.c.bf16 %v678_v3, %v677_v2  ;;  %vm393_vm4 = vcmp.ge.f32.partialorder %v249_v58, 0.0  ;;  %vm394_vm5 = vcmp.ge.f32.partialorder %v250_v54, 0.0  ;;  %v256_v32 = vld [vmem:[%s13355_s0 + $0x338] sm:$0x1] }
  0x14   :  { %13472 = vst [vmem:[#allocation5_spill] sm:$0xff] %v9015_v1  ;;  %831 = vrot.lane.b32.xlu1 %v9004_v55, %s8877_s7  ;;  %v675_v8 = vsel %vm387_vm2, %v243_v49, %v531_v63  ;;  %v537_v12 = vmul.f32 0.2, %v249_v58  ;;  %v538_v14 = vmul.f32 0.2, %v250_v54  ;;  %vm391_vm6 = vcmp.ge.f32.partialorder %v247_v0, 0.0 }
  0x15   :  { %13473 = vst [vmem:[#allocation6_spill] sm:$0xff] %v9025_v7  ;;  %v676_v11 = vsel %vm388_vm3, %v244_v53, %v532_v4  ;;  %829 = vrot.lane.b32.xlu0 %v9015_v1, %s8877_s7  ;;  %vm392_vm7 = vcmp.ge.f32.partialorder %v248_v5, 0.0  ;;  %v535_v16 = vmul.f32 0.2, %v247_v0  ;;  %v536_v17 = vmul.f32 0.2, %v248_v5 }
  0x16   :  { %v9036_v15 = vpack.c.bf16 %v676_v11, %v675_v8  ;;  %v681_v19 = vsel %vm393_vm4, %v249_v58, %v537_v12  ;;  %v682_v21 = vsel %vm394_vm5, %v250_v54, %v538_v14  ;;  %vm397_vm8 = vcmp.ge.f32.partialorder %v253_v6, 0.0  ;;  %v155_v40 = vld [vmem:[%s13355_s0 + $0x10] sm:$0xff]  ;;  %v156_v44 = vld [vmem:[%s13355_s0 + $0x18] sm:$0x1]  ;;  %v153_v46 = vld [vmem:[%s13355_s0] sm:$0xff]  ;;  %s8881_s19 = smov 20  }
  0x17   :  { %vm398_vm9 = vcmp.ge.f32.partialorder %v254_v9, 0.0  ;;  %v9046_v23 = vpack.c.bf16 %v682_v21, %v681_v19  ;;  %v679_v24 = vsel %vm391_vm6, %v247_v0, %v535_v16  ;;  %v680_v25 = vsel %vm392_vm7, %v248_v5, %v536_v17  ;;  %v154_v51 = vld [vmem:[%s13355_s0 + $0x8] sm:$0x1]  ;;  %v160_v52 = vld [vmem:[%s13355_s0 + $0x38] sm:$0x1]  ;;  %v159_v57 = vld [vmem:[%s13355_s0 + $0x30] sm:$0xff] }
  0x18   :  { %835 = vrot.lane.b32.xlu1 %v9025_v7, %s8877_s7  ;;  %v541_v26 = vmul.f32 0.2, %v253_v6  ;;  %v9054_v30 = vpack.c.bf16 %v680_v25, %v679_v24  ;;  %v542_v31 = vmul.f32 0.2, %v254_v9  ;;  %vm395_vm10 = vcmp.ge.f32.partialorder %v251_v18, 0.0  ;;  %v157_v63 = vld [vmem:[%s13355_s0 + $0x20] sm:$0xff] }
  0x19   :  { %13474 = vst [vmem:[#allocation7_spill] sm:$0xff] %v9046_v23  ;;  %vm396_vm11 = vcmp.ge.f32.partialorder %v252_v10, 0.0  ;;  %833 = vrot.lane.b32.xlu0 %v9036_v15, %s8877_s7  ;;  %v539_v35 = vmul.f32 0.2, %v251_v18  ;;  %v540_v36 = vmul.f32 0.2, %v252_v10 }
  0x1a   :  { %13475 = vst [vmem:[#allocation8_spill] sm:$0xff] %v9054_v30  ;;  %v685_v33 = vsel %vm397_vm8, %v253_v6, %v541_v26  ;;  %vm401_vm12 = vcmp.ge.f32.partialorder %v257_v22, 0.0  ;;  %v686_v37 = vsel %vm398_vm9, %v254_v9, %v542_v31  ;;  %vm402_vm13 = vcmp.ge.f32.partialorder %v258_v27, 0.0  ;;  %v158_v5 = vld [vmem:[%s13355_s0 + $0x28] sm:$0x1]  ;;  %v163_v17 = vld [vmem:[%s13355_s0 + $0x50] sm:$0xff] }
  0x1b   :  { %v545_v38 = vmul.f32 0.2, %v257_v22  ;;  %v546_v39 = vmul.f32 0.2, %v258_v27  ;;  %v9068_v41 = vpack.c.bf16 %v686_v37, %v685_v33  ;;  %v683_v42 = vsel %vm395_vm10, %v251_v18, %v539_v35  ;;  %v164_v18 = vld [vmem:[%s13355_s0 + $0x58] sm:$0x1] }
  0x1c   :  { %839 = vrot.lane.b32.xlu1 %v9046_v23, %s8877_s7  ;;  %v684_v43 = vsel %vm396_vm11, %v252_v10, %v540_v36  ;;  %vm399_vm14 = vcmp.ge.f32.partialorder %v255_v28, 0.0  ;;  %vm400_vm15 = vcmp.ge.f32.partialorder %v256_v32, 0.0  ;;  %v543_v54 = vmul.f32 0.2, %v255_v28  ;;  %v161_v31 = vld [vmem:[%s13355_s0 + $0x40] sm:$0xff]  ;;  %s8882_s28 = smov 24  }
  0x1d   :  { %13476 = vst [vmem:[#allocation9_spill] sm:$0xff] %v9068_v41  ;;  %v9076_v47 = vpack.c.bf16 %v684_v43, %v683_v42  ;;  %v689_v48 = vsel %vm401_vm12, %v257_v22, %v545_v38  ;;  %v690_v49 = vsel %vm402_vm13, %v258_v27, %v546_v39  ;;  %837 = vrot.lane.b32.xlu0 %v9054_v30, %s8877_s7  ;;  %v544_v56 = vmul.f32 0.2, %v256_v32  ;;  %v162_v35 = vld [vmem:[%s13355_s0 + $0x48] sm:$0x1]  ;;  %s8884_s30 = smov 32  }
  0x1e   :  { %v9086_v53 = vpack.c.bf16 %v690_v49, %v689_v48  ;;  %vm299_vm0 = vcmp.ge.f32.partialorder %v155_v40, 0.0  ;;  %vm300_vm1 = vcmp.ge.f32.partialorder %v156_v44, 0.0  ;;  %v443_v58 = vmul.f32 0.2, %v155_v40  ;;  %s8885_s5 = smov 36   ;;  %s8886_s6 = smov 40  }
  0x1f   :  { %13477 = vst [vmem:[#allocation10_spill] sm:$0xff] %v9076_v47  ;;  %v444_v59 = vmul.f32 0.2, %v156_v44  ;;  %vm297_vm2 = vcmp.ge.f32.partialorder %v153_v46, 0.0  ;;  %v687_v60 = vsel %vm399_vm14, %v255_v28, %v543_v54  ;;  %v688_v61 = vsel %vm400_vm15, %v256_v32, %v544_v56  ;;  %s8887_s8 = smov 44   ;;  %s8888_s9 = smov 48  }
  0x20   :  { %13478 = vst [vmem:[#allocation11_spill] sm:$0xff] %v9086_v53  ;;  %843 = vrot.lane.b32.xlu1 %v9068_v41, %s8877_s7  ;;  %vm298_vm3 = vcmp.ge.f32.partialorder %v154_v51, 0.0  ;;  %v441_v62 = vmul.f32 0.2, %v153_v46  ;;  %v9097_v0 = vpack.c.bf16 %v688_v61, %v687_v60  ;;  %v587_v2 = vsel %vm299_vm0, %v155_v40, %v443_v58  ;;  %s8889_s10 = smov 52   ;;  %s8890_s11 = smov 56  }
  0x21   :  { %v588_v3 = vsel %vm300_vm1, %v156_v44, %v444_v59  ;;  %v442_v4 = vmul.f32 0.2, %v154_v51  ;;  %841 = vrot.lane.b32.xlu0 %v9076_v47, %s8877_s7  ;;  %vm303_vm4 = vcmp.ge.f32.partialorder %v159_v57, 0.0  ;;  %vm304_vm5 = vcmp.ge.f32.partialorder %v160_v52, 0.0  ;;  %v167_v44 = vld [vmem:[%s13355_s0 + $0x70] sm:$0xff]  ;;  %s8891_s20 = smov 60  }
  0x22   :  { %13479 = vst [vmem:[#allocation12_spill] sm:$0xff] %v9097_v0  ;;  %v9104_v6 = vpack.c.bf16 %v588_v3, %v587_v2  ;;  %v585_v8 = vsel %vm297_vm2, %v153_v46, %v441_v62  ;;  %v447_v10 = vmul.f32 0.2, %v159_v57  ;;  %v448_v11 = vmul.f32 0.2, %v160_v52  ;;  %v165_v62 = vld [vmem:[%s13355_s0 + $0x60] sm:$0xff] }
  0x23   :  { %v586_v9 = vsel %vm298_vm3, %v154_v51, %v442_v4  ;;  %vm301_vm6 = vcmp.ge.f32.partialorder %v157_v63, 0.0  ;;  %vm302_vm7 = vcmp.ge.f32.partialorder %v158_v5, 0.0  ;;  %v445_v22 = vmul.f32 0.2, %v157_v63  ;;  %v168_v51 = vld [vmem:[%s13355_s0 + $0x78] sm:$0x1] }
  0x24   :  { %847 = vrot.lane.b32.xlu1 %v9086_v53, %s8877_s7  ;;  %v857_v12 = vshrl.u32 %v9104_v6, 16  ;;  %v859_v14 = vshll.u32 %v9104_v6, 16  ;;  %v9110_v16 = vpack.c.bf16 %v586_v9, %v585_v8  ;;  %v591_v19 = vsel %vm303_vm4, %v159_v57, %v447_v10 }
  0x25   :  { %v592_v21 = vsel %vm304_vm5, %v160_v52, %v448_v11  ;;  %v446_v24 = vmul.f32 0.2, %v158_v5  ;;  %845 = vrot.lane.b32.xlu0 %v9097_v0, %s8877_s7  ;;  %v589_v32 = vsel %vm301_vm6, %v157_v63, %v445_v22  ;;  %vm307_vm8 = vcmp.ge.f32.partialorder %v163_v17, 0.0  ;;  %v166_v63 = vld [vmem:[%s13355_s0 + $0x68] sm:$0x1] }
  0x26   :  { %13480 = vst [vmem:[#allocation13_spill] sm:$0xff] %v9110_v16  ;;  %v861_v25 = vrot.slane %v859_v14, 1  ;;  %v850_v26 = vshrl.u32 %v9110_v16, 16  ;;  %v852_v27 = vshll.u32 %v9110_v16, 16  ;;  %v9122_v28 = vpack.c.bf16 %v592_v21, %v591_v19  ;;  %v227_v14 = vld [vmem:[%s13355_s0 + $0x250] sm:$0xff] }
  0x27   :  { %v590_v33 = vsel %vm302_vm7, %v158_v5, %v446_v24  ;;  %vm308_vm9 = vcmp.ge.f32.partialorder %v164_v18, 0.0  ;;  %v451_v42 = vmul.f32 0.2, %v163_v17  ;;  %v452_v43 = vmul.f32 0.2, %v164_v18 }
  0x28   :  { %13481 = vst [vmem:[#allocation14_spill] sm:$0xff] %v9122_v28  ;;  %v9131_v36 = vor.u32 %v861_v25, %v857_v12  ;;  %v854_v37 = vrot.slane %v852_v27, 1  ;;  %v871_v38 = vshrl.u32 %v9122_v28, 16  ;;  %v873_v39 = vshll.u32 %v9122_v28, 16  ;;  %v225_v27 = vld [vmem:[%s13355_s0 + $0x240] sm:$0xff] }
  0x29   :  { %v9135_v40 = vpack.c.bf16 %v590_v33, %v589_v32  ;;  %vm305_vm10 = vcmp.ge.f32.partialorder %v161_v31, 0.0  ;;  %vm306_vm11 = vcmp.ge.f32.partialorder %v162_v35, 0.0  ;;  %v449_v49 = vmul.f32 0.2, %v161_v31  ;;  %v226_v33 = vld [vmem:[%s13355_s0 + $0x248] sm:$0x1] }
  0x2a   :  { %963 = vrot.lane.b32.xlu1 %v9131_v36, %s8878_s29  ;;  %v855_v46 = vor.u32 %v854_v37, %v850_v26  ;;  %v875_v48 = vrot.slane %v873_v39, 1  ;;  %v595_v56 = vsel %vm307_vm8, %v163_v17, %v451_v42  ;;  %v596_v57 = vsel %vm308_vm9, %v164_v18, %v452_v43  ;;  %v228_v17 = vld [vmem:[%s13355_s0 + $0x258] sm:$0x1] }
  0x2b   :  { %13482 = vst [vmem:[#allocation15_spill] sm:$0xff] %v9135_v40  ;;  %v864_v52 = vshrl.u32 %v9135_v40, 16  ;;  %v866_v54 = vshll.u32 %v9135_v40, 16  ;;  %v9152_v59 = vpack.c.bf16 %v596_v57, %v595_v56  ;;  %v450_v60 = vmul.f32 0.2, %v162_v35 }
  0x2c   :  { %961 = vrot.lane.b32.xlu0 %v855_v46, %s8878_s29  ;;  %v9150_v58 = vor.u32 %v875_v48, %v871_v38  ;;  %v593_v61 = vsel %vm305_vm10, %v161_v31, %v449_v49  ;;  %vm311_vm12 = vcmp.ge.f32.partialorder %v167_v44, 0.0  ;;  %vm312_vm13 = vcmp.ge.f32.partialorder %v168_v51, 0.0  ;;  %v231_v46 = vld [vmem:[%s13355_s0 + $0x270] sm:$0xff] }
  0x2d   :  { %v868_v2 = vrot.slane %v866_v54, 1  ;;  %v455_v3 = vmul.f32 0.2, %v167_v44  ;;  %v885_v4 = vshrl.u32 %v9152_v59, 16  ;;  %v887_v5 = vshll.u32 %v9152_v59, 16 }
  0x2e   :  { %967 = vrot.lane.b32.xlu1 %v9150_v58, %s8878_s29  ;;  %v594_v8 = vsel %vm306_vm11, %v162_v35, %v450_v60  ;;  %v456_v9 = vmul.f32 0.2, %v168_v51  ;;  %vm309_vm14 = vcmp.ge.f32.partialorder %v165_v62, 0.0  ;;  %vm310_vm15 = vcmp.ge.f32.partialorder %v166_v63, 0.0 }
  0x2f   :  { %v9166_v10 = vor.u32 %v868_v2, %v864_v52  ;;  %v9168_v11 = vpack.c.bf16 %v594_v8, %v593_v61  ;;  %v599_v12 = vsel %vm311_vm12, %v167_v44, %v455_v3  ;;  %v889_v18 = vrot.slane %v887_v5, 1  ;;  %v232_v52 = vld [vmem:[%s13355_s0 + $0x278] sm:$0x1]  ;;  %v229_v3 = vld [vmem:[%s13355_s0 + $0x260] sm:$0xff] }
  0x30   :  { %v600_v19 = vsel %vm312_vm13, %v168_v51, %v456_v9  ;;  %v453_v21 = vmul.f32 0.2, %v165_v62  ;;  %v454_v26 = vmul.f32 0.2, %v166_v63  ;;  %vm371_vm0 = vcmp.ge.f32.partialorder %v227_v14, 0.0 }
  0x31   :  { %965 = vrot.lane.b32.xlu0 %v9166_v10, %s8878_s29  ;;  %v878_v22 = vshrl.u32 %v9168_v11, 16  ;;  %v880_v24 = vshll.u32 %v9168_v11, 16  ;;  %v9180_v25 = vpack.c.bf16 %v600_v19, %v599_v12  ;;  %v9185_v31 = vor.u32 %v889_v18, %v885_v4  ;;  %v230_v4 = vld [vmem:[%s13355_s0 + $0x268] sm:$0x1] }
  0x32   :  { %v597_v32 = vsel %vm309_vm14, %v165_v62, %v453_v21  ;;  %vm372_vm1 = vcmp.ge.f32.partialorder %v228_v17, 0.0  ;;  %v598_v39 = vsel %vm310_vm15, %v166_v63, %v454_v26  ;;  %v515_v43 = vmul.f32 0.2, %v227_v14 }
  0x33   :  { %13483 = vst [vmem:[#allocation16_spill] sm:$0xff] %v9180_v25  ;;  %13484 = vst [vmem:[#allocation17_spill] sm:$0xff] %v9185_v31  ;;  %v882_v35 = vrot.slane %v880_v24, 1  ;;  %v899_v37 = vshrl.u32 %v9180_v25, 16  ;;  %v901_v38 = vshll.u32 %v9180_v25, 16  ;;  %971 = vrot.lane.b32.xlu1 %v9185_v31, %s8878_s29  ;;  %v9195_v42 = vpack.c.bf16 %v598_v39, %v597_v32  ;;  %v233_v39 = vld [vmem:[%s13355_s0 + $0x280] sm:$0xff] }
  0x34   :  { %v516_v44 = vmul.f32 0.2, %v228_v17  ;;  %vm369_vm2 = vcmp.ge.f32.partialorder %v225_v27, 0.0  ;;  %vm370_vm3 = vcmp.ge.f32.partialorder %v226_v33, 0.0  ;;  %v513_v51 = vmul.f32 0.2, %v225_v27 }
  0x35   :  { %13485 = vst [vmem:[#allocation18_spill] sm:$0xff] %v9195_v42  ;;  %v9200_v48 = vor.u32 %v882_v35, %v878_v22  ;;  %v903_v49 = vrot.slane %v901_v38, 1  ;;  %v892_v54 = vshrl.u32 %v9195_v42, 16  ;;  %v894_v56 = vshll.u32 %v9195_v42, 16  ;;  %v235_v22 = vld [vmem:[%s13355_s0 + $0x290] sm:$0xff] }
  0x36   :  { %v659_v57 = vsel %vm371_vm0, %v227_v14, %v515_v43  ;;  %v660_v60 = vsel %vm372_vm1, %v228_v17, %v516_v44  ;;  %v514_v63 = vmul.f32 0.2, %v226_v33  ;;  %v657_v2 = vsel %vm369_vm2, %v225_v27, %v513_v51  ;;  %v236_v24 = vld [vmem:[%s13355_s0 + $0x298] sm:$0x1]  ;;  %v274_v31 = vld [vmem:[%s13355_s0 + $0x3c8] sm:$0x1] }
  0x37   :  { %969 = vrot.lane.b32.xlu0 %v9200_v48, %s8878_s29  ;;  %v9211_v61 = vor.u32 %v903_v49, %v899_v37  ;;  %v9213_v62 = vpack.c.bf16 %v660_v60, %v659_v57  ;;  %v896_v5 = vrot.slane %v894_v56, 1  ;;  %vm375_vm4 = vcmp.ge.f32.partialorder %v231_v46, 0.0 }
  0x38   :  { %vm376_vm5 = vcmp.ge.f32.partialorder %v232_v52, 0.0  ;;  %v519_v8 = vmul.f32 0.2, %v231_v46  ;;  %v658_v14 = vsel %vm370_vm3, %v226_v33, %v514_v63  ;;  %v520_v17 = vmul.f32 0.2, %v232_v52  ;;  %v239_v63 = vld [vmem:[%s13355_s0 + $0x2b0] sm:$0xff] }
  0x39   :  { %13486 = vst [vmem:[#allocation19_spill] sm:$0xff] %v9211_v61  ;;  %13487 = vst [vmem:[#allocation20_spill] sm:$0xff] %v9213_v62  ;;  %975 = vrot.lane.b32.xlu1 %v9211_v61, %s8878_s29  ;;  %v913_v9 = vshrl.u32 %v9213_v62, 16  ;;  %v915_v12 = vshll.u32 %v9213_v62, 16  ;;  %v9226_v18 = vor.u32 %v896_v5, %v892_v54  ;;  %v9228_v19 = vpack.c.bf16 %v658_v14, %v657_v2 }
  0x3a   :  { %v663_v21 = vsel %vm375_vm4, %v231_v46, %v519_v8  ;;  %vm373_vm6 = vcmp.ge.f32.partialorder %v229_v3, 0.0  ;;  %v664_v27 = vsel %vm376_vm5, %v232_v52, %v520_v17  ;;  %vm374_vm7 = vcmp.ge.f32.partialorder %v230_v4, 0.0  ;;  %v234_v46 = vld [vmem:[%s13355_s0 + $0x288] sm:$0x1] }
  0x3b   :  { %13488 = vst [vmem:[#allocation21_spill] sm:$0xff] %v9226_v18  ;;  %13489 = vst [vmem:[#allocation22_spill] sm:$0xff] %v9228_v19  ;;  %v917_v26 = vrot.slane %v915_v12, 1  ;;  %v517_v32 = vmul.f32 0.2, %v229_v3  ;;  %973 = vrot.lane.b32.xlu0 %v9226_v18, %s8878_s29  ;;  %v906_v33 = vshrl.u32 %v9228_v19, 16  ;;  %v9240_v37 = vpack.c.bf16 %v664_v27, %v663_v21 }
  0x3c   :  { %v908_v35 = vshll.u32 %v9228_v19, 16  ;;  %v518_v38 = vmul.f32 0.2, %v230_v4  ;;  %vm379_vm8 = vcmp.ge.f32.partialorder %v235_v22, 0.0  ;;  %vm380_vm9 = vcmp.ge.f32.partialorder %v236_v24, 0.0 }
  0x3d   :  { %13490 = vst [vmem:[#allocation23_spill] sm:$0xff] %v9240_v37  ;;  %v9245_v43 = vor.u32 %v917_v26, %v913_v9  ;;  %v661_v44 = vsel %vm373_vm6, %v229_v3, %v517_v32  ;;  %v927_v51 = vshrl.u32 %v9240_v37, 16  ;;  %v929_v52 = vshll.u32 %v9240_v37, 16  ;;  %v237_v32 = vld [vmem:[%s13355_s0 + $0x2a0] sm:$0xff]  ;;  %v280_v19 = vld [vmem:[%s13355_s0 + $0x3f8] sm:$0x1] }
  0x3e   :  { %v910_v49 = vrot.slane %v908_v35, 1  ;;  %v662_v54 = vsel %vm374_vm7, %v230_v4, %v518_v38  ;;  %v523_v57 = vmul.f32 0.2, %v235_v22  ;;  %v524_v60 = vmul.f32 0.2, %v236_v24 }
  0x3f   :  { %13491 = vst [vmem:[#allocation24_spill] sm:$0xff] %v9245_v43  ;;  %979 = vrot.lane.b32.xlu1 %v9245_v43, %s8878_s29  ;;  %v9255_v56 = vpack.c.bf16 %v662_v54, %v661_v44  ;;  %vm377_vm10 = vcmp.ge.f32.partialorder %v233_v39, 0.0  ;;  %v931_v3 = vrot.slane %v929_v52, 1  ;;  %vm378_vm11 = vcmp.ge.f32.partialorder %v234_v46, 0.0  ;;  %v240_v4 = vld [vmem:[%s13355_s0 + $0x2b8] sm:$0x1] }
  0x40   :  { %v911_v2 = vor.u32 %v910_v49, %v906_v33  ;;  %v521_v5 = vmul.f32 0.2, %v233_v39  ;;  %v667_v12 = vsel %vm379_vm8, %v235_v22, %v523_v57  ;;  %v668_v14 = vsel %vm380_vm9, %v236_v24, %v524_v60  ;;  %v238_v33 = vld [vmem:[%s13355_s0 + $0x2a8] sm:$0x1] }
  0x41   :  { %13492 = vst [vmem:[#allocation25_spill] sm:$0xff] %v9255_v56  ;;  %v920_v8 = vshrl.u32 %v9255_v56, 16  ;;  %v922_v9 = vshll.u32 %v9255_v56, 16  ;;  %v9268_v17 = vor.u32 %v931_v3, %v927_v51  ;;  %v9270_v21 = vpack.c.bf16 %v668_v14, %v667_v12 }
  0x42   :  { %977 = vrot.lane.b32.xlu0 %v911_v2, %s8878_s29  ;;  %v522_v26 = vmul.f32 0.2, %v234_v46  ;;  %v665_v27 = vsel %vm377_vm10, %v233_v39, %v521_v5  ;;  %vm383_vm12 = vcmp.ge.f32.partialorder %v239_v63, 0.0  ;;  %vm384_vm13 = vcmp.ge.f32.partialorder %v240_v4, 0.0 }
  0x43   :  { %13493 = vst [vmem:[#allocation26_spill] sm:$0xff] %v9268_v17  ;;  %13494 = vst [vmem:[#allocation27_spill] sm:$0xff] %v9270_v21  ;;  %v924_v35 = vrot.slane %v922_v9, 1  ;;  %v527_v22 = vmul.f32 0.2, %v239_v63  ;;  %983 = vrot.lane.b32.xlu1 %v9268_v17, %s8878_s29  ;;  %v941_v24 = vshrl.u32 %v9270_v21, 16 }
  0x44   :  { %v943_v38 = vshll.u32 %v9270_v21, 16  ;;  %v666_v39 = vsel %vm378_vm11, %v234_v46, %v522_v26  ;;  %v528_v44 = vmul.f32 0.2, %v240_v4  ;;  %vm381_vm14 = vcmp.ge.f32.partialorder %v237_v32, 0.0  ;;  %v191_v17 = vld [vmem:[%s13355_s0 + $0x130] sm:$0xff] }
  0x45   :  { %v9283_v49 = vor.u32 %v924_v35, %v920_v8  ;;  %v9285_v51 = vpack.c.bf16 %v666_v39, %v665_v27  ;;  %v671_v52 = vsel %vm383_vm12, %v239_v63, %v527_v22  ;;  %vm382_vm15 = vcmp.ge.f32.partialorder %v238_v33, 0.0 }
  0x46   :  { %v945_v54 = vrot.slane %v943_v38, 1  ;;  %v672_v57 = vsel %vm384_vm13, %v240_v4, %v528_v44  ;;  %v525_v60 = vmul.f32 0.2, %v237_v32  ;;  %v526_v46 = vmul.f32 0.2, %v238_v33 }
  0x47   :  { %13495 = vst [vmem:[#allocation28_spill] sm:$0xff] %v9283_v49  ;;  %13496 = vst [vmem:[#allocation29_spill] sm:$0xff] %v9285_v51  ;;  %981 = vrot.lane.b32.xlu0 %v9283_v49, %s8878_s29  ;;  %v934_v2 = vshrl.u32 %v9285_v51, 16  ;;  %v936_v3 = vshll.u32 %v9285_v51, 16  ;;  %v9291_v5 = vpack.c.bf16 %v672_v57, %v671_v52  ;;  %v1003_v63 = vshll.u32 %v8971_v34, 16 }
  0x48   :  { %v9293_v8 = vor.u32 %v945_v54, %v941_v24  ;;  %v669_v9 = vsel %vm381_vm14, %v237_v32, %v525_v60  ;;  %v670_v26 = vsel %vm382_vm15, %v238_v33, %v526_v46  ;;  %v1001_v35 = vshrl.u32 %v8971_v34, 16 }
  0x49   :  { %13497 = vst [vmem:[#allocation30_spill] sm:$0xff] %v9291_v5  ;;  %v938_v12 = vrot.slane %v936_v3, 1  ;;  %v955_v4 = vshrl.u32 %v9291_v5, 16  ;;  %v957_v14 = vshll.u32 %v9291_v5, 16  ;;  %v9300_v27 = vpack.c.bf16 %v670_v26, %v669_v9 }
  0x4a   :  { %13498 = vst [vmem:[#allocation31_spill] sm:$0xff] %v9293_v8  ;;  %987 = vrot.lane.b32.xlu1 %v9293_v8, %s8878_s29  ;;  %v996_v22 = vshll.u32 %v8949_v20, 16  ;;  %v1005_v38 = vrot.slane %v1003_v63, 1  ;;  %v1017_v39 = vshll.u32 %v8962_v29, 16  ;;  %v994_v57 = vshrl.u32 %v8949_v20, 16 }
  0x4b   :  { %13499 = vst [vmem:[#allocation32_spill] sm:$0xff] %v9300_v27  ;;  %v9304_v24 = vor.u32 %v938_v12, %v934_v2  ;;  %v959_v32 = vrot.slane %v957_v14, 1  ;;  %v948_v44 = vshrl.u32 %v9300_v27, 16  ;;  %v950_v52 = vshll.u32 %v9300_v27, 16  ;;  %v210_v27 = vld [vmem:[%s13355_s0 + $0x1c8] sm:$0x1] }
  0x4c   :  { %v998_v60 = vrot.slane %v996_v22, 1  ;;  %v1010_v2 = vshll.u32 %v8939_v13, 16  ;;  %v9317_v3 = vor.u32 %v1005_v38, %v1001_v35  ;;  %v1015_v46 = vshrl.u32 %v8962_v29, 16 }
  0x4d   :  { %13500 = vst [vmem:[#allocation33_spill] sm:$0xff] %v9304_v24  ;;  %985 = vrot.lane.b32.xlu0 %v9304_v24, %s8878_s29  ;;  %v9311_v33 = vor.u32 %v959_v32, %v955_v4  ;;  %v952_v54 = vrot.slane %v950_v52, 1  ;;  %v1019_v9 = vrot.slane %v1017_v39, 1  ;;  %v1031_v63 = vshll.u32 %v8986_v45, 16 }
  0x4e   :  { %v999_v4 = vor.u32 %v998_v60, %v994_v57  ;;  %v1008_v20 = vshrl.u32 %v8939_v13, 16  ;;  %v1012_v14 = vrot.slane %v1010_v2, 1  ;;  %v1024_v26 = vshll.u32 %v8994_v50, 16 }
  0x4f   :  { %13501 = vst [vmem:[#allocation34_spill] sm:$0xff] %v9311_v33  ;;  %991 = vrot.lane.b32.xlu1 %v9311_v33, %s8878_s29  ;;  %v9321_v12 = vor.u32 %v952_v54, %v948_v44  ;;  %v9329_v35 = vor.u32 %v1019_v9, %v1015_v46  ;;  %v1029_v22 = vshrl.u32 %v8986_v45, 16  ;;  %v1033_v32 = vrot.slane %v1031_v63, 1 }
  0x50   :  { %v1045_v38 = vshll.u32 %v9004_v55, 16  ;;  %v9334_v39 = vor.u32 %v1012_v14, %v1008_v20  ;;  %v1022_v44 = vshrl.u32 %v8994_v50, 16  ;;  %v1026_v52 = vrot.slane %v1024_v26, 1 }
  0x51   :  { %13502 = vst [vmem:[#allocation35_spill] sm:$0xff] %v9321_v12  ;;  %989 = vrot.lane.b32.xlu0 %v9321_v12, %s8878_s29  ;;  %v1038_v54 = vshll.u32 %v9015_v1, 16  ;;  %v9340_v57 = vor.u32 %v1033_v32, %v1029_v22  ;;  %v1043_v60 = vshrl.u32 %v9004_v55, 16  ;;  %v1059_v46 = vshll.u32 %v9025_v7, 16 }
  0x52   :  { %v1047_v2 = vrot.slane %v1045_v38, 1  ;;  %v9346_v9 = vor.u32 %v1026_v52, %v1022_v44  ;;  %v1036_v63 = vshrl.u32 %v9015_v1, 16  ;;  %v1052_v20 = vshll.u32 %v9036_v15, 16 }
  0x53   :  { %1107 = vrot.lane.b32.xlu1 %v9317_v3, %s8879_s18  ;;  %13503 = vst [vmem:[#allocation36_spill] sm:$0xff] %v9340_v57  ;;  %v1057_v26 = vshrl.u32 %v9025_v7, 16  ;;  %v1061_v22 = vrot.slane %v1059_v46, 1  ;;  %v1073_v32 = vshll.u32 %v9046_v23, 16  ;;  %v1050_v44 = vshrl.u32 %v9036_v15, 16 }
  0x54   :  { %v9352_v14 = vor.u32 %v1047_v2, %v1043_v60  ;;  %v1054_v52 = vrot.slane %v1052_v20, 1  ;;  %v1071_v2 = vshrl.u32 %v9046_v23, 16  ;;  %v1087_v33 = vshll.u32 %v9068_v41, 16 }
  0x55   :  { %1105 = vrot.lane.b32.xlu0 %v999_v4, %s8879_s18  ;;  %v1040_v4 = vrot.slane %v1038_v54, 1  ;;  %v1066_v54 = vshll.u32 %v9054_v30, 16  ;;  %v9364_v60 = vor.u32 %v1061_v22, %v1057_v26  ;;  %v1075_v46 = vrot.slane %v1073_v32, 1 }
  0x56   :  { %13504 = vst [vmem:[#allocation37_spill] sm:$0xff] %v9352_v14  ;;  %v1080_v8 = vshll.u32 %v9076_v47, 16  ;;  %v1055_v15 = vor.u32 %v1054_v52, %v1050_v44  ;;  %v1085_v22 = vshrl.u32 %v9068_v41, 16  ;;  %v1089_v32 = vrot.slane %v1087_v33, 1  ;;  %v192_v44 = vld [vmem:[%s13355_s0 + $0x138] sm:$0x1] }
  0x57   :  { %1111 = vrot.lane.b32.xlu1 %v9329_v35, %s8879_s18  ;;  %v9358_v38 = vor.u32 %v1040_v4, %v1036_v63  ;;  %13506 = vst [vmem:[#allocation39_spill] sm:$0xff] %v9364_v60  ;;  %v1101_v63 = vshll.u32 %v9086_v53, 16  ;;  %v1064_v4 = vshrl.u32 %v9054_v30, 16  ;;  %v1068_v20 = vrot.slane %v1066_v54, 1  ;;  %v189_v33 = vld [vmem:[%s13355_s0 + $0x120] sm:$0xff] }
  0x58   :  { %v9375_v26 = vor.u32 %v1075_v46, %v1071_v2  ;;  %v1078_v12 = vshrl.u32 %v9076_v47, 16  ;;  %v1082_v52 = vrot.slane %v1080_v8, 1  ;;  %v1099_v54 = vshrl.u32 %v9086_v53, 16  ;;  %v262_v47 = vld [vmem:[%s13355_s0 + $0x368] sm:$0x1] }
  0x59   :  { %1109 = vrot.lane.b32.xlu0 %v9334_v39, %s8879_s18  ;;  %13505 = vst [vmem:[#allocation38_spill] sm:$0xff] %v9358_v38  ;;  %v1103_v24 = vrot.slane %v1101_v63, 1  ;;  %v1094_v2 = vshll.u32 %v9097_v0, 16  ;;  %v9388_v46 = vor.u32 %v1068_v20, %v1064_v4  ;;  %v9395_v41 = vor.u32 %v1089_v32, %v1085_v22  ;;  %v190_v63 = vld [vmem:[%s13355_s0 + $0x128] sm:$0x1] }
  0x5a   :  { %13507 = vst [vmem:[#allocation40_spill] sm:$0xff] %v9375_v26  ;;  %v480_v8 = vmul.f32 0.2, %v192_v44  ;;  %vm335_vm0 = vcmp.ge.f32.partialorder %v191_v17, 0.0  ;;  %vm336_vm1 = vcmp.ge.f32.partialorder %v192_v44, 0.0  ;;  %v9406_v20 = vor.u32 %v1082_v52, %v1078_v12 }
  0x5b   :  { %1115 = vrot.lane.b32.xlu1 %v9340_v57, %s8879_s18  ;;  %13508 = vst [vmem:[#allocation41_spill] sm:$0xff] %v9388_v46  ;;  %13509 = vst [vmem:[#allocation42_spill] sm:$0xff] %v9395_v41  ;;  %v196_v4 = vld [vmem:[%s13355_s0 + $0x158] sm:$0x1]  ;;  %v9408_v22 = vor.u32 %v1103_v24, %v1099_v54  ;;  %v1092_v32 = vshrl.u32 %v9097_v0, 16  ;;  %v1096_v53 = vrot.slane %v1094_v2, 1 }
  0x5c   :  { %13510 = vst [vmem:[#allocation43_spill] sm:$0xff] %v9406_v20  ;;  %vm333_vm2 = vcmp.ge.f32.partialorder %v189_v33, 0.0  ;;  %vm334_vm3 = vcmp.ge.f32.partialorder %v190_v63, 0.0  ;;  %v478_v16 = vmul.f32 0.2, %v190_v63  ;;  %v624_v49 = vsel %vm336_vm1, %v192_v44, %v480_v8  ;;  %v193_v24 = vld [vmem:[%s13355_s0 + $0x140] sm:$0xff] }
  0x5d   :  { %1113 = vrot.lane.b32.xlu0 %v9346_v9, %s8879_s18  ;;  %13511 = vst [vmem:[#allocation44_spill] sm:$0xff] %v9408_v22  ;;  %v484_v12 = vmul.f32 0.2, %v196_v4  ;;  %vm340_vm5 = vcmp.ge.f32.partialorder %v196_v4, 0.0  ;;  %v194_v52 = vld [vmem:[%s13355_s0 + $0x148] sm:$0x1]  ;;  %v9424_v2 = vor.u32 %v1096_v53, %v1092_v32 }
  0x5e   :  { %v199_v54 = vld [vmem:[%s13355_s0 + $0x170] sm:$0xff]  ;;  %v622_v8 = vsel %vm334_vm3, %v190_v63, %v478_v16  ;;  %v197_v0 = vld [vmem:[%s13355_s0 + $0x160] sm:$0xff]  ;;  %v198_v53 = vld [vmem:[%s13355_s0 + $0x168] sm:$0x1]  ;;  %vm337_vm6 = vcmp.ge.f32.partialorder %v193_v24, 0.0  ;;  %vm338_vm7 = vcmp.ge.f32.partialorder %v194_v52, 0.0 }
  0x5f   :  { %1119 = vrot.lane.b32.xlu1 %v9352_v14, %s8879_s18  ;;  %13512 = vst [vmem:[#allocation45_spill] sm:$0xff] %v9424_v2  ;;  %v204_v16 = vld [vmem:[%s13355_s0 + $0x198] sm:$0x1]  ;;  %vm343_vm8 = vcmp.ge.f32.partialorder %v199_v54, 0.0  ;;  %v485_v63 = vmul.f32 0.2, %v197_v0 }
  0x60   :  { %vm341_vm10 = vcmp.ge.f32.partialorder %v197_v0, 0.0  ;;  %vm342_vm11 = vcmp.ge.f32.partialorder %v198_v53, 0.0  ;;  %vm348_vm13 = vcmp.ge.f32.partialorder %v204_v16, 0.0  ;;  %vm406_vm3 = vcmp.ge.f32.partialorder %v262_v47, 0.0  ;;  %v276_v14 = vld [vmem:[%s13355_s0 + $0x3d8] sm:$0x1] }
  0x61   :  { %1117 = vrot.lane.b32.xlu0 %v9358_v38, %s8879_s18  ;;  %v550_v38 = vmul.f32 0.2, %v262_v47  ;;  %v562_v55 = vmul.f32 0.2, %v274_v31 }
  0x63   :  { %1123 = vrot.lane.b32.xlu1 %v9364_v60, %s8879_s18  ;;  %v479_v60 = vmul.f32 0.2, %v191_v17 }
  0x65   :  { %1121 = vrot.lane.b32.xlu0 %v1055_v15, %s8879_s18  ;;  %v195_v15 = vld [vmem:[%s13355_s0 + $0x150] sm:$0xff]  ;;  %v623_v43 = vsel %vm335_vm0, %v191_v17, %v479_v60  ;;  %v200_v17 = vld [vmem:[%s13355_s0 + $0x178] sm:$0x1] }
  0x66   :  { %v483_v23 = vmul.f32 0.2, %v195_v15  ;;  %vm339_vm4 = vcmp.ge.f32.partialorder %v195_v15, 0.0  ;;  %v9431_v60 = vpack.c.bf16 %v624_v49, %v623_v43  ;;  %v482_v43 = vmul.f32 0.2, %v194_v52 }
  0x67   :  { %1127 = vrot.lane.b32.xlu1 %v9375_v26, %s8879_s18  ;;  %v477_v26 = vmul.f32 0.2, %v189_v33  ;;  %v487_v49 = vmul.f32 0.2, %v199_v54  ;;  %vm344_vm9 = vcmp.ge.f32.partialorder %v200_v17, 0.0 }
  0x68   :  { %v627_v32 = vsel %vm339_vm4, %v195_v15, %v483_v23 }
  0x69   :  { %1125 = vrot.lane.b32.xlu0 %v9388_v46, %s8879_s18  ;;  %v621_v44 = vsel %vm333_vm2, %v189_v33, %v477_v26  ;;  %v488_v26 = vmul.f32 0.2, %v200_v17  ;;  %v203_v33 = vld [vmem:[%s13355_s0 + $0x190] sm:$0xff]  ;;  %v486_v46 = vmul.f32 0.2, %v198_v53 }
  0x6a   :  { %v9451_v23 = vpack.c.bf16 %v622_v8, %v621_v44  ;;  %vm347_vm12 = vcmp.ge.f32.partialorder %v203_v33, 0.0  ;;  %v263_v44 = vld [vmem:[%s13355_s0 + $0x370] sm:$0xff]  ;;  %v264_v8 = vld [vmem:[%s13355_s0 + $0x378] sm:$0x1] }
  0x6b   :  { %1131 = vrot.lane.b32.xlu1 %v9395_v41, %s8879_s18  ;;  %v481_v41 = vmul.f32 0.2, %v193_v24  ;;  %v551_v7 = vmul.f32 0.2, %v263_v44  ;;  %vm407_vm0 = vcmp.ge.f32.partialorder %v263_v44, 0.0  ;;  %vm408_vm1 = vcmp.ge.f32.partialorder %v264_v8, 0.0 }
  0x6d   :  { %1129 = vrot.lane.b32.xlu0 %v9406_v20, %s8879_s18  ;;  %v628_v20 = vsel %vm340_vm5, %v196_v4, %v484_v12  ;;  %v201_v4 = vld [vmem:[%s13355_s0 + $0x180] sm:$0xff]  ;;  %v625_v12 = vsel %vm337_vm6, %v193_v24, %v481_v41  ;;  %v491_v41 = vmul.f32 0.2, %v203_v33  ;;  %v492_v24 = vmul.f32 0.2, %v204_v16 }
  0x6e   :  { %v9453_v15 = vpack.c.bf16 %v628_v20, %v627_v32  ;;  %v202_v20 = vld [vmem:[%s13355_s0 + $0x188] sm:$0x1]  ;;  %v632_v32 = vsel %vm344_vm9, %v200_v17, %v488_v26  ;;  %vm345_vm14 = vcmp.ge.f32.partialorder %v201_v4, 0.0 }
  0x6f   :  { %1135 = vrot.lane.b32.xlu1 %v9408_v22, %s8879_s18  ;;  %v626_v22 = vsel %vm338_vm7, %v194_v52, %v482_v43  ;;  %v629_v52 = vsel %vm341_vm10, %v197_v0, %v485_v63  ;;  %v489_v43 = vmul.f32 0.2, %v201_v4  ;;  %v490_v26 = vmul.f32 0.2, %v202_v20 }
  0x70   :  { %v9483_v17 = vpack.c.bf16 %v626_v22, %v625_v12  ;;  %v552_v0 = vmul.f32 0.2, %v264_v8  ;;  %vm346_vm15 = vcmp.ge.f32.partialorder %v202_v20, 0.0  ;;  %v635_v63 = vsel %vm347_vm12, %v203_v33, %v491_v41  ;;  %v267_v22 = vld [vmem:[%s13355_s0 + $0x390] sm:$0xff]  ;;  %v268_v12 = vld [vmem:[%s13355_s0 + $0x398] sm:$0x1] }
  0x71   :  { %1133 = vrot.lane.b32.xlu0 %v9424_v2, %s8879_s18  ;;  %v631_v2 = vsel %vm343_vm8, %v199_v54, %v487_v49  ;;  %v630_v54 = vsel %vm342_vm11, %v198_v53, %v486_v46  ;;  %v261_v49 = vld [vmem:[%s13355_s0 + $0x360] sm:$0xff]  ;;  %v636_v30 = vsel %vm348_vm13, %v204_v16, %v492_v24  ;;  %v695_v33 = vsel %vm407_vm0, %v263_v44, %v551_v7  ;;  %v271_v44 = vld [vmem:[%s13355_s0 + $0x3b0] sm:$0xff] }
  0x72   :  { %v9487_v46 = vpack.c.bf16 %v632_v32, %v631_v2  ;;  %v9489_v53 = vpack.c.bf16 %v630_v54, %v629_v52  ;;  %v633_v2 = vsel %vm345_vm14, %v201_v4, %v489_v43  ;;  %vm405_vm2 = vcmp.ge.f32.partialorder %v261_v49, 0.0  ;;  %v265_v24 = vld [vmem:[%s13355_s0 + $0x380] sm:$0xff] }
  0x73   :  { %1155 = vrot.lane.b32.xlu1 %v9431_v60, %s8880_s25  ;;  %v549_v32 = vmul.f32 0.2, %v261_v49  ;;  %v634_v52 = vsel %vm346_vm15, %v202_v20, %v490_v26  ;;  %v696_v41 = vsel %vm408_vm1, %v264_v8, %v552_v0  ;;  %v9509_v4 = vpack.c.bf16 %v636_v30, %v635_v63  ;;  %v266_v20 = vld [vmem:[%s13355_s0 + $0x388] sm:$0x1]  ;;  %v272_v8 = vld [vmem:[%s13355_s0 + $0x3b8] sm:$0x1] }
  0x74   :  { %13513 = vst [vmem:[#allocation46_spill] sm:$0xff] %v9487_v46  ;;  %v555_v54 = vmul.f32 0.2, %v267_v22  ;;  %v556_v43 = vmul.f32 0.2, %v268_v12  ;;  %vm411_vm4 = vcmp.ge.f32.partialorder %v267_v22, 0.0  ;;  %v9522_v30 = vpack.c.bf16 %v634_v52, %v633_v2 }
  0x75   :  { %1153 = vrot.lane.b32.xlu0 %v9451_v23, %s8880_s25  ;;  %13515 = vst [vmem:[#allocation48_spill] sm:$0xff] %v9509_v4  ;;  %vm412_vm5 = vcmp.ge.f32.partialorder %v268_v12, 0.0  ;;  %v9524_v26 = vpack.c.bf16 %v696_v41, %v695_v33  ;;  %v693_v0 = vsel %vm405_vm2, %v261_v49, %v549_v32  ;;  %v694_v63 = vsel %vm406_vm3, %v262_v47, %v550_v38  ;;  %v275_v47 = vld [vmem:[%s13355_s0 + $0x3d0] sm:$0xff] }
  0x76   :  { %13517 = vst [vmem:[#allocation50_spill] sm:$0xff] %v9522_v30  ;;  %vm409_vm6 = vcmp.ge.f32.partialorder %v265_v24, 0.0  ;;  %vm410_vm7 = vcmp.ge.f32.partialorder %v266_v20, 0.0  ;;  %v553_v2 = vmul.f32 0.2, %v265_v24  ;;  %v699_v38 = vsel %vm411_vm4, %v267_v22, %v555_v54 }
  0x77   :  { %1159 = vrot.lane.b32.xlu1 %v9453_v15, %s8880_s25  ;;  %13518 = vst [vmem:[#allocation51_spill] sm:$0xff] %v9524_v26  ;;  %v554_v52 = vmul.f32 0.2, %v266_v20  ;;  %v700_v49 = vsel %vm412_vm5, %v268_v12, %v556_v43  ;;  %v559_v32 = vmul.f32 0.2, %v271_v44  ;;  %vm415_vm8 = vcmp.ge.f32.partialorder %v271_v44, 0.0 }
  0x78   :  { %v560_v41 = vmul.f32 0.2, %v272_v8  ;;  %vm416_vm9 = vcmp.ge.f32.partialorder %v272_v8, 0.0  ;;  %v9552_v22 = vpack.c.bf16 %v694_v63, %v693_v0  ;;  %v9554_v12 = vpack.c.bf16 %v700_v49, %v699_v38 }
  0x79   :  { %1157 = vrot.lane.b32.xlu0 %v9483_v17, %s8880_s25  ;;  %v697_v54 = vsel %vm409_vm6, %v265_v24, %v553_v2  ;;  %v698_v43 = vsel %vm410_vm7, %v266_v20, %v554_v52  ;;  %v703_v0 = vsel %vm415_vm8, %v271_v44, %v559_v32  ;;  %v563_v38 = vmul.f32 0.2, %v275_v47  ;;  %v209_v52 = vld [vmem:[%s13355_s0 + $0x1c0] sm:$0xff] }
  0x7a   :  { %v9502_v16 = vpop.permute.xlu1 %821  ;;  %13521 = vst [vmem:[#allocation54_spill] sm:$0xff] %v9554_v12  ;;  %v704_v63 = vsel %vm416_vm9, %v272_v8, %v560_v41  ;;  %v564_v49 = vmul.f32 0.2, %v276_v14  ;;  %vm419_vm12 = vcmp.ge.f32.partialorder %v275_v47, 0.0  ;;  %vm420_vm13 = vcmp.ge.f32.partialorder %v276_v14, 0.0 }
  0x7b   :  { %13514 = vst [vmem:[#allocation47_spill] sm:$0xff] %v9502_v16  ;;  %1163 = vrot.lane.b32.xlu1 %v9487_v46, %s8880_s25  ;;  %v9514_v7 = vpop.permute.xlu0 %817  ;;  %v269_v16 = vld [vmem:[%s13355_s0 + $0x3a0] sm:$0xff]  ;;  %v9578_v44 = vpack.c.bf16 %v698_v43, %v697_v54  ;;  %vm418_vm15 = vcmp.ge.f32.partialorder %v274_v31, 0.0  ;;  %v9590_v8 = vpack.c.bf16 %v704_v63, %v703_v0  ;;  %v707_v32 = vsel %vm419_vm12, %v275_v47, %v563_v38  ;;  %v214_v43 = vld [vmem:[%s13355_s0 + $0x1e8] sm:$0x1] }
  0x7c   :  { %13516 = vst [vmem:[#allocation49_spill] sm:$0xff] %v9514_v7  ;;  %v270_v7 = vld [vmem:[%s13355_s0 + $0x3a8] sm:$0x1]  ;;  %vm413_vm10 = vcmp.ge.f32.partialorder %v269_v16, 0.0  ;;  %v708_v41 = vsel %vm420_vm13, %v276_v14, %v564_v49  ;;  %v213_v54 = vld [vmem:[%s13355_s0 + $0x1e0] sm:$0xff]  ;;  %vm353_vm0 = vcmp.ge.f32.partialorder %v209_v52, 0.0  ;;  %v706_v47 = vsel %vm418_vm15, %v274_v31, %v562_v55 }
  0x7d   :  { %1161 = vrot.lane.b32.xlu0 %v9489_v53, %s8880_s25  ;;  %v558_v18 = vmul.f32 0.2, %v270_v7  ;;  %vm414_vm11 = vcmp.ge.f32.partialorder %v270_v7, 0.0  ;;  %13522 = vst [vmem:[#allocation55_spill] sm:$0xff] %v9578_v44  ;;  %13523 = vst [vmem:[#allocation56_spill] sm:$0xff] %v9590_v8  ;;  %vm354_vm1 = vcmp.ge.f32.partialorder %v210_v27, 0.0 }
  0x7e   :  { %v9536_v33 = vpop.permute.xlu1 %823  ;;  %v497_v0 = vmul.f32 0.2, %v209_v52  ;;  %v498_v63 = vmul.f32 0.2, %v210_v27  ;;  %v211_v49 = vld [vmem:[%s13355_s0 + $0x1d0] sm:$0xff]  ;;  %vm357_vm4 = vcmp.ge.f32.partialorder %v213_v54, 0.0 }
  0x7f   :  { %13519 = vst [vmem:[#allocation52_spill] sm:$0xff] %v9536_v33  ;;  %1167 = vrot.lane.b32.xlu1 %v9509_v4, %s8880_s25  ;;  %v9548_v57 = vpop.permute.xlu0 %819  ;;  %v557_v33 = vmul.f32 0.2, %v269_v16  ;;  %v702_v2 = vsel %vm414_vm11, %v270_v7, %v558_v18  ;;  %v208_v7 = vld [vmem:[%s13355_s0 + $0x1b8] sm:$0x1]  ;;  %vm358_vm5 = vcmp.ge.f32.partialorder %v214_v43, 0.0 }
  0x80   :  { %13520 = vst [vmem:[#allocation53_spill] sm:$0xff] %v9548_v57  ;;  %v273_v57 = vld [vmem:[%s13355_s0 + $0x3c0] sm:$0xff]  ;;  %v496_v14 = vmul.f32 0.2, %v208_v7  ;;  %vm352_vm3 = vcmp.ge.f32.partialorder %v208_v7, 0.0  ;;  %v641_v51 = vsel %vm353_vm0, %v209_v52, %v497_v0  ;;  %v642_v21 = vsel %vm354_vm1, %v210_v27, %v498_v63 }
  0x81   :  { %1165 = vrot.lane.b32.xlu0 %v9522_v30, %s8880_s25  ;;  %v701_v24 = vsel %vm413_vm10, %v269_v16, %v557_v33  ;;  %v561_v1 = vmul.f32 0.2, %v273_v57  ;;  %vm417_vm14 = vcmp.ge.f32.partialorder %v273_v57, 0.0  ;;  %v207_v16 = vld [vmem:[%s13355_s0 + $0x1b0] sm:$0xff]  ;;  %v502_v5 = vmul.f32 0.2, %v214_v43 }
  0x82   :  { %v9558_v61 = vpop.permute.xlu1 %827  ;;  %v9592_v33 = vpack.c.bf16 %v702_v2, %v701_v24  ;;  %v495_v38 = vmul.f32 0.2, %v207_v16  ;;  %vm351_vm2 = vcmp.ge.f32.partialorder %v207_v16, 0.0  ;;  %v212_v55 = vld [vmem:[%s13355_s0 + $0x1d8] sm:$0x1]  ;;  %v217_v31 = vld [vmem:[%s13355_s0 + $0x200] sm:$0xff]  ;;  %v9640_v63 = vpack.c.bf16 %v642_v21, %v641_v51 }
  0x83   :  { %1171 = vrot.lane.b32.xlu1 %v9524_v26, %s8880_s25  ;;  %v9568_v20 = vpop.permute.xlu0 %825  ;;  %v705_v24 = vsel %vm417_vm14, %v273_v57, %v561_v1  ;;  %v9615_v1 = vpack.c.bf16 %v708_v41, %v707_v32  ;;  %v218_v32 = vld [vmem:[%s13355_s0 + $0x208] sm:$0x1]  ;;  %vm355_vm6 = vcmp.ge.f32.partialorder %v211_v49, 0.0  ;;  %v499_v37 = vmul.f32 0.2, %v211_v49 }
  0x84   :  { %13524 = vst [vmem:[#allocation57_spill] sm:$0xff] %v9592_v33  ;;  %v9623_v57 = vpack.c.bf16 %v706_v47, %v705_v24  ;;  %v639_v41 = vsel %vm351_vm2, %v207_v16, %v495_v38  ;;  %v646_v47 = vsel %vm358_vm5, %v214_v43, %v502_v5  ;;  %v500_v52 = vmul.f32 0.2, %v212_v55  ;;  %v216_v5 = vld [vmem:[%s13355_s0 + $0x1f8] sm:$0x1] }
  0x85   :  { %1169 = vrot.lane.b32.xlu0 %v9552_v22, %s8880_s25  ;;  %13527 = vst [vmem:[#allocation60_spill] sm:$0xff] %v9615_v1  ;;  %v505_v27 = vmul.f32 0.2, %v217_v31  ;;  %vm356_vm7 = vcmp.ge.f32.partialorder %v212_v55, 0.0  ;;  %vm361_vm8 = vcmp.ge.f32.partialorder %v217_v31, 0.0  ;;  %vm362_vm9 = vcmp.ge.f32.partialorder %v218_v32, 0.0 }
  0x86   :  { %v9580_v18 = vpop.permute.xlu1 %831  ;;  %13528 = vst [vmem:[#allocation61_spill] sm:$0xff] %v9623_v57  ;;  %v506_v16 = vmul.f32 0.2, %v218_v32  ;;  %v222_v21 = vld [vmem:[%s13355_s0 + $0x228] sm:$0x1]  ;;  %v643_v43 = vsel %vm355_vm6, %v211_v49, %v499_v37  ;;  %vm360_vm11 = vcmp.ge.f32.partialorder %v216_v5, 0.0 }
  0x87   :  { %1175 = vrot.lane.b32.xlu1 %v9554_v12, %s8880_s25  ;;  %v9602_v45 = vpop.permute.xlu0 %829  ;;  %v501_v12 = vmul.f32 0.2, %v213_v54  ;;  %v504_v49 = vmul.f32 0.2, %v216_v5  ;;  %vm366_vm13 = vcmp.ge.f32.partialorder %v222_v21, 0.0 }
  0x88   :  { %13525 = vst [vmem:[#allocation58_spill] sm:$0xff] %v9602_v45  ;;  %v650_v37 = vsel %vm362_vm9, %v218_v32, %v506_v16  ;;  %v279_v32 = vld [vmem:[%s13355_s0 + $0x3f0] sm:$0xff] }
  0x89   :  { %1173 = vrot.lane.b32.xlu0 %v9578_v44, %s8880_s25  ;;  %v645_v24 = vsel %vm357_vm4, %v213_v54, %v501_v12  ;;  %v221_v12 = vld [vmem:[%s13355_s0 + $0x220] sm:$0xff]  ;;  %vm423_vm2 = vcmp.ge.f32.partialorder %v279_v32, 0.0 }
  0x8a   :  { %v9611_v2 = vpop.permute.xlu1 %835  ;;  %v9658_v54 = vpack.c.bf16 %v646_v47, %v645_v24  ;;  %v510_v24 = vmul.f32 0.2, %v222_v21  ;;  %vm365_vm12 = vcmp.ge.f32.partialorder %v221_v12, 0.0  ;;  %v281_v47 = vld [vmem:[%s13355_s0 + $0x400] sm:$0xff] }
  0x8b   :  { %13526 = vst [vmem:[#allocation59_spill] sm:$0xff] %v9611_v2  ;;  %1179 = vrot.lane.b32.xlu1 %v9590_v8, %s8880_s25  ;;  %v9627_v56 = vpop.permute.xlu0 %833  ;;  %v640_v8 = vsel %vm352_vm3, %v208_v7, %v496_v14  ;;  %v215_v7 = vld [vmem:[%s13355_s0 + $0x1f0] sm:$0xff]  ;;  %vm425_vm0 = vcmp.ge.f32.partialorder %v281_v47, 0.0  ;;  %vm424_vm3 = vcmp.ge.f32.partialorder %v280_v19, 0.0 }
  0x8c   :  { %13529 = vst [vmem:[#allocation62_spill] sm:$0xff] %v9627_v56  ;;  %v9656_v51 = vpack.c.bf16 %v640_v8, %v639_v41  ;;  %v219_v14 = vld [vmem:[%s13355_s0 + $0x210] sm:$0xff]  ;;  %vm359_vm10 = vcmp.ge.f32.partialorder %v215_v7, 0.0  ;;  %v220_v8 = vld [vmem:[%s13355_s0 + $0x218] sm:$0x1]  ;;  %v648_v56 = vsel %vm360_vm11, %v216_v5, %v504_v49 }
  0x8d   :  { %1177 = vrot.lane.b32.xlu0 %v9592_v33, %s8880_s25  ;;  %v649_v33 = vsel %vm361_vm8, %v217_v31, %v505_v27  ;;  %v509_v41 = vmul.f32 0.2, %v221_v12  ;;  %v507_v31 = vmul.f32 0.2, %v219_v14  ;;  %vm363_vm14 = vcmp.ge.f32.partialorder %v219_v14, 0.0 }
  0x8e   :  { %v9636_v0 = vpop.permute.xlu1 %839  ;;  %v282_v27 = vld [vmem:[%s13355_s0 + $0x408] sm:$0x1]  ;;  %vm364_vm15 = vcmp.ge.f32.partialorder %v220_v8, 0.0  ;;  %v567_v5 = vmul.f32 0.2, %v279_v32 }
  0x8f   :  { %13530 = vst [vmem:[#allocation63_spill] sm:$0xff] %v9636_v0  ;;  %1183 = vrot.lane.b32.xlu1 %v9615_v1, %s8880_s25  ;;  %v9645_v38 = vpop.permute.xlu0 %837  ;;  %v644_v1 = vsel %vm356_vm7, %v212_v55, %v500_v52  ;;  %v508_v52 = vmul.f32 0.2, %v220_v8  ;;  %v653_v62 = vsel %vm365_vm12, %v221_v12, %v509_v41  ;;  %vm426_vm1 = vcmp.ge.f32.partialorder %v282_v27, 0.0 }
  0x90   :  { %13531 = vst [vmem:[#allocation64_spill] sm:$0xff] %v9645_v38  ;;  %v503_v38 = vmul.f32 0.2, %v215_v7  ;;  %v9687_v16 = vpack.c.bf16 %v644_v1, %v643_v43  ;;  %v654_v1 = vsel %vm366_vm13, %v222_v21, %v510_v24  ;;  %v568_v12 = vmul.f32 0.2, %v280_v19 }
  0x91   :  { %1181 = vrot.lane.b32.xlu0 %v9623_v57, %s8880_s25  ;;  %v9689_v57 = vpack.c.bf16 %v650_v37, %v649_v33  ;;  %v285_v33 = vld [vmem:[%s13355_s0 + $0x420] sm:$0xff]  ;;  %v569_v37 = vmul.f32 0.2, %v281_v47  ;;  %v652_v49 = vsel %vm364_vm15, %v220_v8, %v508_v52  ;;  %v284_v21 = vld [vmem:[%s13355_s0 + $0x418] sm:$0x1]  ;;  %v9723_v8 = vpack.c.bf16 %v654_v1, %v653_v62 }
  0x92   :  { %v9666_v0 = vpop.permute.xlu1 %843  ;;  %vm429_vm4 = vcmp.ge.f32.partialorder %v285_v33, 0.0  ;;  %v289_v52 = vld [vmem:[%s13355_s0 + $0x440] sm:$0xff]  ;;  %v711_v2 = vsel %vm423_vm2, %v279_v32, %v567_v5  ;;  %v290_v62 = vld [vmem:[%s13355_s0 + $0x448] sm:$0x1]  ;;  %v712_v1 = vsel %vm424_vm3, %v280_v19, %v568_v12  ;;  %v572_v25 = vmul.f32 0.2, %v284_v21 }
  0x93   :  { %13532 = vst [vmem:[#allocation65_spill] sm:$0xff] %v9666_v0  ;;  %1203 = vrot.lane.b32.xlu1 %v9640_v63, %s8881_s19  ;;  %v9674_v55 = vpop.permute.xlu0 %841  ;;  %vm428_vm7 = vcmp.ge.f32.partialorder %v284_v21, 0.0  ;;  %vm433_vm8 = vcmp.ge.f32.partialorder %v289_v52, 0.0  ;;  %v578_v32 = vmul.f32 0.2, %v290_v62  ;;  %vm434_vm9 = vcmp.ge.f32.partialorder %v290_v62, 0.0 }
  0x94   :  { %13533 = vst [vmem:[#allocation66_spill] sm:$0xff] %v9674_v55  ;;  %v647_v55 = vsel %vm359_vm10, %v215_v7, %v503_v38  ;;  %v286_v7 = vld [vmem:[%s13355_s0 + $0x428] sm:$0x1]  ;;  %v651_v38 = vsel %vm363_vm14, %v219_v14, %v507_v31  ;;  %v573_v14 = vmul.f32 0.2, %v285_v33  ;;  %v283_v31 = vld [vmem:[%s13355_s0 + $0x410] sm:$0xff] }
  0x95   :  { %1201 = vrot.lane.b32.xlu0 %v9656_v51, %s8881_s19  ;;  %v9716_v41 = vpack.c.bf16 %v648_v56, %v647_v55  ;;  %v574_v24 = vmul.f32 0.2, %v286_v7  ;;  %vm430_vm5 = vcmp.ge.f32.partialorder %v286_v7, 0.0  ;;  %v9728_v56 = vpack.c.bf16 %v652_v49, %v651_v38  ;;  %v288_v5 = vld [vmem:[%s13355_s0 + $0x438] sm:$0x1] }
  0x96   :  { %v9692_v0 = vpop.permute.xlu1 %847  ;;  %v713_v55 = vsel %vm425_vm0, %v281_v47, %v569_v37  ;;  %vm427_vm6 = vcmp.ge.f32.partialorder %v283_v31, 0.0  ;;  %v571_v45 = vmul.f32 0.2, %v283_v31  ;;  %v717_v47 = vsel %vm429_vm4, %v285_v33, %v573_v14  ;;  %v293_v33 = vld [vmem:[%s13355_s0 + $0x460] sm:$0xff] }
  0x97   :  { %13534 = vst [vmem:[#allocation67_spill] sm:$0xff] %v9692_v0  ;;  %1207 = vrot.lane.b32.xlu1 %v9658_v54, %s8881_s19  ;;  %v9709_v43 = vpop.permute.xlu0 %845  ;;  %v570_v0 = vmul.f32 0.2, %v282_v27  ;;  %v718_v37 = vsel %vm430_vm5, %v286_v7, %v574_v24  ;;  %v9755_v7 = vpack.c.bf16 %v712_v1, %v711_v2  ;;  %v716_v24 = vsel %vm428_vm7, %v284_v21, %v572_v25  ;;  %v292_v25 = vld [vmem:[%s13355_s0 + $0x458] sm:$0x1] }
  0x98   :  { %13535 = vst [vmem:[#allocation68_spill] sm:$0xff] %v9709_v43  ;;  %v9762_v12 = vpack.c.bf16 %v718_v37, %v717_v47  ;;  %v715_v14 = vsel %vm427_vm6, %v283_v31, %v571_v45  ;;  %v576_v2 = vmul.f32 0.2, %v288_v5  ;;  %v581_v1 = vmul.f32 0.2, %v293_v33  ;;  %v291_v45 = vld [vmem:[%s13355_s0 + $0x450] sm:$0xff] }
  0x99   :  { %1205 = vrot.lane.b32.xlu0 %v9687_v16, %s8881_s19  ;;  %v714_v43 = vsel %vm426_vm1, %v282_v27, %v570_v0  ;;  %v577_v0 = vmul.f32 0.2, %v289_v52  ;;  %v287_v27 = vld [vmem:[%s13355_s0 + $0x430] sm:$0xff]  ;;  %13539 = vst [vmem:[#allocation72_spill] sm:$0xff] %v9755_v7  ;;  %vm432_vm11 = vcmp.ge.f32.partialorder %v288_v5, 0.0  ;;  %vm437_vm12 = vcmp.ge.f32.partialorder %v293_v33, 0.0 }
  0x9a   :  { %v9747_v19 = vpack.c.bf16 %v714_v43, %v713_v55  ;;  %v294_v43 = vld [vmem:[%s13355_s0 + $0x468] sm:$0x1]  ;;  %13541 = vst [vmem:[#allocation74_spill] sm:$0xff] %v9762_v12  ;;  %vm431_vm10 = vcmp.ge.f32.partialorder %v287_v27, 0.0  ;;  %v9777_v21 = vpack.c.bf16 %v716_v24, %v715_v14  ;;  %v1243_v14 = vshll.u32 %v9431_v60, 16 }
  0x9b   :  { %1211 = vrot.lane.b32.xlu1 %v9689_v57, %s8881_s19  ;;  %v721_v55 = vsel %vm433_vm8, %v289_v52, %v577_v0  ;;  %v582_v47 = vmul.f32 0.2, %v294_v43  ;;  %vm438_vm13 = vcmp.ge.f32.partialorder %v294_v43, 0.0  ;;  %v725_v0 = vsel %vm437_vm12, %v293_v33, %v581_v1 }
  0x9c   :  { %v9733_v42 = vpop.permute.xlu1 %963  ;;  %13538 = vst [vmem:[#allocation71_spill] sm:$0xff] %v9747_v19  ;;  %13543 = vst [vmem:[#allocation76_spill] sm:$0xff] %v9777_v21  ;;  %vm435_vm14 = vcmp.ge.f32.partialorder %v291_v45, 0.0  ;;  %vm436_vm15 = vcmp.ge.f32.partialorder %v292_v25, 0.0  ;;  %v1257_v1 = vshll.u32 %v9453_v15, 16  ;;  %vm13448_vm0 = vcmask 31744  }
  0x9d   :  { %13536 = vst [vmem:[#allocation69_spill] sm:$0xff] %v9733_v42  ;;  %1209 = vrot.lane.b32.xlu0 %v9716_v41, %s8881_s19  ;;  %v722_v42 = vsel %vm434_vm9, %v290_v62, %v578_v32  ;;  %v720_v62 = vsel %vm432_vm11, %v288_v5, %v576_v2  ;;  %v726_v32 = vsel %vm438_vm13, %v294_v43, %v582_v47  ;;  %v1236_v5 = vshll.u32 %v9451_v23, 16 }
  0x9e   :  { %v9740_v38 = vpop.permute.xlu0 %961  ;;  %v9781_v31 = vpack.c.bf16 %v722_v42, %v721_v55  ;;  %v1245_v2 = vrot.slane %v1243_v14, 1  ;;  %vm13450_vm1 = vcmask 64512   ;;  %vm1921_vm2 = vcmask 97280  }
  0x9f   :  { %13537 = vst [vmem:[#allocation70_spill] sm:$0xff] %v9740_v38  ;;  %1215 = vrot.lane.b32.xlu1 %v9723_v8, %s8881_s19  ;;  %v575_v38 = vmul.f32 0.2, %v287_v27  ;;  %vm13449_vm3 = vcmask 130048   ;;  %vm1987_vm4 = vcmask 162816   ;;  %vm13452_vm13 = vcmask 195584  }
  0xa0   :  { %v9757_v49 = vpop.permute.xlu1 %967  ;;  %13544 = vst [vmem:[#allocation77_spill] sm:$0xff] %v9781_v31 }
  0xa1   :  { %13540 = vst [vmem:[#allocation73_spill] sm:$0xff] %v9757_v49  ;;  %1213 = vrot.lane.b32.xlu0 %v9728_v56, %s8881_s19  ;;  %v719_v52 = vsel %vm431_vm10, %v287_v27, %v575_v38  ;;  %v9795_v38 = vpack.c.bf16 %v726_v32, %v725_v0  ;;  %v1241_v27 = vshrl.u32 %v9431_v60, 16  ;;  %v1238_v0 = vrot.slane %v1236_v5, 1 }
  0xa2   :  { %v9793_v42 = vpack.c.bf16 %v720_v62, %v719_v52  ;;  %v1234_v62 = vshrl.u32 %v9451_v23, 16  ;;  %v1250_v32 = vshll.u32 %v9483_v17, 16  ;;  %v1248_v23 = vshrl.u32 %v9483_v17, 16 }
  0xa3   :  { %1219 = vrot.lane.b32.xlu1 %v9747_v19, %s8881_s19  ;;  %v9769_v49 = vpop.permute.xlu0 %965  ;;  %v580_v19 = vmul.f32 0.2, %v292_v25  ;;  %13546 = vst [vmem:[#allocation79_spill] sm:$0xff] %v9795_v38 }
  0xa4   :  { %13542 = vst [vmem:[#allocation75_spill] sm:$0xff] %v9769_v49  ;;  %v579_v49 = vmul.f32 0.2, %v291_v45  ;;  %13545 = vst [vmem:[#allocation78_spill] sm:$0xff] %v9793_v42  ;;  %v1252_v5 = vrot.slane %v1250_v32, 1  ;;  %v1262_v32 = vshrl.u32 %v9489_v53, 16 }
  0xa5   :  { %1217 = vrot.lane.b32.xlu0 %v9755_v7, %s8881_s19  ;;  %v9784_v37 = vpop.permute.xlu1 %971  ;;  %v724_v43 = vsel %vm436_vm15, %v292_v25, %v580_v19  ;;  %v9814_v19 = vor.u32 %v1245_v2, %v1241_v27  ;;  %v1271_v25 = vshll.u32 %v9487_v46, 16  ;;  %v1269_v2 = vshrl.u32 %v9487_v46, 16 }
  0xa6   :  { %v723_v33 = vsel %vm435_vm14, %v291_v45, %v579_v49  ;;  %v1255_v49 = vshrl.u32 %v9453_v15, 16  ;;  %v1259_v45 = vrot.slane %v1257_v1, 1  ;;  %v1380_v7 = vshll.u32 %v9656_v51, 16 }
  0xa7   :  { %1223 = vrot.lane.b32.xlu1 %v9762_v12, %s8881_s19  ;;  %v9806_v47 = vpack.c.bf16 %v724_v43, %v723_v33  ;;  %v1239_v33 = vor.u32 %v1238_v0, %v1234_v62  ;;  %v1264_v43 = vshll.u32 %v9489_v53, 16  ;;  %v1273_v1 = vrot.slane %v1271_v25, 1 }
  0xa8   :  { %v9826_v27 = vor.u32 %v1259_v45, %v1255_v49  ;;  %v9833_v62 = vor.u32 %v1252_v5, %v1248_v23  ;;  %v1283_v45 = vshrl.u32 %v9509_v4, 16  ;;  %v1276_v5 = vshrl.u32 %v9522_v30, 16 }
  0xa9   :  { %v9789_v24 = vpop.permute.xlu0 %969  ;;  %1221 = vrot.lane.b32.xlu0 %v9777_v21, %s8881_s19  ;;  %13547 = vst [vmem:[#allocation80_spill] sm:$0xff] %v9806_v47  ;;  %v9841_v49 = vor.u32 %v1273_v1, %v1269_v2  ;;  %v1299_v21 = vshll.u32 %v9524_v26, 16  ;;  %v1292_v12 = vshll.u32 %v9552_v22, 16  ;;  %vm2053_vm14 = vcmask 228352  }
  0xaa   :  { %vm13453_vm15 = vcmask 261120  }
  0xab   :  { %1227 = vrot.lane.b32.xlu1 %v9781_v31, %s8881_s19  ;;  %v9801_v55 = vpop.permute.xlu1 %975  ;;  %13548 = vst [vmem:[#allocation81_spill] sm:$0xff] %v9841_v49  ;;  %v1301_v1 = vrot.slane %v1299_v21, 1 }
  0xad   :  { %1225 = vrot.lane.b32.xlu0 %v9793_v42, %s8881_s19  ;;  %v9808_v52 = vpop.permute.xlu0 %973  ;;  %v1278_v42 = vshll.u32 %v9522_v30, 16  ;;  %v1306_v30 = vshll.u32 %v9578_v44, 16 }
  0xaf   :  { %1231 = vrot.lane.b32.xlu1 %v9795_v38, %s8881_s19  ;;  %v1285_v38 = vshll.u32 %v9509_v4, 16 }
  0xb1   :  { %v9818_v14 = vpop.permute.xlu1 %979  ;;  %1229 = vrot.lane.b32.xlu0 %v9806_v47, %s8881_s19  ;;  %v1266_v47 = vrot.slane %v1264_v43, 1  ;;  %v1287_v25 = vrot.slane %v1285_v38, 1  ;;  %v1280_v43 = vrot.slane %v1278_v42, 1  ;;  %v1297_v38 = vshrl.u32 %v9524_v26, 16  ;;  %s8883_s19 = smov 28  }
  0xb2   :  { %v1290_v42 = vshrl.u32 %v9552_v22, 16  ;;  %v1394_v26 = vshll.u32 %v9687_v16, 16 }
  0xb3   :  { %1347 = vrot.lane.b32.xlu1 %v9814_v19, %s8882_s28  ;;  %v9849_v23 = vor.u32 %v1266_v47, %v1262_v32  ;;  %v9855_v2 = vor.u32 %v1287_v25, %v1283_v45  ;;  %v9863_v47 = vor.u32 %v1280_v43, %v1276_v5  ;;  %v1294_v32 = vrot.slane %v1292_v12, 1 }
  0xb4   :  { %v9830_v31 = vpop.permute.xlu0 %977  ;;  %v9871_v21 = vor.u32 %v1301_v1, %v1297_v38  ;;  %v1378_v45 = vshrl.u32 %v9656_v51, 16  ;;  %v1382_v25 = vrot.slane %v1380_v7, 1  ;;  %v1304_v12 = vshrl.u32 %v9578_v44, 16 }
  0xb5   :  { %1345 = vrot.lane.b32.xlu0 %v1239_v33, %s8882_s28  ;;  %v9835_v0 = vpop.permute.xlu1 %983  ;;  %13549 = vst [vmem:[#allocation82_spill] sm:$0xff] %v9855_v2  ;;  %13550 = vst [vmem:[#allocation83_spill] sm:$0xff] %v9863_v47  ;;  %v1295_v22 = vor.u32 %v1294_v32, %v1290_v42  ;;  %v1308_v5 = vrot.slane %v1306_v30, 1  ;;  %v1387_v43 = vshll.u32 %v9640_v63, 16  ;;  %v1392_v51 = vshrl.u32 %v9687_v16, 16 }
  0xb6   :  { %13551 = vst [vmem:[#allocation84_spill] sm:$0xff] %v9871_v21  ;;  %v1383_v38 = vor.u32 %v1382_v25, %v1378_v45  ;;  %v1396_v7 = vrot.slane %v1394_v26, 1  ;;  %v1385_v42 = vshrl.u32 %v9640_v63, 16  ;;  %v1401_v32 = vshll.u32 %v9658_v54, 16 }
  0xb7   :  { %1351 = vrot.lane.b32.xlu1 %v9826_v27, %s8882_s28  ;;  %v1389_v30 = vrot.slane %v1387_v43, 1 }
  0xb8   :  { %v9894_v45 = vor.u32 %v1396_v7, %v1392_v51 }
  0xb9   :  { %v9845_v33 = vpop.permute.xlu0 %981  ;;  %1349 = vrot.lane.b32.xlu0 %v9833_v62, %s8882_s28 }
  0xbb   :  { %1355 = vrot.lane.b32.xlu1 %v9841_v49, %s8882_s28 }
  0xbc   :  { %v9859_v4 = vpop.permute.xlu1 %987 }
  0xbd   :  { %1353 = vrot.lane.b32.xlu0 %v9849_v23, %s8882_s28 }
  0xbf   :  { %v9867_v49 = vpop.permute.xlu0 %985  ;;  %1359 = vrot.lane.b32.xlu1 %v9855_v2, %s8882_s28 }
  0xc1   :  { %v9875_v46 = vpop.permute.xlu1 %991  ;;  %1357 = vrot.lane.b32.xlu0 %v9863_v47, %s8882_s28  ;;  %v9889_v47 = vor.u32 %v1308_v5, %v1304_v12  ;;  %v1399_v12 = vshrl.u32 %v9658_v54, 16  ;;  %v1403_v5 = vrot.slane %v1401_v32, 1 }
  0xc3   :  { %1363 = vrot.lane.b32.xlu1 %v9871_v21, %s8882_s28  ;;  %v9884_v1 = vpop.permute.xlu0 %989  ;;  %13552 = vst [vmem:[#allocation85_spill] sm:$0xff] %v9889_v47  ;;  %v9913_v51 = vor.u32 %v1403_v5, %v1399_v12 }
  0xc5   :  { %v9886_v2 = vpop.permute.xlu1 %1107  ;;  %1361 = vrot.lane.b32.xlu0 %v1295_v22, %s8882_s28  ;;  %v9902_v22 = vor.u32 %v1389_v30, %v1385_v42 }
  0xc7   :  { %1489 = vrot.lane.b32.xlu1 %v1383_v38, %s8883_s19  ;;  %v9896_v25 = vpop.permute.xlu0 %1105 }
  0xc9   :  { %v9898_v26 = vpop.permute.xlu1 %1111  ;;  %1365 = vrot.lane.b32.xlu0 %v9889_v47, %s8882_s28 }
  0xca   :  { %13553 = vst [vmem:[#allocation86_spill] sm:$0xff] %v9898_v26 }
  0xcb   :  { %1493 = vrot.lane.b32.xlu1 %v9894_v45, %s8883_s19  ;;  %v9907_v43 = vpop.permute.xlu0 %1109 }
  0xcc   :  { %13554 = vst [vmem:[#allocation87_spill] sm:$0xff] %v9907_v43 }
  0xcd   :  { %v9909_v38 = vpop.permute.xlu1 %1115  ;;  %1491 = vrot.lane.b32.xlu0 %v9902_v22, %s8883_s19 }
  0xcf   :  { %1537 = vrot.lane.b32.xlu1 %v9104_v6, %s8884_s30  ;;  %v9917_v7 = vpop.permute.xlu0 %1113 }
  0xd1   :  { %v9919_v42 = vpop.permute.xlu1 %1119  ;;  %1495 = vrot.lane.b32.xlu0 %v9913_v51, %s8883_s19 }
  0xd3   :  { %1541 = vrot.lane.b32.xlu1 %v9122_v28, %s8884_s30  ;;  %v9925_v30 = vpop.permute.xlu0 %1117  ;;  %v1422_v28 = vshll.u32 %v9728_v56, 16 }
  0xd5   :  { %v9927_v32 = vpop.permute.xlu1 %1123  ;;  %1539 = vrot.lane.b32.xlu0 %v9135_v40, %s8884_s30  ;;  %v8600_v40 = vld [vmem:[%s13356_s1 + $0x18] sm:$0xff]  }
  0xd6   :  { %8476 = vmatprep.subr.bf16.mxu0 %v8600_v40 }
  0xd7   :  { %1571 = vrot.lane.b32.xlu1 %v8971_v34, %s8885_s5  ;;  %v9933_v12 = vpop.permute.xlu0 %1121  ;;  %8477 = vmatpush3.bf16.msra.mxu0 %v8600_v40 }
  0xd9   :  { %v9935_v5 = vpop.permute.xlu1 %1127  ;;  %1543 = vrot.lane.b32.xlu0 %v9168_v11, %s8884_s30 }
  0xdb   :  { %1575 = vrot.lane.b32.xlu1 %v8962_v29, %s8885_s5  ;;  %v9941_v21 = vpop.permute.xlu0 %1125 }
  0xdd   :  { %v9943_v47 = vpop.permute.xlu1 %1131  ;;  %1573 = vrot.lane.b32.xlu0 %v8939_v13, %s8885_s5 }
  0xdf   :  { %1617 = vrot.lane.b32.xlu1 %v9131_v36, %s8886_s6  ;;  %v9949_v34 = vpop.permute.xlu0 %1129 }
  0xe1   :  { %v9951_v43 = vpop.permute.xlu1 %1135  ;;  %1577 = vrot.lane.b32.xlu0 %v8994_v50, %s8885_s5 }
  0xe3   :  { %1621 = vrot.lane.b32.xlu1 %v9150_v58, %s8886_s6  ;;  %v9957_v29 = vpop.permute.xlu0 %1133 }
  0xe5   :  { %v9959_v26 = vpop.permute.xlu1 %1155  ;;  %1619 = vrot.lane.b32.xlu0 %v9166_v10, %s8886_s6 }
  0xe6   :  { %13555 = vst [vmem:[#allocation88_spill] sm:$0xff] %v9959_v26 }
  0xe7   :  { %1663 = vrot.lane.b32.xlu1 %v9317_v3, %s8887_s8  ;;  %v9965_v13 = vpop.permute.xlu0 %1153 }
  0xe8   :  { %13556 = vst [vmem:[#allocation89_spill] sm:$0xff] %v9965_v13  ;;  %v1424_v13 = vrot.slane %v1422_v28, 1  ;;  %v8602_v28 = vld [vmem:[%s13356_s1 + $0x8] sm:$0xff]  }
  0xe9   :  { %v9967_v36 = vpop.permute.xlu1 %1159  ;;  %1623 = vrot.lane.b32.xlu0 %v9200_v48, %s8886_s6 }
  0xea   :  { %13557 = vst [vmem:[#allocation90_spill] sm:$0xff] %v9967_v36 }
  0xeb   :  { %1667 = vrot.lane.b32.xlu1 %v9329_v35, %s8887_s8  ;;  %v9973_v50 = vpop.permute.xlu0 %1157 }
  0xec   :  { %13558 = vst [vmem:[#allocation91_spill] sm:$0xff] %v9973_v50 }
  0xed   :  { %v9975_v58 = vpop.permute.xlu1 %1163  ;;  %1665 = vrot.lane.b32.xlu0 %v9334_v39, %s8887_s8  ;;  %v1408_v39 = vshll.u32 %v9716_v41, 16 }
  0xef   :  { %1697 = vrot.lane.b32.xlu1 %v9431_v60, %s8888_s9  ;;  %v9981_v10 = vpop.permute.xlu0 %1161 }
  0xf1   :  { %v9983_v3 = vpop.permute.xlu1 %1167  ;;  %1669 = vrot.lane.b32.xlu0 %v9346_v9, %s8887_s8  ;;  %v1406_v9 = vshrl.u32 %v9716_v41, 16 }
  0xf3   :  { %1701 = vrot.lane.b32.xlu1 %v9453_v15, %s8888_s9  ;;  %v9989_v48 = vpop.permute.xlu0 %1165  ;;  %v1410_v15 = vrot.slane %v1408_v39, 1  ;;  %v1413_v39 = vshrl.u32 %v9689_v57, 16 }
  0xf5   :  { %v9991_v35 = vpop.permute.xlu1 %1171  ;;  %1699 = vrot.lane.b32.xlu0 %v9483_v17, %s8888_s9 }
  0xf7   :  { %1731 = vrot.lane.b32.xlu1 %v9640_v63, %s8889_s10  ;;  %v9998_v60 = vpop.permute.xlu0 %1169  ;;  %v1415_v63 = vshll.u32 %v9689_v57, 16 }
  0xf9   :  { %v10000_v50 = vpop.permute.xlu1 %1175  ;;  %1703 = vrot.lane.b32.xlu0 %v9489_v53, %s8888_s9  ;;  %v10016_v53 = vor.u32 %v1410_v15, %v1406_v9 }
  0xfb   :  { %1735 = vrot.lane.b32.xlu1 %v9658_v54, %s8889_s10  ;;  %v10007_v17 = vpop.permute.xlu0 %1173 }
  0xfd   :  { %v10009_v36 = vpop.permute.xlu1 %1179  ;;  %1733 = vrot.lane.b32.xlu0 %v9687_v16, %s8889_s10  ;;  %v1417_v16 = vrot.slane %v1415_v63, 1  ;;  %v1420_v63 = vshrl.u32 %v9728_v56, 16 }
  0xff   :  { %1777 = vrot.lane.b32.xlu1 %v9814_v19, %s8890_s11  ;;  %v10018_v44 = vpop.permute.xlu0 %1177  ;;  %v10037_v15 = vor.u32 %v1417_v16, %v1413_v39  ;;  %v10062_v16 = vor.u32 %v1424_v13, %v1420_v63 }
 0x101   :  { %v10020_v54 = vpop.permute.xlu1 %1183  ;;  %1737 = vrot.lane.b32.xlu0 %v9716_v41, %s8889_s10  ;;  %v8601_v41 = vld [vmem:[%s13356_s1 + $0x10] sm:$0xff]  }
 0x102   :  { %8478 = vmatprep.subr.bf16.mxu0 %v8601_v41 }
 0x103   :  { %1497 = vrot.lane.b32.xlu1 %v10016_v53, %s8883_s19  ;;  %v10031_v19 = vpop.permute.xlu0 %1181  ;;  %8479 = vmatpush3.bf16.msra.mxu0 %v8601_v41 }
 0x104   :  { %8480 = vmatprep.subr.bf16.mxu0 %v8602_v28 }
 0x105   :  { %v10033_v9 = vpop.permute.xlu1 %1203  ;;  %1779 = vrot.lane.b32.xlu0 %v9833_v62, %s8890_s11  ;;  %v1867_v62 = vsel %vm13448_vm0, %v9152_v59, %v9558_v61 }
 0x106   :  { %v1900_v39 = vsel %vm13450_vm1, %v1867_v62, %v9784_v37  ;;  %v13560_v37 = vld [vmem:[#allocation16_spill] sm:$0xff] }
 0x107   :  { %1781 = vrot.lane.b32.xlu1 %v9826_v27, %s8890_s11  ;;  %v10045_v26 = vpop.permute.xlu0 %1201  ;;  %v1429_v27 = vshll.u32 %v9723_v8, 16  ;;  %v1933_v61 = vsel %vm1921_vm2, %v1900_v39, %v9909_v38  ;;  %v1871_v62 = vsel %vm13448_vm0, %v13560_v37, %v9580_v18  ;;  %8481 = vmatpush3.bf16.msra.mxu0 %v8602_v28  ;;  %v8603_v18 = vld [vmem:[%s13356_s1] sm:$0xff]   ;;  %v13563_v39 = vld [vmem:[#allocation18_spill] sm:$0xff] }
 0x108   :  { %8482 = vmatprep.subr.bf16.mxu0 %v8603_v18 }
 0x109   :  { %v10047_v40 = vpop.permute.xlu1 %1207  ;;  %1499 = vrot.lane.b32.xlu0 %v10037_v15, %s8883_s19 }
 0x10a   :  { %13559 = vst [vmem:[#allocation92_spill] sm:$0xff] %v10047_v40  ;;  %v1865_v40 = vsel %vm13448_vm0, %v9168_v11, %v9568_v20  ;;  %v1427_v11 = vshrl.u32 %v9723_v8, 16  ;;  %v1431_v20 = vrot.slane %v1429_v27, 1  ;;  %v13562_v27 = vld [vmem:[#allocation58_spill] sm:$0xff] }
 0x10b   :  { %1823 = vrot.lane.b32.xlu1 %v9902_v22, %s8891_s20  ;;  %v10066_v41 = vpop.permute.xlu0 %1205  ;;  %v1966_v22 = vsel %vm13449_vm3, %v1933_v61, %v9975_v58  ;;  %v1898_v38 = vsel %vm13450_vm1, %v1865_v40, %v9789_v24  ;;  %v1904_v58 = vsel %vm13450_vm1, %v1871_v62, %v9801_v55  ;;  %v1869_v61 = vsel %vm13448_vm0, %v13563_v39, %v13562_v27 }
 0x10c   :  { %v1931_v28 = vsel %vm1921_vm2, %v1898_v38, %v9917_v7  ;;  %v1937_v24 = vsel %vm1921_vm2, %v1904_v58, %v9919_v42  ;;  %8483 = vmatpush3.bf16.msra.mxu0 %v8603_v18  ;;  %v10115_v58 = vor.u32 %v1431_v20, %v1427_v11  ;;  %v169_v11 = vld [vmem:[%s13355_s0 + $0x80] sm:$0xff]  ;;  %v13568_v20 = vld [vmem:[#allocation62_spill] sm:$0xff] }
 0x10d   :  { %v1212_v13 = vpop.permute.xlu1 %1211  ;;  %1783 = vrot.lane.b32.xlu0 %v9849_v23, %s8890_s11  ;;  %v1964_v23 = vsel %vm13449_vm3, %v1931_v28, %v9981_v10  ;;  %v1970_v55 = vsel %vm13449_vm3, %v1937_v24, %v9983_v3  ;;  %v1902_v10 = vsel %vm13450_vm1, %v1869_v61, %v9808_v52  ;;  %vm313_vm5 = vcmp.ge.f32.partialorder %v169_v11, 0.0 }
 0x10e   :  { %v10081_v63 = vsel %vm1987_vm4, %v1966_v22, %v1212_v13  ;;  %v13565_v22 = vld [vmem:[#allocation59_spill] sm:$0xff]  ;;  %v13566_v13 = vld [vmem:[#allocation20_spill] sm:$0xff]  ;;  %v1935_v18 = vsel %vm1921_vm2, %v1902_v10, %v9925_v30  ;;  %v13569_v30 = vld [vmem:[#allocation22_spill] sm:$0xff] }
 0x10f   :  { %13561 = vst [vmem:[#allocation16_spill] sm:$0xff] %v10081_v63  ;;  %1501 = vrot.lane.b32.xlu1 %v10062_v16, %s8883_s19  ;;  %v1210_v40 = vpop.permute.xlu0 %1209  ;;  %v1875_v42 = vsel %vm13448_vm0, %v13566_v13, %v13565_v22  ;;  %v1873_v24 = vsel %vm13448_vm0, %v13569_v30, %v13568_v20  ;;  %v457_v22 = vmul.f32 0.2, %v169_v11  ;;  %v13578_v20 = vld [vmem:[#allocation27_spill] sm:$0xff] }
 0x110   :  { %v10103_v7 = vsel %vm1987_vm4, %v1964_v23, %v1210_v40  ;;  %v1908_v3 = vsel %vm13450_vm1, %v1875_v42, %v9818_v14  ;;  %v170_v14 = vld [vmem:[%s13355_s0 + $0x88] sm:$0x1]  ;;  %v13571_v23 = vld [vmem:[#allocation63_spill] sm:$0xff]  ;;  %v1906_v61 = vsel %vm13450_vm1, %v1873_v24, %v9830_v31 }
 0x111   :  { %13564 = vst [vmem:[#allocation58_spill] sm:$0xff] %v10103_v7  ;;  %v1216_v62 = vpop.permute.xlu1 %1215  ;;  %1825 = vrot.lane.b32.xlu0 %v9894_v45, %s8891_s20  ;;  %v1941_v52 = vsel %vm1921_vm2, %v1908_v3, %v9927_v32  ;;  %v1968_v45 = vsel %vm13449_vm3, %v1935_v18, %v9989_v48  ;;  %v13572_v40 = vld [vmem:[#allocation23_spill] sm:$0xff]  ;;  %v458_v42 = vmul.f32 0.2, %v170_v14  ;;  %vm314_vm6 = vcmp.ge.f32.partialorder %v170_v14, 0.0  ;;  %v13574_v18 = vld [vmem:[#allocation64_spill] sm:$0xff] }
 0x112   :  { %v10113_v38 = vsel %vm1987_vm4, %v1970_v55, %v1216_v62  ;;  %v1879_v27 = vsel %vm13448_vm0, %v13572_v40, %v13571_v23  ;;  %v1939_v62 = vsel %vm1921_vm2, %v1906_v61, %v9933_v12  ;;  %v13581_v61 = vld [vmem:[#allocation29_spill] sm:$0xff]  ;;  %v13629_v7 = vld [vmem:[#allocation70_spill] sm:$0xff] }
 0x113   :  { %13567 = vst [vmem:[#allocation18_spill] sm:$0xff] %v10113_v38  ;;  %1545 = vrot.lane.b32.xlu1 %v9152_v59, %s8884_s30  ;;  %v1214_v28 = vpop.permute.xlu0 %1213  ;;  %v1974_v59 = vsel %vm13449_vm3, %v1941_v52, %v9991_v35  ;;  %v1912_v35 = vsel %vm13450_vm1, %v1879_v27, %v9835_v0  ;;  %v1972_v10 = vsel %vm13449_vm3, %v1939_v62, %v9998_v60  ;;  %v13575_v52 = vld [vmem:[#allocation25_spill] sm:$0xff] }
 0x114   :  { %v10139_v32 = vsel %vm1987_vm4, %v1968_v45, %v1214_v28  ;;  %v1945_v31 = vsel %vm1921_vm2, %v1912_v35, %v9935_v5  ;;  %v1877_v0 = vsel %vm13448_vm0, %v13575_v52, %v13574_v18  ;;  %v13577_v28 = vld [vmem:[#allocation65_spill] sm:$0xff]  ;;  %v13584_v35 = vld [vmem:[#allocation30_spill] sm:$0xff] }
 0x115   :  { %13570 = vst [vmem:[#allocation59_spill] sm:$0xff] %v10139_v32  ;;  %v1220_v48 = vpop.permute.xlu1 %1219  ;;  %1503 = vrot.lane.b32.xlu0 %v10115_v58, %s8883_s19  ;;  %v1978_v12 = vsel %vm13449_vm3, %v1945_v31, %v10000_v50  ;;  %v1883_v5 = vsel %vm13448_vm0, %v13578_v20, %v13577_v28  ;;  %v1910_v60 = vsel %vm13450_vm1, %v1877_v0, %v9845_v33  ;;  %v187_v27 = vld [vmem:[%s13355_s0 + $0x110] sm:$0xff]  ;;  %v13588_v28 = vld [vmem:[#allocation32_spill] sm:$0xff] }
 0x116   :  { %v10149_v55 = vsel %vm1987_vm4, %v1974_v59, %v1220_v48  ;;  %v1916_v50 = vsel %vm13450_vm1, %v1883_v5, %v9859_v4  ;;  %v1943_v24 = vsel %vm1921_vm2, %v1910_v60, %v9941_v21  ;;  %v601_v59 = vsel %vm313_vm5, %v169_v11, %v457_v22  ;;  %v188_v4 = vld [vmem:[%s13355_s0 + $0x118] sm:$0x1]  ;;  %v13624_v32 = vld [vmem:[#allocation49_spill] sm:$0xff] }
 0x117   :  { %13573 = vst [vmem:[#allocation20_spill] sm:$0xff] %v10149_v55  ;;  %1827 = vrot.lane.b32.xlu1 %v9913_v51, %s8891_s20  ;;  %v1218_v3 = vpop.permute.xlu0 %1217  ;;  %v602_v48 = vsel %vm314_vm6, %v170_v14, %v458_v42  ;;  %v1949_v33 = vsel %vm1921_vm2, %v1916_v50, %v9943_v47  ;;  %v13580_v21 = vld [vmem:[#allocation66_spill] sm:$0xff]  ;;  %v13583_v14 = vld [vmem:[#allocation67_spill] sm:$0xff]  ;;  %v475_v18 = vmul.f32 0.2, %v187_v27  ;;  %vm331_vm7 = vcmp.ge.f32.partialorder %v187_v27, 0.0 }
 0x118   :  { %v10167_v51 = vsel %vm1987_vm4, %v1972_v10, %v1218_v3  ;;  %v1982_v11 = vsel %vm13449_vm3, %v1949_v33, %v10009_v36  ;;  %v1887_v62 = vsel %vm13448_vm0, %v13584_v35, %v13583_v14  ;;  %v737_v31 = vpack.c.bf16 %v602_v48, %v601_v59  ;;  %v13586_v3 = vld [vmem:[#allocation3_spill] sm:$0xff] }
 0x119   :  { %13576 = vst [vmem:[#allocation62_spill] sm:$0xff] %v10167_v51  ;;  %v1224_v45 = vpop.permute.xlu1 %1223  ;;  %1547 = vrot.lane.b32.xlu0 %v13563_v39, %s8884_s30  ;;  %v1976_v39 = vsel %vm13449_vm3, %v1943_v24, %v10007_v17  ;;  %v1920_v36 = vsel %vm13450_vm1, %v1887_v62, %v9875_v46  ;;  %v476_v0 = vmul.f32 0.2, %v188_v4  ;;  %vm332_vm8 = vcmp.ge.f32.partialorder %v188_v4, 0.0  ;;  %v13591_v24 = vld [vmem:[#allocation4_spill] sm:$0xff] }
 0x11a   :  { %v10177_v30 = vsel %vm1987_vm4, %v1978_v12, %v1224_v45  ;;  %v13587_v45 = vld [vmem:[#allocation68_spill] sm:$0xff]  ;;  %v619_v59 = vsel %vm331_vm7, %v187_v27, %v475_v18  ;;  %vm2119_vm5 = vcmask 293888   ;;  %vm13451_vm6 = vcmask 326656  }
 0x11b   :  { %13579 = vst [vmem:[#allocation22_spill] sm:$0xff] %v10177_v30  ;;  %1549 = vrot.lane.b32.xlu1 %v13560_v37, %s8884_s30  ;;  %v1222_v23 = vpop.permute.xlu0 %1221  ;;  %v1881_v37 = vsel %vm13448_vm0, %v13581_v61, %v13580_v21  ;;  %v1885_v46 = vsel %vm13448_vm0, %v13588_v28, %v13587_v45  ;;  %v205_v45 = vld [vmem:[%s13355_s0 + $0x1a0] sm:$0xff]  ;;  %vm2185_vm7 = vcmask 359424  }
 0x11c   :  { %v10201_v47 = vsel %vm1987_vm4, %v1976_v39, %v1222_v23  ;;  %v1914_v22 = vsel %vm13450_vm1, %v1881_v37, %v9867_v49  ;;  %v1953_v49 = vsel %vm1921_vm2, %v1920_v36, %v9951_v43  ;;  %v1918_v43 = vsel %vm13450_vm1, %v1885_v46, %v9884_v1  ;;  %v13593_v23 = vld [vmem:[#allocation5_spill] sm:$0xff]  ;;  %v206_v46 = vld [vmem:[%s13355_s0 + $0x1a8] sm:$0x1] }
 0x11d   :  { %13582 = vst [vmem:[#allocation63_spill] sm:$0xff] %v10201_v47  ;;  %v1228_v17 = vpop.permute.xlu1 %1227  ;;  %1829 = vrot.lane.b32.xlu0 %v10016_v53, %s8891_s20  ;;  %v1947_v10 = vsel %vm1921_vm2, %v1914_v22, %v9949_v34  ;;  %v1986_v34 = vsel %vm13449_vm3, %v1953_v49, %v10020_v54  ;;  %v1951_v50 = vsel %vm1921_vm2, %v1918_v43, %v9957_v29  ;;  %v1606_v37 = vshll.u32 %v737_v31, 16  ;;  %v13594_v29 = vld [vmem:[#allocation17_spill] sm:$0xff] }
 0x11e   :  { %v10211_v42 = vsel %vm1987_vm4, %v1982_v11, %v1228_v17  ;;  %v1980_v53 = vsel %vm13449_vm3, %v1947_v10, %v10018_v44  ;;  %v620_v54 = vsel %vm332_vm8, %v188_v4, %v476_v0  ;;  %v1984_v48 = vsel %vm13449_vm3, %v1951_v50, %v10031_v19  ;;  %v13595_v17 = vld [vmem:[#allocation19_spill] sm:$0xff]  ;;  %v13596_v22 = vld [vmem:[#allocation21_spill] sm:$0xff]  ;;  %v13604_v50 = vld [vmem:[#allocation46_spill] sm:$0xff] }
 0x11f   :  { %13585 = vst [vmem:[#allocation23_spill] sm:$0xff] %v10211_v42  ;;  %1579 = vrot.lane.b32.xlu1 %v13586_v3, %s8885_s5  ;;  %v1226_v12 = vpop.permute.xlu0 %1225  ;;  %v746_v21 = vpack.c.bf16 %v620_v54, %v619_v59  ;;  %v1604_v19 = vshrl.u32 %v737_v31, 16  ;;  %v1608_v4 = vrot.slane %v1606_v37, 1  ;;  %v13597_v3 = vld [vmem:[#allocation36_spill] sm:$0xff]  ;;  %v494_v59 = vmul.f32 0.2, %v206_v46 }
 0x120   :  { %v10229_v5 = vsel %vm1987_vm4, %v1980_v53, %v1226_v12  ;;  %v13600_v53 = vld [vmem:[#allocation37_spill] sm:$0xff]  ;;  %vm349_vm9 = vcmp.ge.f32.partialorder %v205_v45, 0.0  ;;  %vm350_vm10 = vcmp.ge.f32.partialorder %v206_v46, 0.0  ;;  %vm2218_vm8 = vcmask 392192  }
 0x121   :  { %13589 = vst [vmem:[#allocation64_spill] sm:$0xff] %v10229_v5  ;;  %v1232_v60 = vpop.permute.xlu1 %1231  ;;  %1551 = vrot.lane.b32.xlu0 %v737_v31, %s8884_s30  ;;  %v1609_v36 = vor.u32 %v1608_v4, %v1604_v19  ;;  %v1652_v10 = vshll.u32 %v746_v21, 16  ;;  %v1650_v31 = vshrl.u32 %v746_v21, 16  ;;  %v223_v37 = vld [vmem:[%s13355_s0 + $0x230] sm:$0xff]  ;;  %v224_v19 = vld [vmem:[%s13355_s0 + $0x238] sm:$0x1] }
 0x122   :  { %v10235_v44 = vsel %vm1987_vm4, %v1986_v34, %v1232_v60  ;;  %v13603_v60 = vld [vmem:[#allocation38_spill] sm:$0xff]  ;;  %vm367_vm11 = vcmp.ge.f32.partialorder %v223_v37, 0.0  ;;  %vm368_vm12 = vcmp.ge.f32.partialorder %v224_v19, 0.0 }
 0x123   :  { %13590 = vst [vmem:[#allocation25_spill] sm:$0xff] %v10235_v44  ;;  %1583 = vrot.lane.b32.xlu1 %v13591_v24, %s8885_s5  ;;  %v1230_v33 = vpop.permute.xlu0 %1229  ;;  %v1654_v49 = vrot.slane %v1652_v10, 1  ;;  %v493_v24 = vmul.f32 0.2, %v205_v45  ;;  %v512_v10 = vmul.f32 0.2, %v224_v19 }
 0x124   :  { %v10244_v39 = vsel %vm1987_vm4, %v1984_v48, %v1230_v33  ;;  %v13606_v33 = vld [vmem:[#allocation48_spill] sm:$0xff] }
 0x125   :  { %13592 = vst [vmem:[#allocation65_spill] sm:$0xff] %v10244_v39  ;;  %v10246_v1 = vpop.permute.xlu1 %1347  ;;  %1581 = vrot.lane.b32.xlu0 %v13593_v23, %s8885_s5  ;;  %v1655_v43 = vor.u32 %v1654_v49, %v1650_v31  ;;  %v637_v23 = vsel %vm349_vm9, %v205_v45, %v493_v24  ;;  %vm2251_vm9 = vcmask 424960  }
 0x127   :  { %1625 = vrot.lane.b32.xlu1 %v13594_v29, %s8886_s6  ;;  %v10252_v11 = vpop.permute.xlu0 %1345 }
 0x129   :  { %v10254_v27 = vpop.permute.xlu1 %1351  ;;  %1585 = vrot.lane.b32.xlu0 %v746_v21, %s8885_s5  ;;  %v638_v21 = vsel %vm350_vm10, %v206_v46, %v494_v59  ;;  %v656_v46 = vsel %vm368_vm12, %v224_v19, %v512_v10  ;;  %vm2284_vm10 = vcmask 457728   ;;  %vm2422_vm12 = vcmask 523264  }
 0x12b   :  { %1629 = vrot.lane.b32.xlu1 %v13595_v17, %s8886_s6  ;;  %v10259_v14 = vpop.permute.xlu0 %1349  ;;  %v13608_v17 = vld [vmem:[#allocation50_spill] sm:$0xff] }
 0x12d   :  { %v10261_v62 = vpop.permute.xlu1 %1355  ;;  %1627 = vrot.lane.b32.xlu0 %v13596_v22, %s8886_s6  ;;  %v755_v22 = vpack.c.bf16 %v638_v21, %v637_v23 }
 0x12f   :  { %1671 = vrot.lane.b32.xlu1 %v13597_v3, %s8887_s8  ;;  %v10267_v18 = vpop.permute.xlu0 %1353  ;;  %v13609_v3 = vld [vmem:[#allocation54_spill] sm:$0xff] }
 0x130   :  { %13598 = vst [vmem:[#allocation27_spill] sm:$0xff] %v10267_v18  ;;  %v1313_v31 = vshll.u32 %v13609_v3, 16 }
 0x131   :  { %v10269_v0 = vpop.permute.xlu1 %1359  ;;  %1631 = vrot.lane.b32.xlu0 %v1609_v36, %s8886_s6  ;;  %v511_v36 = vmul.f32 0.2, %v223_v37 }
 0x132   :  { %13599 = vst [vmem:[#allocation66_spill] sm:$0xff] %v10269_v0  ;;  %v13628_v0 = vld [vmem:[#allocation69_spill] sm:$0xff] }
 0x133   :  { %1675 = vrot.lane.b32.xlu1 %v13600_v53, %s8887_s8  ;;  %v10274_v12 = vpop.permute.xlu0 %1357  ;;  %v655_v45 = vsel %vm367_vm11, %v223_v37, %v511_v36  ;;  %v13612_v37 = vld [vmem:[#allocation81_spill] sm:$0xff]  ;;  %v1766_v36 = vshll.u32 %v755_v22, 16  ;;  %vm2317_vm11 = vcmask 490496  }
 0x134   :  { %13601 = vst [vmem:[#allocation29_spill] sm:$0xff] %v10274_v12  ;;  %v764_v21 = vpack.c.bf16 %v656_v46, %v655_v45  ;;  %v1764_v45 = vshrl.u32 %v755_v22, 16 }
 0x135   :  { %v10282_v34 = vpop.permute.xlu1 %1363  ;;  %1673 = vrot.lane.b32.xlu0 %v13603_v60, %s8887_s8  ;;  %v1311_v60 = vshrl.u32 %v13609_v3, 16  ;;  %v1768_v46 = vrot.slane %v1766_v36, 1 }
 0x136   :  { %13602 = vst [vmem:[#allocation67_spill] sm:$0xff] %v10282_v34  ;;  %v13623_v34 = vld [vmem:[#allocation24_spill] sm:$0xff] }
 0x137   :  { %1705 = vrot.lane.b32.xlu1 %v13604_v50, %s8888_s9  ;;  %v10288_v54 = vpop.permute.xlu0 %1361 }
 0x138   :  { %13605 = vst [vmem:[#allocation30_spill] sm:$0xff] %v10288_v54  ;;  %v13620_v54 = vld [vmem:[#allocation7_spill] sm:$0xff] }
 0x139   :  { %v10290_v48 = vpop.permute.xlu1 %1489  ;;  %1677 = vrot.lane.b32.xlu0 %v1655_v43, %s8887_s8  ;;  %v1315_v43 = vrot.slane %v1313_v31, 1 }
 0x13b   :  { %1709 = vrot.lane.b32.xlu1 %v13606_v33, %s8888_s9  ;;  %v10298_v29 = vpop.permute.xlu0 %1365  ;;  %v13611_v33 = vld [vmem:[#allocation72_spill] sm:$0xff] }
 0x13c   :  { %13607 = vst [vmem:[#allocation3_spill] sm:$0xff] %v10298_v29  ;;  %v1436_v23 = vshll.u32 %v13611_v33, 16  ;;  %v1434_v39 = vshrl.u32 %v13611_v33, 16  ;;  %v1769_v33 = vor.u32 %v1768_v46, %v1764_v45  ;;  %v13616_v45 = vld [vmem:[#allocation82_spill] sm:$0xff]  ;;  %v1812_v29 = vshll.u32 %v764_v21, 16 }
 0x13d   :  { %v10303_v4 = vpop.permute.xlu1 %1493  ;;  %1707 = vrot.lane.b32.xlu0 %v13608_v17, %s8888_s9 }
 0x13e   :  { %v1438_v44 = vrot.slane %v1436_v23, 1  ;;  %v13614_v23 = vld [vmem:[#allocation74_spill] sm:$0xff] }
 0x13f   :  { %1739 = vrot.lane.b32.xlu1 %v9689_v57, %s8889_s10  ;;  %v10310_v49 = vpop.permute.xlu0 %1491  ;;  %v13610_v57 = vld [vmem:[#allocation71_spill] sm:$0xff]  ;;  %v1457_v5 = vshll.u32 %v13614_v23, 16  ;;  %v1455_v36 = vshrl.u32 %v13614_v23, 16 }
 0x140   :  { %v1443_v50 = vshll.u32 %v13610_v57, 16  ;;  %v1441_v19 = vshrl.u32 %v13610_v57, 16 }
 0x141   :  { %v10312_v53 = vpop.permute.xlu1 %1537  ;;  %1711 = vrot.lane.b32.xlu0 %v755_v22, %s8888_s9  ;;  %v13615_v22 = vld [vmem:[#allocation76_spill] sm:$0xff] }
 0x142   :  { %v1445_v17 = vrot.slane %v1443_v50, 1  ;;  %v13613_v50 = vld [vmem:[#allocation83_spill] sm:$0xff]  ;;  %v1448_v46 = vshrl.u32 %v13615_v22, 16 }
 0x143   :  { %1743 = vrot.lane.b32.xlu1 %v9723_v8, %s8889_s10  ;;  %v10319_v24 = vpop.permute.xlu0 %1495  ;;  %v10328_v8 = vor.u32 %v1315_v43, %v1311_v60 }
 0x145   :  { %v10321_v59 = vpop.permute.xlu1 %1541  ;;  %1741 = vrot.lane.b32.xlu0 %v9728_v56, %s8889_s10  ;;  %v10339_v56 = vor.u32 %v1445_v17, %v1441_v19  ;;  %v1450_v17 = vshll.u32 %v13615_v22, 16 }
 0x147   :  { %1785 = vrot.lane.b32.xlu1 %v13612_v37, %s8890_s11  ;;  %v10331_v10 = vpop.permute.xlu0 %1539  ;;  %v1439_v37 = vor.u32 %v1438_v44, %v1434_v39  ;;  %v1452_v47 = vrot.slane %v1450_v17, 1  ;;  %v1814_v17 = vrot.slane %v1812_v29, 1 }
 0x149   :  { %v10333_v31 = vpop.permute.xlu1 %1571  ;;  %1745 = vrot.lane.b32.xlu0 %v764_v21, %s8889_s10 }
 0x14b   :  { %1367 = vrot.lane.b32.xlu1 %v10328_v8, %s8882_s28  ;;  %v10341_v60 = vpop.permute.xlu0 %1543 }
 0x14d   :  { %v10343_v43 = vpop.permute.xlu1 %1575  ;;  %1787 = vrot.lane.b32.xlu0 %v13613_v50, %s8890_s11  ;;  %v1459_v50 = vrot.slane %v1457_v5, 1  ;;  %v10375_v5 = vor.u32 %v1452_v47, %v1448_v46 }
 0x14f   :  { %1507 = vrot.lane.b32.xlu1 %v10339_v56, %s8883_s19  ;;  %v10350_v42 = vpop.permute.xlu0 %1573 }
 0x151   :  { %v10352_v19 = vpop.permute.xlu1 %1617  ;;  %1505 = vrot.lane.b32.xlu0 %v1439_v37, %s8883_s19  ;;  %v10367_v37 = vor.u32 %v1459_v50, %v1455_v36 }
 0x153   :  { %1791 = vrot.lane.b32.xlu1 %v1769_v33, %s8890_s11  ;;  %v10358_v44 = vpop.permute.xlu0 %1577 }
 0x155   :  { %v10360_v39 = vpop.permute.xlu1 %1621  ;;  %1789 = vrot.lane.b32.xlu0 %v13616_v45, %s8890_s11  ;;  %v1810_v45 = vshrl.u32 %v764_v21, 16 }
 0x157   :  { %1833 = vrot.lane.b32.xlu1 %v10062_v16, %s8891_s20  ;;  %v10369_v33 = vpop.permute.xlu0 %1619  ;;  %v1815_v36 = vor.u32 %v1814_v17, %v1810_v45  ;;  %v13618_v17 = vld [vmem:[#allocation6_spill] sm:$0xff] }
 0x159   :  { %v10371_v30 = vpop.permute.xlu1 %1663  ;;  %1831 = vrot.lane.b32.xlu0 %v10037_v15, %s8891_s20 }
 0x15b   :  { %1511 = vrot.lane.b32.xlu1 %v10367_v37, %s8883_s19  ;;  %v10379_v51 = vpop.permute.xlu0 %1623 }
 0x15d   :  { %v10381_v16 = vpop.permute.xlu1 %1667  ;;  %1509 = vrot.lane.b32.xlu0 %v10375_v5, %s8883_s19 }
 0x15f   :  { %1555 = vrot.lane.b32.xlu1 %v13575_v52, %s8884_s30  ;;  %v10387_v50 = vpop.permute.xlu0 %1665 }
 0x161   :  { %v10389_v15 = vpop.permute.xlu1 %1697  ;;  %1553 = vrot.lane.b32.xlu0 %v13566_v13, %s8884_s30  ;;  %v13617_v13 = vld [vmem:[#allocation8_spill] sm:$0xff] }
 0x163   :  { %1837 = vrot.lane.b32.xlu1 %v1815_v36, %s8891_s20  ;;  %v10394_v47 = vpop.permute.xlu0 %1669 }
 0x165   :  { %v10396_v29 = vpop.permute.xlu1 %1701  ;;  %1835 = vrot.lane.b32.xlu0 %v10115_v58, %s8891_s20  ;;  %v13619_v58 = vld [vmem:[#allocation10_spill] sm:$0xff] }
 0x167   :  { %1559 = vrot.lane.b32.xlu1 %v13581_v61, %s8884_s30  ;;  %v1700_v52 = vpop.permute.xlu0 %1699 }
 0x169   :  { %v10402_v21 = vpop.permute.xlu1 %1731  ;;  %1557 = vrot.lane.b32.xlu0 %v13572_v40, %s8884_s30  ;;  %v13621_v40 = vld [vmem:[#allocation28_spill] sm:$0xff] }
 0x16b   :  { %1589 = vrot.lane.b32.xlu1 %v13617_v13, %s8885_s5  ;;  %v10408_v46 = vpop.permute.xlu0 %1703 }
 0x16d   :  { %v10410_v45 = vpop.permute.xlu1 %1735  ;;  %1587 = vrot.lane.b32.xlu0 %v13618_v17, %s8885_s5  ;;  %v13625_v17 = vld [vmem:[#allocation13_spill] sm:$0xff] }
 0x16e   :  { %v1857_v12 = vsel %vm13448_vm0, %v13625_v17, %v13624_v32 }
 0x16f   :  { %1593 = vrot.lane.b32.xlu1 %v13619_v58, %s8885_s5  ;;  %v1734_v61 = vpop.permute.xlu0 %1733  ;;  %v13626_v58 = vld [vmem:[#allocation53_spill] sm:$0xff] }
 0x170   :  { %v1859_v38 = vsel %vm13448_vm0, %v9104_v6, %v13626_v58  ;;  %v13630_v6 = vld [vmem:[#allocation88_spill] sm:$0xff] }
 0x171   :  { %v1778_v36 = vpop.permute.xlu1 %1777  ;;  %1591 = vrot.lane.b32.xlu0 %v13620_v54, %s8885_s5  ;;  %v13627_v54 = vld [vmem:[#allocation33_spill] sm:$0xff] }
 0x173   :  { %1635 = vrot.lane.b32.xlu1 %v13621_v40, %s8886_s6  ;;  %v10420_v55 = vpop.permute.xlu0 %1737  ;;  %v1892_v40 = vsel %vm13450_vm1, %v1859_v38, %v13628_v0  ;;  %v13632_v38 = vld [vmem:[#allocation26_spill] sm:$0xff] }
 0x175   :  { %v10422_v13 = vpop.permute.xlu1 %1497  ;;  %1633 = vrot.lane.b32.xlu0 %v13623_v34, %s8886_s6  ;;  %v1925_v34 = vsel %vm1921_vm2, %v1892_v40, %v9886_v2 }
 0x176   :  { %13622 = vst [vmem:[#allocation68_spill] sm:$0xff] %v10422_v13  ;;  %v1890_v13 = vsel %vm13450_vm1, %v1857_v12, %v13629_v7  ;;  %v1958_v58 = vsel %vm13449_vm3, %v1925_v34, %v13630_v6  ;;  %v13636_v6 = vld [vmem:[#allocation47_spill] sm:$0xff] }
 0x177   :  { %1639 = vrot.lane.b32.xlu1 %v13627_v54, %s8886_s6  ;;  %v1780_v18 = vpop.permute.xlu0 %1779  ;;  %v1923_v32 = vsel %vm1921_vm2, %v1890_v13, %v9896_v25  ;;  %v13631_v54 = vld [vmem:[#allocation89_spill] sm:$0xff]  ;;  %v1991_v7 = vsel %vm1987_vm4, %v1958_v58, %v10033_v9  ;;  %v13637_v58 = vld [vmem:[#allocation15_spill] sm:$0xff] }
 0x178   :  { %v1956_v63 = vsel %vm13449_vm3, %v1923_v32, %v13631_v54  ;;  %v13633_v25 = vld [vmem:[#allocation41_spill] sm:$0xff]  ;;  %v2024_v0 = vsel %vm13452_vm13, %v1991_v7, %v10246_v1  ;;  %v13639_v7 = vld [vmem:[#allocation14_spill] sm:$0xff] }
 0x179   :  { %v10442_v17 = vpop.permute.xlu1 %1781  ;;  %1637 = vrot.lane.b32.xlu0 %v13632_v38, %s8886_s6  ;;  %v1989_v2 = vsel %vm1987_vm4, %v1956_v63, %v10045_v26  ;;  %v2057_v9 = vsel %vm2053_vm14, %v2024_v0, %v10310_v49  ;;  %v13635_v49 = vld [vmem:[#allocation43_spill] sm:$0xff]  ;;  %v13640_v0 = vld [vmem:[#allocation40_spill] sm:$0xff] }
 0x17a   :  { %v2022_v12 = vsel %vm13452_vm13, %v1989_v2, %v10252_v11  ;;  %v2090_v1 = vsel %vm13453_vm15, %v2057_v9, %v10331_v10  ;;  %v13634_v11 = vld [vmem:[#allocation39_spill] sm:$0xff] }
 0x17b   :  { %1681 = vrot.lane.b32.xlu1 %v13633_v25, %s8887_s8  ;;  %v10460_v13 = vpop.permute.xlu0 %1499  ;;  %v2055_v40 = vsel %vm2053_vm14, %v2022_v12, %v10290_v48  ;;  %v2123_v48 = vsel %vm2119_vm5, %v2090_v1, %v10350_v42  ;;  %v13642_v9 = vld [vmem:[#allocation55_spill] sm:$0xff] }
 0x17c   :  { %v2088_v63 = vsel %vm13453_vm15, %v2055_v40, %v10312_v53  ;;  %v2156_v10 = vsel %vm13451_vm6, %v2123_v48, %v10369_v33 }
 0x17d   :  { %v1824_v26 = vpop.permute.xlu1 %1823  ;;  %1679 = vrot.lane.b32.xlu0 %v13634_v11, %s8887_s8  ;;  %v2121_v34 = vsel %vm2119_vm5, %v2088_v63, %v10333_v31  ;;  %v1861_v31 = vsel %vm13448_vm0, %v13637_v58, %v13636_v6  ;;  %v2189_v54 = vsel %vm2185_vm7, %v2156_v10, %v10387_v50  ;;  %v13643_v63 = vld [vmem:[#allocation56_spill] sm:$0xff]  ;;  %v13645_v11 = vld [vmem:[#allocation86_spill] sm:$0xff]  ;;  %v13646_v10 = vld [vmem:[#allocation87_spill] sm:$0xff] }
 0x17e   :  { %v2154_v53 = vsel %vm13451_vm6, %v2121_v34, %v10352_v19  ;;  %v13638_v19 = vld [vmem:[#allocation52_spill] sm:$0xff]  ;;  %v2222_v25 = vsel %vm2218_vm8, %v2189_v54, %v1700_v52  ;;  %v1327_v1 = vshll.u32 %v13643_v63, 16  ;;  %v13648_v54 = vld [vmem:[#allocation91_spill] sm:$0xff] }
 0x17f   :  { %1685 = vrot.lane.b32.xlu1 %v13635_v49, %s8887_s8  ;;  %v10482_v32 = vpop.permute.xlu0 %1783  ;;  %v2187_v42 = vsel %vm2185_vm7, %v2154_v53, %v10371_v30  ;;  %v1863_v33 = vsel %vm13448_vm0, %v13639_v7, %v13638_v19  ;;  %v13641_v30 = vld [vmem:[#allocation73_spill] sm:$0xff]  ;;  %v2255_v40 = vsel %vm2251_vm9, %v2222_v25, %v1734_v61 }
 0x180   :  { %v2220_v2 = vsel %vm2218_vm8, %v2187_v42, %v10389_v15  ;;  %v1896_v12 = vsel %vm13450_vm1, %v1863_v33, %v13641_v30  ;;  %v13644_v15 = vld [vmem:[#allocation75_spill] sm:$0xff]  ;;  %v2288_v49 = vsel %vm2284_vm10, %v2255_v40, %v1780_v18  ;;  %v13647_v42 = vld [vmem:[#allocation90_spill] sm:$0xff]  ;;  %v13650_v7 = vld [vmem:[#allocation57_spill] sm:$0xff]  ;;  %v1329_v30 = vrot.slane %v1327_v1, 1 }
 0x181   :  { %v10491_v38 = vpop.permute.xlu1 %1501  ;;  %1683 = vrot.lane.b32.xlu0 %v13640_v0, %s8887_s8  ;;  %v2253_v50 = vsel %vm2251_vm9, %v2220_v2, %v10402_v21  ;;  %v1894_v52 = vsel %vm13450_vm1, %v1861_v31, %v13644_v15  ;;  %v1929_v34 = vsel %vm1921_vm2, %v1896_v12, %v13645_v11  ;;  %v1320_v33 = vshll.u32 %v13650_v7, 16  ;;  %v13651_v2 = vld [vmem:[#allocation92_spill] sm:$0xff] }
 0x182   :  { %v2286_v48 = vsel %vm2284_vm10, %v2253_v50, %v1778_v36  ;;  %v1927_v21 = vsel %vm1921_vm2, %v1894_v52, %v13646_v10  ;;  %v1962_v31 = vsel %vm13449_vm3, %v1929_v34, %v13647_v42  ;;  %v13649_v36 = vld [vmem:[#allocation51_spill] sm:$0xff]  ;;  %v1325_v0 = vshrl.u32 %v13643_v63, 16 }
 0x183   :  { %1715 = vrot.lane.b32.xlu1 %v13642_v9, %s8888_s9  ;;  %v1826_v53 = vpop.permute.xlu0 %1825  ;;  %v2319_v61 = vsel %vm2317_vm11, %v2286_v48, %v1824_v26  ;;  %v1960_v19 = vsel %vm13449_vm3, %v1927_v21, %v13648_v54  ;;  %v1995_v26 = vsel %vm1987_vm4, %v1962_v31, %v13651_v2  ;;  %v1322_v52 = vrot.slane %v1320_v33, 1  ;;  %v13655_v31 = vld [vmem:[#allocation77_spill] sm:$0xff] }
 0x184   :  { %v2321_v6 = vsel %vm2317_vm11, %v2288_v49, %v1826_v53  ;;  %v1993_v25 = vsel %vm1987_vm4, %v1960_v19, %v10066_v41  ;;  %v2028_v12 = vsel %vm13452_vm13, %v1995_v26, %v10254_v27  ;;  %v13656_v33 = vld [vmem:[#allocation85_spill] sm:$0xff]  ;;  %v1469_v26 = vshrl.u32 %v13655_v31, 16 }
 0x185   :  { %v10519_v58 = vpop.permute.xlu1 %1545  ;;  %1713 = vrot.lane.b32.xlu0 %v13649_v36, %s8888_s9  ;;  %v7824_v18 = vcombine.low %v2319_v61, %v2321_v6  ;;  %v2026_v50 = vsel %vm13452_vm13, %v1993_v25, %v10259_v14  ;;  %v2061_v41 = vsel %vm2053_vm14, %v2028_v12, %v10319_v24  ;;  %v1318_v14 = vshrl.u32 %v13650_v7, 16  ;;  %v13654_v6 = vld [vmem:[#allocation78_spill] sm:$0xff]  ;;  %v13657_v12 = vld [vmem:[#allocation84_spill] sm:$0xff] }
 0x186   :  { %v2059_v9 = vsel %vm2053_vm14, %v2026_v50, %v10303_v4  ;;  %v2094_v27 = vsel %vm13453_vm15, %v2061_v41, %v10341_v60  ;;  %v10559_v24 = vor.u32 %v1329_v30, %v1325_v0  ;;  %v1462_v50 = vshrl.u32 %v13654_v6, 16 }
 0x187   :  { %1719 = vrot.lane.b32.xlu1 %v13650_v7, %s8888_s9  ;;  %8484 = vmatprep.mubr.msk.bf16.mxu0 %vm2422_vm12, %v7824_v18  ;;  %v10540_v40 = vpop.permute.xlu0 %1503  ;;  %v2092_v1 = vsel %vm13453_vm15, %v2059_v9, %v10321_v59  ;;  %v2127_v4 = vsel %vm2119_vm5, %v2094_v27, %v10358_v44  ;;  %v1464_v7 = vshll.u32 %v13654_v6, 16  ;;  %vm91_vm3 = vsmask.f32 7938 }
 0x188   :  { %v2125_v11 = vsel %vm2119_vm5, %v2092_v1, %v10343_v43 }
 0x189   :  { %v1828_v15 = vpop.permute.xlu1 %1827  ;;  %1717 = vrot.lane.b32.xlu0 %v13609_v3, %s8888_s9  ;;  %v2158_v59 = vsel %vm13451_vm6, %v2125_v11, %v10360_v39  ;;  %v2160_v3 = vsel %vm13451_vm6, %v2127_v4, %v10379_v51  ;;  %v1323_v51 = vor.u32 %v1322_v52, %v1318_v14  ;;  %v1466_v9 = vrot.slane %v1464_v7, 1  ;;  %v13658_v14 = vld [vmem:[#allocation79_spill] sm:$0xff] }
 0x18a   :  { %v2191_v34 = vsel %vm2185_vm7, %v2158_v59, %v10381_v16  ;;  %v2193_v43 = vsel %vm2185_vm7, %v2160_v3, %v10394_v47  ;;  %v13652_v47 = vld [vmem:[#allocation60_spill] sm:$0xff]  ;;  %v1485_v52 = vshll.u32 %v13658_v14, 16 }
 0x18b   :  { %1749 = vrot.lane.b32.xlu1 %v13615_v22, %s8889_s10  ;;  %v10565_v60 = vpop.permute.xlu0 %1547  ;;  %v2224_v22 = vsel %vm2218_vm8, %v2191_v34, %v10396_v29  ;;  %v2226_v48 = vsel %vm2218_vm8, %v2193_v43, %v10408_v46  ;;  %v1341_v49 = vshll.u32 %v13652_v47, 16  ;;  %v1467_v27 = vor.u32 %v1466_v9, %v1462_v50  ;;  %v13659_v59 = vld [vmem:[#allocation80_spill] sm:$0xff] }
 0x18c   :  { %v2257_v39 = vsel %vm2251_vm9, %v2224_v22, %v10410_v45  ;;  %v2259_v16 = vsel %vm2251_vm9, %v2226_v48, %v10420_v55  ;;  %v13653_v55 = vld [vmem:[#allocation61_spill] sm:$0xff]  ;;  %v1478_v3 = vshll.u32 %v13659_v59, 16  ;;  %v1483_v34 = vshrl.u32 %v13658_v14, 16  ;;  %v13660_v50 = vld [vmem:[#allocation12_spill] sm:$0xff] }
 0x18d   :  { %v10571_v44 = vpop.permute.xlu1 %1549  ;;  %1747 = vrot.lane.b32.xlu0 %v13610_v57, %s8889_s10  ;;  %v2290_v29 = vsel %vm2284_vm10, %v2257_v39, %v10442_v17  ;;  %v2292_v46 = vsel %vm2284_vm10, %v2259_v16, %v10482_v32  ;;  %v1334_v61 = vshll.u32 %v13653_v55, 16  ;;  %v1339_v17 = vshrl.u32 %v13652_v47, 16 }
 0x18e   :  { %v2323_v57 = vsel %vm2317_vm11, %v2290_v29, %v1828_v15  ;;  %v1343_v42 = vrot.slane %v1341_v49, 1  ;;  %v1471_v32 = vshll.u32 %v13655_v31, 16  ;;  %v1332_v36 = vshrl.u32 %v13653_v55, 16 }
 0x18f   :  { %1371 = vrot.lane.b32.xlu1 %v10559_v24, %s8882_s28  ;;  %v1830_v53 = vpop.permute.xlu0 %1829  ;;  %v1336_v18 = vrot.slane %v1334_v61, 1  ;;  %v1487_v43 = vrot.slane %v1485_v52, 1  ;;  %v1476_v39 = vshrl.u32 %v13659_v59, 16  ;;  %v1480_v16 = vrot.slane %v1478_v3, 1 }
 0x190   :  { %v2325_v10 = vsel %vm2317_vm11, %v2292_v46, %v1830_v53  ;;  %v10611_v2 = vor.u32 %v1343_v42, %v1339_v17  ;;  %v1473_v25 = vrot.slane %v1471_v32, 1  ;;  %v241_v46 = vld [vmem:[%s13355_s0 + $0x2c0] sm:$0xff]  ;;  %v259_v42 = vld [vmem:[%s13355_s0 + $0x350] sm:$0xff]  ;;  %v260_v32 = vld [vmem:[%s13355_s0 + $0x358] sm:$0x1] }
 0x191   :  { %v10592_v45 = vpop.permute.xlu1 %1579  ;;  %v7825_v21 = vcombine.low %v2323_v57, %v2325_v10  ;;  %1369 = vrot.lane.b32.xlu0 %v1323_v51, %s8882_s28  ;;  %v10653_v49 = vor.u32 %v1487_v43, %v1483_v34  ;;  %v10667_v53 = vor.u32 %v1480_v16, %v1476_v39  ;;  %v529_v57 = vmul.f32 0.2, %v241_v46 }
 0x192   :  { %v10625_v41 = vor.u32 %v1473_v25, %v1469_v26  ;;  %vm385_vm2 = vcmp.ge.f32.partialorder %v241_v46, 0.0  ;;  %v548_v7 = vmul.f32 0.2, %v260_v32 }
 0x193   :  { %1753 = vrot.lane.b32.xlu1 %v13654_v6, %s8889_s10  ;;  %8485 = vmatmul.mubr.msk.bf16.vlgmr.msra.gmra.mxu0 %vm2422_vm12, %v7825_v21  ;;  %v10601_v54 = vpop.permute.xlu0 %1551  ;;  %v673_v61 = vsel %vm385_vm2, %v241_v46, %v529_v57  ;;  %vm403_vm2 = vcmp.ge.f32.partialorder %v259_v42, 0.0  ;;  %v13662_v46 = vld [vmem:[#allocation16_spill] sm:$0xff]  ;;  %v13663_v57 = vld [vmem:[#allocation11_spill] sm:$0xff] }
 0x195   :  { %v10603_v19 = vpop.permute.xlu1 %1583  ;;  %1751 = vrot.lane.b32.xlu0 %v13614_v23, %s8889_s10  ;;  %v10620_v23 = vor.u32 %v1336_v18, %v1332_v36  ;;  %v547_v18 = vmul.f32 0.2, %v259_v42 }
 0x197   :  { %1795 = vrot.lane.b32.xlu1 %v13656_v33, %s8890_s11  ;;  %v10614_v0 = vpop.permute.xlu0 %1581  ;;  %v691_v25 = vsel %vm403_vm2, %v259_v42, %v547_v18  ;;  %v13665_v42 = vld [vmem:[#allocation27_spill] sm:$0xff] }
 0x199   :  { %v10616_v30 = vpop.permute.xlu1 %1625  ;;  %1793 = vrot.lane.b32.xlu0 %v13657_v12, %s8890_s11 }
 0x19b   :  { %1375 = vrot.lane.b32.xlu1 %v10611_v2, %s8882_s28  ;;  %v10627_v15 = vpop.permute.xlu0 %1585 }
 0x19d   :  { %v10629_v1 = vpop.permute.xlu1 %1629  ;;  %1373 = vrot.lane.b32.xlu0 %v10620_v23, %s8882_s28 }
 0x19f   :  { %1515 = vrot.lane.b32.xlu1 %v10625_v41, %s8883_s19  ;;  %v10636_v11 = vpop.permute.xlu0 %1627 }
 0x1a1   :  { %v10638_v4 = vpop.permute.xlu1 %1671  ;;  %1513 = vrot.lane.b32.xlu0 %v1467_v27, %s8883_s19 }
 0x1a3   :  { %1799 = vrot.lane.b32.xlu1 %v1323_v51, %s8890_s11  ;;  %v10644_v22 = vpop.permute.xlu0 %1631 }
 0x1a5   :  { %v10646_v48 = vpop.permute.xlu1 %1675  ;;  %1797 = vrot.lane.b32.xlu0 %v10328_v8, %s8890_s11  ;;  %v242_v8 = vld [vmem:[%s13355_s0 + $0x2c8] sm:$0x1] }
 0x1a6   :  { %v530_v10 = vmul.f32 0.2, %v242_v8  ;;  %vm386_vm4 = vcmp.ge.f32.partialorder %v242_v8, 0.0 }
 0x1a7   :  { %1841 = vrot.lane.b32.xlu1 %v10375_v5, %s8891_s20  ;;  %v10655_v29 = vpop.permute.xlu0 %1673 }
 0x1a8   :  { %v674_v6 = vsel %vm386_vm4, %v242_v8, %v530_v10  ;;  %vm404_vm4 = vcmp.ge.f32.partialorder %v260_v32, 0.0  ;;  %v2032_v8 = vsel %vm13452_vm13, %v13662_v46, %v10261_v62  ;;  %v13667_v62 = vld [vmem:[#allocation68_spill] sm:$0xff] }
 0x1a9   :  { %v10657_v51 = vpop.permute.xlu1 %1705  ;;  %1839 = vrot.lane.b32.xlu0 %v10339_v56, %s8891_s20  ;;  %v773_v36 = vpack.c.bf16 %v674_v6, %v673_v61  ;;  %v692_v12 = vsel %vm404_vm4, %v260_v32, %v548_v7  ;;  %v2065_v10 = vsel %vm2053_vm14, %v2032_v8, %v10460_v13  ;;  %v13664_v61 = vld [vmem:[#allocation35_spill] sm:$0xff]  ;;  %v13666_v32 = vld [vmem:[#allocation58_spill] sm:$0xff] }
 0x1aa   :  { %v782_v9 = vpack.c.bf16 %v692_v12, %v691_v25  ;;  %v2098_v18 = vsel %vm13453_vm15, %v2065_v10, %v10565_v60  ;;  %v13668_v60 = vld [vmem:[#allocation31_spill] sm:$0xff] }
 0x1ab   :  { %1519 = vrot.lane.b32.xlu1 %v10653_v49, %s8883_s19  ;;  %v10671_v5 = vpop.permute.xlu0 %1677  ;;  %v1611_v34 = vshrl.u32 %v773_v36, 16  ;;  %v2131_v12 = vsel %vm2119_vm5, %v2098_v18, %v10614_v0  ;;  %v277_v0 = vld [vmem:[%s13355_s0 + $0x3e0] sm:$0xff]  ;;  %v13671_v18 = vld [vmem:[#allocation66_spill] sm:$0xff] }
 0x1ac   :  { %vm421_vm2 = vcmp.ge.f32.partialorder %v277_v0, 0.0 }
 0x1ad   :  { %v10673_v21 = vpop.permute.xlu1 %1709  ;;  %1517 = vrot.lane.b32.xlu0 %v10667_v53, %s8883_s19 }
 0x1af   :  { %1563 = vrot.lane.b32.xlu1 %v13588_v28, %s8884_s30  ;;  %v1708_v56 = vpop.permute.xlu0 %1707 }
 0x1b1   :  { %v10679_v17 = vpop.permute.xlu1 %1739  ;;  %1561 = vrot.lane.b32.xlu0 %v13578_v20, %s8884_s30 }
 0x1b3   :  { %1845 = vrot.lane.b32.xlu1 %v1467_v27, %s8891_s20  ;;  %v10690_v28 = vpop.permute.xlu0 %1711  ;;  %v1613_v27 = vshll.u32 %v773_v36, 16 }
 0x1b5   :  { %v10692_v33 = vpop.permute.xlu1 %1743  ;;  %1843 = vrot.lane.b32.xlu0 %v10367_v37, %s8891_s20  ;;  %v13661_v37 = vld [vmem:[#allocation9_spill] sm:$0xff]  ;;  %v1615_v43 = vrot.slane %v1613_v27, 1 }
 0x1b7   :  { %1567 = vrot.lane.b32.xlu1 %v773_v36, %s8884_s30  ;;  %v1742_v26 = vpop.permute.xlu0 %1741  ;;  %v1616_v6 = vor.u32 %v1615_v43, %v1611_v34  ;;  %v2030_v36 = vsel %vm13452_vm13, %v13666_v32, %v13665_v42  ;;  %v2164_v34 = vsel %vm13451_vm6, %v2131_v12, %v10636_v11 }
 0x1b8   :  { %v2063_v25 = vsel %vm2053_vm14, %v2030_v36, %v13667_v62  ;;  %v2197_v46 = vsel %vm2185_vm7, %v2164_v34, %v10655_v29  ;;  %v13672_v62 = vld [vmem:[#allocation18_spill] sm:$0xff]  ;;  %v13674_v34 = vld [vmem:[#allocation29_spill] sm:$0xff] }
 0x1b9   :  { %v1786_v20 = vpop.permute.xlu1 %1785  ;;  %1565 = vrot.lane.b32.xlu0 %v13584_v35, %s8884_s30  ;;  %v1659_v35 = vshll.u32 %v782_v9, 16 }
 0x1bb   :  { %1597 = vrot.lane.b32.xlu1 %v13660_v50, %s8885_s5  ;;  %v10701_v52 = vpop.permute.xlu0 %1745  ;;  %v1657_v50 = vshrl.u32 %v782_v9, 16  ;;  %v1661_v27 = vrot.slane %v1659_v35, 1 }
 0x1bd   :  { %v10703_v3 = vpop.permute.xlu1 %1367  ;;  %1595 = vrot.lane.b32.xlu0 %v13661_v37, %s8885_s5  ;;  %v2096_v37 = vsel %vm13453_vm15, %v2063_v25, %v10519_v58  ;;  %v278_v58 = vld [vmem:[%s13355_s0 + $0x3e8] sm:$0x1]  ;;  %v2036_v25 = vsel %vm13452_vm13, %v13672_v62, %v13671_v18 }
 0x1be   :  { %v2129_v43 = vsel %vm2119_vm5, %v2096_v37, %v10592_v45  ;;  %v566_v42 = vmul.f32 0.2, %v278_v58  ;;  %vm422_vm4 = vcmp.ge.f32.partialorder %v278_v58, 0.0  ;;  %v295_v37 = vld [vmem:[%s13355_s0 + $0x470] sm:$0xff] }
 0x1bf   :  { %1601 = vrot.lane.b32.xlu1 %v782_v9, %s8885_s5  ;;  %v1788_v39 = vpop.permute.xlu0 %1787  ;;  %v2162_v11 = vsel %vm13451_vm6, %v2129_v43, %v10616_v30  ;;  %v2230_v9 = vsel %vm2218_vm8, %v2197_v46, %v1708_v56  ;;  %v565_v30 = vmul.f32 0.2, %v277_v0  ;;  %vm439_vm1 = vcmp.ge.f32.partialorder %v295_v37, 0.0 }
 0x1c0   :  { %v2195_v45 = vsel %vm2185_vm7, %v2162_v11, %v10638_v4  ;;  %v2263_v29 = vsel %vm2251_vm9, %v2230_v9, %v1742_v26  ;;  %v13670_v4 = vld [vmem:[#allocation45_spill] sm:$0xff] }
 0x1c1   :  { %v10708_v16 = vpop.permute.xlu1 %1507  ;;  %1599 = vrot.lane.b32.xlu0 %v13663_v57, %s8885_s5  ;;  %v1662_v57 = vor.u32 %v1661_v27, %v1657_v50  ;;  %v2228_v10 = vsel %vm2218_vm8, %v2195_v45, %v10657_v51  ;;  %v709_v50 = vsel %vm421_vm2, %v277_v0, %v565_v30  ;;  %v710_v27 = vsel %vm422_vm4, %v278_v58, %v566_v42  ;;  %v296_v58 = vld [vmem:[%s13355_s0 + $0x478] sm:$0x1] }
 0x1c2   :  { %v2261_v56 = vsel %vm2251_vm9, %v2228_v10, %v10679_v17  ;;  %v13673_v17 = vld [vmem:[#allocation42_spill] sm:$0xff]  ;;  %v10799_v45 = vpack.c.bf16 %v710_v27, %v709_v50  ;;  %vm19_vm2 = vcmask 57344   ;;  %vm29_vm4 = vsmask.f32 256 }
 0x1c3   :  { %1643 = vrot.lane.b32.xlu1 %v13664_v61, %s8886_s6  ;;  %v10724_v7 = vpop.permute.xlu0 %1505  ;;  %v2296_v61 = vsel %vm2284_vm10, %v2263_v29, %v1788_v39  ;;  %v2294_v26 = vsel %vm2284_vm10, %v2261_v56, %v1786_v20  ;;  %v2069_v20 = vsel %vm2053_vm14, %v2036_v25, %v10540_v40  ;;  %v583_v29 = vmul.f32 0.2, %v295_v37  ;;  %vm10814_vm0 = vmand %vm19_vm2, %vm29_vm4 }
 0x1c4   :  { %v2102_v46 = vsel %vm13453_vm15, %v2069_v20, %v10601_v54  ;;  %vm10828_vm4 = vmand %vm19_vm2, %vm91_vm3  ;;  %v1773_v20 = vshll.u32 %v10799_v45, 16 }
 0x1c5   :  { %v10730_v13 = vpop.permute.xlu1 %1791  ;;  %1641 = vrot.lane.b32.xlu0 %v13668_v60, %s8886_s6  ;;  %v13675_v60 = vld [vmem:[#allocation59_spill] sm:$0xff]  ;;  %v2135_v11 = vsel %vm2119_vm5, %v2102_v46, %v10627_v15 }
 0x1c6   :  { %v2034_v43 = vsel %vm13452_vm13, %v13675_v60, %v13674_v34  ;;  %v37_v60 = vld [vmem:[#allocation2 + $0x10] sm:$0x1] }
 0x1c7   :  { %1647 = vrot.lane.b32.xlu1 %v1616_v6, %s8886_s6  ;;  %v10752_v35 = vpop.permute.xlu0 %1789  ;;  %v13669_v6 = vld [vmem:[#allocation34_spill] sm:$0xff]  ;;  %v2067_v40 = vsel %vm2053_vm14, %v2034_v43, %v10491_v38  ;;  %v38_v46 = vsel %vm10814_vm0, 0, %v37_v60 }
 0x1c8   :  { %v2100_v54 = vsel %vm13453_vm15, %v2067_v40, %v10571_v44  ;;  %v40_v38 = vld [vmem:[#allocation2 + $0x18] sm:$0x1]  ;;  %39 = vst [vmem:[#allocation2 + $0x10] sm:$0x1] %v38_v46  ;;  %v1775_v40 = vrot.slane %v1773_v20, 1 }
 0x1c9   :  { %v1834_v8 = vpop.permute.xlu1 %1833  ;;  %1645 = vrot.lane.b32.xlu0 %v13669_v6, %s8886_s6  ;;  %v2133_v15 = vsel %vm2119_vm5, %v2100_v54, %v10603_v19 }
 0x1ca   :  { %v2329_v32 = vsel %vm2317_vm11, %v2296_v61, %v1834_v8  ;;  %v2168_v8 = vsel %vm13451_vm6, %v2135_v11, %v10644_v22  ;;  %v584_v61 = vmul.f32 0.2, %v296_v58  ;;  %v102_v22 = vld [vmem:[#allocation2 + $0x1c] sm:$0x1]  ;;  %v2166_v6 = vsel %vm13451_vm6, %v2133_v15, %v10629_v1 }
 0x1cb   :  { %1689 = vrot.lane.b32.xlu1 %v13670_v4, %s8887_s8  ;;  %v1832_v51 = vpop.permute.xlu0 %1831  ;;  %v2201_v10 = vsel %vm2185_vm7, %v2168_v8, %v10671_v5  ;;  %v2199_v42 = vsel %vm2185_vm7, %v2166_v6, %v10646_v48  ;;  %vm440_vm6 = vcmp.ge.f32.partialorder %v296_v58, 0.0 }
 0x1cc   :  { %v2327_v39 = vsel %vm2317_vm11, %v2294_v26, %v1832_v51  ;;  %v2234_v19 = vsel %vm2218_vm8, %v2201_v10, %v10690_v28  ;;  %v103_v28 = vsel %vm10828_vm4, 0, %v102_v22  ;;  %v727_v26 = vsel %vm439_vm1, %v295_v37, %v583_v29  ;;  %v34_v51 = vld [vmem:[#allocation2 + $0x8] sm:$0x1] }
 0x1cd   :  { %v10769_v36 = vpop.permute.xlu1 %1511  ;;  %v7826_v12 = vcombine.low %v2327_v39, %v2329_v32  ;;  %1687 = vrot.lane.b32.xlu0 %v13673_v17, %s8887_s8  ;;  %v2267_v1 = vsel %vm2251_vm9, %v2234_v19, %v10701_v52  ;;  %v2232_v32 = vsel %vm2218_vm8, %v2199_v42, %v10673_v21  ;;  %104 = vst [vmem:[#allocation2 + $0x1c] sm:$0x1] %v103_v28  ;;  %v96_v39 = vld [vmem:[#allocation2 + $0xc] sm:$0x1]  ;;  %v105_v17 = vld [vmem:[#allocation2 + $0x24] sm:$0x1] }
 0x1ce   :  { %v2300_v4 = vsel %vm2284_vm10, %v2267_v1, %v10730_v13  ;;  %v2265_v48 = vsel %vm2251_vm9, %v2232_v32, %v10692_v33  ;;  %v728_v18 = vsel %vm440_vm6, %v296_v58, %v584_v61  ;;  %v97_v33 = vsel %vm10828_vm4, 0, %v96_v39  ;;  %v52_v19 = vld [vmem:[#allocation2 + $0x38] sm:$0x1] }
 0x1cf   :  { %1693 = vrot.lane.b32.xlu1 %v1662_v57, %s8887_s8  ;;  %8488 = vmatprep.mubr.msk.bf16.mxu0 %vm2422_vm12, %v7826_v12  ;;  %v10788_v0 = vpop.permute.xlu0 %1509  ;;  %v13676_v57 = vld [vmem:[#allocation44_spill] sm:$0xff]  ;;  %v2298_v21 = vsel %vm2284_vm10, %v2265_v48, %v10752_v35  ;;  %98 = vst [vmem:[#allocation2 + $0xc] sm:$0x1] %v97_v33  ;;  %v43_v12 = vld [vmem:[#allocation2 + $0x20] sm:$0x1]  ;;  %v106_v27 = vsel %vm10828_vm4, 0, %v105_v17  ;;  %v800_v37 = vpack.c.bf16 %v728_v18, %v727_v26 }
 0x1d0   :  { %v44_v35 = vsel %vm10814_vm0, 0, %v43_v12  ;;  %107 = vst [vmem:[#allocation2 + $0x24] sm:$0x1] %v106_v27  ;;  %v53_v42 = vsel %vm10814_vm0, 0, %v52_v19  ;;  %v13681_v18 = vld [vmem:[#allocation67_spill] sm:$0xff]  ;;  %v13683_v12 = vld [vmem:[#allocation30_spill] sm:$0xff] }
 0x1d1   :  { %v10797_v9 = vpop.permute.xlu1 %1555  ;;  %1691 = vrot.lane.b32.xlu0 %v13676_v57, %s8887_s8  ;;  %45 = vst [vmem:[#allocation2 + $0x20] sm:$0x1] %v44_v35  ;;  %v1819_v8 = vshll.u32 %v800_v37, 16  ;;  %54 = vst [vmem:[#allocation2 + $0x38] sm:$0x1] %v53_v42  ;;  %v13684_v17 = vld [vmem:[#allocation62_spill] sm:$0xff] }
 0x1d2   :  { %vm13685_vm1 = vcmask 326656  }
 0x1d3   :  { %1723 = vrot.lane.b32.xlu1 %v13653_v55, %s8888_s9  ;;  %v10822_v30 = vpop.permute.xlu0 %1553  ;;  %v41_v55 = vsel %vm10814_vm0, 0, %v40_v38  ;;  %v1821_v38 = vrot.slane %v1819_v8, 1  ;;  %vm13686_vm6 = vmmov %vm13685_vm1 }
 0x1d4   :  { %42 = vst [vmem:[#allocation2 + $0x18] sm:$0x1] %v41_v55 }
 0x1d5   :  { %v1838_v56 = vpop.permute.xlu1 %1837  ;;  %1721 = vrot.lane.b32.xlu0 %v13643_v63, %s8888_s9  ;;  %v35_v63 = vsel %vm10814_vm0, 0, %v34_v51 }
 0x1d6   :  { %v2333_v52 = vsel %vm2317_vm11, %v2300_v4, %v1838_v56  ;;  %36 = vst [vmem:[#allocation2 + $0x8] sm:$0x1] %v35_v63  ;;  %v13682_v63 = vld [vmem:[#allocation20_spill] sm:$0xff] }
 0x1d7   :  { %1727 = vrot.lane.b32.xlu1 %v10799_v45, %s8888_s9  ;;  %v1836_v13 = vpop.permute.xlu0 %1835  ;;  %v2040_v33 = vsel %vm13452_vm13, %v13682_v63, %v13681_v18 }
 0x1d8   :  { %v2331_v62 = vsel %vm2317_vm11, %v2298_v21, %v1836_v13 }
 0x1d9   :  { %v10857_v25 = vpop.permute.xlu1 %1559  ;;  %v7827_v50 = vcombine.low %v2331_v62, %v2333_v52  ;;  %1725 = vrot.lane.b32.xlu0 %v13652_v47, %s8888_s9  ;;  %v99_v47 = vld [vmem:[#allocation2 + $0x14] sm:$0x1]  ;;  %v2073_v62 = vsel %vm2053_vm14, %v2040_v33, %v10708_v16 }
 0x1da   :  { %v100_v58 = vsel %vm10828_vm4, 0, %v99_v47  ;;  %v2106_v35 = vsel %vm13453_vm15, %v2073_v62, %v10797_v9  ;;  %v117_v62 = vld [vmem:[#allocation2 + $0x44] sm:$0x1] }
 0x1db   :  { %1757 = vrot.lane.b32.xlu1 %v13659_v59, %s8889_s10  ;;  %8489 = vmatmul.mubr.msk.bf16.gmra.mxu0 %vm2422_vm12, %v7827_v50  ;;  %v10869_v34 = vpop.permute.xlu0 %1557  ;;  %101 = vst [vmem:[#allocation2 + $0x14] sm:$0x1] %v100_v58  ;;  %v1771_v59 = vshrl.u32 %v10799_v45, 16  ;;  %v1817_v45 = vshrl.u32 %v800_v37, 16  ;;  %v2038_v50 = vsel %vm13452_vm13, %v13684_v17, %v13683_v12 }
 0x1dd   :  { %v1590_v43 = vpop.permute.xlu1 %1589  ;;  %1755 = vrot.lane.b32.xlu0 %v13655_v31, %s8889_s10  ;;  %v1776_v54 = vor.u32 %v1775_v40, %v1771_v59 }
 0x1de   :  { %v2139_v20 = vsel %vm2119_vm5, %v2106_v35, %v1590_v43 }
 0x1df   :  { %1761 = vrot.lane.b32.xlu1 %v800_v37, %s8889_s10  ;;  %v1588_v11 = vpop.permute.xlu0 %1587  ;;  %v2071_v37 = vsel %vm2053_vm14, %v2038_v50, %v10724_v7  ;;  %v118_v50 = vsel %vm10828_vm4, 0, %v117_v62 }
 0x1e0   :  { %v2104_v47 = vsel %vm13453_vm15, %v2071_v37, %v10822_v30  ;;  %119 = vst [vmem:[#allocation2 + $0x44] sm:$0x1] %v118_v50  ;;  %v49_v37 = vld [vmem:[#allocation2 + $0x30] sm:$0x1] }
 0x1e1   :  { %v10879_v29 = vpop.permute.xlu1 %1593  ;;  %1759 = vrot.lane.b32.xlu0 %v13658_v14, %s8889_s10  ;;  %v2137_v46 = vsel %vm2119_vm5, %v2104_v47, %v1588_v11 }
 0x1e3   :  { %1803 = vrot.lane.b32.xlu1 %v10620_v23, %s8890_s11  ;;  %v10885_v57 = vpop.permute.xlu0 %1591  ;;  %v1822_v23 = vor.u32 %v1821_v38, %v1817_v45 }
 0x1e5   :  { %v1636_v31 = vpop.permute.xlu1 %1635  ;;  %1801 = vrot.lane.b32.xlu0 %v10559_v24, %s8890_s11 }
 0x1e6   :  { %v2172_v16 = vsel %vm13685_vm1, %v2139_v20, %v1636_v31 }
 0x1e7   :  { %1807 = vrot.lane.b32.xlu1 %v1776_v54, %s8890_s11  ;;  %v1634_v15 = vpop.permute.xlu0 %1633 }
 0x1e8   :  { %v2170_v59 = vsel %vm13686_vm6, %v2137_v46, %v1634_v15  ;;  %vm13690_vm6 = vmmov %vm13685_vm1 }
 0x1e9   :  { %v10890_v10 = vpop.permute.xlu1 %1639  ;;  %1805 = vrot.lane.b32.xlu0 %v10611_v2, %s8890_s11 }
 0x1eb   :  { %1849 = vrot.lane.b32.xlu1 %v10667_v53, %s8891_s20  ;;  %v10896_v14 = vpop.permute.xlu0 %1637  ;;  %v114_v53 = vld [vmem:[#allocation2 + $0x3c] sm:$0x1] }
 0x1ed   :  { %v1682_v61 = vpop.permute.xlu1 %1681  ;;  %1847 = vrot.lane.b32.xlu0 %v10625_v41, %s8891_s20  ;;  %v115_v41 = vsel %vm10828_vm4, 0, %v114_v53  ;;  %v13688_v53 = vld [vmem:[#allocation3_spill] sm:$0xff] }
 0x1ee   :  { %116 = vst [vmem:[#allocation2 + $0x3c] sm:$0x1] %v115_v41  ;;  %v2205_v58 = vsel %vm2185_vm7, %v2172_v16, %v1682_v61  ;;  %v13687_v61 = vld [vmem:[#allocation22_spill] sm:$0xff]  ;;  %v50_v16 = vsel %vm10814_vm0, 0, %v49_v37 }
 0x1ef   :  { %1853 = vrot.lane.b32.xlu1 %v1822_v23, %s8891_s20  ;;  %v1680_v24 = vpop.permute.xlu0 %1679  ;;  %51 = vst [vmem:[#allocation2 + $0x30] sm:$0x1] %v50_v16 }
 0x1f0   :  { %v2203_v54 = vsel %vm2185_vm7, %v2170_v59, %v1680_v24  ;;  %v2044_v24 = vsel %vm13452_vm13, %v13687_v61, %v10703_v3 }
 0x1f1   :  { %v10901_v22 = vpop.permute.xlu1 %1685  ;;  %1851 = vrot.lane.b32.xlu0 %v10653_v49, %s8891_s20  ;;  %v2077_v19 = vsel %vm2053_vm14, %v2044_v24, %v10769_v36 }
 0x1f2   :  { %v2110_v41 = vsel %vm13453_vm15, %v2077_v19, %v10857_v25 }
 0x1f3   :  { %v10905_v6 = vpop.permute.xlu0 %1683 }
 0x1f5   :  { %v1716_v2 = vpop.permute.xlu1 %1715 }
 0x1f6   :  { %v2238_v9 = vsel %vm2218_vm8, %v2205_v58, %v1716_v2 }
 0x1f7   :  { %v1714_v55 = vpop.permute.xlu0 %1713 }
 0x1f8   :  { %v2236_v8 = vsel %vm2218_vm8, %v2203_v54, %v1714_v55  ;;  %v13689_v55 = vld [vmem:[#allocation63_spill] sm:$0xff] }
 0x1f9   :  { %v10911_v1 = vpop.permute.xlu1 %1719  ;;  %v2042_v42 = vsel %vm13452_vm13, %v13689_v55, %v13688_v53 }
 0x1fa   :  { %v2075_v3 = vsel %vm2053_vm14, %v2042_v42, %v10788_v0  ;;  %v55_v0 = vld [vmem:[#allocation2 + $0x40] sm:$0x1] }
 0x1fb   :  { %v10913_v56 = vpop.permute.xlu0 %1717  ;;  %v2108_v63 = vsel %vm13453_vm15, %v2075_v3, %v10869_v34  ;;  %v56_v17 = vsel %vm10814_vm0, 0, %v55_v0  ;;  %v13692_v3 = vld [vmem:[#allocation64_spill] sm:$0xff] }
 0x1fc   :  { %57 = vst [vmem:[#allocation2 + $0x40] sm:$0x1] %v56_v17 }
 0x1fd   :  { %v1750_v28 = vpop.permute.xlu1 %1749 }
 0x1fe   :  { %v2271_v7 = vsel %vm2251_vm9, %v2238_v9, %v1750_v28 }
 0x1ff   :  { %v1748_v49 = vpop.permute.xlu0 %1747 }
 0x200   :  { %v2269_v31 = vsel %vm2251_vm9, %v2236_v8, %v1748_v49  ;;  %v46_v49 = vld [vmem:[#allocation2 + $0x28] sm:$0x1] }
 0x201   :  { %v10915_v32 = vpop.permute.xlu1 %1371  ;;  %v47_v18 = vsel %vm10814_vm0, 0, %v46_v49  ;;  %v13691_v49 = vld [vmem:[#allocation23_spill] sm:$0xff] }
 0x202   :  { %48 = vst [vmem:[#allocation2 + $0x28] sm:$0x1] %v47_v18  ;;  %v13693_v18 = vld [vmem:[#allocation25_spill] sm:$0xff] }
 0x203   :  { %v10917_v4 = vpop.permute.xlu0 %1369 }
 0x205   :  { %v10919_v48 = vpop.permute.xlu1 %1753 }
 0x207   :  { %v10921_v52 = vpop.permute.xlu0 %1751 }
 0x209   :  { %v1796_v26 = vpop.permute.xlu1 %1795 }
 0x20a   :  { %v2304_v30 = vsel %vm2284_vm10, %v2271_v7, %v1796_v26  ;;  %v108_v26 = vld [vmem:[#allocation2 + $0x2c] sm:$0x1] }
 0x20b   :  { %v1794_v51 = vpop.permute.xlu0 %1793  ;;  %v109_v25 = vsel %vm10828_vm4, 0, %v108_v26  ;;  %v2048_v26 = vsel %vm13452_vm13, %v13691_v49, %v10915_v32 }
 0x20c   :  { %v2302_v45 = vsel %vm2284_vm10, %v2269_v31, %v1794_v51  ;;  %v2143_v51 = vsel %vm2119_vm5, %v2110_v41, %v10879_v29  ;;  %110 = vst [vmem:[#allocation2 + $0x2c] sm:$0x1] %v109_v25  ;;  %v2141_v29 = vsel %vm2119_vm5, %v2108_v63, %v10885_v57  ;;  %v111_v57 = vld [vmem:[#allocation2 + $0x34] sm:$0x1] }
 0x20d   :  { %v10923_v39 = vpop.permute.xlu1 %1375  ;;  %v2176_v33 = vsel %vm13685_vm1, %v2143_v51, %v10890_v10  ;;  %v2174_v34 = vsel %vm13690_vm6, %v2141_v29, %v10896_v14  ;;  %v112_v14 = vsel %vm10828_vm4, 0, %v111_v57  ;;  %vm17_vm1 = vcmask 60416   ;;  %v13694_v63 = vld [vmem:[#allocation65_spill] sm:$0xff] }
 0x20e   :  { %v2209_v12 = vsel %vm2185_vm7, %v2176_v33, %v10901_v22  ;;  %v2207_v22 = vsel %vm2185_vm7, %v2174_v34, %v10905_v6  ;;  %113 = vst [vmem:[#allocation2 + $0x34] sm:$0x1] %v112_v14  ;;  %v2046_v51 = vsel %vm13452_vm13, %v13692_v3, %v10917_v4  ;;  %v2052_v25 = vsel %vm13452_vm13, %v13693_v18, %v10923_v39  ;;  %v2787_v18 = vld [vmem:[#allocation2 + $0x8] sm:$0xf] }
 0x20f   :  { %v10925_v21 = vpop.permute.xlu0 %1373  ;;  %v2242_v10 = vsel %vm2218_vm8, %v2209_v12, %v10911_v1  ;;  %v2240_v1 = vsel %vm2218_vm8, %v2207_v22, %v10913_v56 }
 0x210   :  { %v2275_v20 = vsel %vm2251_vm9, %v2242_v10, %v10919_v48  ;;  %v2273_v6 = vsel %vm2251_vm9, %v2240_v1, %v10921_v52  ;;  %v2050_v33 = vsel %vm13452_vm13, %v13694_v63, %v10925_v21  ;;  %vm13696_vm13 = vmmov %vm13690_vm6 }
 0x211   :  { %v10927_v13 = vpop.permute.xlu1 %1515 }
 0x212   :  { %v2081_v0 = vsel %vm2053_vm14, %v2048_v26, %v10927_v13 }
 0x213   :  { %v10939_v27 = vpop.permute.xlu0 %1513 }
 0x214   :  { %v2079_v62 = vsel %vm2053_vm14, %v2046_v51, %v10939_v27 }
 0x215   :  { %v1800_v60 = vpop.permute.xlu1 %1799 }
 0x216   :  { %v2308_v46 = vsel %vm2284_vm10, %v2275_v20, %v1800_v60 }
 0x217   :  { %v1798_v40 = vpop.permute.xlu0 %1797 }
 0x218   :  { %v2306_v48 = vsel %vm2284_vm10, %v2273_v6, %v1798_v40 }
 0x219   :  { %v1842_v43 = vpop.permute.xlu1 %1841 }
 0x21a   :  { %v2337_v11 = vsel %vm2317_vm11, %v2304_v30, %v1842_v43 }
 0x21b   :  { %v1840_v38 = vpop.permute.xlu0 %1839 }
 0x21c   :  { %v2335_v15 = vsel %vm2317_vm11, %v2302_v45, %v1840_v38 }
 0x21d   :  { %v10959_v23 = vpop.permute.xlu1 %1519  ;;  %v7828_v2 = vcombine.low %v2335_v15, %v2337_v11 }
 0x21e   :  { %v2085_v32 = vsel %vm2053_vm14, %v2052_v25, %v10959_v23  ;;  %v2790_v25 = vld [vmem:[#allocation2 + $0xc] sm:$0x1] }
 0x21f   :  { %8492 = vmatprep.mubr.msk.bf16.mxu0 %vm2422_vm12, %v7828_v2  ;;  %v10972_v28 = vpop.permute.xlu0 %1517 }
 0x220   :  { %v2083_v4 = vsel %vm2053_vm14, %v2050_v33, %v10972_v28  ;;  %vm13695_vm14 = vmmov %vm13690_vm6 }
 0x221   :  { %v10978_v36 = vpop.permute.xlu1 %1563 }
 0x222   :  { %v2114_v29 = vsel %vm13453_vm15, %v2081_v0, %v10978_v36 }
 0x223   :  { %v1562_v35 = vpop.permute.xlu0 %1561 }
 0x224   :  { %v2112_v39 = vsel %vm13453_vm15, %v2079_v62, %v1562_v35 }
 0x225   :  { %v1846_v47 = vpop.permute.xlu1 %1845 }
 0x226   :  { %v2341_v58 = vsel %vm2317_vm11, %v2308_v46, %v1846_v47 }
 0x227   :  { %v1844_v59 = vpop.permute.xlu0 %1843 }
 0x228   :  { %v2339_v9 = vsel %vm2317_vm11, %v2306_v48, %v1844_v59 }
 0x229   :  { %v1568_v54 = vpop.permute.xlu1 %1567  ;;  %v7829_v7 = vcombine.low %v2339_v9, %v2341_v58 }
 0x22a   :  { %v2118_v12 = vsel %vm13453_vm15, %v2085_v32, %v1568_v54 }
 0x22b   :  { %8493 = vmatmul.mubr.msk.bf16.gmra.mxu0 %vm2422_vm12, %v7829_v7  ;;  %v1566_v43 = vpop.permute.xlu0 %1565 }
 0x22c   :  { %v2116_v21 = vsel %vm13453_vm15, %v2083_v4, %v1566_v43  ;;  %vm13697_vm15 = vmmov %vm13690_vm6 }
 0x22d   :  { %v1598_v56 = vpop.permute.xlu1 %1597 }
 0x22e   :  { %v2147_v50 = vsel %vm2119_vm5, %v2114_v29, %v1598_v56 }
 0x22f   :  { %v1596_v8 = vpop.permute.xlu0 %1595 }
 0x230   :  { %v2145_v27 = vsel %vm2119_vm5, %v2112_v39, %v1596_v8 }
 0x231   :  { %v1602_v60 = vpop.permute.xlu1 %1601 }
 0x232   :  { %v2151_v23 = vsel %vm2119_vm5, %v2118_v12, %v1602_v60 }
 0x233   :  { %v1600_v30 = vpop.permute.xlu0 %1599 }
 0x234   :  { %v2149_v28 = vsel %vm2119_vm5, %v2116_v21, %v1600_v30  ;;  %vm13702_vm5 = vcmask 195584  }
 0x235   :  { %v1644_v31 = vpop.permute.xlu1 %1643 }
 0x236   :  { %v2180_v36 = vsel %vm13695_vm14, %v2147_v50, %v1644_v31 }
 0x237   :  { %v1642_v11 = vpop.permute.xlu0 %1641 }
 0x238   :  { %v2178_v35 = vsel %vm13690_vm6, %v2145_v27, %v1642_v11 }
 0x239   :  { %v1648_v45 = vpop.permute.xlu1 %1647 }
 0x23a   :  { %v2184_v37 = vsel %vm13696_vm13, %v2151_v23, %v1648_v45  ;;  %vm11063_vm13 = vmand %vm17_vm1, %vm91_vm3  ;;  %v2805_v23 = vld [vmem:[#allocation2 + $0x20] sm:$0xf]  ;;  %vm13700_vm3 = vcmask 64512  }
 0x23b   :  { %v1646_v52 = vpop.permute.xlu0 %1645 }
 0x23c   :  { %v2182_v22 = vsel %vm13697_vm15, %v2149_v28, %v1646_v52  ;;  %vm13701_vm15 = vcmask 130048  }
 0x23d   :  { %v1690_v38 = vpop.permute.xlu1 %1689 }
 0x23e   :  { %v2213_v20 = vsel %vm2185_vm7, %v2180_v36, %v1690_v38 }
 0x23f   :  { %v1688_v15 = vpop.permute.xlu0 %1687 }
 0x240   :  { %v2211_v14 = vsel %vm2185_vm7, %v2178_v35, %v1688_v15 }
 0x241   :  { %v1694_v61 = vpop.permute.xlu1 %1693 }
 0x242   :  { %v2217_v1 = vsel %vm2185_vm7, %v2184_v37, %v1694_v61 }
 0x243   :  { %v1692_v40 = vpop.permute.xlu0 %1691 }
 0x244   :  { %v2215_v46 = vsel %vm2185_vm7, %v2182_v22, %v1692_v40  ;;  %v2799_v40 = vld [vmem:[#allocation2 + $0x18] sm:$0xf]  ;;  %vm13703_vm7 = vmmov %vm13700_vm3 }
 0x245   :  { %v1724_v24 = vpop.permute.xlu1 %1723 }
 0x246   :  { %v2246_v6 = vsel %vm2218_vm8, %v2213_v20, %v1724_v24  ;;  %v2802_v24 = vld [vmem:[#allocation2 + $0x1c] sm:$0x1]  ;;  %v2793_v20 = vld [vmem:[#allocation2 + $0x10] sm:$0xf] }
 0x247   :  { %v1722_v2 = vpop.permute.xlu0 %1721 }
 0x248   :  { %v2244_v59 = vsel %vm2218_vm8, %v2211_v14, %v1722_v2 }
 0x249   :  { %v1728_v19 = vpop.permute.xlu1 %1727 }
 0x24a   :  { %v2250_v56 = vsel %vm2218_vm8, %v2217_v1, %v1728_v19 }
 0x24b   :  { %v1726_v53 = vpop.permute.xlu0 %1725 }
 0x24c   :  { %v2248_v8 = vsel %vm2218_vm8, %v2215_v46, %v1726_v53  ;;  %vm13704_vm8 = vmmov %vm13700_vm3 }
 0x24d   :  { %v1758_v55 = vpop.permute.xlu1 %1757 }
 0x24e   :  { %v2279_v60 = vsel %vm2251_vm9, %v2246_v6, %v1758_v55 }
 0x24f   :  { %v1756_v42 = vpop.permute.xlu0 %1755 }
 0x250   :  { %v2277_v30 = vsel %vm2251_vm9, %v2244_v59, %v1756_v42 }
 0x251   :  { %v1762_v41 = vpop.permute.xlu1 %1761 }
 0x252   :  { %v2283_v15 = vsel %vm2251_vm9, %v2250_v56, %v1762_v41 }
 0x253   :  { %v8486_v17 = vpop.f32.mrf.mxu0  ;;  %v1760_v13 = vpop.permute.xlu0 %1759 }
 0x254   :  { %v2546_v34 = vmax.f32 %v8486_v17, 0.0  ;;  %v2281_v41 = vsel %vm2251_vm9, %v2248_v8, %v1760_v13  ;;  %vm13705_vm9 = vmmov %vm13701_vm15 }
 0x255   :  { %v1804_v10 = vpop.permute.xlu1 %1803  ;;  %v2481_v57 = vpop.f32.mrf.mxu0  ;;  %vm13709_vm14 = vmmov %vm13705_vm9 }
 0x256   :  { %v8410_v47 = vpack.c.bf16 %v2546_v34, %v2546_v34  ;;  %v2544_v16 = vmax.f32 %v2481_v57, 0.0  ;;  %v2312_v19 = vsel %vm2284_vm10, %v2279_v60, %v1804_v10  ;;  %v2808_v34 = vld [vmem:[#allocation2 + $0x24] sm:$0x1] }
 0x257   :  { %v8487_v58 = vpop.f32.mrf.mxu0  ;;  %v1802_v48 = vpop.permute.xlu0 %1801 }
 0x258   :  { %v2641_v9 = vshrl.u32 %v8410_v47, 16  ;;  %v8408_v54 = vpack.c.bf16 %v2544_v16, %v2544_v16  ;;  %v2547_v7 = vmax.f32 %v8487_v58, 0.0  ;;  %v2644_v45 = vshll.u32 %v8410_v47, 16  ;;  %v2796_v47 = vld [vmem:[#allocation2 + $0x14] sm:$0x1] }
 0x259   :  { %v1808_v43 = vpop.permute.xlu1 %1807  ;;  %v2484_v31 = vpop.f32.mrf.mxu0  ;;  %v2310_v63 = vsel %vm2284_vm10, %v2277_v30, %v1802_v48  ;;  %v70_v30 = vld [vmem:[#allocation2 + $0x68] sm:$0x1] }
 0x25a   :  { %v2643_v11 = vrot.slane %v2641_v9, 7  ;;  %v2625_v52 = vshrl.u32 %v8408_v54, 16  ;;  %v8411_v38 = vpack.c.bf16 %v2547_v7, %v2547_v7  ;;  %v2628_v2 = vshll.u32 %v8408_v54, 16 }
 0x25b   :  { %v2545_v53 = vmax.f32 %v2484_v31, 0.0  ;;  %v1806_v55 = vpop.permute.xlu0 %1805  ;;  %v2316_v17 = vsel %vm2284_vm10, %v2283_v15, %v1808_v43  ;;  %v132_v31 = vld [vmem:[#allocation2 + $0x6c] sm:$0x1] }
 0x25c   :  { %v2646_v42 = vor.u32 %v2644_v45, %v2643_v11  ;;  %v2647_v49 = vrot.slane %v2643_v11, 4  ;;  %v2627_v26 = vrot.slane %v2625_v52, 7  ;;  %v2649_v3 = vshrl.u32 %v8411_v38, 16 }
 0x25d   :  { %v1850_v51 = vpop.permute.xlu1 %1849  ;;  %v8409_v33 = vpack.c.bf16 %v2545_v53, %v2545_v53  ;;  %v2652_v12 = vshll.u32 %v8411_v38, 16  ;;  %v2314_v16 = vsel %vm2284_vm10, %v2281_v41, %v1806_v55  ;;  %v71_v11 = vsel %vm10814_vm0, 0, %v70_v30  ;;  %v2814_v30 = vld [vmem:[#allocation2 + $0x2c] sm:$0x1]  ;;  %vm13706_vm10 = vmmov %vm13700_vm3 }
 0x25e   :  { %v2345_v0 = vsel %vm2317_vm11, %v2312_v19, %v1850_v51  ;;  %v2800_v62 = vsel %vm11063_vm13, %v2646_v42, %v2799_v40  ;;  %v2803_v32 = vsel %vm10814_vm0, %v2647_v49, %v2802_v24  ;;  %v2630_v4 = vor.u32 %v2628_v2, %v2627_v26  ;;  %72 = vst [vmem:[#allocation2 + $0x68] sm:$0x1] %v71_v11  ;;  %v64_v42 = vld [vmem:[#allocation2 + $0x58] sm:$0x1]  ;;  %v126_v51 = vld [vmem:[#allocation2 + $0x5c] sm:$0x1] }
 0x25f   :  { %v2631_v29 = vrot.slane %v2627_v26, 4  ;;  %2801 = vst [vmem:[#allocation2 + $0x18] sm:$0xf] %v2800_v62  ;;  %2804 = vst [vmem:[#allocation2 + $0x1c] sm:$0x1] %v2803_v32  ;;  %v2651_v39 = vrot.slane %v2649_v3, 7  ;;  %v1848_v13 = vpop.permute.xlu0 %1847 }
 0x260   :  { %v2633_v21 = vshrl.u32 %v8409_v33, 16  ;;  %v2788_v50 = vsel %vm11063_vm13, %v2630_v4, %v2787_v18  ;;  %v2636_v10 = vshll.u32 %v8409_v33, 16  ;;  %v2343_v28 = vsel %vm2317_vm11, %v2310_v63, %v1848_v13  ;;  %v135_v63 = vld [vmem:[#allocation2 + $0x74] sm:$0x1]  ;;  %v67_v4 = vld [vmem:[#allocation2 + $0x60] sm:$0x1] }
 0x261   :  { %v2791_v27 = vsel %vm10814_vm0, %v2631_v29, %v2790_v25  ;;  %v1854_v36 = vpop.permute.xlu1 %1853  ;;  %2789 = vst [vmem:[#allocation2 + $0x8] sm:$0xf] %v2788_v50  ;;  %v2654_v35 = vor.u32 %v2652_v12, %v2651_v39  ;;  %v2655_v37 = vrot.slane %v2651_v39, 4  ;;  %v7830_v22 = vcombine.low %v2343_v28, %v2345_v0  ;;  %v73_v25 = vld [vmem:[#allocation2 + $0x70] sm:$0x1] }
 0x262   :  { %2792 = vst [vmem:[#allocation2 + $0xc] sm:$0x1] %v2791_v27  ;;  %v2635_v57 = vrot.slane %v2633_v21, 7  ;;  %v2349_v14 = vsel %vm2317_vm11, %v2316_v17, %v1854_v36  ;;  %v133_v45 = vsel %vm10828_vm4, 0, %v132_v31  ;;  %v65_v3 = vsel %vm10814_vm0, 0, %v64_v42 }
 0x263   :  { %v2806_v1 = vsel %vm11063_vm13, %v2654_v35, %v2805_v23  ;;  %v2809_v46 = vsel %vm10814_vm0, %v2655_v37, %v2808_v34  ;;  %8496 = vmatprep.mubr.msk.bf16.mxu0 %vm2422_vm12, %v7830_v22  ;;  %v1852_v48 = vpop.permute.xlu0 %1851  ;;  %134 = vst [vmem:[#allocation2 + $0x6c] sm:$0x1] %v133_v45  ;;  %66 = vst [vmem:[#allocation2 + $0x58] sm:$0x1] %v65_v3  ;;  %v127_v18 = vsel %vm10828_vm4, 0, %v126_v51  ;;  %v74_v0 = vsel %vm10814_vm0, 0, %v73_v25 }
 0x264   :  { %v2638_v6 = vor.u32 %v2636_v10, %v2635_v57  ;;  %v2639_v58 = vrot.slane %v2635_v57, 4  ;;  %2807 = vst [vmem:[#allocation2 + $0x20] sm:$0xf] %v2806_v1  ;;  %2810 = vst [vmem:[#allocation2 + $0x24] sm:$0x1] %v2809_v46  ;;  %v2347_v59 = vsel %vm2317_vm11, %v2314_v16, %v1852_v48  ;;  %v136_v62 = vsel %vm10828_vm4, 0, %v135_v63 }
 0x265   :  { %v7831_v7 = vcombine.low %v2347_v59, %v2349_v14  ;;  %128 = vst [vmem:[#allocation2 + $0x5c] sm:$0x1] %v127_v18  ;;  %75 = vst [vmem:[#allocation2 + $0x70] sm:$0x1] %v74_v0  ;;  %v129_v29 = vld [vmem:[#allocation2 + $0x64] sm:$0x1] }
 0x266   :  { %v2794_v9 = vsel %vm11063_vm13, %v2638_v6, %v2793_v20  ;;  %v2797_v54 = vsel %vm10814_vm0, %v2639_v58, %v2796_v47  ;;  %v2887_v43 = vld [vmem:[#allocation2 + $0x18] sm:$0xf]  ;;  %137 = vst [vmem:[#allocation2 + $0x74] sm:$0x1] %v136_v62  ;;  %v68_v39 = vsel %vm10814_vm0, 0, %v67_v4  ;;  %v130_v12 = vsel %vm10828_vm4, 0, %v129_v29  ;;  %vm13707_vm11 = vmmov %vm13705_vm9 }
 0x267   :  { %2795 = vst [vmem:[#allocation2 + $0x10] sm:$0xf] %v2794_v9  ;;  %2798 = vst [vmem:[#allocation2 + $0x14] sm:$0x1] %v2797_v54  ;;  %8497 = vmatmul.mubr.msk.bf16.gmra.mxu0 %vm2422_vm12, %v7831_v7  ;;  %v7878_v56 = vcombine.low %v2887_v43, %v2887_v43  ;;  %v8892_v21 = vmov 0  }
 0x268   :  { %v2883_v8 = vld [vmem:[#allocation2 + $0x8] sm:$0xf]  ;;  %69 = vst [vmem:[#allocation2 + $0x60] sm:$0x1] %v68_v39  ;;  %131 = vst [vmem:[#allocation2 + $0x64] sm:$0x1] %v130_v12 }
 0x269   :  { %v7876_v60 = vcombine.low %v2883_v8, %v2883_v8  ;;  %v3058_v38 = vshrl.u32 %v7878_v56, 16  ;;  %v3061_v26 = vshll.u32 %v7878_v56, 16  ;;  %21 = vst.msk [vmem:[#allocation2 + $0x50] sm:$0xf] %vm17_vm1, %v8892_v21  ;;  %18 = vst.msk [vmem:[#allocation2] sm:$0xf] %vm17_vm1, %v8892_v21 }
 0x26a   :  { %22 = vst.msk [vmem:[#allocation2 + $0x54] sm:$0x1] %vm19_vm2, %v8892_v21  ;;  %20 = vst.msk [vmem:[#allocation2 + $0x4] sm:$0x1] %vm19_vm2, %v8892_v21  ;;  %v2823_v20 = vld [vmem:[#allocation2 + $0x38] sm:$0xf] }
 0x26b   :  { %v3044_v52 = vshrl.u32 %v7876_v60, 16  ;;  %v3047_v40 = vshll.u32 %v7876_v60, 16  ;;  %v3060_v53 = vrot.slane %v3058_v38, 7  ;;  %24 = vst.msk [vmem:[#allocation2 + $0x48] sm:$0xf] %vm17_vm1, %v8892_v21 }
 0x26c   :  { %25 = vst.msk [vmem:[#allocation2 + $0x4c] sm:$0x1] %vm19_vm2, %v8892_v21  ;;  %27 = vst.msk [vmem:[#allocation2 + $0x9c] sm:$0x1] %vm19_vm2, %v8892_v21  ;;  %v2826_v47 = vld [vmem:[#allocation2 + $0x3c] sm:$0x1] }
 0x26d   :  { %v3046_v15 = vrot.slane %v3044_v52, 7  ;;  %v3063_v33 = vor.u32 %v3061_v26, %v3060_v53  ;;  %26 = vst.msk [vmem:[#allocation2 + $0x98] sm:$0xf] %vm17_vm1, %v8892_v21  ;;  %v82_v58 = vld [vmem:[#allocation2 + $0x88] sm:$0x1]  ;;  %vm13708_vm1 = vmmov %vm13702_vm5 }
 0x26e   :  { %v2885_v24 = vld [vmem:[#allocation2 + $0x10] sm:$0xf]  ;;  %v83_v9 = vsel %vm10814_vm0, 0, %v82_v58  ;;  %v144_v54 = vld [vmem:[#allocation2 + $0x8c] sm:$0x1]  ;;  %vm13710_vm6 = vmmov %vm13708_vm1 }
 0x26f   :  { %v7877_v2 = vcombine.low %v2885_v24, %v2885_v24  ;;  %v3049_v19 = vor.u32 %v3047_v40, %v3046_v15  ;;  %84 = vst [vmem:[#allocation2 + $0x88] sm:$0x1] %v83_v9  ;;  %v2811_v60 = vld [vmem:[#allocation2 + $0x28] sm:$0xf]  ;;  %v145_v11 = vsel %vm10828_vm4, 0, %v144_v54 }
 0x270   :  { %v61_v17 = vld [vmem:[#allocation2 + $0x50] sm:$0x1]  ;;  %146 = vst [vmem:[#allocation2 + $0x8c] sm:$0x1] %v145_v11  ;;  %v2832_v42 = vld [vmem:[#allocation2 + $0x44] sm:$0x1] }
 0x271   :  { %v3051_v55 = vshrl.u32 %v7877_v2, 16  ;;  %3155 = vrot.lane.b32.xlu0 %v3049_v19, %s8878_s29  ;;  %v3054_v49 = vshll.u32 %v7877_v2, 16  ;;  %v123_v13 = vld [vmem:[#allocation2 + $0x54] sm:$0x1]  ;;  %v62_v50 = vsel %vm10814_vm0, 0, %v61_v17 }
 0x272   :  { %v124_v27 = vsel %vm10828_vm4, 0, %v123_v13  ;;  %63 = vst [vmem:[#allocation2 + $0x50] sm:$0x1] %v62_v50  ;;  %v2820_v18 = vld [vmem:[#allocation2 + $0x34] sm:$0x1] }
 0x273   :  { %v3053_v41 = vrot.slane %v3051_v55, 7  ;;  %125 = vst [vmem:[#allocation2 + $0x54] sm:$0x1] %v124_v27  ;;  %v2829_v55 = vld [vmem:[#allocation2 + $0x40] sm:$0xf] }
 0x274   :  { %v76_v62 = vld [vmem:[#allocation2 + $0x78] sm:$0x1]  ;;  %v85_v50 = vld [vmem:[#allocation2 + $0x90] sm:$0x1]  ;;  %v2923_v58 = vld [vmem:[#allocation2 + $0x20] sm:$0xf] }
 0x275   :  { %v3056_v32 = vor.u32 %v3054_v49, %v3053_v41  ;;  %3159 = vrot.lane.b32.xlu0 %v3063_v33, %s8878_s29  ;;  %v2817_v41 = vld [vmem:[#allocation2 + $0x30] sm:$0xf]  ;;  %v77_v39 = vsel %vm10814_vm0, 0, %v76_v62  ;;  %vm3651_vm12 = vsmask.f32 3328 }
 0x276   :  { %78 = vst [vmem:[#allocation2 + $0x78] sm:$0x1] %v77_v39  ;;  %vm3652_vm2 = vsmask.f32 7440 }
 0x277   :  { %3157 = vrot.lane.b32.xlu1 %v3056_v32, %s8878_s29  ;;  %v138_v32 = vld [vmem:[#allocation2 + $0x7c] sm:$0x1] }
 0x278   :  { %v139_v12 = vsel %vm10828_vm4, 0, %v138_v32 }
 0x279   :  { %140 = vst [vmem:[#allocation2 + $0x7c] sm:$0x1] %v139_v12 }
 0x29b   :  { %v8490_v23 = vpop.f32.mrf.mxu0 }
 0x29c   :  { %v2550_v34 = vmax.f32 %v8490_v23, 0.0  ;;  %v147_v23 = vld [vmem:[#allocation2 + $0x94] sm:$0x1] }
 0x29d   :  { %v2497_v10 = vpop.f32.mrf.mxu0 }
 0x29e   :  { %v8414_v28 = vpack.c.bf16 %v2550_v34, %v2550_v34  ;;  %v2548_v36 = vmax.f32 %v2497_v10, 0.0 }
 0x29f   :  { %v8491_v35 = vpop.f32.mrf.mxu0 }
 0x2a0   :  { %v2673_v37 = vshrl.u32 %v8414_v28, 16  ;;  %v8412_v57 = vpack.c.bf16 %v2548_v36, %v2548_v36  ;;  %v2551_v22 = vmax.f32 %v8491_v35, 0.0  ;;  %v2676_v1 = vshll.u32 %v8414_v28, 16 }
 0x2a1   :  { %v2500_v16 = vpop.f32.mrf.mxu0  ;;  %v86_v36 = vsel %vm10814_vm0, 0, %v85_v50 }
 0x2a2   :  { %v2675_v14 = vrot.slane %v2673_v37, 7  ;;  %v2657_v46 = vshrl.u32 %v8412_v57, 16  ;;  %v8415_v6 = vpack.c.bf16 %v2551_v22, %v2551_v22  ;;  %v2660_v48 = vshll.u32 %v8412_v57, 16  ;;  %87 = vst [vmem:[#allocation2 + $0x90] sm:$0x1] %v86_v36 }
 0x2a3   :  { %v2549_v59 = vmax.f32 %v2500_v16, 0.0  ;;  %v79_v16 = vld [vmem:[#allocation2 + $0x80] sm:$0x1]  ;;  %v93_v36 = vld [vmem:[#allocation2 + $0x4] sm:$0x1] }
 0x2a4   :  { %v2678_v7 = vor.u32 %v2676_v1, %v2675_v14  ;;  %v2679_v43 = vrot.slane %v2675_v14, 4  ;;  %v2659_v56 = vrot.slane %v2657_v46, 7  ;;  %v2681_v8 = vshrl.u32 %v8415_v6, 16  ;;  %v141_v14 = vld [vmem:[#allocation2 + $0x84] sm:$0x1] }
 0x2a5   :  { %v8413_v31 = vpack.c.bf16 %v2549_v59, %v2549_v59  ;;  %v2684_v24 = vshll.u32 %v8415_v6, 16  ;;  %v80_v9 = vsel %vm10814_vm0, 0, %v79_v16  ;;  %v142_v54 = vsel %vm10828_vm4, 0, %v141_v14 }
 0x2a6   :  { %v2824_v45 = vsel %vm11063_vm13, %v2678_v7, %v2823_v20  ;;  %v2827_v52 = vsel %vm10814_vm0, %v2679_v43, %v2826_v47  ;;  %v2662_v38 = vor.u32 %v2660_v48, %v2659_v56  ;;  %v2663_v15 = vrot.slane %v2659_v56, 4  ;;  %81 = vst [vmem:[#allocation2 + $0x80] sm:$0x1] %v80_v9  ;;  %143 = vst [vmem:[#allocation2 + $0x84] sm:$0x1] %v142_v54 }
 0x2a7   :  { %2825 = vst [vmem:[#allocation2 + $0x38] sm:$0xf] %v2824_v45  ;;  %2828 = vst [vmem:[#allocation2 + $0x3c] sm:$0x1] %v2827_v52  ;;  %v2683_v40 = vrot.slane %v2681_v8, 7  ;;  %v2665_v2 = vshrl.u32 %v8413_v31, 16  ;;  %v7912_v8 = vcombine.low %v2923_v58, %v2923_v58 }
 0x2a8   :  { %v2812_v19 = vsel %vm11063_vm13, %v2662_v38, %v2811_v60  ;;  %v2815_v53 = vsel %vm10814_vm0, %v2663_v15, %v2814_v30  ;;  %v2668_v51 = vshll.u32 %v8413_v31, 16  ;;  %v148_v20 = vsel %vm10828_vm4, 0, %v147_v23  ;;  %v2924_v30 = vld [vmem:[#allocation2 + $0x24] sm:$0x1]  ;;  %v8637_v23 = vld [vmem:[%s13357_s2 + $0x8] sm:$0xff]  }
 0x2a9   :  { %2813 = vst [vmem:[#allocation2 + $0x28] sm:$0xf] %v2812_v19  ;;  %2816 = vst [vmem:[#allocation2 + $0x2c] sm:$0x1] %v2815_v53  ;;  %v2686_v49 = vor.u32 %v2684_v24, %v2683_v40  ;;  %v2687_v26 = vrot.slane %v2683_v40, 4  ;;  %v2667_v3 = vrot.slane %v2665_v2, 7  ;;  %v7896_v38 = vcombine.low %v2923_v58, %v2924_v30  ;;  %8580 = vmatprep.subr.bf16.mxu1 %v8637_v23 }
 0x2aa   :  { %149 = vst [vmem:[#allocation2 + $0x94] sm:$0x1] %v148_v20  ;;  %v3344_v40 = vshrl.u32 %v7912_v8, 16  ;;  %8582 = vmatpush3.bf16.msra.mxu1 %v8637_v23  ;;  %8500 = vmatprep.subr.bf16.mxu0 %v8637_v23 }
 0x2ab   :  { %v2830_v25 = vsel %vm11063_vm13, %v2686_v49, %v2829_v55  ;;  %v2833_v63 = vsel %vm10814_vm0, %v2687_v26, %v2832_v42  ;;  %v2670_v33 = vor.u32 %v2668_v51, %v2667_v3  ;;  %v2671_v0 = vrot.slane %v2667_v3, 4  ;;  %8501 = vmatpush3.bf16.msra.mxu0 %v8637_v23 }
 0x2ac   :  { %2831 = vst [vmem:[#allocation2 + $0x40] sm:$0xf] %v2830_v25  ;;  %2834 = vst [vmem:[#allocation2 + $0x44] sm:$0x1] %v2833_v63  ;;  %v3346_v49 = vrot.slane %v3344_v40, 7 }
 0x2ad   :  { %v2818_v4 = vsel %vm11063_vm13, %v2670_v33, %v2817_v41  ;;  %v2821_v29 = vsel %vm10814_vm0, %v2671_v0, %v2820_v18  ;;  %v3347_v18 = vshll.u32 %v7912_v8, 16 }
 0x2ae   :  { %2819 = vst [vmem:[#allocation2 + $0x30] sm:$0xf] %v2818_v4  ;;  %2822 = vst [vmem:[#allocation2 + $0x34] sm:$0x1] %v2821_v29  ;;  %v11149_v21 = vld [vmem:[#allocation2 + $0x38] sm:$0xf] }
 0x2af   :  { %v7882_v17 = vcombine.low %v11149_v21, %v11149_v21  ;;  %v2929_v55 = vld [vmem:[#allocation2 + $0x38] sm:$0xf]  ;;  %v2930_v25 = vld [vmem:[#allocation2 + $0x3c] sm:$0x1]  ;;  %v3349_v63 = vor.u32 %v3347_v18, %v3346_v49 }
 0x2b0   :  { %v11153_v13 = vld [vmem:[#allocation2 + $0x28] sm:$0xf]  ;;  %v2926_v53 = vld [vmem:[#allocation2 + $0x2c] sm:$0x1]  ;;  %v7915_v51 = vcombine.low %v2929_v55, %v2929_v55  ;;  %v7899_v0 = vcombine.low %v2929_v55, %v2930_v25 }
 0x2b1   :  { %v7880_v27 = vcombine.low %v11153_v13, %v11153_v13  ;;  %v3086_v10 = vshrl.u32 %v7882_v17, 16  ;;  %v3089_v59 = vshll.u32 %v7882_v17, 16  ;;  %v2925_v45 = vld [vmem:[#allocation2 + $0x28] sm:$0xf] }
 0x2b2   :  { %v7913_v19 = vcombine.low %v2925_v45, %v2925_v45  ;;  %v7897_v3 = vcombine.low %v2925_v45, %v2926_v53  ;;  %v3365_v32 = vshrl.u32 %v7915_v51, 16  ;;  %v3368_v50 = vshll.u32 %v7915_v51, 16  ;;  %v2856_v51 = vld [vmem:[#allocation2 + $0x74] sm:$0x1] }
 0x2b3   :  { %v3072_v34 = vshrl.u32 %v7880_v27, 16  ;;  %v11157_v28 = vld [vmem:[#allocation2 + $0x40] sm:$0xf]  ;;  %v3075_v57 = vshll.u32 %v7880_v27, 16  ;;  %v3088_v46 = vrot.slane %v3086_v10, 7 }
 0x2b4   :  { %v7883_v35 = vcombine.low %v11157_v28, %v11157_v28  ;;  %v3351_v41 = vshrl.u32 %v7913_v19, 16  ;;  %v3354_v29 = vshll.u32 %v7913_v19, 16  ;;  %v3367_v17 = vrot.slane %v3365_v32, 7  ;;  %v31_v10 = vld [vmem:[#allocation2] sm:$0x1] }
 0x2b5   :  { %v3074_v37 = vrot.slane %v3072_v34, 7  ;;  %v11163_v22 = vld [vmem:[#allocation2 + $0x30] sm:$0xf]  ;;  %v3091_v56 = vor.u32 %v3089_v59, %v3088_v46  ;;  %v2928_v2 = vld [vmem:[#allocation2 + $0x34] sm:$0x1]  ;;  %v8641_v34 = vld [vmem:[%s13357_s2] sm:$0xff]  }
 0x2b6   :  { %v7881_v47 = vcombine.low %v11163_v22, %v11163_v22  ;;  %v3093_v48 = vshrl.u32 %v7883_v35, 16  ;;  %v2927_v11 = vld [vmem:[#allocation2 + $0x30] sm:$0xf]  ;;  %v3096_v52 = vshll.u32 %v7883_v35, 16  ;;  %v3353_v62 = vrot.slane %v3351_v41, 7  ;;  %8581 = vmatprep.subr.bf16.mxu1 %v8641_v34  ;;  %8502 = vmatprep.subr.bf16.mxu0 %v8641_v34 }
 0x2b7   :  { %v3077_v1 = vor.u32 %v3075_v57, %v3074_v37  ;;  %v7914_v15 = vcombine.low %v2927_v11, %v2927_v11  ;;  %v7898_v42 = vcombine.low %v2927_v11, %v2928_v2  ;;  %v3370_v27 = vor.u32 %v3368_v50, %v3367_v17  ;;  %8583 = vmatpush3.bf16.msra.mxu1 %v8641_v34 }
 0x2b8   :  { %v3079_v6 = vshrl.u32 %v7881_v47, 16  ;;  %v3082_v43 = vshll.u32 %v7881_v47, 16  ;;  %v3095_v31 = vrot.slane %v3093_v48, 7  ;;  %v3356_v12 = vor.u32 %v3354_v29, %v3353_v62  ;;  %8503 = vmatpush3.bf16.msra.mxu0 %v8641_v34 }
 0x2b9   :  { %3163 = vrot.lane.b32.xlu1 %v3077_v1, %s8878_s29  ;;  %v3358_v26 = vshrl.u32 %v7914_v15, 16  ;;  %v3361_v4 = vshll.u32 %v7914_v15, 16  ;;  %v32_v35 = vsel %vm10814_vm0, 0, %v31_v10  ;;  %v94_v37 = vsel %vm10828_vm4, 0, %v93_v36 }
 0x2ba   :  { %v3081_v7 = vrot.slane %v3079_v6, 7  ;;  %v3098_v24 = vor.u32 %v3096_v52, %v3095_v31  ;;  %33 = vst [vmem:[#allocation2] sm:$0x1] %v32_v35  ;;  %95 = vst [vmem:[#allocation2 + $0x4] sm:$0x1] %v94_v37 }
 0x2bb   :  { %v3360_v33 = vrot.slane %v3358_v26, 7  ;;  %v2835_v52 = vld [vmem:[#allocation2 + $0x58] sm:$0xf] }
 0x2bc   :  { %v3084_v60 = vor.u32 %v3082_v43, %v3081_v7  ;;  %v2847_v43 = vld [vmem:[#allocation2 + $0x68] sm:$0xf] }
 0x2bd   :  { %3167 = vrot.lane.b32.xlu1 %v3091_v56, %s8878_s29  ;;  %v3363_v39 = vor.u32 %v3361_v4, %v3360_v33  ;;  %v2850_v56 = vld [vmem:[#allocation2 + $0x6c] sm:$0x1]  ;;  %v2841_v33 = vld [vmem:[#allocation2 + $0x60] sm:$0xf] }
 0x2be   :  { %3165 = vrot.lane.b32.xlu0 %v3084_v60, %s8878_s29 }
 0x2c1   :  { %3275 = vrot.lane.b32.xlu1 %v7896_v38, %s8880_s25  ;;  %v2838_v38 = vld [vmem:[#allocation2 + $0x5c] sm:$0x1] }
 0x2c2   :  { %3169 = vrot.lane.b32.xlu0 %v3098_v24, %s8878_s29 }
 0x2c5   :  { %3279 = vrot.lane.b32.xlu1 %v7898_v42, %s8880_s25 }
 0x2c6   :  { %3277 = vrot.lane.b32.xlu0 %v7897_v3, %s8880_s25  ;;  %v2853_v3 = vld [vmem:[#allocation2 + $0x70] sm:$0xf] }
 0x2c9   :  { %3435 = vrot.lane.b32.xlu1 %v3349_v63, %s8882_s28 }
 0x2ca   :  { %3281 = vrot.lane.b32.xlu0 %v7899_v0, %s8880_s25  ;;  %v2844_v0 = vld [vmem:[#allocation2 + $0x64] sm:$0x1] }
 0x2cd   :  { %3439 = vrot.lane.b32.xlu1 %v3363_v39, %s8882_s28 }
 0x2ce   :  { %3437 = vrot.lane.b32.xlu0 %v3356_v12, %s8882_s28 }
 0x2d2   :  { %3441 = vrot.lane.b32.xlu0 %v3370_v27, %s8882_s28 }
 0x2eb   :  { %v8494_v57 = vpop.f32.mrf.mxu0 }
 0x2ec   :  { %v2554_v20 = vmax.f32 %v8494_v57, 0.0 }
 0x2ed   :  { %v2513_v47 = vpop.f32.mrf.mxu0 }
 0x2ee   :  { %v8418_v16 = vpack.c.bf16 %v2554_v20, %v2554_v20  ;;  %v2552_v14 = vmax.f32 %v2513_v47, 0.0 }
 0x2ef   :  { %v8495_v1 = vpop.f32.mrf.mxu0 }
 0x2f0   :  { %v2705_v46 = vshrl.u32 %v8418_v16, 16  ;;  %v8416_v6 = vpack.c.bf16 %v2552_v14, %v2552_v14  ;;  %v2555_v58 = vmax.f32 %v8495_v1, 0.0  ;;  %v2708_v9 = vshll.u32 %v8418_v16, 16 }
 0x2f1   :  { %v2516_v48 = vpop.f32.mrf.mxu0 }
 0x2f2   :  { %v2707_v59 = vrot.slane %v2705_v46, 7  ;;  %v2689_v54 = vshrl.u32 %v8416_v6, 16  ;;  %v8419_v7 = vpack.c.bf16 %v2555_v58, %v2555_v58  ;;  %v2692_v8 = vshll.u32 %v8416_v6, 16  ;;  %v2931_v46 = vld [vmem:[#allocation2 + $0x50] sm:$0xf] }
 0x2f3   :  { %v2553_v60 = vmax.f32 %v2516_v48, 0.0  ;;  %v7916_v48 = vcombine.low %v2931_v46, %v2931_v46 }
 0x2f4   :  { %v2710_v30 = vor.u32 %v2708_v9, %v2707_v59  ;;  %v2711_v31 = vrot.slane %v2707_v59, 4  ;;  %v2691_v11 = vrot.slane %v2689_v54, 7  ;;  %v2713_v45 = vshrl.u32 %v8419_v7, 16  ;;  %v2932_v54 = vld [vmem:[#allocation2 + $0x54] sm:$0x1] }
 0x2f5   :  { %v8417_v15 = vpack.c.bf16 %v2553_v60, %v2553_v60  ;;  %v2716_v55 = vshll.u32 %v8419_v7, 16  ;;  %v7900_v60 = vcombine.low %v2931_v46, %v2932_v54  ;;  %v2871_v54 = vld [vmem:[#allocation2 + $0x88] sm:$0xf] }
 0x2f6   :  { %v2848_v40 = vsel %vm11063_vm13, %v2710_v30, %v2847_v43  ;;  %v2851_v24 = vsel %vm10814_vm0, %v2711_v31, %v2850_v56  ;;  %v2694_v2 = vor.u32 %v2692_v8, %v2691_v11  ;;  %v2695_v19 = vrot.slane %v2691_v11, 4 }
 0x2f7   :  { %2849 = vst [vmem:[#allocation2 + $0x68] sm:$0xf] %v2848_v40  ;;  %2852 = vst [vmem:[#allocation2 + $0x6c] sm:$0x1] %v2851_v24  ;;  %v2715_v53 = vrot.slane %v2713_v45, 7  ;;  %v2697_v42 = vshrl.u32 %v8417_v15, 16 }
 0x2f8   :  { %v2836_v49 = vsel %vm11063_vm13, %v2694_v2, %v2835_v52  ;;  %v2839_v26 = vsel %vm10814_vm0, %v2695_v19, %v2838_v38  ;;  %v2700_v63 = vshll.u32 %v8417_v15, 16  ;;  %v3372_v31 = vshrl.u32 %v7916_v48, 16 }
 0x2f9   :  { %2837 = vst [vmem:[#allocation2 + $0x58] sm:$0xf] %v2836_v49  ;;  %2840 = vst [vmem:[#allocation2 + $0x5c] sm:$0x1] %v2839_v26  ;;  %v2718_v41 = vor.u32 %v2716_v55, %v2715_v53  ;;  %v2719_v18 = vrot.slane %v2715_v53, 4  ;;  %v2699_v25 = vrot.slane %v2697_v42, 7 }
 0x2fa   :  { %v3374_v24 = vrot.slane %v3372_v31, 7  ;;  %v3375_v2 = vshll.u32 %v7916_v48, 16 }
 0x2fb   :  { %v2854_v62 = vsel %vm11063_vm13, %v2718_v41, %v2853_v3  ;;  %v2857_v32 = vsel %vm10814_vm0, %v2719_v18, %v2856_v51  ;;  %v2702_v4 = vor.u32 %v2700_v63, %v2699_v25  ;;  %v2703_v29 = vrot.slane %v2699_v25, 4 }
 0x2fc   :  { %2855 = vst [vmem:[#allocation2 + $0x70] sm:$0xf] %v2854_v62  ;;  %2858 = vst [vmem:[#allocation2 + $0x74] sm:$0x1] %v2857_v32  ;;  %v3377_v3 = vor.u32 %v3375_v2, %v3374_v24 }
 0x2fd   :  { %v2842_v39 = vsel %vm11063_vm13, %v2702_v4, %v2841_v33  ;;  %v2845_v12 = vsel %vm10814_vm0, %v2703_v29, %v2844_v0 }
 0x2fe   :  { %2843 = vst [vmem:[#allocation2 + $0x60] sm:$0xf] %v2842_v39  ;;  %2846 = vst [vmem:[#allocation2 + $0x64] sm:$0x1] %v2845_v12  ;;  %v11211_v17 = vld [vmem:[#allocation2 + $0x68] sm:$0xf]  ;;  %v11239_v12 = vpop.permute.xlu0 %3155 }
 0x2ff   :  { %v7886_v50 = vcombine.low %v11211_v17, %v11211_v17  ;;  %v2937_v19 = vld [vmem:[#allocation2 + $0x68] sm:$0xf]  ;;  %v2938_v51 = vld [vmem:[#allocation2 + $0x6c] sm:$0x1] }
 0x300   :  { %v11215_v27 = vld [vmem:[#allocation2 + $0x58] sm:$0xf]  ;;  %v2934_v40 = vld [vmem:[#allocation2 + $0x5c] sm:$0x1]  ;;  %v7919_v49 = vcombine.low %v2937_v19, %v2937_v19  ;;  %v7903_v18 = vcombine.low %v2937_v19, %v2938_v51  ;;  %v2877_v51 = vld [vmem:[#allocation2 + $0x90] sm:$0xf] }
 0x301   :  { %v7884_v23 = vcombine.low %v11215_v27, %v11215_v27  ;;  %v3114_v10 = vshrl.u32 %v7886_v50, 16  ;;  %v3117_v58 = vshll.u32 %v7886_v50, 16  ;;  %v2933_v30 = vld [vmem:[#allocation2 + $0x58] sm:$0xf]  ;;  %v11241_v50 = vpop.permute.xlu1 %3157 }
 0x302   :  { %v7917_v15 = vcombine.low %v2933_v30, %v2933_v30  ;;  %v7901_v42 = vcombine.low %v2933_v30, %v2934_v40  ;;  %v3393_v63 = vshrl.u32 %v7919_v49, 16  ;;  %v3396_v29 = vshll.u32 %v7919_v49, 16 }
 0x303   :  { %v3100_v34 = vshrl.u32 %v7884_v23, 16  ;;  %v11219_v36 = vld [vmem:[#allocation2 + $0x70] sm:$0xf]  ;;  %v3103_v57 = vshll.u32 %v7884_v23, 16  ;;  %v3116_v14 = vrot.slane %v3114_v10, 7 }
 0x304   :  { %v7887_v35 = vcombine.low %v11219_v36, %v11219_v36  ;;  %v3379_v26 = vshrl.u32 %v7917_v15, 16  ;;  %v3382_v0 = vshll.u32 %v7917_v15, 16  ;;  %v3395_v4 = vrot.slane %v3393_v63, 7 }
 0x305   :  { %v3102_v37 = vrot.slane %v3100_v34, 7  ;;  %v11223_v20 = vld [vmem:[#allocation2 + $0x60] sm:$0xf]  ;;  %v3119_v7 = vor.u32 %v3117_v58, %v3116_v14  ;;  %v2936_v38 = vld [vmem:[#allocation2 + $0x64] sm:$0x1] }
 0x306   :  { %v7885_v47 = vcombine.low %v11223_v20, %v11223_v20  ;;  %v3121_v6 = vshrl.u32 %v7887_v35, 16  ;;  %v2935_v8 = vld [vmem:[#allocation2 + $0x60] sm:$0xf]  ;;  %v3124_v11 = vshll.u32 %v7887_v35, 16  ;;  %v3381_v25 = vrot.slane %v3379_v26, 7 }
 0x307   :  { %v3105_v16 = vor.u32 %v3103_v57, %v3102_v37  ;;  %v7918_v45 = vcombine.low %v2935_v8, %v2935_v8  ;;  %v7902_v53 = vcombine.low %v2935_v8, %v2936_v38  ;;  %v3398_v39 = vor.u32 %v3396_v29, %v3395_v4  ;;  %v2862_v38 = vld [vmem:[#allocation2 + $0x7c] sm:$0x1]  ;;  %v2868_v4 = vld [vmem:[#allocation2 + $0x84] sm:$0x1] }
 0x308   :  { %v3107_v1 = vshrl.u32 %v7885_v47, 16  ;;  %v3110_v9 = vshll.u32 %v7885_v47, 16  ;;  %v3123_v56 = vrot.slane %v3121_v6, 7  ;;  %v3384_v32 = vor.u32 %v3382_v0, %v3381_v25  ;;  %v2892_v25 = vld [vmem:[#allocation2 + $0x2c] sm:$0x1] }
 0x309   :  { %3171 = vrot.lane.b32.xlu1 %v3105_v16, %s8878_s29  ;;  %v3386_v55 = vshrl.u32 %v7918_v45, 16  ;;  %v3389_v33 = vshll.u32 %v7918_v45, 16  ;;  %v11245_v16 = vpop.permute.xlu0 %3159 }
 0x30a   :  { %v3109_v59 = vrot.slane %v3107_v1, 7  ;;  %v3126_v52 = vor.u32 %v3124_v11, %v3123_v56 }
 0x30b   :  { %v3388_v41 = vrot.slane %v3386_v55, 7 }
 0x30c   :  { %v3112_v43 = vor.u32 %v3110_v9, %v3109_v59 }
 0x30d   :  { %3175 = vrot.lane.b32.xlu1 %v3119_v7, %s8878_s29  ;;  %v3391_v62 = vor.u32 %v3389_v33, %v3388_v41  ;;  %v2874_v7 = vld [vmem:[#allocation2 + $0x8c] sm:$0x1]  ;;  %v2880_v41 = vld [vmem:[#allocation2 + $0x94] sm:$0x1] }
 0x30e   :  { %3173 = vrot.lane.b32.xlu0 %v3112_v43, %s8878_s29 }
 0x311   :  { %3283 = vrot.lane.b32.xlu1 %v7900_v60, %s8880_s25 }
 0x312   :  { %3177 = vrot.lane.b32.xlu0 %v3126_v52, %s8878_s29  ;;  %v2859_v52 = vld [vmem:[#allocation2 + $0x78] sm:$0xf] }
 0x315   :  { %3287 = vrot.lane.b32.xlu1 %v7902_v53, %s8880_s25 }
 0x316   :  { %3285 = vrot.lane.b32.xlu0 %v7901_v42, %s8880_s25 }
 0x319   :  { %3443 = vrot.lane.b32.xlu1 %v3377_v3, %s8882_s28 }
 0x31a   :  { %3289 = vrot.lane.b32.xlu0 %v7903_v18, %s8880_s25 }
 0x31d   :  { %3447 = vrot.lane.b32.xlu1 %v3391_v62, %s8882_s28 }
 0x31e   :  { %3445 = vrot.lane.b32.xlu0 %v3384_v32, %s8882_s28  ;;  %v2865_v32 = vld [vmem:[#allocation2 + $0x80] sm:$0xf] }
 0x322   :  { %3449 = vrot.lane.b32.xlu0 %v3398_v39, %s8882_s28 }
 0x327   :  { %v8498_v23 = vpop.f32.mrf.mxu0 }
 0x328   :  { %v2558_v34 = vmax.f32 %v8498_v23, 0.0 }
 0x329   :  { %v2529_v10 = vpop.f32.mrf.mxu0 }
 0x32a   :  { %v8422_v35 = vpack.c.bf16 %v2558_v34, %v2558_v34  ;;  %v2556_v37 = vmax.f32 %v2529_v10, 0.0 }
 0x32b   :  { %v11243_v57 = vpop.permute.xlu1 %3163  ;;  %v8499_v47 = vpop.f32.mrf.mxu0 }
 0x32c   :  { %v2737_v14 = vshrl.u32 %v8422_v35, 16  ;;  %v8420_v1 = vpack.c.bf16 %v2556_v37, %v2556_v37  ;;  %v2559_v46 = vmax.f32 %v8499_v47, 0.0  ;;  %v2740_v48 = vshll.u32 %v8422_v35, 16  ;;  %v11263_v35 = vld [vmem:[#allocation2 + $0x70] sm:$0xf] }
 0x32d   :  { %v2532_v6 = vpop.f32.mrf.mxu0  ;;  %v7864_v37 = vcombine.low %v11153_v13, %v2892_v25  ;;  %v11276_v13 = vcombine.low %v11263_v35, %v11263_v35 }
 0x32e   :  { %v2739_v58 = vrot.slane %v2737_v14, 7  ;;  %v2721_v59 = vshrl.u32 %v8420_v1, 16  ;;  %v2557_v9 = vmax.f32 %v2532_v6, 0.0  ;;  %v2724_v43 = vshll.u32 %v8420_v1, 16  ;;  %v2894_v6 = vld [vmem:[#allocation2 + $0x34] sm:$0x1] }
 0x32f   :  { %v8423_v56 = vpack.c.bf16 %v2559_v46, %v2559_v46  ;;  %v11247_v8 = vpop.permute.xlu1 %3167  ;;  %v2896_v46 = vld [vmem:[#allocation2 + $0x3c] sm:$0x1] }
 0x330   :  { %v2742_v60 = vor.u32 %v2740_v48, %v2739_v58  ;;  %v2743_v30 = vrot.slane %v2739_v58, 4  ;;  %v2723_v31 = vrot.slane %v2721_v59, 7  ;;  %v8421_v11 = vpack.c.bf16 %v2557_v9, %v2557_v9  ;;  %v11249_v45 = vpop.permute.xlu0 %3165  ;;  %v2898_v58 = vld [vmem:[#allocation2 + $0x44] sm:$0x1]  ;;  %v11272_v9 = vld [vmem:[#allocation2 + $0x74] sm:$0x1] }
 0x331   :  { %v2745_v15 = vshrl.u32 %v8423_v56, 16  ;;  %v2748_v55 = vshll.u32 %v8423_v56, 16  ;;  %v3473_v48 = vsel %vm13700_vm3, %v7864_v37, %v11243_v57  ;;  %v7865_v56 = vcombine.low %v11163_v22, %v2894_v6  ;;  %vm11304_vm3 = vmor %vm3651_vm12, %vm3652_vm2 }
 0x332   :  { %v2872_v40 = vsel %vm11063_vm13, %v2742_v60, %v2871_v54  ;;  %v2875_v24 = vsel %vm10814_vm0, %v2743_v30, %v2874_v7  ;;  %v2726_v2 = vor.u32 %v2724_v43, %v2723_v31  ;;  %v2727_v19 = vrot.slane %v2723_v31, 4  ;;  %vm13720_vm12 = vmmov %vm13703_vm7 }
 0x333   :  { %2873 = vst [vmem:[#allocation2 + $0x88] sm:$0xf] %v2872_v40  ;;  %2876 = vst [vmem:[#allocation2 + $0x8c] sm:$0x1] %v2875_v24  ;;  %v2747_v53 = vrot.slane %v2745_v15, 7  ;;  %v2729_v42 = vshrl.u32 %v8421_v11, 16  ;;  %v3276_v49 = vpop.permute.xlu1 %3275  ;;  %v7866_v43 = vcombine.low %v11149_v21, %v2896_v46  ;;  %v7867_v60 = vcombine.low %v11157_v28, %v2898_v58 }
 0x334   :  { %v2860_v26 = vsel %vm11063_vm13, %v2726_v2, %v2859_v52  ;;  %v2863_v3 = vsel %vm10814_vm0, %v2727_v19, %v2862_v38  ;;  %v3170_v18 = vpop.permute.xlu0 %3169  ;;  %v2732_v62 = vshll.u32 %v8421_v11, 16  ;;  %v3516_v61 = vsel %vm13701_vm15, %v3473_v48, %v3276_v49  ;;  %vm13721_vm2 = vmmov %vm13708_vm1 }
 0x335   :  { %2861 = vst [vmem:[#allocation2 + $0x78] sm:$0xf] %v2860_v26  ;;  %2864 = vst [vmem:[#allocation2 + $0x7c] sm:$0x1] %v2863_v3  ;;  %v2750_v63 = vor.u32 %v2748_v55, %v2747_v53  ;;  %v2751_v33 = vrot.slane %v2747_v53, 4  ;;  %v2731_v0 = vrot.slane %v2729_v42, 7  ;;  %v7904_v15 = vcombine.low %v11263_v35, %v11272_v9 }
 0x336   :  { %v3479_v40 = vsel %vm13703_vm7, %v7866_v43, %v11247_v8  ;;  %v3476_v21 = vsel %vm13704_vm8, %v7865_v56, %v11249_v45  ;;  %v3400_v22 = vshrl.u32 %v11276_v13, 16  ;;  %v3482_v42 = vsel %vm13706_vm10, %v7867_v60, %v3170_v18  ;;  %vm13716_vm8 = vmmov %vm13705_vm9 }
 0x337   :  { %v2878_v29 = vsel %vm11063_vm13, %v2750_v63, %v2877_v51  ;;  %v2881_v39 = vsel %vm10814_vm0, %v2751_v33, %v2880_v41  ;;  %v2734_v23 = vor.u32 %v2732_v62, %v2731_v0  ;;  %v2735_v34 = vrot.slane %v2731_v0, 4  ;;  %v3280_v10 = vpop.permute.xlu1 %3279  ;;  %vm13718_vm10 = vmmov %vm13703_vm7 }
 0x338   :  { %2879 = vst [vmem:[#allocation2 + $0x90] sm:$0xf] %v2878_v29  ;;  %2882 = vst [vmem:[#allocation2 + $0x94] sm:$0x1] %v2881_v39  ;;  %v3278_v47 = vpop.permute.xlu0 %3277  ;;  %v3520_v28 = vsel %vm13705_vm9, %v3479_v40, %v3280_v10  ;;  %v3402_v35 = vrot.slane %v3400_v22, 7  ;;  %vm13714_vm15 = vcmask 261120  }
 0x339   :  { %v2866_v14 = vsel %vm11063_vm13, %v2734_v23, %v2865_v32  ;;  %v2869_v1 = vsel %vm10814_vm0, %v2735_v34, %v2868_v4  ;;  %v3518_v49 = vsel %vm13707_vm11, %v3476_v21, %v3278_v47  ;;  %vm13711_vm13 = vmmov %vm13708_vm1 }
 0x33a   :  { %2867 = vst [vmem:[#allocation2 + $0x80] sm:$0xf] %v2866_v14  ;;  %2870 = vst [vmem:[#allocation2 + $0x84] sm:$0x1] %v2869_v1  ;;  %v2911_v59 = vld [vmem:[#allocation2 + $0x88] sm:$0xf] }
 0x33b   :  { %v3436_v54 = vpop.permute.xlu1 %3435  ;;  %v7890_v7 = vcombine.low %v2911_v59, %v2911_v59  ;;  %vm13717_vm9 = vmmov %vm13708_vm1 }
 0x33c   :  { %v3548_v57 = vsel %vm13702_vm5, %v3516_v61, %v3436_v54  ;;  %v3282_v30 = vpop.permute.xlu0 %3281  ;;  %v2907_v31 = vld [vmem:[#allocation2 + $0x78] sm:$0xf]  ;;  %vm13715_vm5 = vmmov %vm13714_vm15 }
 0x33d   :  { %v7932_v11 = vcombine.low %v3548_v57, %v3548_v57  ;;  %v7933_v52 = vcombine.high %v3548_v57, %v3548_v57  ;;  %v7888_v38 = vcombine.low %v2907_v31, %v2907_v31  ;;  %v3142_v24 = vshrl.u32 %v7890_v7, 16  ;;  %vm13719_vm11 = vmmov %vm13716_vm8 }
 0x33e   :  { %v3145_v3 = vshll.u32 %v7890_v7, 16  ;;  %v3522_v51 = vsel %vm13709_vm14, %v3482_v42, %v3282_v30  ;;  %vm13723_vm14 = vmmov %vm13721_vm2 }
 0x33f   :  { %v3711_v2 = vshrl.u32 %v7932_v11, 16  ;;  %v3714_v19 = vshll.u32 %v7932_v11, 16  ;;  %v3440_v53 = vpop.permute.xlu1 %3439  ;;  %v3128_v55 = vshrl.u32 %v7888_v38, 16  ;;  %v11294_v45 = vshll.u32 %v7933_v52, 16  ;;  %v2913_v33 = vld [vmem:[#allocation2 + $0x90] sm:$0xf] }
 0x340   :  { %v3552_v8 = vsel %vm13708_vm1, %v3520_v28, %v3440_v53  ;;  %v3438_v26 = vpop.permute.xlu0 %3437  ;;  %v3131_v25 = vshll.u32 %v7888_v38, 16  ;;  %v3144_v32 = vrot.slane %v3142_v24, 7  ;;  %v7891_v14 = vcombine.low %v2913_v33, %v2913_v33  ;;  %vm13722_vm1 = vmmov %vm13716_vm8 }
 0x341   :  { %v7936_v41 = vcombine.low %v3552_v8, %v3552_v8  ;;  %v2909_v63 = vld [vmem:[#allocation2 + $0x80] sm:$0xf]  ;;  %v3713_v0 = vrot.slane %v3711_v2, 4  ;;  %v3550_v62 = vsel %vm13710_vm6, %v3518_v49, %v3438_v26  ;;  %v3130_v18 = vrot.slane %v3128_v55, 7  ;;  %vm13724_vm6 = vmmov %vm13703_vm7 }
 0x342   :  { %v3716_v4 = vrot.slane %v3714_v19, 5  ;;  %v7934_v23 = vcombine.low %v3550_v62, %v3550_v62  ;;  %v7935_v34 = vcombine.high %v3550_v62, %v3550_v62  ;;  %v7889_v47 = vcombine.low %v2909_v63, %v2909_v63  ;;  %v2943_v53 = vld [vmem:[#allocation2 + $0x80] sm:$0xf]  ;;  %v11309_v63 = vld [vmem:[#allocation2 + $0xc] sm:$0x1] }
 0x343   :  { %v3739_v29 = vshrl.u32 %v7936_v41, 16  ;;  %v3742_v39 = vshll.u32 %v7936_v41, 16  ;;  %v3133_v37 = vor.u32 %v3131_v25, %v3130_v18  ;;  %v7937_v48 = vcombine.high %v3552_v8, %v3552_v8  ;;  %v2944_v62 = vld [vmem:[#allocation2 + $0x84] sm:$0x1] }
 0x344   :  { %v3442_v10 = vpop.permute.xlu0 %3441  ;;  %v3725_v6 = vshrl.u32 %v7934_v23, 16  ;;  %v3728_v58 = vshll.u32 %v7934_v23, 16  ;;  %v3147_v61 = vor.u32 %v3145_v3, %v3144_v32  ;;  %v3135_v54 = vshrl.u32 %v7889_v47, 16  ;;  %v2941_v3 = vld [vmem:[#allocation2 + $0x78] sm:$0xf] }
 0x345   :  { %v3741_v1 = vrot.slane %v3739_v29, 4  ;;  %v3744_v46 = vrot.slane %v3742_v39, 5  ;;  %v3554_v59 = vsel %vm13711_vm13, %v3522_v51, %v3442_v10  ;;  %3179 = vrot.lane.b32.xlu1 %v3133_v37, %s8878_s29  ;;  %v3717_v7 = vor.u32 %v3716_v4, %v3713_v0  ;;  %v4179_v32 = vld [vmem:[#allocation2 + $0x8] sm:$0xf]  ;;  %vm13725_vm13 = vmmov %vm13722_vm1 }
 0x346   :  { %v3727_v43 = vrot.slane %v3725_v6, 4  ;;  %v3730_v56 = vrot.slane %v3728_v58, 5  ;;  %v7938_v60 = vcombine.low %v3554_v59, %v3554_v59  ;;  %v3734_v57 = vshll.u32 %v7935_v34, 16  ;;  %v2945_v34 = vld [vmem:[#allocation2 + $0x88] sm:$0xf] }
 0x347   :  { %v7939_v30 = vcombine.high %v3554_v59, %v3554_v59  ;;  %v3137_v31 = vrot.slane %v3135_v54, 7  ;;  %v3138_v11 = vshll.u32 %v7889_v47, 16  ;;  %v3745_v52 = vor.u32 %v3744_v46, %v3741_v1  ;;  %v2942_v1 = vld [vmem:[#allocation2 + $0x7c] sm:$0x1] }
 0x348   :  { %v3731_v38 = vor.u32 %v3730_v56, %v3727_v43  ;;  %v3753_v40 = vshrl.u32 %v7938_v60, 16  ;;  %v3756_v21 = vshll.u32 %v7938_v60, 16  ;;  %v3722_v24 = vrot.slane %v11294_v45, 5  ;;  %v11329_v59 = vld [vmem:[#allocation2 + $0x1c] sm:$0x1] }
 0x349   :  { %v3748_v28 = vshll.u32 %v7937_v48, 16  ;;  %3183 = vrot.lane.b32.xlu1 %v3147_v61, %s8878_s29  ;;  %v3140_v2 = vor.u32 %v3138_v11, %v3137_v31  ;;  %v3149_v19 = vshrl.u32 %v7891_v14, 16  ;;  %v3762_v8 = vshll.u32 %v7939_v30, 16  ;;  %v4181_v61 = vld [vmem:[#allocation2 + $0x18] sm:$0xf] }
 0x34a   :  { %v3755_v42 = vrot.slane %v3753_v40, 4  ;;  %v3758_v49 = vrot.slane %v3756_v21, 5  ;;  %v3718_v26 = vrot.slane %v3717_v7, 4  ;;  %v3736_v51 = vrot.slane %v3734_v57, 5  ;;  %v11332_v56 = vld [vmem:[#allocation2 + $0x14] sm:$0x1] }
 0x34b   :  { %3181 = vrot.lane.b32.xlu0 %v3140_v2, %s8878_s29  ;;  %v3151_v45 = vrot.slane %v3149_v19, 7  ;;  %v3152_v41 = vshll.u32 %v7891_v14, 16  ;;  %v3732_v25 = vrot.slane %v3731_v38, 4  ;;  %v3746_v33 = vrot.slane %v3745_v52, 4  ;;  %v4180_v60 = vld [vmem:[#allocation2 + $0x10] sm:$0xf] }
 0x34c   :  { %v3759_v0 = vor.u32 %v3758_v49, %v3755_v42  ;;  %v7922_v18 = vcombine.low %v2943_v53, %v2943_v53  ;;  %v3723_v29 = vsel %vm11304_vm3, %v3718_v26, %v3722_v24  ;;  %v7921_v23 = vcombine.low %v2941_v3, %v2941_v3  ;;  %v2946_v57 = vld [vmem:[#allocation2 + $0x8c] sm:$0x1]  ;;  %v4182_v2 = vld [vmem:[#allocation2 + $0x20] sm:$0xf] }
 0x34d   :  { %3291 = vrot.lane.b32.xlu1 %v7904_v15, %s8880_s25  ;;  %v3154_v4 = vor.u32 %v3152_v41, %v3151_v45  ;;  %v3737_v39 = vsel %vm11304_vm3, %v3732_v25, %v3736_v51  ;;  %v3750_v10 = vrot.slane %v3748_v28, 5  ;;  %v3764_v47 = vrot.slane %v3762_v8, 5  ;;  %v11339_v28 = vld [vmem:[#allocation2 + $0x24] sm:$0x1]  ;;  %v4227_v41 = vld [vmem:[#allocation2] sm:$0xf] }
 0x34e   :  { %v3760_v37 = vrot.slane %v3759_v0, 4  ;;  %v7958_v14 = vcombine.low %v3723_v29, %v3737_v39  ;;  %v7906_v46 = vcombine.low %v2943_v53, %v2944_v62  ;;  %v3414_v9 = vshrl.u32 %v7922_v18, 16 }
 0x34f   :  { %3185 = vrot.lane.b32.xlu0 %v3154_v4, %s8878_s29  ;;  %v7990_v15 = vcombine.low %v4179_v32, %v11309_v63  ;;  %v3751_v6 = vsel %vm11304_vm3, %v3746_v33, %v3750_v10  ;;  %v3403_v48 = vshll.u32 %v11276_v13, 16  ;;  %v7905_v54 = vcombine.low %v2941_v3, %v2942_v1 }
 0x350   :  { %v3765_v58 = vsel %vm11304_vm3, %v3760_v37, %v3764_v47  ;;  %8508 = vmatprep.mubr.msk.bf16.mxu1 %vm13714_vm15, %v7958_v14  ;;  %v7923_v7 = vcombine.low %v2945_v34, %v2945_v34  ;;  %v3407_v43 = vshrl.u32 %v7921_v23, 16  ;;  %v3416_v31 = vrot.slane %v3414_v9, 7  ;;  %v4200_v37 = vld [vmem:[#allocation2 + $0x14] sm:$0x1]  ;;  %v4229_v47 = vld [vmem:[#allocation2 + $0x10] sm:$0xf]  ;;  %vm13726_vm15 = vmmov %vm13721_vm2 }
 0x351   :  { %3295 = vrot.lane.b32.xlu1 %v7906_v46, %s8880_s25  ;;  %v7959_v22 = vcombine.low %v3751_v6, %v3765_v58  ;;  %v3405_v30 = vor.u32 %v3403_v48, %v3402_v35  ;;  %v4372_v13 = vshrl.u32 %v7990_v15, 16  ;;  %v7992_v11 = vcombine.low %v4181_v61, %v11329_v59  ;;  %v4198_v9 = vld [vmem:[#allocation2 + $0xc] sm:$0x1]  ;;  %v4199_v48 = vld [vmem:[#allocation2 + $0x10] sm:$0xe] }
 0x352   :  { %v7991_v52 = vcombine.low %v4180_v60, %v11332_v56  ;;  %v7907_v38 = vcombine.low %v2945_v34, %v2946_v57  ;;  %v3417_v40 = vshll.u32 %v7922_v18, 16  ;;  %v3409_v21 = vrot.slane %v3407_v43, 7  ;;  %v4196_v18 = vld [vmem:[#allocation2 + $0x4] sm:$0x1]  ;;  %v4156_v61 = vld [vmem:[#allocation2 + $0x2c] sm:$0x1] }
 0x353   :  { %3293 = vrot.lane.b32.xlu0 %v7905_v54, %s8880_s25  ;;  %8509 = vmatmul.mubr.msk.bf16.vlgmr.msra.gmra.mxu1 %vm13715_vm5, %v7959_v22  ;;  %v3421_v24 = vshrl.u32 %v7923_v7, 16  ;;  %v3410_v53 = vshll.u32 %v7921_v23, 16  ;;  %v4374_v42 = vrot.slane %v4372_v13, 7  ;;  %v4386_v49 = vshrl.u32 %v7992_v11, 16  ;;  %v4195_v23 = vld [vmem:[#allocation2] sm:$0xe] }
 0x354   :  { %v3419_v19 = vor.u32 %v3417_v40, %v3416_v31  ;;  %v4375_v8 = vshll.u32 %v7990_v15, 16  ;;  %v4379_v51 = vshrl.u32 %v7991_v52, 16  ;;  %v7993_v45 = vcombine.low %v4182_v2, %v11339_v28  ;;  %v4228_v15 = vld [vmem:[#allocation2 + $0x8] sm:$0xf]  ;;  %v4202_v57 = vld [vmem:[#allocation2 + $0x1c] sm:$0x1] }
 0x355   :  { %3451 = vrot.lane.b32.xlu1 %v3405_v30, %s8882_s28  ;;  %v3412_v26 = vor.u32 %v3410_v53, %v3409_v21  ;;  %v3423_v3 = vrot.slane %v3421_v24, 7  ;;  %v3424_v33 = vshll.u32 %v7923_v7, 16  ;;  %v4388_v0 = vrot.slane %v4386_v49, 7  ;;  %v4183_v54 = vld [vmem:[#allocation2 + $0x28] sm:$0xf] }
 0x356   :  { %v4377_v25 = vor.u32 %v4375_v8, %v4374_v42  ;;  %v4389_v62 = vshll.u32 %v7992_v11, 16  ;;  %v4381_v4 = vrot.slane %v4379_v51, 7  ;;  %v8022_v29 = vcombine.low %v4227_v41, %v4196_v18  ;;  %v4230_v30 = vld [vmem:[#allocation2 + $0x18] sm:$0xf]  ;;  %v4197_v31 = vld [vmem:[#allocation2 + $0x8] sm:$0xe] }
 0x357   :  { %3297 = vrot.lane.b32.xlu0 %v7907_v38, %s8880_s25  ;;  %v3426_v32 = vor.u32 %v3424_v33, %v3423_v3  ;;  %v4393_v39 = vshrl.u32 %v7993_v45, 16  ;;  %v4382_v10 = vshll.u32 %v7991_v52, 16  ;;  %v8006_v1 = vcombine.low %v4195_v23, %v4196_v18  ;;  %v4160_v40 = vld [vmem:[#allocation2 + $0x3c] sm:$0x1]  ;;  %v4185_v21 = vld [vmem:[#allocation2 + $0x38] sm:$0xf] }
 0x358   :  { %v4391_v34 = vor.u32 %v4389_v62, %v4388_v0  ;;  %v4676_v35 = vshrl.u32 %v8022_v29, 16  ;;  %v4396_v6 = vshll.u32 %v7993_v45, 16  ;;  %v8024_v58 = vcombine.low %v4229_v47, %v4200_v37  ;;  %v4201_v53 = vld [vmem:[#allocation2 + $0x18] sm:$0xe]  ;;  %v4158_v42 = vld [vmem:[#allocation2 + $0x34] sm:$0x1] }
 0x359   :  { %3455 = vrot.lane.b32.xlu1 %v3419_v19, %s8882_s28  ;;  %v4384_v14 = vor.u32 %v4382_v10, %v4381_v4  ;;  %v4395_v46 = vrot.slane %v4393_v39, 7  ;;  %v8023_v7 = vcombine.low %v4228_v15, %v4198_v9  ;;  %v4679_v60 = vshll.u32 %v8022_v29, 16  ;;  %v4184_v49 = vld [vmem:[#allocation2 + $0x30] sm:$0xf]  ;;  %v4162_v0 = vld [vmem:[#allocation2 + $0x44] sm:$0x1] }
 0x35a   :  { %v4678_v43 = vrot.slane %v4676_v35, 7  ;;  %v8008_v13 = vcombine.low %v4199_v48, %v4200_v37  ;;  %v4690_v11 = vshrl.u32 %v8024_v58, 16  ;;  %v7994_v52 = vcombine.low %v4183_v54, %v4156_v61  ;;  %v4186_v62 = vld [vmem:[#allocation2 + $0x40] sm:$0xf]  ;;  %v8727_v23 = vld [vmem:[%s13357_s2 + $0x18] sm:$0xff]  }
 0x35b   :  { %3453 = vrot.lane.b32.xlu0 %v3412_v26, %s8882_s28  ;;  %v4398_v22 = vor.u32 %v4396_v6, %v4395_v46  ;;  %v8025_v38 = vcombine.low %v4230_v30, %v4202_v57  ;;  %v8007_v24 = vcombine.low %v4197_v31, %v4198_v9  ;;  %v4683_v19 = vshrl.u32 %v8023_v7, 16  ;;  %8520 = vmatprep.subr.bf16.mxu1 %v8727_v23  ;;  %v4204_v6 = vld [vmem:[#allocation2 + $0x24] sm:$0x1]  ;;  %v4208_v30 = vld [vmem:[#allocation2 + $0x34] sm:$0x1] }
 0x35c   :  { %v4681_v2 = vor.u32 %v4679_v60, %v4678_v43  ;;  %v4692_v8 = vrot.slane %v4690_v11, 7  ;;  %v4400_v26 = vshrl.u32 %v7994_v52, 16  ;;  %v7996_v3 = vcombine.low %v4185_v21, %v4160_v40  ;;  %8521 = vmatpush3.bf16.msra.mxu1 %v8727_v23  ;;  %v4233_v31 = vld [vmem:[#allocation2 + $0x30] sm:$0xf]  ;;  %v4232_v40 = vld [vmem:[#allocation2 + $0x28] sm:$0xf] }
 0x35d   :  { %4483 = vrot.lane.b32.xlu1 %v4377_v25, %s8878_s29  ;;  %v4697_v51 = vshrl.u32 %v8025_v38, 16  ;;  %v8009_v45 = vcombine.low %v4201_v53, %v4202_v57  ;;  %v4693_v41 = vshll.u32 %v8024_v58, 16  ;;  %v4685_v25 = vrot.slane %v4683_v19, 7  ;;  %v4231_v58 = vld [vmem:[#allocation2 + $0x20] sm:$0xf] }
 0x35e   :  { %v7995_v33 = vcombine.low %v4184_v49, %v4158_v42  ;;  %v4402_v4 = vrot.slane %v4400_v26, 7  ;;  %v4414_v29 = vshrl.u32 %v7996_v3, 16  ;;  %v4403_v37 = vshll.u32 %v7994_v52, 16  ;;  %v4203_v57 = vld [vmem:[#allocation2 + $0x20] sm:$0xe] }
 0x35f   :  { %3457 = vrot.lane.b32.xlu0 %v3426_v32, %s8882_s28  ;;  %v4695_v18 = vor.u32 %v4693_v41, %v4692_v8  ;;  %v4686_v32 = vshll.u32 %v8023_v7, 16  ;;  %v4699_v39 = vrot.slane %v4697_v51, 7  ;;  %v4700_v35 = vshll.u32 %v8025_v38, 16  ;;  %v4206_v38 = vld [vmem:[#allocation2 + $0x2c] sm:$0x1] }
 0x360   :  { %v4407_v47 = vshrl.u32 %v7995_v33, 16  ;;  %v4405_v46 = vor.u32 %v4403_v37, %v4402_v4  ;;  %v4416_v9 = vrot.slane %v4414_v29, 7  ;;  %v4417_v61 = vshll.u32 %v7996_v3, 16  ;;  %v4207_v53 = vld [vmem:[#allocation2 + $0x30] sm:$0xe] }
 0x361   :  { %4487 = vrot.lane.b32.xlu1 %v4391_v34, %s8878_s29  ;;  %v8732_v34 = vld [vmem:[%s13357_s2 + $0x10] sm:$0xff]   ;;  %v4688_v10 = vor.u32 %v4686_v32, %v4685_v25  ;;  %v4702_v48 = vor.u32 %v4700_v35, %v4699_v39  ;;  %v4410_v43 = vshll.u32 %v7995_v33, 16  ;;  %v8026_v60 = vcombine.low %v4231_v58, %v4204_v6  ;;  %v4164_v42 = vld [vmem:[#allocation2 + $0x5c] sm:$0x1]  ;;  %v4187_v49 = vld [vmem:[#allocation2 + $0x58] sm:$0xf] }
 0x362   :  { %8522 = vmatprep.subr.bf16.mxu1 %v8732_v34  ;;  %v4409_v54 = vrot.slane %v4407_v47, 7  ;;  %v4419_v7 = vor.u32 %v4417_v61, %v4416_v9  ;;  %v8010_v21 = vcombine.low %v4203_v57, %v4204_v6  ;;  %v8027_v26 = vcombine.low %v4232_v40, %v4206_v38  ;;  %v4210_v3 = vld [vmem:[#allocation2 + $0x3c] sm:$0x1]  ;;  %v4234_v51 = vld [vmem:[#allocation2 + $0x38] sm:$0xf] }
 0x363   :  { %4485 = vrot.lane.b32.xlu0 %v4384_v14, %s8878_s29  ;;  %v7997_v14 = vcombine.low %v4186_v62, %v4162_v0  ;;  %8523 = vmatpush3.bf16.msra.mxu1 %v8732_v34  ;;  %v4704_v19 = vshrl.u32 %v8026_v60, 16  ;;  %v4205_v25 = vld [vmem:[#allocation2 + $0x28] sm:$0xe]  ;;  %v8012_v0 = vcombine.low %v4207_v53, %v4208_v30  ;;  %v7998_v32 = vcombine.low %v4187_v49, %v4164_v42  ;;  %v4209_v37 = vld [vmem:[#allocation2 + $0x38] sm:$0xe] }
 0x364   :  { %v8029_v4 = vcombine.low %v4234_v51, %v4210_v3  ;;  %v8011_v39 = vcombine.low %v4205_v25, %v4206_v38  ;;  %v4707_v23 = vshll.u32 %v8026_v60, 16  ;;  %v4711_v34 = vshrl.u32 %v8027_v26, 16  ;;  %v4166_v47 = vld [vmem:[#allocation2 + $0x64] sm:$0x1]  ;;  %v2900_v6 = vld [vmem:[#allocation2 + $0x5c] sm:$0x1] }
 0x365   :  { %4595 = vrot.lane.b32.xlu1 %v8006_v1, %s8880_s25  ;;  %v58_v1 = vld [vmem:[#allocation2 + $0x48] sm:$0x1]  ;;  %v4706_v62 = vrot.slane %v4704_v19, 7  ;;  %v4428_v9 = vshrl.u32 %v7998_v32, 16  ;;  %v8013_v61 = vcombine.low %v4209_v37, %v4210_v3  ;;  %v4190_v60 = vld [vmem:[#allocation2 + $0x70] sm:$0xf] }
 0x366   :  { %v59_v15 = vsel %vm10814_vm0, 0, %v58_v1  ;;  %v4725_v58 = vshrl.u32 %v8029_v4, 16  ;;  %v4714_v40 = vshll.u32 %v8027_v26, 16  ;;  %v2904_v19 = vld [vmem:[#allocation2 + $0x6c] sm:$0x1]  ;;  %v4431_v51 = vshll.u32 %v7998_v32, 16 }
 0x367   :  { %4489 = vrot.lane.b32.xlu0 %v4398_v22, %s8878_s29  ;;  %60 = vst [vmem:[#allocation2 + $0x48] sm:$0x1] %v59_v15  ;;  %v4421_v22 = vshrl.u32 %v7997_v14, 16  ;;  %v11381_v15 = vld [vmem:[#allocation2 + $0x8] sm:$0xf] }
 0x368   :  { %v4727_v53 = vrot.slane %v4725_v58, 7  ;;  %v2902_v25 = vld [vmem:[#allocation2 + $0x64] sm:$0x1] }
 0x369   :  { %4599 = vrot.lane.b32.xlu1 %v8008_v13, %s8880_s25  ;;  %v4412_v13 = vor.u32 %v4410_v43, %v4409_v54  ;;  %v4423_v11 = vrot.slane %v4421_v22, 7  ;;  %v4713_v22 = vrot.slane %v4711_v34, 7  ;;  %v4170_v43 = vld [vmem:[#allocation2 + $0x74] sm:$0x1] }
 0x36b   :  { %4597 = vrot.lane.b32.xlu0 %v8007_v24, %s8880_s25  ;;  %v4424_v24 = vshll.u32 %v7997_v14, 16  ;;  %v4188_v14 = vld [vmem:[#allocation2 + $0x60] sm:$0xf] }
 0x36d   :  { %4787 = vrot.lane.b32.xlu1 %v4681_v2, %s8882_s28  ;;  %v8028_v2 = vcombine.low %v4233_v31, %v4208_v30  ;;  %v4426_v8 = vor.u32 %v4424_v24, %v4423_v11  ;;  %v11386_v30 = vld [vmem:[#allocation2 + $0xc] sm:$0x1]  ;;  %v11390_v31 = vcombine.low %v11381_v15, %v11381_v15 }
 0x36e   :  { %v4168_v24 = vld [vmem:[#allocation2 + $0x6c] sm:$0x1] }
 0x36f   :  { %4601 = vrot.lane.b32.xlu0 %v8009_v45, %s8880_s25  ;;  %v2889_v45 = vld [vmem:[#allocation2 + $0x20] sm:$0xf]  ;;  %v4721_v54 = vshll.u32 %v8028_v2, 16  ;;  %v3323_v37 = vshrl.u32 %v11390_v31, 16 }
 0x370   :  { %v7879_v29 = vcombine.low %v2889_v45, %v2889_v45 }
 0x371   :  { %4791 = vrot.lane.b32.xlu1 %v4695_v18, %s8882_s28  ;;  %v4718_v18 = vshrl.u32 %v8028_v2, 16  ;;  %v4189_v2 = vld [vmem:[#allocation2 + $0x68] sm:$0xf] }
 0x372   :  { %v3068_v49 = vshll.u32 %v7879_v29, 16 }
 0x373   :  { %4789 = vrot.lane.b32.xlu0 %v4688_v10, %s8882_s28  ;;  %v4720_v35 = vrot.slane %v4718_v18, 7  ;;  %v4728_v18 = vshll.u32 %v8029_v4, 16 }
 0x375   :  { %4491 = vrot.lane.b32.xlu1 %v4405_v46, %s8878_s29  ;;  %v4709_v46 = vor.u32 %v4707_v23, %v4706_v62  ;;  %v4723_v38 = vor.u32 %v4721_v54, %v4720_v35  ;;  %v7870_v23 = vcombine.low %v11211_v17, %v2904_v19  ;;  %v7869_v35 = vcombine.low %v11223_v20, %v2902_v25 }
 0x377   :  { %4793 = vrot.lane.b32.xlu0 %v4702_v48, %s8882_s28  ;;  %v3065_v48 = vshrl.u32 %v7879_v29, 16  ;;  %v7893_v29 = vcombine.low %v11381_v15, %v11386_v30  ;;  %v2916_v30 = vld [vmem:[#allocation2 + $0x4] sm:$0x1] }
 0x379   :  { %4495 = vrot.lane.b32.xlu1 %v4419_v7, %s8878_s29  ;;  %v11384_v7 = vcombine.low %v4188_v14, %v4166_v47  ;;  %v3067_v42 = vrot.slane %v3065_v48, 7 }
 0x37b   :  { %v11368_v52 = vpop.permute.xlu1 %3171  ;;  %4493 = vrot.lane.b32.xlu0 %v4412_v13, %s8878_s29  ;;  %v7868_v13 = vcombine.low %v11215_v27, %v2900_v6  ;;  %v4716_v27 = vor.u32 %v4714_v40, %v4713_v22  ;;  %v4435_v45 = vshrl.u32 %v11384_v7, 16  ;;  %v3070_v14 = vor.u32 %v3068_v49, %v3067_v42 }
 0x37d   :  { %4603 = vrot.lane.b32.xlu1 %v8010_v21, %s8880_s25  ;;  %v4430_v21 = vrot.slane %v4428_v9, 7  ;;  %v3485_v3 = vsel %vm13703_vm7, %v7868_v13, %v11368_v52  ;;  %v4437_v9 = vrot.slane %v4435_v45, 7  ;;  %vm13727_vm7 = vmmov %vm13715_vm5 }
 0x37f   :  { %v11372_v41 = vpop.permute.xlu1 %3175  ;;  %4497 = vrot.lane.b32.xlu0 %v4426_v8, %s8878_s29  ;;  %v11394_v8 = vcombine.low %v4190_v60, %v4170_v43  ;;  %v4433_v34 = vor.u32 %v4431_v51, %v4430_v21 }
 0x380   :  { %v11375_v33 = vpop.permute.xlu0 %3173 }
 0x381   :  { %4607 = vrot.lane.b32.xlu1 %v8012_v0, %s8880_s25  ;;  %v2906_v0 = vld [vmem:[#allocation2 + $0x74] sm:$0x1]  ;;  %v4449_v4 = vshrl.u32 %v11394_v8, 16  ;;  %v3488_v54 = vsel %vm13720_vm12, %v7869_v35, %v11375_v33  ;;  %vm13732_vm12 = vmmov %vm13722_vm1 }
 0x382   :  { %v7871_v17 = vcombine.low %v11219_v36, %v2906_v0  ;;  %v4438_v36 = vshll.u32 %v11384_v7, 16 }
 0x383   :  { %v3284_v10 = vpop.permute.xlu1 %3283  ;;  %4605 = vrot.lane.b32.xlu0 %v8011_v39, %s8880_s25  ;;  %v11403_v39 = vcombine.low %v4189_v2, %v4168_v24  ;;  %v4451_v13 = vrot.slane %v4449_v4, 7 }
 0x384   :  { %v11379_v1 = vpop.permute.xlu0 %3177  ;;  %v3524_v26 = vsel %vm13716_vm8, %v3485_v3, %v3284_v10  ;;  %v4730_v10 = vor.u32 %v4728_v18, %v4727_v53  ;;  %v4440_v24 = vor.u32 %v4438_v36, %v4437_v9  ;;  %vm13728_vm8 = vmmov %vm13724_vm6 }
 0x385   :  { %4795 = vrot.lane.b32.xlu1 %v4709_v46, %s8882_s28  ;;  %v3491_v46 = vsel %vm13718_vm10, %v7870_v23, %v11372_v41  ;;  %v4445_v22 = vshll.u32 %v11403_v39, 16  ;;  %vm13730_vm10 = vmmov %vm13721_vm2 }
 0x387   :  { %v3288_v57 = vpop.permute.xlu1 %3287  ;;  %4609 = vrot.lane.b32.xlu0 %v8013_v61, %s8880_s25  ;;  %v4442_v61 = vshrl.u32 %v11403_v39, 16  ;;  %v4213_v39 = vld [vmem:[#allocation2 + $0x58] sm:$0xe] }
 0x388   :  { %v3286_v11 = vpop.permute.xlu0 %3285  ;;  %v3528_v15 = vsel %vm13719_vm11, %v3491_v46, %v3288_v57  ;;  %v2915_v57 = vld [vmem:[#allocation2] sm:$0xf]  ;;  %vm13731_vm11 = vmmov %vm13724_vm6 }
 0x389   :  { %4799 = vrot.lane.b32.xlu1 %v4723_v38, %s8882_s28  ;;  %v3526_v43 = vsel %vm13722_vm1, %v3488_v54, %v3286_v11  ;;  %v4452_v38 = vshll.u32 %v11394_v8, 16  ;;  %v4444_v53 = vrot.slane %v4442_v61, 7  ;;  %v3494_v11 = vsel %vm13724_vm6, %v7871_v17, %v11379_v1  ;;  %v4214_v1 = vld [vmem:[#allocation2 + $0x5c] sm:$0x1]  ;;  %v2921_v54 = vld [vmem:[#allocation2 + $0x18] sm:$0xf] }
 0x38a   :  { %v7892_v8 = vcombine.low %v2915_v57, %v2916_v30 }
 0x38b   :  { %v3444_v62 = vpop.permute.xlu1 %3443  ;;  %4797 = vrot.lane.b32.xlu0 %v4716_v27, %s8882_s28  ;;  %v4454_v18 = vor.u32 %v4452_v38, %v4451_v13 }
 0x38c   :  { %v3556_v52 = vsel %vm13717_vm9, %v3524_v26, %v3444_v62  ;;  %v3290_v32 = vpop.permute.xlu0 %3289  ;;  %vm13729_vm9 = vmmov %vm13722_vm1 }
 0x38d   :  { %v7940_v47 = vcombine.low %v3556_v52, %v3556_v52  ;;  %4499 = vrot.lane.b32.xlu1 %v4433_v34, %s8878_s29  ;;  %v7941_v42 = vcombine.high %v3556_v52, %v3556_v52  ;;  %v3530_v27 = vsel %vm13725_vm13, %v3494_v11, %v3290_v32  ;;  %vm13734_vm1 = vmmov %vm13730_vm10 }
 0x38f   :  { %v3767_v6 = vshrl.u32 %v7940_v47, 16  ;;  %v3770_v58 = vshll.u32 %v7940_v47, 16  ;;  %v3448_v48 = vpop.permute.xlu1 %3447  ;;  %4801 = vrot.lane.b32.xlu0 %v4730_v10, %s8882_s28  ;;  %v7908_v47 = vcombine.low %v2915_v57, %v2915_v57  ;;  %v4211_v10 = vld [vmem:[#allocation2 + $0x50] sm:$0xe]  ;;  %v3776_v4 = vshll.u32 %v7941_v42, 16 }
 0x390   :  { %v3560_v41 = vsel %vm13721_vm2, %v3528_v15, %v3448_v48  ;;  %v3446_v20 = vpop.permute.xlu0 %3445  ;;  %v4447_v48 = vor.u32 %v4445_v22, %v4444_v53  ;;  %v3325_v53 = vrot.slane %v3323_v37, 7  ;;  %v7911_v37 = vcombine.low %v2921_v54, %v2921_v54  ;;  %vm13733_vm2 = vmmov %vm13724_vm6 }
 0x391   :  { %v7944_v60 = vcombine.low %v3560_v41, %v3560_v41  ;;  %v3769_v40 = vrot.slane %v3767_v6, 4  ;;  %v3772_v21 = vrot.slane %v3770_v58, 5  ;;  %v3558_v33 = vsel %vm13723_vm14, %v3526_v43, %v3446_v20  ;;  %3161 = vrot.lane.b32.xlu1 %v3070_v14, %s8878_s29  ;;  %v4212_v14 = vld [vmem:[#allocation2 + $0x54] sm:$0x1]  ;;  %vm13735_vm14 = vmmov %vm13729_vm9 }
 0x392   :  { %v7942_v7 = vcombine.low %v3558_v33, %v3558_v33  ;;  %v7943_v49 = vcombine.high %v3558_v33, %v3558_v33  ;;  %v7945_v23 = vcombine.high %v3560_v41, %v3560_v41  ;;  %v8015_v6 = vcombine.low %v4213_v39, %v4214_v1  ;;  %v4236_v33 = vld [vmem:[#allocation2 + $0x58] sm:$0xf]  ;;  %vm13736_vm6 = vmmov %vm13734_vm1 }
 0x393   :  { %v3795_v2 = vshrl.u32 %v7944_v60, 16  ;;  %v3798_v19 = vshll.u32 %v7944_v60, 16  ;;  %4501 = vrot.lane.b32.xlu0 %v4440_v24, %s8878_s29  ;;  %v3773_v26 = vor.u32 %v3772_v21, %v3769_v40  ;;  %v8014_v61 = vcombine.low %v4211_v10, %v4212_v14  ;;  %v2922_v60 = vld [vmem:[#allocation2 + $0x1c] sm:$0x1]  ;;  %v4235_v24 = vld [vmem:[#allocation2 + $0x50] sm:$0xf]  ;;  %vm13738_vm13 = vmmov %vm13733_vm2 }
 0x394   :  { %v3450_v3 = vpop.permute.xlu0 %3449  ;;  %v3781_v25 = vshrl.u32 %v7942_v7, 16  ;;  %v3784_v0 = vshll.u32 %v7942_v7, 16  ;;  %v3790_v46 = vshll.u32 %v7943_v49, 16  ;;  %v3804_v41 = vshll.u32 %v7945_v23, 16  ;;  %v2919_v7 = vld [vmem:[#allocation2 + $0x10] sm:$0xf] }
 0x395   :  { %v3797_v51 = vrot.slane %v3795_v2, 4  ;;  %v3800_v45 = vrot.slane %v3798_v19, 5  ;;  %v3562_v62 = vsel %vm13726_vm15, %v3530_v27, %v3450_v3  ;;  %3269 = vrot.lane.b32.xlu1 %v7893_v29, %s8880_s25  ;;  %v3774_v29 = vrot.slane %v3773_v26, 4  ;;  %vm13739_vm15 = vmmov %vm13729_vm9 }
 0x396   :  { %v3783_v52 = vrot.slane %v3781_v25, 4  ;;  %v7946_v34 = vcombine.low %v3562_v62, %v3562_v62  ;;  %v3786_v32 = vrot.slane %v3784_v0, 5  ;;  %v7947_v35 = vcombine.high %v3562_v62, %v3562_v62 }
 0x397   :  { %3267 = vrot.lane.b32.xlu0 %v7892_v8, %s8880_s25  ;;  %v3801_v17 = vor.u32 %v3800_v45, %v3797_v51  ;;  %v3778_v57 = vrot.slane %v3776_v4, 5  ;;  %v3792_v13 = vrot.slane %v3790_v46, 5  ;;  %v3316_v38 = vshrl.u32 %v7908_v47, 16  ;;  %v2920_v8 = vld [vmem:[#allocation2 + $0x14] sm:$0x1] }
 0x398   :  { %v3809_v9 = vshrl.u32 %v7946_v34, 16  ;;  %v3812_v15 = vshll.u32 %v7946_v34, 16  ;;  %v3787_v58 = vor.u32 %v3786_v32, %v3783_v52  ;;  %v3818_v43 = vshll.u32 %v7947_v35, 16  ;;  %v4217_v52 = vld [vmem:[#allocation2 + $0x68] sm:$0xe] }
 0x399   :  { %4505 = vrot.lane.b32.xlu1 %v4454_v18, %s8878_s29  ;;  %v3802_v40 = vrot.slane %v3801_v17, 4  ;;  %v3779_v22 = vsel %vm11304_vm3, %v3774_v29, %v3778_v57  ;;  %v7895_v19 = vcombine.low %v2921_v54, %v2922_v60  ;;  %v3806_v11 = vrot.slane %v3804_v41, 5  ;;  %v4218_v34 = vld [vmem:[#allocation2 + $0x6c] sm:$0x1]  ;;  %v4215_v35 = vld [vmem:[#allocation2 + $0x60] sm:$0xe] }
 0x39a   :  { %v3811_v20 = vrot.slane %v3809_v9, 4  ;;  %v3814_v36 = vrot.slane %v3812_v15, 5  ;;  %v3788_v30 = vrot.slane %v3787_v58, 4  ;;  %v3820_v49 = vrot.slane %v3818_v43, 5  ;;  %v4216_v17 = vld [vmem:[#allocation2 + $0x64] sm:$0x1] }
 0x39b   :  { %4503 = vrot.lane.b32.xlu0 %v4447_v48, %s8878_s29  ;;  %v8031_v27 = vcombine.low %v4236_v33, %v4214_v1  ;;  %v8030_v51 = vcombine.low %v4235_v24, %v4212_v14  ;;  %v3318_v45 = vrot.slane %v3316_v38, 7  ;;  %v3319_v25 = vshll.u32 %v7908_v47, 16  ;;  %v4238_v14 = vld [vmem:[#allocation2 + $0x68] sm:$0xf]  ;;  %v4237_v9 = vld [vmem:[#allocation2 + $0x60] sm:$0xf] }
 0x39c   :  { %v3815_v21 = vor.u32 %v3814_v36, %v3811_v20  ;;  %v3793_v2 = vsel %vm11304_vm3, %v3788_v30, %v3792_v13  ;;  %v3807_v26 = vsel %vm11304_vm3, %v3802_v40, %v3806_v11  ;;  %v7894_v62 = vcombine.low %v2919_v7, %v2920_v8  ;;  %v4174_v58 = vld [vmem:[#allocation2 + $0x84] sm:$0x1]  ;;  %v4192_v48 = vld [vmem:[#allocation2 + $0x80] sm:$0xf]  ;;  %v4172_v43 = vld [vmem:[#allocation2 + $0x7c] sm:$0x1] }
 0x39d   :  { %4613 = vrot.lane.b32.xlu1 %v8015_v6, %s8880_s25  ;;  %v7960_v3 = vcombine.low %v3779_v22, %v3793_v2  ;;  %v3326_v39 = vshll.u32 %v11390_v31, 16  ;;  %v3321_v23 = vor.u32 %v3319_v25, %v3318_v45  ;;  %v4739_v47 = vshrl.u32 %v8031_v27, 16  ;;  %v4191_v60 = vld [vmem:[#allocation2 + $0x78] sm:$0xf]  ;;  %v5350_v2 = vld [vmem:[#allocation2 + $0x10] sm:$0xf] }
 0x39e   :  { %v3816_v42 = vrot.slane %v3815_v21, 4  ;;  %v4732_v10 = vshrl.u32 %v8030_v51, 16  ;;  %v7910_v4 = vcombine.low %v2919_v7, %v2919_v7  ;;  %v3337_v32 = vshrl.u32 %v7911_v37, 16  ;;  %v5352_v40 = vld [vmem:[#allocation2 + $0x18] sm:$0xf] }
 0x39f   :  { %4611 = vrot.lane.b32.xlu0 %v8014_v61, %s8880_s25  ;;  %8512 = vmatprep.mubr.msk.bf16.mxu1 %vm13715_vm5, %v7960_v3  ;;  %v3328_v1 = vor.u32 %v3326_v39, %v3325_v53  ;;  %v8017_v46 = vcombine.low %v4217_v52, %v4218_v34  ;;  %v8033_v31 = vcombine.low %v4238_v14, %v4218_v34  ;;  %v4741_v15 = vrot.slane %v4739_v47, 7  ;;  %v4178_v3 = vld [vmem:[#allocation2 + $0x94] sm:$0x1]  ;;  %v4194_v8 = vld [vmem:[#allocation2 + $0x90] sm:$0xf]  ;;  %vm13740_vm5 = vmmov %vm13734_vm1 }
 0x3a0   :  { %v3821_v0 = vsel %vm11304_vm3, %v3816_v42, %v3820_v49  ;;  %v4734_v6 = vrot.slane %v4732_v10, 7  ;;  %v4735_v29 = vshll.u32 %v8030_v51, 16  ;;  %v8016_v61 = vcombine.low %v4215_v35, %v4216_v17  ;;  %v120_v52 = vld [vmem:[#allocation2 + $0x4c] sm:$0x1] }
 0x3a1   :  { %3273 = vrot.lane.b32.xlu1 %v7895_v19, %s8880_s25  ;;  %v7961_v18 = vcombine.low %v3807_v26, %v3821_v0  ;;  %v8032_v54 = vcombine.low %v4237_v9, %v4216_v17  ;;  %v4742_v41 = vshll.u32 %v8031_v27, 16  ;;  %v3330_v20 = vshrl.u32 %v7910_v4, 16  ;;  %v4176_v0 = vld [vmem:[#allocation2 + $0x8c] sm:$0x1] }
 0x3a2   :  { %v3339_v36 = vrot.slane %v3337_v32, 7  ;;  %v4737_v30 = vor.u32 %v4735_v29, %v4734_v6  ;;  %v4753_v13 = vshrl.u32 %v8033_v31, 16  ;;  %v8003_v38 = vcombine.low %v4192_v48, %v4174_v58  ;;  %v5356_v6 = vld [vmem:[#allocation2 + $0x28] sm:$0xf] }
 0x3a3   :  { %3271 = vrot.lane.b32.xlu0 %v7894_v62, %s8880_s25  ;;  %8513 = vmatmul.mubr.msk.bf16.gmra.mxu1 %vm13727_vm7, %v7961_v18  ;;  %v4744_v57 = vor.u32 %v4742_v41, %v4741_v15  ;;  %v3340_v21 = vshll.u32 %v7911_v37, 16  ;;  %v3332_v33 = vrot.slane %v3330_v20, 7  ;;  %v4746_v24 = vshrl.u32 %v8032_v54, 16  ;;  %v4193_v37 = vld [vmem:[#allocation2 + $0x88] sm:$0xf] }
 0x3a4   :  { %v8002_v22 = vcombine.low %v4191_v60, %v4172_v43  ;;  %v8141_v19 = vcombine.low %v5352_v40, %v5352_v40  ;;  %v3333_v53 = vshll.u32 %v7910_v4, 16  ;;  %v4755_v11 = vrot.slane %v4753_v13, 7  ;;  %v11477_v13 = vld [vmem:[#allocation2 + $0x8] sm:$0xf] }
 0x3a5   :  { %3429 = vrot.lane.b32.xlu1 %v3328_v1, %s8882_s28  ;;  %v3342_v7 = vor.u32 %v3340_v21, %v3339_v36  ;;  %v4463_v42 = vshrl.u32 %v8003_v38, 16  ;;  %v8140_v49 = vcombine.low %v5350_v2, %v5350_v2  ;;  %v4756_v51 = vshll.u32 %v8033_v31, 16  ;;  %v11481_v40 = vld [vmem:[#allocation2 + $0x8] sm:$0xe]  ;;  %v4220_v2 = vld [vmem:[#allocation2 + $0x74] sm:$0x1] }
 0x3a6   :  { %v3335_v27 = vor.u32 %v3333_v53, %v3332_v33  ;;  %v4748_v45 = vrot.slane %v4746_v24, 7  ;;  %v4456_v25 = vshrl.u32 %v8002_v22, 16  ;;  %v5518_v26 = vshrl.u32 %v8141_v19, 16 }
 0x3a7   :  { %3427 = vrot.lane.b32.xlu0 %v3321_v23, %s8882_s28  ;;  %v4758_v62 = vor.u32 %v4756_v51, %v4755_v11  ;;  %v4749_v18 = vshll.u32 %v8032_v54, 16  ;;  %v4465_v39 = vrot.slane %v4463_v42, 7  ;;  %v8005_v1 = vcombine.low %v4194_v8, %v4178_v3  ;;  %v5354_v23 = vld [vmem:[#allocation2 + $0x20] sm:$0xf]  ;;  %v11490_v42 = vld [vmem:[#allocation2 + $0x18] sm:$0xe] }
 0x3a8   :  { %v5511_v34 = vshrl.u32 %v8140_v49, 16  ;;  %v121_v47 = vsel %vm10828_vm4, 0, %v120_v52  ;;  %v4466_v14 = vshll.u32 %v8003_v38, 16  ;;  %v4458_v4 = vrot.slane %v4456_v25, 7  ;;  %v11479_v38 = vld [vmem:[#allocation2 + $0xc] sm:$0x1] }
 0x3a9   :  { %4617 = vrot.lane.b32.xlu1 %v8017_v46, %s8880_s25  ;;  %v4751_v10 = vor.u32 %v4749_v18, %v4748_v45  ;;  %v8004_v32 = vcombine.low %v4193_v37, %v4176_v0  ;;  %122 = vst [vmem:[#allocation2 + $0x4c] sm:$0x1] %v121_v47  ;;  %v8142_v46 = vcombine.low %v5354_v23, %v5354_v23  ;;  %v4459_v9 = vshll.u32 %v8002_v22, 16  ;;  %v11496_v45 = vld [vmem:[#allocation2 + $0x10] sm:$0xe] }
 0x3aa   :  { %v4468_v17 = vor.u32 %v4466_v14, %v4465_v39  ;;  %v5520_v31 = vrot.slane %v5518_v26, 7  ;;  %v4477_v15 = vshrl.u32 %v8005_v1, 16  ;;  %v5521_v58 = vshll.u32 %v8141_v19, 16  ;;  %v4239_v19 = vld [vmem:[#allocation2 + $0x70] sm:$0xf] }
 0x3ab   :  { %4615 = vrot.lane.b32.xlu0 %v8016_v61, %s8880_s25  ;;  %v4461_v29 = vor.u32 %v4459_v9, %v4458_v4  ;;  %v5513_v48 = vrot.slane %v5511_v34, 7  ;;  %v4470_v61 = vshrl.u32 %v8004_v32, 16  ;;  %v5525_v54 = vshrl.u32 %v8142_v46, 16  ;;  %v11498_v25 = vld [vmem:[#allocation2 + $0x20] sm:$0xe] }
 0x3ac   :  { %v5523_v20 = vor.u32 %v5521_v58, %v5520_v31  ;;  %v5514_v36 = vshll.u32 %v8140_v49, 16  ;;  %v4479_v43 = vrot.slane %v4477_v15, 7  ;;  %v11471_v60 = vcombine.low %v5356_v6, %v5356_v6  ;;  %v11492_v49 = vld [vmem:[#allocation2 + $0x20] sm:$0xf]  ;;  %v4221_v26 = vld [vmem:[#allocation2 + $0x78] sm:$0xe] }
 0x3ad   :  { %4805 = vrot.lane.b32.xlu1 %v4744_v57, %s8882_s28  ;;  %v11473_v57 = vld [vmem:[#allocation2 + $0x10] sm:$0xf]  ;;  %v4480_v24 = vshll.u32 %v8005_v1, 16  ;;  %v4472_v22 = vrot.slane %v4470_v61, 7  ;;  %v5528_v53 = vshll.u32 %v8142_v46, 16  ;;  %v11500_v37 = vcombine.low %v4239_v19, %v4220_v2 }
 0x3ae   :  { %v5516_v33 = vor.u32 %v5514_v36, %v5513_v48  ;;  %v11488_v11 = vcombine.low %v11473_v57, %v11473_v57  ;;  %v5532_v51 = vshrl.u32 %v11471_v60, 16  ;;  %v4222_v0 = vld [vmem:[#allocation2 + $0x7c] sm:$0x1]  ;;  %v11506_v39 = vld [vmem:[#allocation2 + $0x18] sm:$0xf]  ;;  %v11513_v34 = vcombine.low %v11477_v13, %v11477_v13 }
 0x3af   :  { %4803 = vrot.lane.b32.xlu0 %v4737_v30, %s8882_s28  ;;  %v11475_v30 = vld [vmem:[#allocation2 + $0x14] sm:$0x1]  ;;  %v4482_v8 = vor.u32 %v4480_v24, %v4479_v43  ;;  %v2908_v1 = vld [vmem:[#allocation2 + $0x7c] sm:$0x1]  ;;  %v11521_v14 = vcombine.low %v11492_v49, %v11492_v49  ;;  %v4219_v4 = vld [vmem:[#allocation2 + $0x70] sm:$0xe]  ;;  %v8019_v15 = vcombine.low %v4221_v26, %v4222_v0  ;;  %v11533_v58 = vcombine.low %v11506_v39, %v11506_v39 }
 0x3b0   :  { %v5790_v9 = vshrl.u32 %v11488_v11, 16  ;;  %v5534_v6 = vrot.slane %v5532_v51, 7  ;;  %v8825_v48 = vld [vmem:[#allocation2 + $0x78] sm:$0xf]  ;;  %v5535_v19 = vshll.u32 %v11471_v60, 16 }
 0x3b1   :  { %3433 = vrot.lane.b32.xlu1 %v3342_v7, %s8882_s28  ;;  %v5527_v7 = vrot.slane %v5525_v54, 7  ;;  %v7872_v61 = vcombine.low %v8825_v48, %v2908_v1  ;;  %v4240_v54 = vld [vmem:[#allocation2 + $0x78] sm:$0xf]  ;;  %v6614_v47 = vld [vmem:[#allocation2 + $0x14] sm:$0x1]  ;;  %v13751_v44 = vshll.u32 %v11533_v58, 16 }
 0x3b2   :  { %v11547_v51 = vrot.slane %v5790_v9, 7  ;;  %v11552_v60 = vcombine.low %v4240_v54, %v4222_v0  ;;  %v5537_v48 = vor.u32 %v5535_v19, %v5534_v6  ;;  %v6645_v26 = vld [vmem:[#allocation2 + $0x10] sm:$0xf]  ;;  %v4763_v6 = vshll.u32 %v11500_v37, 16  ;;  %v8827_v19 = vld [vmem:[#allocation2 + $0x80] sm:$0xf] }
 0x3b3   :  { %3431 = vrot.lane.b32.xlu0 %v3335_v27, %s8882_s28  ;;  %v4473_v27 = vshll.u32 %v8004_v32, 16  ;;  %v5530_v32 = vor.u32 %v5528_v53, %v5527_v7  ;;  %v11541_v7 = vld [vmem:[#allocation2 + $0x1c] sm:$0x1]  ;;  %v5783_v53 = vshrl.u32 %v11513_v34, 16  ;;  %v4224_v36 = vld [vmem:[#allocation2 + $0x84] sm:$0x1]  ;;  %v11580_v43 = vcombine.low %v6645_v26, %v6614_v47 }
 0x3b5   :  { %4809 = vrot.lane.b32.xlu1 %v4758_v62, %s8882_s28  ;;  %v8157_v62 = vcombine.low %v11473_v57, %v11475_v30  ;;  %v4475_v52 = vor.u32 %v4473_v27, %v4472_v22  ;;  %v8018_v22 = vcombine.low %v4219_v4, %v4220_v2 }
 0x3b7   :  { %4807 = vrot.lane.b32.xlu0 %v4751_v10, %s8882_s28  ;;  %v11465_v35 = vpop.permute.xlu1 %3179  ;;  %v11517_v10 = vld [vmem:[#allocation2 + $0x24] sm:$0x1] }
 0x3b8   :  { %v3497_v27 = vsel %vm13728_vm8, %v7872_v61, %v11465_v35  ;;  %v8826_v35 = vld [vmem:[#allocation2 + $0x88] sm:$0xf]  ;;  %vm13747_vm8 = vmmov %vm13733_vm2 }
 0x3b9   :  { %4509 = vrot.lane.b32.xlu1 %v4468_v17, %s8878_s29  ;;  %v6646_v17 = vld [vmem:[#allocation2 + $0x18] sm:$0xf] }
 0x3bb   :  { %4507 = vrot.lane.b32.xlu0 %v4461_v29, %s8878_s29  ;;  %v11469_v41 = vpop.permute.xlu1 %3183 }
 0x3bd   :  { %v11483_v21 = vpop.permute.xlu0 %3181  ;;  %5624 = vrot.lane.b32.xlu1 %v5523_v20, %s8878_s29  ;;  %v4760_v20 = vshrl.u32 %v11500_v37, 16 }
 0x3bf   :  { %5622 = vrot.lane.b32.xlu0 %v5516_v33, %s8878_s29  ;;  %v3292_v3 = vpop.permute.xlu1 %3291  ;;  %v2912_v33 = vld [vmem:[#allocation2 + $0x8c] sm:$0x1]  ;;  %v4762_v46 = vrot.slane %v4760_v20, 7 }
 0x3c0   :  { %v3532_v2 = vsel %vm13729_vm9, %v3497_v27, %v3292_v3  ;;  %v7874_v9 = vcombine.low %v8826_v35, %v2912_v33  ;;  %v2914_v3 = vld [vmem:[#allocation2 + $0x94] sm:$0x1]  ;;  %v4223_v35 = vld [vmem:[#allocation2 + $0x80] sm:$0xe] }
 0x3c1   :  { %v11508_v23 = vpop.permute.xlu0 %3185  ;;  %4513 = vrot.lane.b32.xlu1 %v4482_v8, %s8878_s29  ;;  %v5804_v8 = vshrl.u32 %v11521_v14, 16 }
 0x3c2   :  { %v3503_v20 = vsel %vm13731_vm11, %v7874_v9, %v11469_v41  ;;  %v4767_v41 = vshrl.u32 %v11552_v60, 16  ;;  %vm13749_vm11 = vmmov %vm13734_vm1 }
 0x3c3   :  { %4511 = vrot.lane.b32.xlu0 %v4475_v52, %s8878_s29  ;;  %v3296_v31 = vpop.permute.xlu1 %3295  ;;  %v6616_v52 = vld [vmem:[#allocation2 + $0x1c] sm:$0x1]  ;;  %v11566_v33 = vrot.slane %v5804_v8, 7 }
 0x3c4   :  { %v11572_v29 = vcombine.low %v6646_v17, %v6616_v52  ;;  %v8828_v17 = vld [vmem:[#allocation2 + $0x90] sm:$0xf] }
 0x3c5   :  { %v3294_v24 = vpop.permute.xlu0 %3293  ;;  %4621 = vrot.lane.b32.xlu1 %v8019_v15, %s8880_s25  ;;  %v2910_v15 = vld [vmem:[#allocation2 + $0x84] sm:$0x1]  ;;  %v7875_v52 = vcombine.low %v8828_v17, %v2914_v3 }
 0x3c6   :  { %v7873_v27 = vcombine.low %v8827_v19, %v2910_v15  ;;  %v4765_v19 = vor.u32 %v4763_v6, %v4762_v46  ;;  %v4242_v6 = vld [vmem:[#allocation2 + $0x88] sm:$0xf] }
 0x3c7   :  { %4619 = vrot.lane.b32.xlu0 %v8018_v22, %s8880_s25  ;;  %v3452_v4 = vpop.permute.xlu1 %3451  ;;  %v11564_v22 = vrot.slane %v5783_v53, 7  ;;  %v3506_v57 = vsel %vm13738_vm13, %v7875_v52, %v11508_v23  ;;  %v4241_v23 = vld [vmem:[#allocation2 + $0x80] sm:$0xf]  ;;  %vm13758_vm13 = vmmov %vm13729_vm9 }
 0x3c8   :  { %v11557_v61 = vsel %vm13730_vm10, %v3532_v2, %v3452_v4  ;;  %v4225_v2 = vld [vmem:[#allocation2 + $0x88] sm:$0xe]  ;;  %v4226_v4 = vld [vmem:[#allocation2 + $0x8c] sm:$0x1]  ;;  %v3500_v15 = vsel %vm13733_vm2, %v7873_v27, %v11483_v21  ;;  %v8020_v27 = vcombine.low %v4223_v35, %v4224_v36  ;;  %vm13748_vm10 = vmmov %vm13727_vm7 }
 0x3c9   :  { %v7948_v0 = vcombine.low %v11557_v61, %v11557_v61  ;;  %v3298_v54 = vpop.permute.xlu0 %3297  ;;  %5628 = vrot.lane.b32.xlu1 %v5537_v48, %s8878_s29  ;;  %v3536_v48 = vsel %vm13732_vm12, %v3503_v20, %v3296_v31  ;;  %v3534_v31 = vsel %vm13735_vm14, %v3500_v15, %v3294_v24  ;;  %v13737_v24 = vcombine.low %v11477_v13, %v11479_v38  ;;  %vm13754_vm12 = vmmov %vm13729_vm9 }
 0x3ca   :  { %v7949_v30 = vcombine.high %v11557_v61, %v11557_v61  ;;  %v3538_v35 = vsel %vm13739_vm15, %v3506_v57, %v3298_v54  ;;  %v11602_v17 = vcombine.low %v4242_v6, %v4226_v4  ;;  %vm5012_vm14 = vcmask 1046532   ;;  %vm13759_vm15 = vmmov %vm13740_vm5 }
 0x3cb   :  { %v3823_v37 = vshrl.u32 %v7948_v0, 16  ;;  %v3826_v53 = vshll.u32 %v7948_v0, 16  ;;  %5626 = vrot.lane.b32.xlu0 %v5530_v32, %s8878_s29  ;;  %v3456_v8 = vpop.permute.xlu1 %3455  ;;  %v8021_v32 = vcombine.low %v4225_v2, %v4226_v4  ;;  %v4770_v2 = vshll.u32 %v11552_v60, 16 }
 0x3cc   :  { %v3568_v9 = vsel %vm13734_vm1, %v3536_v48, %v3456_v8  ;;  %v4769_v48 = vrot.slane %v4767_v41, 7  ;;  %v4781_v6 = vshrl.u32 %v11602_v17, 16  ;;  %vm5011_vm1 = vcmask 1042432  }
 0x3cd   :  { %v7952_v20 = vcombine.low %v3568_v9, %v3568_v9  ;;  %v3454_v0 = vpop.permute.xlu0 %3453  ;;  %5736 = vrot.lane.b32.xlu1 %v8157_v62, %s8880_s25  ;;  %v3825_v1 = vrot.slane %v3823_v37, 4  ;;  %v3828_v18 = vrot.slane %v3826_v53, 5  ;;  %v7953_v52 = vcombine.high %v3568_v9, %v3568_v9 }
 0x3ce   :  { %v3566_v21 = vsel %vm13736_vm6, %v3534_v31, %v3454_v0  ;;  %v4772_v54 = vor.u32 %v4770_v2, %v4769_v48  ;;  %v5360_v48 = vld [vmem:[#allocation2 + $0x38] sm:$0xf]  ;;  %vm13757_vm6 = vmmov %vm13740_vm5 }
 0x3cf   :  { %v3851_v46 = vshrl.u32 %v7952_v20, 16  ;;  %v3854_v47 = vshll.u32 %v7952_v20, 16  ;;  %v7950_v26 = vcombine.low %v3566_v21, %v3566_v21  ;;  %5734 = vrot.lane.b32.xlu0 %v13737_v24, %s8880_s25  ;;  %v11592_v3 = vpop.permute.xlu1 %4483  ;;  %v7951_v62 = vcombine.high %v3566_v21, %v3566_v21 }
 0x3d0   :  { %v3829_v38 = vor.u32 %v3828_v18, %v3825_v1  ;;  %v3832_v20 = vshll.u32 %v7949_v30, 16  ;;  %v3860_v57 = vshll.u32 %v7953_v52, 16 }
 0x3d1   :  { %v3853_v37 = vrot.slane %v3851_v46, 4  ;;  %v3856_v53 = vrot.slane %v3854_v47, 5  ;;  %v3837_v8 = vshrl.u32 %v7950_v26, 16  ;;  %v3458_v13 = vpop.permute.xlu0 %3457  ;;  %4625 = vrot.lane.b32.xlu1 %v8021_v32, %s8880_s25  ;;  %v3840_v15 = vshll.u32 %v7950_v26, 16 }
 0x3d2   :  { %v3570_v41 = vsel %vm13740_vm5, %v3538_v35, %v3458_v13  ;;  %v3846_v21 = vshll.u32 %v7951_v62, 16  ;;  %v11607_v47 = vcombine.low %v4241_v23, %v4224_v36  ;;  %v3830_v9 = vrot.slane %v3829_v38, 4  ;;  %v5358_v35 = vld [vmem:[#allocation2 + $0x30] sm:$0xf]  ;;  %vm11695_vm5 = vmor %vm5011_vm1, %vm5012_vm14 }
 0x3d3   :  { %v3839_v61 = vrot.slane %v3837_v8, 4  ;;  %v7954_v31 = vcombine.low %v3570_v41, %v3570_v41  ;;  %4623 = vrot.lane.b32.xlu0 %v8020_v27, %s8880_s25  ;;  %v11605_v60 = vpop.permute.xlu1 %4487  ;;  %v3842_v0 = vrot.slane %v3840_v15, 5  ;;  %v7955_v46 = vcombine.high %v3570_v41, %v3570_v41 }
 0x3d4   :  { %v3857_v32 = vor.u32 %v3856_v53, %v3853_v37  ;;  %v13741_v27 = vshll.u32 %v11488_v11, 16  ;;  %v3834_v37 = vrot.slane %v3832_v20, 5  ;;  %v3848_v8 = vrot.slane %v3846_v21, 5 }
 0x3d5   :  { %v3865_v18 = vshrl.u32 %v7954_v31, 16  ;;  %v3868_v1 = vshll.u32 %v7954_v31, 16  ;;  %v11609_v4 = vpop.permute.xlu0 %4485  ;;  %4813 = vrot.lane.b32.xlu1 %v4772_v54, %s8882_s28  ;;  %v3843_v26 = vor.u32 %v3842_v0, %v3839_v61  ;;  %v3874_v2 = vshll.u32 %v7955_v46, 16 }
 0x3d6   :  { %v5795_v24 = vor.u32 %v13741_v27, %v11547_v51  ;;  %v6845_v13 = vshrl.u32 %v11572_v29, 16  ;;  %v3858_v38 = vrot.slane %v3857_v32, 4  ;;  %v13742_v51 = vcombine.low %v11492_v49, %v11517_v10 }
 0x3d7   :  { %v3867_v30 = vrot.slane %v3865_v18, 4  ;;  %v3870_v62 = vrot.slane %v3868_v1, 5  ;;  %4811 = vrot.lane.b32.xlu0 %v4765_v19, %s8882_s28  ;;  %v4596_v36 = vpop.permute.xlu1 %4595  ;;  %v3844_v53 = vrot.slane %v3843_v26, 4  ;;  %v4774_v41 = vshrl.u32 %v11607_v47, 16 }
 0x3d8   :  { %v11625_v23 = vcombine.low %v5360_v48, %v5360_v48  ;;  %v3835_v19 = vsel %vm11304_vm3, %v3830_v9, %v3834_v37  ;;  %v4783_v61 = vrot.slane %v4781_v6, 7  ;;  %v11631_v31 = vcombine.low %v5358_v35, %v5358_v35  ;;  %v88_v35 = vld [vmem:[#allocation2 + $0x98] sm:$0x1] }
 0x3d9   :  { %v3871_v15 = vor.u32 %v3870_v62, %v3867_v30  ;;  %v11618_v11 = vpop.permute.xlu0 %4489  ;;  %5740 = vrot.lane.b32.xlu1 %v13742_v51, %s8880_s25  ;;  %v3849_v52 = vsel %vm11304_vm3, %v3844_v53, %v3848_v8  ;;  %v3862_v54 = vrot.slane %v3860_v57, 5  ;;  %v3876_v0 = vrot.slane %v3874_v2, 5  ;;  %v5364_v2 = vld [vmem:[#allocation2 + $0x48] sm:$0xf] }
 0x3da   :  { %v13743_v49 = vcombine.low %v11506_v39, %v11541_v7  ;;  %v7962_v10 = vcombine.low %v3835_v19, %v3849_v52  ;;  %v13744_v46 = vshll.u32 %v11513_v34, 16  ;;  %v13745_v18 = vshrl.u32 %v11533_v58, 16 }
 0x3db   :  { %v3872_v20 = vrot.slane %v3871_v15, 4  ;;  %v4600_v21 = vpop.permute.xlu1 %4599  ;;  %v6847_v9 = vrot.slane %v6845_v13, 7  ;;  %v6838_v26 = vshrl.u32 %v11580_v43, 16  ;;  %v3863_v27 = vsel %vm11304_vm3, %v3858_v38, %v3862_v54  ;;  %v5362_v38 = vld [vmem:[#allocation2 + $0x40] sm:$0xf] }
 0x3dc   :  { %5738 = vrot.lane.b32.xlu0 %v13743_v49, %s8880_s25  ;;  %v5788_v32 = vor.u32 %v13744_v46, %v11564_v22  ;;  %v5799_v1 = vrot.slane %v13745_v18, 7  ;;  %8516 = vmatprep.mubr.msk.bf16.mxu1 %vm13727_vm7, %v7962_v10  ;;  %v4784_v34 = vshll.u32 %v11602_v17, 16  ;;  %v4776_v7 = vrot.slane %v4774_v41, 7 }
 0x3dd   :  { %v3877_v6 = vsel %vm11304_vm3, %v3872_v20, %v3876_v0  ;;  %v4598_v39 = vpop.permute.xlu0 %4597  ;;  %5896 = vrot.lane.b32.xlu1 %v5795_v24, %s8882_s28  ;;  %v13746_v22 = vcombine.low %v11481_v40, %v11309_v63  ;;  %v5546_v30 = vshrl.u32 %v11625_v23, 16  ;;  %v5539_v62 = vshrl.u32 %v11631_v31, 16 }
 0x3de   :  { %v7963_v57 = vcombine.low %v3863_v27, %v3877_v6  ;;  %v4786_v17 = vor.u32 %v4784_v34, %v4783_v61  ;;  %v4777_v53 = vshll.u32 %v11607_v47, 16  ;;  %v89_v63 = vsel %vm10814_vm0, 0, %v88_v35  ;;  %vm13753_vm0 = vmmov %vm13733_vm2  ;;  %v6648_v34 = vld [vmem:[#allocation2 + $0x28] sm:$0xf] }
 0x3df   :  { %v4821_v48 = vsel %vm13747_vm8, %v13746_v22, %v11592_v3  ;;  %v4788_v24 = vpop.permute.xlu1 %4787  ;;  %v13750_v3 = vshll.u32 %v11521_v14, 16  ;;  %v6848_v13 = vshll.u32 %v11572_v29, 16  ;;  %90 = vst [vmem:[#allocation2 + $0x98] sm:$0x1] %v89_v63  ;;  %v5802_v51 = vor.u32 %v13751_v44, %v5799_v1  ;;  %vm13756_vm2 = vmmov %vm13753_vm0 }
 0x3e0   :  { %v4868_v37 = vsel %vm13729_vm9, %v4821_v48, %v4596_v36  ;;  %5894 = vrot.lane.b32.xlu0 %v5788_v32, %s8882_s28  ;;  %8517 = vmatmul.mubr.msk.bf16.gmra.mxu1 %vm13748_vm10, %v7963_v57  ;;  %v6841_v36 = vshll.u32 %v11580_v43, 16  ;;  %v4779_v47 = vor.u32 %v4777_v53, %v4776_v7  ;;  %v6840_v41 = vrot.slane %v6838_v26, 7  ;;  %vm13763_vm7 = vmmov %vm13753_vm0 }
 0x3e1   :  { %v4900_v40 = vsel %vm13749_vm11, %v4868_v37, %v4788_v24  ;;  %v5809_v8 = vor.u32 %v13750_v3, %v11566_v33  ;;  %v4602_v15 = vpop.permute.xlu0 %4601  ;;  %4817 = vrot.lane.b32.xlu1 %v4786_v17, %s8882_s28  ;;  %v11672_v19 = vcombine.low %v5364_v2, %v5364_v2  ;;  %v13752_v14 = vcombine.low %v11490_v42, %v11329_v59  ;;  %v11712_v2 = vld [vmem:[%s13357_s2 + $0x28] sm:$0xff]   ;;  %vm13764_vm8 = vmmov %vm13729_vm9 }
 0x3e2   :  { %v8038_v33 = vcombine.low %v4900_v40, %v4900_v40  ;;  %v8039_v52 = vcombine.high %v4900_v40, %v4900_v40  ;;  %v6850_v61 = vor.u32 %v6848_v13, %v6847_v9  ;;  %v5548_v0 = vrot.slane %v5546_v30, 7  ;;  %vm13765_vm9 = vmmov %vm13757_vm6  ;;  %8540 = vmatprep.subr.bf16.mxu0 %v11712_v2 }
 0x3e3   :  { %v4827_v29 = vsel %vm13753_vm0, %v13752_v14, %v11605_v60  ;;  %v4792_v20 = vpop.permute.xlu1 %4791  ;;  %v5541_v58 = vrot.slane %v5539_v62, 7  ;;  %v11681_v49 = vcombine.low %v5362_v38, %v5362_v38  ;;  %v13755_v10 = vcombine.low %v11496_v45, %v11332_v56  ;;  %v6618_v62 = vld [vmem:[#allocation2 + $0x24] sm:$0x1]  ;;  %vm13766_vm11 = vmmov %vm13748_vm10 }
 0x3e4   :  { %v4872_v54 = vsel %vm13754_vm12, %v4827_v29, %v4600_v21  ;;  %4815 = vrot.lane.b32.xlu0 %v4779_v47, %s8882_s28  ;;  %v5549_v46 = vshll.u32 %v11625_v23, 16  ;;  %v5542_v32 = vshll.u32 %v11631_v31, 16  ;;  %v5560_v18 = vshrl.u32 %v11672_v19, 16  ;;  %v6620_v31 = vld [vmem:[#allocation2 + $0x2c] sm:$0x1]  ;;  %vm13767_vm12 = vmmov %vm13764_vm8 }
 0x3e5   :  { %v4824_v59 = vsel %vm13756_vm2, %v13755_v10, %v11609_v4  ;;  %v4904_v42 = vsel %vm13757_vm6, %v4872_v54, %v4792_v20  ;;  %v4790_v21 = vpop.permute.xlu0 %4789  ;;  %5900 = vrot.lane.b32.xlu1 %v5809_v8, %s8882_s28  ;;  %v8070_v1 = vrot.slane %v8038_v33, 9  ;;  %v5016_v9 = vrot.slane %v8039_v52, 5  ;;  %v11742_v10 = vld [vmem:[#allocation2 + $0x14] sm:$0x1]  ;;  %vm13768_vm2 = vmmov %vm13757_vm6 }
 0x3e6   :  { %v4870_v60 = vsel %vm13758_vm13, %v4824_v59, %v4598_v39  ;;  %v8042_v56 = vcombine.low %v4904_v42, %v4904_v42  ;;  %v8043_v26 = vcombine.high %v4904_v42, %v4904_v42  ;;  %v5551_v23 = vor.u32 %v5549_v46, %v5548_v0  ;;  %v4155_v59 = vld [vmem:[#allocation2 + $0x28] sm:$0xe]  ;;  %v6694_v46 = vld [vmem:[#allocation2 + $0x10] sm:$0xf]  ;;  %vm13769_vm1 = vmmov %vm13753_vm0 }
 0x3e7   :  { %v4902_v45 = vsel %vm13759_vm15, %v4870_v60, %v4790_v21  ;;  %v11700_v39 = vpop.permute.xlu1 %4491  ;;  %v13762_v7 = vcombine.low %v11498_v25, %v11339_v28  ;;  %v5544_v48 = vor.u32 %v5542_v32, %v5541_v58  ;;  %v5563_v57 = vshll.u32 %v11672_v19, 16  ;;  %v6647_v25 = vld [vmem:[#allocation2 + $0x20] sm:$0xf]  ;;  %v5392_v58 = vld [vmem:[#allocation2 + $0x30] sm:$0xf]  ;;  %vm13770_vm14 = vmmov %vm13764_vm8 }
 0x3e8   :  { %v8040_v27 = vcombine.low %v4902_v45, %v4902_v45  ;;  %v8041_v6 = vcombine.high %v4902_v45, %v4902_v45  ;;  %5898 = vrot.lane.b32.xlu0 %v5802_v51, %s8882_s28  ;;  %v5553_v30 = vshrl.u32 %v11681_v49, 16  ;;  %v5562_v28 = vrot.slane %v5560_v18, 7  ;;  %v5390_v32 = vld [vmem:[#allocation2 + $0x28] sm:$0xf]  ;;  %vm13771_vm6 = vmmov %vm13753_vm0 }
 0x3e9   :  { %v4830_v22 = vsel %vm13763_vm7, %v13762_v7, %v11618_v11  ;;  %v4794_v17 = vpop.permute.xlu0 %4793  ;;  %5632 = vrot.lane.b32.xlu1 %v5551_v23, %s8878_s29  ;;  %v5017_v11 = vsel %vm11695_vm5, %v8070_v1, %v5016_v9  ;;  %v8072_v53 = vrot.slane %v8042_v56, 9  ;;  %v11719_v40 = vcombine.low %v6648_v34, %v6620_v31  ;;  %v8829_v56 = vld [vmem:[#allocation2 + $0x2c] sm:$0x1]  ;;  %v4159_v31 = vld [vmem:[#allocation2 + $0x38] sm:$0xe]  ;;  %vm13772_vm13 = vmmov %vm13768_vm2 }
 0x3ea   :  { %v4874_v35 = vsel %vm13764_vm8, %v4830_v22, %v4602_v15  ;;  %v8071_v37 = vrot.slane %v8040_v27, 9  ;;  %v5020_v24 = vrot.slane %v8041_v6, 5  ;;  %v5024_v3 = vrot.slane %v8043_v26, 5  ;;  %v6663_v26 = vld [vmem:[#allocation2 + $0x10] sm:$0xe]  ;;  %vm13773_vm15 = vmmov %vm13764_vm8 }
 0x3eb   :  { %v4906_v63 = vsel %vm13765_vm9, %v4874_v35, %v4794_v17  ;;  %v11725_v15 = vpop.permute.xlu1 %4495  ;;  %v6843_v44 = vor.u32 %v6841_v36, %v6840_v41  ;;  %v11729_v51 = vcombine.low %v6647_v25, %v6618_v62  ;;  %v5565_v33 = vor.u32 %v5563_v57, %v5562_v28  ;;  %v11753_v6 = vld [vmem:[#allocation2 + $0x8] sm:$0xe]  ;;  %v11755_v23 = vld [vmem:[#allocation2 + $0xc] sm:$0x1]  ;;  %v4157_v17 = vld [vmem:[#allocation2 + $0x30] sm:$0xe] }
 0x3ec   :  { %v5021_v8 = vsel %vm11695_vm5, %v8071_v37, %v5020_v24  ;;  %v8044_v13 = vcombine.low %v4906_v63, %v4906_v63  ;;  %v8045_v38 = vcombine.high %v4906_v63, %v4906_v63  ;;  %5630 = vrot.lane.b32.xlu0 %v5544_v48, %s8878_s29  ;;  %v5555_v52 = vrot.slane %v5553_v30, 7  ;;  %v6693_v30 = vld [vmem:[#allocation2 + $0x8] sm:$0xf]  ;;  %v11764_v37 = vld [vmem:[#allocation2 + $0x20] sm:$0xe]  ;;  %vm13774_vm7 = vmmov %vm13768_vm2 }
 0x3ed   :  { %v8090_v47 = vcombine.low %v5017_v11, %v5021_v8  ;;  %v11731_v29 = vpop.permute.xlu0 %4493  ;;  %6951 = vrot.lane.b32.xlu1 %v6850_v61, %s8878_s29  ;;  %v5025_v54 = vsel %vm11695_vm5, %v8072_v53, %v5024_v3  ;;  %v5556_v36 = vshll.u32 %v11681_v49, 16  ;;  %v6859_v41 = vshrl.u32 %v11719_v40, 16  ;;  %v5393_v61 = vld [vmem:[#allocation2 + $0x34] sm:$0x1]  ;;  %v5391_v49 = vld [vmem:[#allocation2 + $0x2c] sm:$0x1]  ;;  %vm13775_vm8 = vmmov %vm13753_vm0 }
 0x3ee   :  { %v8073_v19 = vrot.slane %v8044_v13, 9  ;;  %v5028_v14 = vrot.slane %v8045_v38, 5  ;;  %v6852_v21 = vshrl.u32 %v11729_v51, 16  ;;  %v8161_v1 = vcombine.low %v5392_v58, %v5393_v61  ;;  %v11766_v24 = vld [vmem:[#allocation2 + $0x24] sm:$0x1]  ;;  %vm13776_vm9 = vmmov %vm13767_vm12 }
 0x3ef   :  { %8524 = vmatprep.mubr.msk.bf16.mxu1 %vm13748_vm10, %v8090_v47  ;;  %v4604_v43 = vpop.permute.xlu1 %4603  ;;  %v5558_v60 = vor.u32 %v5556_v36, %v5555_v52  ;;  %v6861_v9 = vrot.slane %v6859_v41, 7  ;;  %v7978_v45 = vcombine.low %v4155_v59, %v8829_v56  ;;  %v11751_v27 = vcombine.low %v6694_v46, %v11742_v10  ;;  %v8830_v3 = vld [vmem:[#allocation2 + $0x3c] sm:$0x1]  ;;  %v8831_v36 = vld [vmem:[#allocation2 + $0x34] sm:$0x1]  ;;  %vm13777_vm10 = vmmov %vm13768_vm2 }
 0x3f0   :  { %v5029_v20 = vsel %vm11695_vm5, %v8073_v19, %v5028_v14  ;;  %6949 = vrot.lane.b32.xlu0 %v6843_v44, %s8878_s29  ;;  %v11757_v7 = vcombine.low %v5392_v58, %v5392_v58  ;;  %v8160_v22 = vcombine.low %v5390_v32, %v5391_v49  ;;  %v6862_v48 = vshll.u32 %v11719_v40, 16  ;;  %v6696_v40 = vld [vmem:[#allocation2 + $0x20] sm:$0xf]  ;;  %v11779_v47 = vld [vmem:[#allocation2 + $0x1c] sm:$0x1] }
 0x3f1   :  { %v8091_v0 = vcombine.low %v5025_v54, %v5029_v20  ;;  %v11744_v42 = vpop.permute.xlu0 %4497  ;;  %5636 = vrot.lane.b32.xlu1 %v5565_v33, %s8878_s29  ;;  %v6854_v57 = vrot.slane %v6852_v21, 7  ;;  %v4833_v62 = vsel %vm13753_vm0, %v7978_v45, %v11700_v39  ;;  %v6855_v35 = vshll.u32 %v11729_v51, 16  ;;  %v11773_v39 = vld [vmem:[#allocation2 + $0x18] sm:$0xe]  ;;  %v4161_v19 = vld [vmem:[#allocation2 + $0x40] sm:$0xe] }
 0x3f2   :  { %v4876_v28 = vsel %vm13767_vm12, %v4833_v62, %v4604_v43  ;;  %v6864_v11 = vor.u32 %v6862_v48, %v6861_v9  ;;  %v8291_v53 = vcombine.low %v6663_v26, %v11742_v10  ;;  %v8290_v63 = vcombine.low %v11753_v6, %v11755_v23  ;;  %v6695_v44 = vld [vmem:[#allocation2 + $0x18] sm:$0xf]  ;;  %v5396_v61 = vld [vmem:[#allocation2 + $0x40] sm:$0xf]  ;;  %v5397_v10 = vld [vmem:[#allocation2 + $0x44] sm:$0x1] }
 0x3f3   :  { %8525 = vmatmul.mubr.msk.bf16.vlgmr.msra.gmra.mxu1 %vm13766_vm11, %v8091_v0  ;;  %v4608_v18 = vpop.permute.xlu1 %4607  ;;  %v7980_v8 = vcombine.low %v4159_v31, %v8830_v3  ;;  %v11777_v38 = vcombine.low %v6693_v30, %v11755_v23  ;;  %v7149_v51 = vshrl.u32 %v11751_v27, 16  ;;  %v11782_v14 = vcombine.low %v5390_v32, %v5390_v32  ;;  %v8832_v49 = vld [vmem:[#allocation2 + $0x44] sm:$0x1]  ;;  %v5394_v6 = vld [vmem:[#allocation2 + $0x38] sm:$0xf]  ;;  %vm13779_vm12 = vmmov %vm13753_vm0 }
 0x3f4   :  { %5634 = vrot.lane.b32.xlu0 %v5558_v60, %s8878_s29  ;;  %v6857_v52 = vor.u32 %v6855_v35, %v6854_v57  ;;  %v5818_v54 = vshrl.u32 %v11757_v7, 16  ;;  %v8293_v20 = vcombine.low %v11764_v37, %v11766_v24  ;;  %v7979_v41 = vcombine.low %v4157_v17, %v8831_v36  ;;  %v5395_v23 = vld [vmem:[#allocation2 + $0x3c] sm:$0x1]  ;;  %v6649_v36 = vld [vmem:[#allocation2 + $0x30] sm:$0xf] }
 0x3f5   :  { %v4606_v34 = vpop.permute.xlu0 %4605  ;;  %5744 = vrot.lane.b32.xlu1 %v8161_v1, %s8880_s25  ;;  %v4839_v43 = vsel %vm13769_vm1, %v7980_v8, %v11725_v15  ;;  %v11793_v21 = vcombine.low %v6696_v40, %v11766_v24  ;;  %v8292_v46 = vcombine.low %v11773_v39, %v11779_v47  ;;  %v11798_v32 = vcombine.low %v6695_v44, %v11779_v47  ;;  %v8834_v39 = vld [vmem:[#allocation2 + $0x8] sm:$0xf] }
 0x3f6   :  { %v4880_v59 = vsel %vm13770_vm14, %v4839_v43, %v4608_v18  ;;  %v4836_v15 = vsel %vm13771_vm6, %v7979_v41, %v11731_v29  ;;  %v7981_v1 = vcombine.low %v4161_v19, %v8832_v49  ;;  %v11803_v18 = vrot.slane %v7149_v51, 7  ;;  %v6624_v51 = vld [vmem:[#allocation2 + $0x3c] sm:$0x1]  ;;  %v6650_v19 = vld [vmem:[#allocation2 + $0x38] sm:$0xf]  ;;  %vm13785_vm6 = vmmov %vm13776_vm9 }
 0x3f7   :  { %v4796_v25 = vpop.permute.xlu1 %4795  ;;  %v4878_v56 = vsel %vm13773_vm15, %v4836_v15, %v4606_v34  ;;  %v8163_v26 = vcombine.low %v5396_v61, %v5397_v10  ;;  %v5820_v31 = vrot.slane %v5818_v54, 7  ;;  %v5814_v40 = vshll.u32 %v11782_v14, 16  ;;  %v6651_v10 = vld [vmem:[#allocation2 + $0x40] sm:$0xf]  ;;  %vm13788_vm15 = vmmov %vm13774_vm7 }
 0x3f8   :  { %5742 = vrot.lane.b32.xlu0 %v8160_v22, %s8880_s25  ;;  %v4908_v13 = vsel %vm13768_vm2, %v4876_v28, %v4796_v25  ;;  %v5811_v22 = vshrl.u32 %v11782_v14, 16  ;;  %v11812_v28 = vcombine.low %v5396_v61, %v5396_v61  ;;  %v4842_v25 = vsel %vm13775_vm8, %v7981_v1, %v11744_v42  ;;  %v6626_v61 = vld [vmem:[#allocation2 + $0x44] sm:$0x1]  ;;  %vm13781_vm2 = vmmov %vm13753_vm0 }
 0x3f9   :  { %v4610_v33 = vpop.permute.xlu0 %4609  ;;  %6955 = vrot.lane.b32.xlu1 %v6864_v11, %s8878_s29  ;;  %v8046_v0 = vcombine.low %v4908_v13, %v4908_v13  ;;  %v8047_v58 = vcombine.high %v4908_v13, %v4908_v13  ;;  %v8162_v11 = vcombine.low %v5394_v6, %v5395_v23  ;;  %v7152_v15 = vshll.u32 %v11751_v27, 16  ;;  %vm13791_vm8 = vmmov %vm13777_vm10 }
 0x3fa   :  { %v4882_v3 = vsel %vm13776_vm9, %v4842_v25, %v4610_v33  ;;  %v7142_v49 = vshrl.u32 %v11777_v38, 16  ;;  %v7156_v23 = vshrl.u32 %v11798_v32, 16  ;;  %v11842_v27 = vcombine.low %v6651_v10, %v6626_v61 }
 0x3fb   :  { %v4800_v60 = vpop.permute.xlu1 %4799  ;;  %v8074_v48 = vrot.slane %v8046_v0, 9  ;;  %v5032_v57 = vrot.slane %v8047_v58, 5  ;;  %v7154_v5 = vor.u32 %v7152_v15, %v11803_v18  ;;  %v6652_v15 = vld [vmem:[#allocation2 + $0x48] sm:$0xf]  ;;  %vm13782_vm1 = vcmask 31744  }
 0x3fc   :  { %6953 = vrot.lane.b32.xlu0 %v6857_v52, %s8878_s29  ;;  %v4912_v9 = vsel %vm13772_vm13, %v4880_v59, %v4800_v60  ;;  %v11828_v59 = vcombine.low %v5394_v6, %v5394_v6  ;;  %v11838_v6 = vcombine.low %v6650_v19, %v6624_v51  ;;  %v5366_v51 = vld [vmem:[#allocation2 + $0x60] sm:$0xf]  ;;  %vm13784_vm14 = vmmov %vm13782_vm1 }
 0x3fd   :  { %v4798_v45 = vpop.permute.xlu0 %4797  ;;  %7063 = vrot.lane.b32.xlu1 %v8291_v53, %s8880_s25  ;;  %v8050_v29 = vcombine.low %v4912_v9, %v4912_v9  ;;  %v8051_v62 = vcombine.high %v4912_v9, %v4912_v9  ;;  %v5821_v53 = vshll.u32 %v11757_v7, 16  ;;  %v5033_v52 = vsel %vm11695_vm5, %v8074_v48, %v5032_v57  ;;  %v6622_v7 = vld [vmem:[#allocation2 + $0x34] sm:$0x1]  ;;  %v11844_v48 = vld [vmem:[#allocation2 + $0x1c] sm:$0x1]  ;;  %vm13787_vm13 = vmmov %vm13782_vm1 }
 0x3fe   :  { %v4910_v30 = vsel %vm13774_vm7, %v4878_v56, %v4798_v45  ;;  %v6873_v19 = vshrl.u32 %v11838_v6, 16  ;;  %v11896_v10 = vcombine.low %v5366_v51, %v5366_v51  ;;  %vm13789_vm7 = vmmov %vm13785_vm6 }
 0x3ff   :  { %v8048_v35 = vcombine.low %v4910_v30, %v4910_v30  ;;  %v8049_v17 = vcombine.high %v4910_v30, %v4910_v30  ;;  %v11810_v34 = vpop.permute.xlu1 %4499  ;;  %v8076_v54 = vrot.slane %v8050_v29, 9  ;;  %v5823_v43 = vor.u32 %v5821_v53, %v5820_v31  ;;  %vm13792_vm9 = vmmov %vm13782_vm1 }
 0x400   :  { %7061 = vrot.lane.b32.xlu0 %v8290_v63, %s8880_s25  ;;  %v5813_v63 = vrot.slane %v5811_v22, 7  ;;  %v5040_v14 = vrot.slane %v8051_v62, 5  ;;  %v11840_v31 = vcombine.low %v6649_v36, %v6622_v7  ;;  %v150_v22 = vld [vmem:[#allocation2 + $0x9c] sm:$0x1]  ;;  %v5832_v62 = vshrl.u32 %v11812_v28, 16 }
 0x401   :  { %v8075_v8 = vrot.slane %v8048_v35, 9  ;;  %v5036_v13 = vrot.slane %v8049_v17, 5  ;;  %v4802_v44 = vpop.permute.xlu0 %4801  ;;  %5748 = vrot.lane.b32.xlu1 %v8163_v26, %s8880_s25  ;;  %v7163_v26 = vshrl.u32 %v11793_v21, 16  ;;  %v151_v35 = vsel %vm10828_vm4, 0, %v150_v22  ;;  %v11856_v17 = vld [vmem:[#allocation2 + $0xc] sm:$0x1]  ;;  %vm13778_vm4 = vmmov %vm13766_vm11 }
 0x402   :  { %v4914_v42 = vsel %vm13777_vm10, %v4882_v3, %v4802_v44  ;;  %v5816_v45 = vor.u32 %v5814_v40, %v5813_v63  ;;  %v5041_v57 = vsel %vm11695_vm5, %v8076_v54, %v5040_v14  ;;  %v5825_v53 = vshrl.u32 %v11828_v59, 16  ;;  %v5368_v3 = vld [vmem:[#allocation2 + $0x68] sm:$0xf]  ;;  %152 = vst [vmem:[#allocation2 + $0x9c] sm:$0x1] %v151_v35  ;;  %vm13793_vm10 = vmmov %vm13753_vm0 }
 0x403   :  { %v5037_v33 = vsel %vm11695_vm5, %v8075_v8, %v5036_v13  ;;  %v8052_v41 = vcombine.low %v4914_v42, %v4914_v42  ;;  %v8053_v0 = vcombine.high %v4914_v42, %v4914_v42  ;;  %v11826_v58 = vpop.permute.xlu1 %3161  ;;  %v7166_v40 = vshll.u32 %v11793_v21, 16  ;;  %v11861_v8 = vld [vmem:[#allocation2 + $0x14] sm:$0x1]  ;;  %v11875_v42 = vld [vmem:[#allocation2 + $0x24] sm:$0x1] }
 0x404   :  { %5746 = vrot.lane.b32.xlu0 %v8162_v11, %s8880_s25  ;;  %v8092_v60 = vcombine.low %v5033_v52, %v5037_v33  ;;  %v7145_v11 = vshll.u32 %v11777_v38, 16  ;;  %v7144_v44 = vrot.slane %v7142_v49, 7  ;;  %v7165_v63 = vrot.slane %v7163_v26, 7  ;;  %v5370_v33 = vld [vmem:[#allocation2 + $0x70] sm:$0xf] }
 0x405   :  { %v8077_v1 = vrot.slane %v8052_v41, 9  ;;  %v5044_v9 = vrot.slane %v8053_v0, 5  ;;  %v11832_v56 = vpop.permute.xlu0 %4501  ;;  %5904 = vrot.lane.b32.xlu1 %v5823_v43, %s8882_s28  ;;  %v7159_v38 = vshll.u32 %v11798_v32, 16  ;;  %v7158_v21 = vrot.slane %v7156_v23, 7  ;;  %v8833_v43 = vld [vmem:[#allocation2 + $0x18] sm:$0xf] }
 0x406   :  { %8528 = vmatprep.mubr.msk.bf16.mxu1 %vm13766_vm11, %v8092_v60  ;;  %v6866_v52 = vshrl.u32 %v11840_v31, 16  ;;  %v6880_v54 = vshrl.u32 %v11842_v27, 16  ;;  %v5834_v24 = vrot.slane %v5832_v62, 7  ;;  %v5828_v32 = vshll.u32 %v11828_v59, 16  ;;  %v11889_v41 = vld [vmem:[#allocation2 + $0x30] sm:$0xe]  ;;  %vm13794_vm11 = vmmov %vm13753_vm0 }
 0x407   :  { %v5045_v29 = vsel %vm11695_vm5, %v8077_v1, %v5044_v9  ;;  %v11851_v30 = vpop.permute.xlu1 %3269  ;;  %v11885_v18 = vcombine.low %v5368_v3, %v5368_v3  ;;  %v7862_v7 = vcombine.low %v8833_v43, %v11844_v48  ;;  %v5827_v36 = vrot.slane %v5825_v53, 7  ;;  %v5372_v59 = vld [vmem:[#allocation2 + $0x78] sm:$0xf]  ;;  %v6628_v60 = vld [vmem:[#allocation2 + $0x4c] sm:$0x1] }
 0x408   :  { %5902 = vrot.lane.b32.xlu0 %v5816_v45, %s8882_s28  ;;  %v8093_v25 = vcombine.low %v5041_v57, %v5045_v29  ;;  %v6876_v14 = vshll.u32 %v11838_v6, 16  ;;  %v7860_v47 = vcombine.low %v8834_v39, %v11856_v17  ;;  %v7147_v61 = vor.u32 %v7145_v11, %v7144_v44  ;;  %v11899_v26 = vld [vmem:[#allocation2 + $0x34] sm:$0x1]  ;;  %v11908_v29 = vld [vmem:[#allocation2 + $0x28] sm:$0xe] }
 0x409   :  { %v11863_v13 = vpop.permute.xlu0 %3267  ;;  %7067 = vrot.lane.b32.xlu1 %v8293_v20, %s8880_s25  ;;  %v5835_v20 = vshll.u32 %v11812_v28, 16  ;;  %v6875_v49 = vrot.slane %v6873_v19, 7  ;;  %v6868_v1 = vrot.slane %v6866_v52, 7  ;;  %v6869_v9 = vshll.u32 %v11840_v31, 16  ;;  %v11910_v62 = vld [vmem:[#allocation2 + $0x2c] sm:$0x1] }
 0x40a   :  { %8529 = vmatmul.mubr.msk.bf16.gmra.mxu1 %vm13778_vm4, %v8093_v25  ;;  %v6882_v45 = vrot.slane %v6880_v54, 7  ;;  %v5574_v22 = vshrl.u32 %v11885_v18, 16  ;;  %v11905_v48 = vcombine.low %v5370_v33, %v5370_v33  ;;  %v6883_v57 = vshll.u32 %v11842_v27, 16  ;;  %v11912_v35 = vld [vmem:[#allocation2 + $0x58] sm:$0xe]  ;;  %vm13795_vm4 = vmmov %vm13753_vm0 }
 0x40b   :  { %v11881_v37 = vpop.permute.xlu1 %4505  ;;  %v5837_v6 = vor.u32 %v5835_v20, %v5834_v24  ;;  %v11914_v31 = vld [vmem:[#allocation2 + $0x20] sm:$0xf]  ;;  %v11920_v11 = vld [vmem:[#allocation2 + $0x70] sm:$0xe]  ;;  %v7168_v53 = vor.u32 %v7166_v40, %v7165_v63  ;;  %v11922_v3 = vcombine.low %v5372_v59, %v5372_v59  ;;  %v11926_v27 = vld [vmem:[#allocation2 + $0x68] sm:$0xe]  ;;  %v5830_v44 = vor.u32 %v5828_v32, %v5827_v36 }
 0x40c   :  { %7065 = vrot.lane.b32.xlu0 %v8292_v46, %s8880_s25  ;;  %v8835_v46 = vld [vmem:[#allocation2 + $0x10] sm:$0xf]  ;;  %v7863_v17 = vcombine.low %v11914_v31, %v11875_v42  ;;  %v11918_v25 = vld [vmem:[#allocation2 + $0x60] sm:$0xe]  ;;  %v7161_v51 = vor.u32 %v7159_v38, %v7158_v21  ;;  %v5567_v19 = vshrl.u32 %v11896_v10, 16  ;;  %v11936_v40 = vor.u32 %v6876_v14, %v6875_v49  ;;  %v8823_v38 = vld [vmem:[%s13357_s2 + $0x38] sm:$0xff]  }
 0x40d   :  { %v7861_v0 = vcombine.low %v8835_v46, %v11861_v8  ;;  %v11893_v28 = vpop.permute.xlu0 %4503  ;;  %7255 = vrot.lane.b32.xlu1 %v7154_v5, %s8882_s28  ;;  %v11924_v8 = vcombine.low %v6652_v15, %v6628_v60  ;;  %v11932_v52 = vld [vmem:[#allocation2 + $0x60] sm:$0xf]  ;;  %v11938_v63 = vor.u32 %v6869_v9, %v6868_v1  ;;  %v11940_v24 = vld [vmem:[#allocation2 + $0x64] sm:$0x1]  ;;  %v11942_v20 = vor.u32 %v6883_v57, %v6882_v45  ;;  %v8824_v21 = vld [vmem:[%s13357_s2 + $0x30] sm:$0xff]  }
 0x40e   :  { %v3461_v32 = vsel %vm13753_vm0, %v7860_v47, %v11239_v12  ;;  %v11956_v36 = vsel %vm13779_vm12, %v7862_v7, %v11245_v16  ;;  %v5576_v39 = vrot.slane %v5574_v22, 7  ;;  %v5581_v46 = vshrl.u32 %v11905_v48, 16  ;;  %v11966_v59 = vld [vmem:[#allocation2 + $0x5c] sm:$0x1]  ;;  %8560 = vmatprep.subr.bf16.mxu1 %v8823_v38  ;;  %v8838_v15 = vld [vmem:[#allocation2 + $0x64] sm:$0x1]  ;;  %vm13796_vm12 = vmmov %vm13785_vm6 }
 0x40f   :  { %v11902_v23 = vpop.permute.xlu1 %4613  ;;  %v3464_v12 = vsel %vm13781_vm2, %v7861_v0, %v11241_v50  ;;  %v8837_v47 = vld [vmem:[#allocation2 + $0x5c] sm:$0x1]  ;;  %v5588_v7 = vshrl.u32 %v11922_v3, 16  ;;  %v6887_v60 = vshrl.u32 %v11924_v8, 16  ;;  %v7983_v49 = vcombine.low %v11918_v25, %v8838_v15  ;;  %v8839_v1 = vld [vmem:[#allocation2 + $0x74] sm:$0x1]  ;;  %8561 = vmatpush3.bf16.msra.mxu1 %v8823_v38  ;;  %vm13797_vm2 = vmmov %vm13753_vm0 }
 0x410   :  { %7253 = vrot.lane.b32.xlu0 %v7147_v61, %s8882_s28  ;;  %v11964_v61 = vld [vmem:[#allocation2 + $0x58] sm:$0xf]  ;;  %v7982_v16 = vcombine.low %v11912_v35, %v8837_v47  ;;  %v7985_v50 = vcombine.low %v11920_v11, %v8839_v1  ;;  %v5577_v45 = vshll.u32 %v11885_v18, 16  ;;  %v8840_v22 = vld [vmem:[#allocation2 + $0x6c] sm:$0x1]  ;;  %v8165_v35 = vcombine.low %v11932_v52, %v11940_v24  ;;  %8562 = vmatprep.subr.bf16.mxu1 %v8824_v21 }
 0x411   :  { %v11928_v5 = vpop.permute.xlu0 %4611  ;;  %5908 = vrot.lane.b32.xlu1 %v5837_v6, %s8882_s28  ;;  %v5569_v6 = vrot.slane %v5567_v19, 7  ;;  %v7984_v57 = vcombine.low %v11926_v27, %v8840_v22  ;;  %v11996_v25 = vcombine.low %v11932_v52, %v11932_v52  ;;  %v8164_v18 = vcombine.low %v11964_v61, %v11966_v59 }
 0x412   :  { %v3510_v11 = vsel %vm13785_vm6, %v3464_v12, %v11851_v30  ;;  %v5570_v19 = vshll.u32 %v11896_v10, 16  ;;  %v5583_v38 = vrot.slane %v5581_v46, 7  ;;  %v5590_v15 = vrot.slane %v5588_v7, 7 }
 0x413   :  { %v11959_v14 = vpop.f32.mrf.mxu1  ;;  %v11961_v33 = vpop.permute.xlu1 %3273  ;;  %v6889_v1 = vrot.slane %v6887_v60, 7  ;;  %v6890_v30 = vshll.u32 %v11924_v8, 16  ;;  %v5584_v46 = vshll.u32 %v11905_v48, 16  ;;  %8563 = vmatpush3.bf16.msra.mxu1 %v8824_v21  ;;  %v12028_v8 = vcombine.low %v11964_v61, %v11964_v61 }
 0x414   :  { %5906 = vrot.lane.b32.xlu0 %v5830_v44, %s8882_s28  ;;  %13780 = vst [vmem:[#allocation32_spill] sm:$0xff] %v11959_v14  ;;  %4045 = vst.msk [vmem:[%s13358_s3 + $0x30] sm:$0xff] %vm13782_vm1, %v11959_v14  ;;  %v5579_v44 = vor.u32 %v5577_v45, %v5576_v39  ;;  %v5572_v10 = vor.u32 %v5570_v19, %v5569_v6 }
 0x415   :  { %v11980_v0 = vpop.permute.xlu0 %3271  ;;  %v11982_v9 = vpop.f32.mrf.mxu1  ;;  %7259 = vrot.lane.b32.xlu1 %v7168_v53, %s8882_s28  ;;  %v12032_v19 = vor.u32 %v6890_v30, %v6889_v1  ;;  %vm13798_vm1 = vmmov %vm13791_vm8 }
 0x416   :  { %13783 = vst [vmem:[#allocation4_spill] sm:$0xff] %v11982_v9  ;;  %4043 = vst.msk [vmem:[%s13358_s3 + $0x20] sm:$0xff] %vm13784_vm14, %v11982_v9  ;;  %v5365_v9 = vld [vmem:[#allocation2 + $0x4c] sm:$0x1] }
 0x417   :  { %v12003_v53 = vpop.f32.mrf.mxu1  ;;  %v3430_v27 = vpop.permute.xlu1 %3429  ;;  %vm13799_vm14 = vmmov %vm13785_vm6 }
 0x418   :  { %7257 = vrot.lane.b32.xlu0 %v7161_v51, %s8882_s28  ;;  %13786 = vst [vmem:[#allocation5_spill] sm:$0xff] %v12003_v53  ;;  %4046 = vst.msk [vmem:[%s13358_s3 + $0x38] sm:$0xff] %vm13787_vm13, %v12003_v53  ;;  %v3542_v47 = vsel %vm13788_vm15, %v3510_v11, %v3430_v27  ;;  %v3508_v51 = vsel %vm13789_vm7, %v3461_v32, %v11863_v13  ;;  %v5591_v13 = vshll.u32 %v11922_v3, 16  ;;  %v5846_v32 = vshrl.u32 %v11996_v25, 16 }
 0x419   :  { %v7926_v12 = vcombine.low %v3542_v47, %v3542_v47  ;;  %v3428_v39 = vpop.permute.xlu0 %3427  ;;  %v12015_v45 = vpop.f32.mrf.mxu1  ;;  %5640 = vrot.lane.b32.xlu1 %v5579_v44, %s8878_s29  ;;  %v7927_v7 = vcombine.high %v3542_v47, %v3542_v47  ;;  %v5586_v44 = vor.u32 %v5584_v46, %v5583_v38  ;;  %v4845_v3 = vsel %vm13793_vm10, %v7982_v16, %v11810_v34  ;;  %vm13800_vm13 = vmmov %vm13785_vm6 }
 0x41a   :  { %13790 = vst [vmem:[#allocation17_spill] sm:$0xff] %v12015_v45  ;;  %v3540_v22 = vsel %vm13791_vm8, %v3508_v51, %v3428_v39  ;;  %4044 = vst.msk [vmem:[%s13358_s3 + $0x28] sm:$0xff] %vm13792_vm9, %v12015_v45  ;;  %v5593_v27 = vor.u32 %v5591_v13, %v5590_v15  ;;  %v3470_v47 = vsel %vm13794_vm11, %v7863_v17, %v11826_v58  ;;  %v12568_v45 = vld [vmem:[#allocation2 + $0x88] sm:$0xe] }
 0x41b   :  { %v3669_v60 = vshrl.u32 %v7926_v12, 16  ;;  %v3672_v48 = vshll.u32 %v7926_v12, 16  ;;  %v7924_v21 = vcombine.low %v3540_v22, %v3540_v22  ;;  %v4618_v6 = vpop.permute.xlu1 %4617  ;;  %v7925_v11 = vcombine.high %v3540_v22, %v3540_v22  ;;  %vm13801_vm15 = vmmov %vm13798_vm1 }
 0x41c   :  { %5638 = vrot.lane.b32.xlu0 %v5572_v10, %s8878_s29  ;;  %v4848_v38 = vsel %vm13795_vm4, %v7983_v49, %v11832_v56  ;;  %v4854_v15 = vsel %vm13753_vm0, %v7985_v50, %v11881_v37  ;;  %v3678_v30 = vshll.u32 %v7927_v7, 16  ;;  %v4851_v58 = vsel %vm13797_vm2, %v7984_v57, %v11893_v28  ;;  %vm13802_vm7 = vmmov %vm13798_vm1 }
 0x41d   :  { %v3671_v51 = vrot.slane %v3669_v60, 4  ;;  %v3674_v39 = vrot.slane %v3672_v48, 5  ;;  %v3655_v43 = vshrl.u32 %v7924_v21, 16  ;;  %v4616_v54 = vpop.permute.xlu0 %4615  ;;  %6959 = vrot.lane.b32.xlu1 %v11936_v40, %s8878_s29  ;;  %v3658_v34 = vshll.u32 %v7924_v21, 16  ;;  %vm13803_vm8 = vmmov %vm13785_vm6 }
 0x41e   :  { %v4886_v16 = vsel %vm13796_vm12, %v4848_v38, %v11902_v23  ;;  %v3664_v31 = vshll.u32 %v7925_v11, 16  ;;  %v4884_v37 = vsel %vm13799_vm14, %v4845_v3, %v11928_v5  ;;  %v3512_v28 = vsel %vm13800_vm13, %v11956_v36, %v11980_v0  ;;  %vm13804_vm9 = vmmov %vm13798_vm1 }
 0x41f   :  { %v3675_v1 = vor.u32 %v3674_v39, %v3671_v51  ;;  %v3657_v12 = vrot.slane %v3655_v43, 4  ;;  %v4806_v40 = vpop.permute.xlu1 %4805  ;;  %v3660_v42 = vrot.slane %v3658_v34, 5  ;;  %v3680_v10 = vrot.slane %v3678_v30, 5  ;;  %vm13805_vm10 = vmmov %vm13798_vm1 }
 0x420   :  { %6957 = vrot.lane.b32.xlu0 %v11938_v63, %s8878_s29  ;;  %v4918_v56 = vsel %vm13798_vm1, %v4886_v16, %v4806_v40  ;;  %v3514_v63 = vsel %vm13785_vm6, %v3470_v47, %v11961_v33  ;;  %v3666_v60 = vrot.slane %v3664_v31, 5  ;;  %v4890_v36 = vsel %vm13803_vm8, %v4854_v15, %v4618_v6  ;;  %vm13806_vm11 = vmmov %vm13785_vm6 }
 0x421   :  { %v3676_v17 = vrot.slane %v3675_v1, 4  ;;  %v8056_v49 = vcombine.low %v4918_v56, %v4918_v56  ;;  %v8057_v23 = vcombine.high %v4918_v56, %v4918_v56  ;;  %v4804_v50 = vpop.permute.xlu0 %4803  ;;  %5644 = vrot.lane.b32.xlu1 %v5593_v27, %s8878_s29  ;;  %v3661_v43 = vor.u32 %v3660_v42, %v3657_v12  ;;  %v6698_v56 = vld [vmem:[#allocation2 + $0x30] sm:$0xf]  ;;  %vm13808_vm0 = vmmov %vm13798_vm1 }
 0x422   :  { %v4916_v57 = vsel %vm13801_vm15, %v4884_v37, %v4804_v50  ;;  %v4888_v1 = vsel %vm13806_vm11, %v4851_v58, %v4616_v54  ;;  %vm13807_vm4 = vcmask 261120   ;;  %v5404_v58 = vld [vmem:[#allocation2 + $0x70] sm:$0xf]  ;;  %v5405_v50 = vld [vmem:[#allocation2 + $0x74] sm:$0x1]  ;;  %vm13814_vm14 = vcmask 64512   ;;  %vm13816_vm15 = vmmov %vm13808_vm0 }
 0x423   :  { %v8079_v46 = vrot.slane %v8056_v49, 9  ;;  %v5052_v22 = vrot.slane %v8057_v23, 5  ;;  %v8054_v5 = vcombine.low %v4916_v57, %v4916_v57  ;;  %v3434_v13 = vpop.permute.xlu1 %3433  ;;  %v3662_v7 = vrot.slane %v3661_v43, 4  ;;  %vm13809_vm12 = vmmov %vm13807_vm4 }
 0x424   :  { %5642 = vrot.lane.b32.xlu0 %v5586_v44, %s8878_s29  ;;  %v8055_v48 = vcombine.high %v4916_v57, %v4916_v57  ;;  %v3546_v21 = vsel %vm13802_vm7, %v3514_v63, %v3434_v13  ;;  %v3681_v33 = vsel %vm11304_vm3, %v3676_v17, %v3680_v10  ;;  %v5839_v13 = vshrl.u32 %v12028_v8, 16  ;;  %vm13812_vm2 = vmmov %vm13807_vm4 }
 0x425   :  { %v8078_v0 = vrot.slane %v8054_v5, 9  ;;  %v7930_v11 = vcombine.low %v3546_v21, %v3546_v21  ;;  %v3432_v27 = vpop.permute.xlu0 %3431  ;;  %5752 = vrot.lane.b32.xlu1 %v8165_v35, %s8880_s25  ;;  %v3667_v44 = vsel %vm11304_vm3, %v3662_v7, %v3666_v60  ;;  %v7931_v51 = vcombine.high %v3546_v21, %v3546_v21  ;;  %vm13813_vm1 = vmmov %vm13812_vm2 }
 0x426   :  { %v5048_v3 = vrot.slane %v8055_v48, 5  ;;  %v3544_v39 = vsel %vm13804_vm9, %v3512_v28, %v3432_v27  ;;  %v5053_v47 = vsel %vm11695_vm5, %v8079_v46, %v5052_v22  ;;  %v7956_v34 = vcombine.low %v3667_v44, %v3681_v33  ;;  %v5402_v33 = vld [vmem:[#allocation2 + $0x68] sm:$0xf]  ;;  %vm13815_vm13 = vmmov %vm13814_vm14 }
 0x427   :  { %v3697_v38 = vshrl.u32 %v7930_v11, 16  ;;  %v3700_v6 = vshll.u32 %v7930_v11, 16  ;;  %v7928_v15 = vcombine.low %v3544_v39, %v3544_v39  ;;  %v4810_v52 = vpop.permute.xlu1 %4809  ;;  %v7929_v35 = vcombine.high %v3544_v39, %v3544_v39  ;;  %vm13817_vm7 = vmmov %vm13785_vm6 }
 0x428   :  { %5750 = vrot.lane.b32.xlu0 %v8164_v18, %s8880_s25  ;;  %v5049_v24 = vsel %vm11695_vm5, %v8078_v0, %v5048_v3  ;;  %v4922_v16 = vsel %vm13805_vm10, %v4890_v36, %v4810_v52  ;;  %v3706_v31 = vshll.u32 %v7931_v51, 16  ;;  %8504 = vmatprep.mubr.msk.bf16.mxu0 %vm13807_vm4, %v7956_v34  ;;  %v13810_v5 = vcombine.low %v11889_v41, %v11899_v26  ;;  %v5403_v36 = vld [vmem:[#allocation2 + $0x6c] sm:$0x1]  ;;  %v6699_v34 = vld [vmem:[#allocation2 + $0x38] sm:$0xf]  ;;  %vm13818_vm8 = vmmov %vm13808_vm0 }
 0x429   :  { %v3699_v30 = vrot.slane %v3697_v38, 4  ;;  %v3702_v12 = vrot.slane %v3700_v6, 5  ;;  %v3683_v40 = vshrl.u32 %v7928_v15, 16  ;;  %v4808_v42 = vpop.permute.xlu0 %4807  ;;  %6963 = vrot.lane.b32.xlu1 %v12032_v19, %s8878_s29  ;;  %v3686_v61 = vshll.u32 %v7928_v15, 16  ;;  %v6676_v38 = vld [vmem:[#allocation2 + $0x44] sm:$0x1]  ;;  %vm13819_vm9 = vmmov %vm13815_vm13 }
 0x42a   :  { %v8060_v59 = vcombine.low %v4922_v16, %v4922_v16  ;;  %v8061_v18 = vcombine.high %v4922_v16, %v4922_v16  ;;  %v4920_v49 = vsel %vm13808_vm0, %v4888_v1, %v4808_v42  ;;  %v8094_v23 = vcombine.low %v5049_v24, %v5053_v47  ;;  %v6700_v6 = vld [vmem:[#allocation2 + $0x40] sm:$0xf]  ;;  %vm13820_vm10 = vmmov %vm13785_vm6 }
 0x42b   :  { %v3703_v37 = vor.u32 %v3702_v12, %v3699_v30  ;;  %v3685_v17 = vrot.slane %v3683_v40, 4  ;;  %v12091_v54 = vpop.permute.xlu1 %4509  ;;  %v3688_v19 = vrot.slane %v3686_v61, 5  ;;  %v3692_v63 = vshll.u32 %v7929_v35, 16  ;;  %v6674_v35 = vld [vmem:[#allocation2 + $0x3c] sm:$0x1]  ;;  %vm13822_vm11 = vmmov %vm13819_vm9 }
 0x42c   :  { %6961 = vrot.lane.b32.xlu0 %v11942_v20, %s8878_s29  ;;  %v8081_v28 = vrot.slane %v8060_v59, 9  ;;  %v5060_v43 = vrot.slane %v8061_v18, 5  ;;  %v8058_v10 = vcombine.low %v4920_v49, %v4920_v49  ;;  %v8059_v46 = vcombine.high %v4920_v49, %v4920_v49  ;;  %8532 = vmatprep.mubr.msk.bf16.mxu1 %vm13809_vm12, %v8094_v23  ;;  %v6697_v20 = vld [vmem:[#allocation2 + $0x28] sm:$0xf]  ;;  %v6675_v61 = vld [vmem:[#allocation2 + $0x40] sm:$0xe]  ;;  %vm13823_vm4 = vmmov %vm13808_vm0 }
 0x42d   :  { %v3704_v57 = vrot.slane %v3703_v37, 4  ;;  %v12094_v22 = vpop.permute.xlu0 %4507  ;;  %7071 = vrot.lane.b32.xlu1 %v13810_v5, %s8880_s25  ;;  %v3708_v7 = vrot.slane %v3706_v31, 5  ;;  %v3689_v60 = vor.u32 %v3688_v19, %v3685_v17  ;;  %v12102_v48 = vcombine.low %v6698_v56, %v11899_v26  ;;  %v6632_v37 = vld [vmem:[#allocation2 + $0x6c] sm:$0x1]  ;;  %v6654_v23 = vld [vmem:[#allocation2 + $0x68] sm:$0xf]  ;;  %vm13824_vm0 = vmmov %vm13785_vm6 }
 0x42e   :  { %v8167_v21 = vcombine.low %v5404_v58, %v5405_v50  ;;  %v5061_v0 = vsel %vm11695_vm5, %v8081_v28, %v5060_v43  ;;  %v8080_v11 = vrot.slane %v8058_v10, 9  ;;  %v5056_v27 = vrot.slane %v8059_v46, 5  ;;  %v6653_v50 = vld [vmem:[#allocation2 + $0x60] sm:$0xf]  ;;  %v12149_v19 = vld [vmem:[#allocation2 + $0x1c] sm:$0x1]  ;;  %vm13826_vm12 = vmmov %vm13819_vm9 }
 0x42f   :  { %v13811_v41 = vcombine.low %v11908_v29, %v11910_v62  ;;  %v12110_v44 = vpop.permute.xlu1 %5624  ;;  %v5848_v3 = vrot.slane %v5846_v32, 7  ;;  %v3709_v26 = vsel %vm11304_vm3, %v3704_v57, %v3708_v7  ;;  %v3690_v51 = vrot.slane %v3689_v60, 4  ;;  %v6634_v46 = vld [vmem:[#allocation2 + $0x74] sm:$0x1]  ;;  %v6655_v5 = vld [vmem:[#allocation2 + $0x70] sm:$0xf] }
 0x430   :  { %v3694_v39 = vrot.slane %v3692_v63, 5  ;;  %v12117_v47 = vcombine.low %v6697_v20, %v11910_v62  ;;  %v5057_v15 = vsel %vm11695_vm5, %v8080_v11, %v5056_v27  ;;  %v8166_v52 = vcombine.low %v5402_v33, %v5403_v36  ;;  %v6673_v63 = vld [vmem:[#allocation2 + $0x38] sm:$0xe]  ;;  %v5376_v7 = vld [vmem:[#allocation2 + $0x88] sm:$0xf] }
 0x431   :  { %7069 = vrot.lane.b32.xlu0 %v13811_v41, %s8880_s25  ;;  %v12121_v29 = vpop.permute.xlu0 %5622  ;;  %5756 = vrot.lane.b32.xlu1 %v8167_v21, %s8880_s25  ;;  %v5849_v32 = vshll.u32 %v11996_v25, 16  ;;  %v5841_v24 = vrot.slane %v5839_v13, 7  ;;  %v8095_v62 = vcombine.low %v5057_v15, %v5061_v0  ;;  %v7177_v1 = vshrl.u32 %v12102_v48, 16  ;;  %v8806_v25 = vld [vmem:[%s13357_s2 + $0x20] sm:$0xff]   ;;  %v12167_v41 = vld [vmem:[#allocation2 + $0x18] sm:$0xf] }
 0x432   :  { %v3695_v16 = vsel %vm11304_vm3, %v3690_v51, %v3694_v39  ;;  %v12128_v12 = vcombine.low %v5404_v58, %v5404_v58  ;;  %v5842_v31 = vshll.u32 %v12028_v8, 16  ;;  %v12138_v59 = vcombine.low %v6700_v6, %v6676_v38  ;;  %v6630_v58 = vld [vmem:[#allocation2 + $0x64] sm:$0x1]  ;;  %v5374_v60 = vld [vmem:[#allocation2 + $0x80] sm:$0xf] }
 0x433   :  { %v7957_v30 = vcombine.low %v3695_v16, %v3709_v26  ;;  %v12131_v40 = vpop.permute.xlu1 %4513  ;;  %v5851_v42 = vor.u32 %v5849_v32, %v5848_v3  ;;  %8533 = vmatmul.mubr.msk.bf16.gmra.mxu1 %vm13812_vm2, %v8095_v62  ;;  %v12140_v18 = vcombine.low %v6699_v34, %v6674_v35  ;;  %v7170_v56 = vshrl.u32 %v12117_v47, 16  ;;  %v12171_v26 = vld [vmem:[#allocation2 + $0x14] sm:$0x1]  ;;  %v12182_v15 = vld [vmem:[#allocation2 + $0x24] sm:$0x1]  ;;  %vm13827_vm2 = vmmov %vm13819_vm9 }
 0x434   :  { %v12143_v17 = vcombine.low %v5402_v33, %v5402_v33  ;;  %v5844_v8 = vor.u32 %v5842_v31, %v5841_v24  ;;  %v8297_v43 = vcombine.low %v6675_v61, %v6676_v38  ;;  %v7179_v57 = vrot.slane %v7177_v1, 7  ;;  %v12190_v1 = vld [vmem:[#allocation2 + $0x60] sm:$0xe] }
 0x435   :  { %5754 = vrot.lane.b32.xlu0 %v8166_v52, %s8880_s25  ;;  %8505 = vmatmul.mubr.msk.bf16.vlgmr.msra.gmra.mxu0 %vm13813_vm1, %v7957_v30  ;;  %v12146_v49 = vpop.permute.xlu0 %4511  ;;  %v5860_v10 = vshrl.u32 %v12128_v12, 16  ;;  %v7191_v20 = vshrl.u32 %v12138_v59, 16  ;;  %v7184_v13 = vshrl.u32 %v12140_v18, 16  ;;  %v12158_v21 = vcombine.low %v6654_v23, %v6632_v37  ;;  %v12192_v30 = vld [vmem:[#allocation2 + $0x10] sm:$0xf]  ;;  %vm13829_vm1 = vmmov %vm13827_vm2 }
 0x436   :  { %5912 = vrot.lane.b32.xlu1 %v5851_v42, %s8882_s28  ;;  %8541 = vmatpush3.bf16.msra.mxu0 %v11712_v2  ;;  %v12160_v2 = vcombine.low %v6653_v50, %v6630_v58  ;;  %v8296_v36 = vcombine.low %v6673_v63, %v6674_v35  ;;  %v7180_v0 = vshll.u32 %v12102_v48, 16  ;;  %v7172_v11 = vrot.slane %v7170_v56, 7  ;;  %v12178_v48 = vld [vmem:[#allocation2 + $0x2c] sm:$0x1]  ;;  %v12200_v56 = vld [vmem:[#allocation2 + $0x64] sm:$0x1] }
 0x437   :  { %v12153_v28 = vpop.permute.xlu1 %4621  ;;  %8542 = vmatprep.subr.bf16.mxu0 %v8806_v25  ;;  %v5853_v27 = vshrl.u32 %v12143_v17, 16  ;;  %v8125_v3 = vcombine.low %v12167_v41, %v12149_v19  ;;  %v7173_v51 = vshll.u32 %v12117_v47, 16  ;;  %v7194_v39 = vshll.u32 %v12138_v59, 16  ;;  %v6702_v37 = vld [vmem:[#allocation2 + $0x60] sm:$0xf] }
 0x438   :  { %v12175_v38 = vcombine.low %v6655_v5, %v6634_v46  ;;  %v7182_v52 = vor.u32 %v7180_v0, %v7179_v57  ;;  %v5862_v32 = vrot.slane %v5860_v10, 7  ;;  %v12184_v24 = vcombine.low %v5376_v7, %v5376_v7  ;;  %v12206_v58 = vld [vmem:[#allocation2 + $0x20] sm:$0xf]  ;;  %v5378_v7 = vld [vmem:[#allocation2 + $0x90] sm:$0xf] }
 0x439   :  { %5910 = vrot.lane.b32.xlu0 %v5844_v8, %s8882_s28  ;;  %v12162_v33 = vpop.permute.xlu0 %4619  ;;  %v12186_v35 = vcombine.low %v5374_v60, %v5374_v60  ;;  %v7193_v47 = vrot.slane %v7191_v20, 7  ;;  %v7186_v34 = vrot.slane %v7184_v13, 7  ;;  %v6901_v16 = vshrl.u32 %v12158_v21, 16  ;;  %v12202_v8 = vld [vmem:[#allocation2 + $0x28] sm:$0xf] }
 0x43a   :  { %7075 = vrot.lane.b32.xlu1 %v8297_v43, %s8880_s25  ;;  %8543 = vmatpush3.bf16.msra.mxu0 %v8806_v25  ;;  %v6894_v62 = vshrl.u32 %v12160_v2, 16  ;;  %v7175_v25 = vor.u32 %v7173_v51, %v7172_v11  ;;  %v5863_v61 = vshll.u32 %v12128_v12, 16  ;;  %v5855_v59 = vrot.slane %v5853_v27, 7  ;;  %v5380_v43 = vld [vmem:[#allocation2 + $0x98] sm:$0xf] }
 0x43b   :  { %v12180_v6 = vpop.permute.xlu1 %5628  ;;  %v7187_v63 = vshll.u32 %v12140_v18, 16  ;;  %v6908_v57 = vshrl.u32 %v12175_v38, 16  ;;  %v12212_v12 = vld [vmem:[#allocation2 + $0x58] sm:$0xe]  ;;  %v5856_v5 = vshll.u32 %v12143_v17, 16  ;;  %v5602_v20 = vshrl.u32 %v12184_v24, 16 }
 0x43c   :  { %v5865_v46 = vor.u32 %v5863_v61, %v5862_v32  ;;  %v5595_v13 = vshrl.u32 %v12186_v35, 16  ;;  %v7196_v60 = vor.u32 %v7194_v39, %v7193_v47  ;;  %v6903_v18 = vrot.slane %v6901_v16, 7  ;;  %v12220_v11 = vld [vmem:[#allocation2 + $0x5c] sm:$0x1]  ;;  %v6701_v27 = vld [vmem:[#allocation2 + $0x58] sm:$0xf] }
 0x43d   :  { %7073 = vrot.lane.b32.xlu0 %v8296_v36, %s8880_s25  ;;  %v12196_v31 = vpop.permute.xlu0 %5626  ;;  %v7189_v36 = vor.u32 %v7187_v63, %v7186_v34  ;;  %v6896_v0 = vrot.slane %v6894_v62, 7  ;;  %v4173_v51 = vld [vmem:[#allocation2 + $0x80] sm:$0xe]  ;;  %v5858_v32 = vor.u32 %v5856_v5, %v5855_v59  ;;  %v6636_v17 = vld [vmem:[#allocation2 + $0x7c] sm:$0x1]  ;;  %v12230_v39 = vcombine.low %v6702_v37, %v12200_v56 }
 0x43e   :  { %7263 = vrot.lane.b32.xlu1 %v7182_v52, %s8882_s28  ;;  %v6656_v61 = vld [vmem:[#allocation2 + $0x78] sm:$0xf]  ;;  %v6904_v47 = vshll.u32 %v12158_v21, 16  ;;  %v6897_v34 = vshll.u32 %v12160_v2, 16  ;;  %v12234_v16 = vcombine.low %v5378_v7, %v5378_v7  ;;  %v6910_v62 = vrot.slane %v6908_v57, 7 }
 0x43f   :  { %v12215_v10 = vpop.permute.xlu1 %5736  ;;  %v4171_v63 = vld [vmem:[#allocation2 + $0x78] sm:$0xe]  ;;  %v6911_v5 = vshll.u32 %v12175_v38, 16  ;;  %v8845_v50 = vld [vmem:[#allocation2 + $0x84] sm:$0x1]  ;;  %v12244_v7 = vcombine.low %v6656_v61, %v6636_v17  ;;  %v12247_v57 = vcombine.low %v6701_v27, %v12220_v11  ;;  %v5598_v38 = vshll.u32 %v12186_v35, 16 }
 0x440   :  { %v7987_v23 = vcombine.low %v4173_v51, %v8845_v50  ;;  %v12242_v21 = vld [vmem:[#allocation2 + $0x90] sm:$0xe]  ;;  %v6906_v2 = vor.u32 %v6904_v47, %v6903_v18  ;;  %v8846_v18 = vld [vmem:[#allocation2 + $0x7c] sm:$0x1]  ;;  %v5609_v17 = vshrl.u32 %v12234_v16, 16  ;;  %v13821_v41 = vcombine.low %v12192_v30, %v12171_v26 }
 0x441   :  { %7261 = vrot.lane.b32.xlu0 %v7175_v25, %s8882_s28  ;;  %v12222_v52 = vpop.permute.xlu0 %5734  ;;  %v12225_v25 = vcombine.low %v5380_v43, %v5380_v43  ;;  %v5604_v43 = vrot.slane %v5602_v20, 7  ;;  %v5605_v20 = vshll.u32 %v12184_v24, 16  ;;  %v7986_v51 = vcombine.low %v4171_v63, %v8846_v18  ;;  %v12260_v61 = vld [vmem:[#allocation2 + $0x94] sm:$0x1]  ;;  %v12264_v24 = vld [vmem:[#allocation2 + $0x88] sm:$0xe] }
 0x442   :  { %5916 = vrot.lane.b32.xlu1 %v5865_v46, %s8882_s28  ;;  %v5597_v46 = vrot.slane %v5595_v13, 7  ;;  %v6899_v13 = vor.u32 %v6897_v34, %v6896_v0  ;;  %v4860_v50 = vsel %vm13814_vm14, %v7987_v23, %v12091_v54  ;;  %v12258_v27 = vor.u32 %v6911_v5, %v6910_v62  ;;  %v12269_v47 = vld [vmem:[#allocation2 + $0x80] sm:$0xf]  ;;  %v12294_v42 = vld [vmem:[#allocation2 + $0x94] sm:$0x1]  ;;  %vm13830_vm14 = vmmov %vm13823_vm4 }
 0x443   :  { %v12237_v59 = vpop.permute.xlu1 %4625  ;;  %v5616_v37 = vshrl.u32 %v12225_v25, 16  ;;  %v4894_v35 = vsel %vm13785_vm6, %v4860_v50, %v12153_v28  ;;  %v5607_v54 = vor.u32 %v5605_v20, %v5604_v43  ;;  %v4857_v34 = vsel %vm13815_vm13, %v7986_v51, %v12094_v22  ;;  %v12281_v20 = vld [vmem:[#allocation2 + $0x78] sm:$0xf]  ;;  %v8848_v22 = vld [vmem:[#allocation2 + $0x8c] sm:$0x1]  ;;  %vm13832_vm13 = vmmov %vm13824_vm0 }
 0x444   :  { %v5600_v23 = vor.u32 %v5598_v38, %v5597_v46  ;;  %v5619_v63 = vshll.u32 %v12225_v25, 16  ;;  %v6915_v5 = vshrl.u32 %v12244_v7, 16  ;;  %v4892_v18 = vsel %vm13817_vm7, %v4857_v34, %v12162_v33  ;;  %v12279_v46 = vld [vmem:[#allocation2 + $0x84] sm:$0x1]  ;;  %v12289_v33 = vld [vmem:[#allocation2 + $0x7c] sm:$0x1]  ;;  %vm13835_vm7 = vmmov %vm13824_vm0 }
 0x445   :  { %5914 = vrot.lane.b32.xlu0 %v5858_v32, %s8882_s28  ;;  %v12249_v32 = vpop.permute.xlu0 %4623  ;;  %v5618_v43 = vrot.slane %v5616_v37, 7  ;;  %v7988_v38 = vcombine.low %v12264_v24, %v8848_v22  ;;  %v5611_v51 = vrot.slane %v5609_v17, 7  ;;  %v5612_v24 = vshll.u32 %v12234_v16, 16 }
 0x446   :  { %7267 = vrot.lane.b32.xlu1 %v7196_v60, %s8882_s28  ;;  %v12292_v60 = vld [vmem:[#allocation2 + $0x90] sm:$0xf]  ;;  %v8169_v17 = vcombine.low %v12269_v47, %v12279_v46  ;;  %v5931_v16 = vsel %vm13819_vm9, %v8125_v3, %v12110_v44  ;;  %v8168_v46 = vcombine.low %v12281_v20, %v12289_v33  ;;  %v6918_v19 = vshll.u32 %v12244_v7, 16  ;;  %vm13837_vm9 = vmmov %vm13824_vm0 }
 0x447   :  { %v4814_v0 = vpop.permute.xlu1 %4813  ;;  %v5928_v3 = vsel %vm13822_vm11, %v13821_v41, %v12121_v29  ;;  %v13825_v26 = vcombine.low %v12242_v21, %v12260_v61  ;;  %v4863_v30 = vsel %vm13827_vm2, %v7988_v38, %v12146_v49  ;;  %vm13831_vm6 = vcmask 261120   ;;  %vm13839_vm11 = vmmov %vm13824_vm0 }
 0x448   :  { %v4926_v62 = vsel %vm13816_vm15, %v4894_v35, %v4814_v0  ;;  %v12287_v35 = vcombine.low %v12269_v47, %v12269_v47  ;;  %v5614_v47 = vor.u32 %v5612_v24, %v5611_v51  ;;  %v5975_v51 = vsel %vm13824_vm0, %v5928_v3, %v12222_v52  ;;  %vm13834_vm15 = vmmov %vm13829_vm1 }
 0x449   :  { %7265 = vrot.lane.b32.xlu0 %v7189_v36, %s8882_s28  ;;  %v8064_v28 = vcombine.low %v4926_v62, %v4926_v62  ;;  %v8065_v50 = vcombine.high %v4926_v62, %v4926_v62  ;;  %v4812_v36 = vpop.permute.xlu0 %4811  ;;  %v4866_v29 = vsel %vm13826_vm12, %v13825_v26, %v12131_v40  ;;  %v13833_v49 = vcombine.low %v12206_v58, %v12182_v15  ;;  %vm13840_vm0 = vmmov %vm13823_vm4 }
 0x44a   :  { %5648 = vrot.lane.b32.xlu1 %v5607_v54, %s8878_s29  ;;  %v4924_v25 = vsel %vm13818_vm8, %v4892_v18, %v4812_v36  ;;  %v12301_v18 = vcombine.low %v12281_v20, %v12281_v20  ;;  %v5874_v44 = vshrl.u32 %v12287_v35, 16  ;;  %v4898_v24 = vsel %vm13832_vm13, %v4866_v29, %v12237_v59  ;;  %vm13836_vm8 = vmmov %vm13823_vm4 }
 0x44b   :  { %v8083_v0 = vrot.slane %v8064_v28, 9  ;;  %v5068_v34 = vrot.slane %v8065_v50, 5  ;;  %v8062_v54 = vcombine.low %v4924_v25, %v4924_v25  ;;  %v8063_v37 = vcombine.high %v4924_v25, %v4924_v25  ;;  %v5741_v62 = vpop.permute.xlu1 %5740  ;;  %vm13843_vm12 = vmmov %vm13831_vm6 }
 0x44c   :  { %v6917_v28 = vrot.slane %v6915_v5, 7  ;;  %v5621_v25 = vor.u32 %v5619_v63, %v5618_v43  ;;  %v8171_v5 = vcombine.low %v12292_v60, %v12294_v42  ;;  %vm13844_vm2 = vmmov %vm13831_vm6 }
 0x44d   :  { %5646 = vrot.lane.b32.xlu0 %v5600_v23, %s8878_s29  ;;  %v5069_v50 = vsel %vm11695_vm5, %v8083_v0, %v5068_v34  ;;  %v8082_v36 = vrot.slane %v8062_v54, 9  ;;  %v5064_v23 = vrot.slane %v8063_v37, 5  ;;  %v5977_v0 = vsel %vm13820_vm10, %v5931_v16, %v12215_v10  ;;  %vm13838_vm10 = vmmov %vm13823_vm4 }
 0x44e   :  { %v5739_v22 = vpop.permute.xlu0 %5738  ;;  %6967 = vrot.lane.b32.xlu1 %v6906_v2, %s8878_s29  ;;  %v5867_v10 = vshrl.u32 %v12301_v18, 16  ;;  %v6920_v7 = vor.u32 %v6918_v19, %v6917_v28  ;;  %v13828_v54 = vcombine.low %v12202_v8, %v12178_v48  ;;  %v5934_v48 = vsel %vm13834_vm15, %v13833_v49, %v12196_v31  ;;  %vm13852_vm13 = vmmov %vm13844_vm2 }
 0x44f   :  { %v5065_v2 = vsel %vm11695_vm5, %v8082_v36, %v5064_v23  ;;  %v5897_v63 = vpop.permute.xlu1 %5896  ;;  %v5979_v19 = vsel %vm13839_vm11, %v5934_v48, %v5739_v22 }
 0x450   :  { %v6009_v43 = vsel %vm13823_vm4, %v5977_v0, %v5897_v63  ;;  %v8096_v20 = vcombine.low %v5065_v2, %v5069_v50  ;;  %v5937_v52 = vsel %vm13829_vm1, %v13828_v54, %v12180_v6  ;;  %v4896_v6 = vsel %vm13835_vm7, %v4863_v30, %v12249_v32 }
 0x451   :  { %6965 = vrot.lane.b32.xlu0 %v6899_v13, %s8878_s29  ;;  %v8190_v13 = vcombine.low %v6009_v43, %v6009_v43  ;;  %v8191_v33 = vcombine.high %v6009_v43, %v6009_v43  ;;  %v5981_v15 = vsel %vm13837_vm9, %v5937_v52, %v5741_v62  ;;  %vm13846_vm1 = vcmask 31744  }
 0x452   :  { %v5895_v34 = vpop.permute.xlu0 %5894  ;;  %5652 = vrot.lane.b32.xlu1 %v5621_v25, %s8878_s29  ;;  %8536 = vmatprep.mubr.msk.bf16.mxu1 %vm13831_vm6, %v8096_v20  ;;  %vm13850_vm6 = vmmov %vm13846_vm1  ;;  %vm13855_vm7 = vcmask 64512  }
 0x453   :  { %v6007_v37 = vsel %vm13830_vm14, %v5975_v51, %v5895_v34  ;;  %v6133_v28 = vshrl.u32 %v8190_v13, 16  ;;  %v6136_v21 = vshll.u32 %v8190_v13, 16  ;;  %v4818_v40 = vpop.permute.xlu1 %4817  ;;  %v6142_v36 = vshll.u32 %v8191_v33, 16  ;;  %vm13848_vm14 = vmmov %vm13846_vm1 }
 0x454   :  { %v8188_v61 = vcombine.low %v6007_v37, %v6007_v37  ;;  %v8189_v8 = vcombine.high %v6007_v37, %v6007_v37  ;;  %v4930_v38 = vsel %vm13836_vm8, %v4898_v24, %v4818_v40  ;;  %v5410_v37 = vld [vmem:[#allocation2 + $0x88] sm:$0xf]  ;;  %v5411_v24 = vld [vmem:[#allocation2 + $0x8c] sm:$0x1]  ;;  %vm13853_vm15 = vmmov %vm13846_vm1 }
 0x455   :  { %5650 = vrot.lane.b32.xlu0 %v5614_v47, %s8878_s29  ;;  %v6135_v50 = vrot.slane %v6133_v28, 4  ;;  %v6138_v59 = vrot.slane %v6136_v21, 5  ;;  %v8068_v0 = vcombine.low %v4930_v38, %v4930_v38  ;;  %v8069_v2 = vcombine.high %v4930_v38, %v4930_v38  ;;  %vm13856_vm8 = vmmov %vm13837_vm9 }
 0x456   :  { %v6119_v23 = vshrl.u32 %v8188_v61, 16  ;;  %v4816_v25 = vpop.permute.xlu0 %4815  ;;  %5760 = vrot.lane.b32.xlu1 %v8169_v17, %s8880_s25  ;;  %v6122_v16 = vshll.u32 %v8188_v61, 16  ;;  %v6128_v47 = vshll.u32 %v8189_v8, 16  ;;  %v6144_v62 = vrot.slane %v6142_v36, 5  ;;  %vm13858_vm9 = vmmov %vm13855_vm7 }
 0x457   :  { %v6139_v31 = vor.u32 %v6138_v59, %v6135_v50  ;;  %v4928_v32 = vsel %vm13838_vm10, %v4896_v6, %v4816_v25  ;;  %v5901_v63 = vpop.permute.xlu1 %5900  ;;  %v8085_v3 = vrot.slane %v8068_v0, 9  ;;  %v5076_v43 = vrot.slane %v8069_v2, 5  ;;  %vm13859_vm10 = vmmov %vm13840_vm0 }
 0x458   :  { %v6121_v58 = vrot.slane %v6119_v23, 4  ;;  %v6124_v41 = vrot.slane %v6122_v16, 5  ;;  %v8066_v17 = vcombine.low %v4928_v32, %v4928_v32  ;;  %v8067_v51 = vcombine.high %v4928_v32, %v4928_v32  ;;  %v12383_v23 = vld [vmem:[#allocation2 + $0x74] sm:$0x1]  ;;  %vm13860_vm11 = vmmov %vm13856_vm8 }
 0x459   :  { %5758 = vrot.lane.b32.xlu0 %v8168_v46, %s8880_s25  ;;  %v6140_v20 = vrot.slane %v6139_v31, 4  ;;  %v6013_v13 = vsel %vm13823_vm4, %v5981_v15, %v5901_v63  ;;  %v6130_v26 = vrot.slane %v6128_v47, 5  ;;  %v8170_v36 = vcombine.low %v5410_v37, %v5411_v24  ;;  %v12394_v63 = vld [vmem:[#allocation2 + $0x6c] sm:$0x1]  ;;  %vm13861_vm4 = vmmov %vm13840_vm0 }
 0x45a   :  { %v5899_v33 = vpop.permute.xlu0 %5898  ;;  %6971 = vrot.lane.b32.xlu1 %v6920_v7, %s8878_s29  ;;  %v6125_v34 = vor.u32 %v6124_v41, %v6121_v58  ;;  %v8194_v29 = vcombine.low %v6013_v13, %v6013_v13  ;;  %v8084_v30 = vrot.slane %v8066_v17, 9  ;;  %v5072_v46 = vrot.slane %v8067_v51, 5 }
 0x45b   :  { %v8195_v54 = vcombine.high %v6013_v13, %v6013_v13  ;;  %v6011_v22 = vsel %vm13840_vm0, %v5979_v19, %v5899_v33  ;;  %v12367_v52 = vpop.permute.xlu1 %5632  ;;  %v5077_v7 = vsel %vm11695_vm5, %v8085_v3, %v5076_v43  ;;  %v6145_v40 = vsel %vm11304_vm3, %v6140_v20, %v6144_v62  ;;  %v6683_v62 = vld [vmem:[#allocation2 + $0x70] sm:$0xe]  ;;  %vm13863_vm0 = vmmov %vm13855_vm7 }
 0x45c   :  { %v6126_v28 = vrot.slane %v6125_v34, 4  ;;  %v6161_v21 = vshrl.u32 %v8194_v29, 16  ;;  %v6164_v61 = vshll.u32 %v8194_v29, 16  ;;  %v5073_v49 = vsel %vm11695_vm5, %v8084_v30, %v5072_v46 }
 0x45d   :  { %6969 = vrot.lane.b32.xlu0 %v12258_v27, %s8878_s29  ;;  %v8192_v48 = vcombine.low %v6011_v22, %v6011_v22  ;;  %v8193_v6 = vcombine.high %v6011_v22, %v6011_v22  ;;  %v13841_v27 = vcombine.low %v12190_v1, %v12200_v56  ;;  %v6170_v25 = vshll.u32 %v8195_v54, 16  ;;  %v6704_v56 = vld [vmem:[#allocation2 + $0x70] sm:$0xf]  ;;  %v12433_v54 = vld [vmem:[#allocation2 + $0x18] sm:$0xe] }
 0x45e   :  { %v12375_v8 = vpop.permute.xlu0 %5630  ;;  %v6131_v38 = vsel %vm11304_vm3, %v6126_v28, %v6130_v26  ;;  %v6163_v50 = vrot.slane %v6161_v21, 4  ;;  %v6166_v59 = vrot.slane %v6164_v61, 5  ;;  %v13842_v0 = vcombine.low %v12212_v12, %v12220_v11  ;;  %v6703_v11 = vld [vmem:[#allocation2 + $0x68] sm:$0xf]  ;;  %v12435_v22 = vld [vmem:[#allocation2 + $0x10] sm:$0xe] }
 0x45f   :  { %7079 = vrot.lane.b32.xlu1 %v13841_v27, %s8880_s25  ;;  %v6147_v16 = vshrl.u32 %v8192_v48, 16  ;;  %v6150_v47 = vshll.u32 %v8192_v48, 16  ;;  %v12389_v2 = vpop.permute.xlu1 %6951  ;;  %v5876_v1 = vrot.slane %v5874_v44, 7  ;;  %v8097_v31 = vcombine.low %v5073_v49, %v5077_v7  ;;  %v12442_v7 = vld [vmem:[#allocation2 + $0x20] sm:$0xe] }
 0x460   :  { %v6167_v15 = vor.u32 %v6166_v59, %v6163_v50  ;;  %v8224_v58 = vcombine.low %v6131_v38, %v6145_v40  ;;  %v5877_v32 = vshll.u32 %v12287_v35, 16  ;;  %v6156_v3 = vshll.u32 %v8193_v6, 16  ;;  %v6640_v21 = vld [vmem:[#allocation2 + $0x8c] sm:$0x1]  ;;  %v6658_v61 = vld [vmem:[#allocation2 + $0x88] sm:$0xf] }
 0x461   :  { %7077 = vrot.lane.b32.xlu0 %v13842_v0, %s8880_s25  ;;  %v6149_v19 = vrot.slane %v6147_v16, 4  ;;  %v6152_v41 = vrot.slane %v6150_v47, 5  ;;  %v5869_v12 = vrot.slane %v5867_v10, 7  ;;  %8537 = vmatmul.mubr.msk.bf16.gmra.mxu1 %vm13843_vm12, %v8097_v31  ;;  %v12408_v35 = vcombine.low %v12292_v60, %v12292_v60  ;;  %v6681_v60 = vld [vmem:[#allocation2 + $0x68] sm:$0xe]  ;;  %vm13865_vm12 = vmmov %vm13863_vm0 }
 0x462   :  { %v12396_v43 = vpop.permute.xlu0 %6949  ;;  %v6168_v44 = vrot.slane %v6167_v15, 4  ;;  %8544 = vmatprep.mubr.msk.bf16.mxu0 %vm13844_vm2, %v8224_v58  ;;  %v12411_v20 = vcombine.low %v6704_v56, %v12383_v23  ;;  %v7205_v17 = vshrl.u32 %v12230_v39, 16  ;;  %v6172_v42 = vrot.slane %v6170_v25, 5  ;;  %v6638_v48 = vld [vmem:[#allocation2 + $0x84] sm:$0x1]  ;;  %vm13866_vm2 = vmmov %vm13863_vm0 }
 0x463   :  { %5764 = vrot.lane.b32.xlu1 %v8171_v5, %s8880_s25  ;;  %v6153_v5 = vor.u32 %v6152_v41, %v6149_v19  ;;  %v12415_v10 = vpop.f32.mrf.mxu1  ;;  %v12417_v51 = vpop.permute.xlu1 %5636  ;;  %v5879_v13 = vor.u32 %v5877_v32, %v5876_v1  ;;  %v5870_v33 = vshll.u32 %v12301_v18, 16  ;;  %v12420_v34 = vcombine.low %v5410_v37, %v5410_v37  ;;  %v6657_v6 = vld [vmem:[#allocation2 + $0x80] sm:$0xf]  ;;  %v6642_v16 = vld [vmem:[#allocation2 + $0x94] sm:$0x1] }
 0x464   :  { %13845 = vst [vmem:[#allocation19_spill] sm:$0xff] %v12415_v10  ;;  %4049 = vst.msk [vmem:[%s13358_s3 + $0x50] sm:$0xff] %vm13846_vm1, %v12415_v10  ;;  %v12428_v26 = vcombine.low %v6703_v11, %v12394_v63  ;;  %v7198_v29 = vshrl.u32 %v12247_v57, 16  ;;  %v6173_v30 = vsel %vm11304_vm3, %v6168_v44, %v6172_v42  ;;  %v6158_v18 = vrot.slane %v6156_v3, 5  ;;  %v12460_v0 = vld [vmem:[#allocation2 + $0x3c] sm:$0x1] }
 0x465   :  { %5762 = vrot.lane.b32.xlu0 %v8170_v36, %s8880_s25  ;;  %v6154_v46 = vrot.slane %v6153_v5, 4  ;;  %v12439_v24 = vpop.f32.mrf.mxu1  ;;  %v5872_v28 = vor.u32 %v5870_v33, %v5869_v12  ;;  %v8301_v40 = vcombine.low %v6683_v62, %v12383_v23  ;;  %v7207_v49 = vrot.slane %v7205_v17, 7  ;;  %v6659_v23 = vld [vmem:[#allocation2 + $0x90] sm:$0xf]  ;;  %v12462_v1 = vld [vmem:[#allocation2 + $0x34] sm:$0x1]  ;;  %vm13868_vm1 = vmmov %vm13863_vm0 }
 0x466   :  { %v12437_v37 = vpop.permute.xlu0 %5634  ;;  %13847 = vst [vmem:[#allocation21_spill] sm:$0xff] %v12439_v24  ;;  %4047 = vst.msk [vmem:[%s13358_s3 + $0x40] sm:$0xff] %vm13848_vm14, %v12439_v24  ;;  %v8300_v59 = vcombine.low %v6681_v60, %v12394_v63  ;;  %v5888_v36 = vshrl.u32 %v12408_v35, 16  ;;  %v7219_v25 = vshrl.u32 %v12411_v20, 16  ;;  %v7200_v56 = vrot.slane %v7198_v29, 7 }
 0x467   :  { %5920 = vrot.lane.b32.xlu1 %v5879_v13, %s8882_s28  ;;  %v6159_v27 = vsel %vm11304_vm3, %v6154_v46, %v6158_v18  ;;  %v12453_v38 = vpop.f32.mrf.mxu1  ;;  %v12455_v50 = vpop.permute.xlu1 %5744  ;;  %v7212_v15 = vshrl.u32 %v12428_v26, 16  ;;  %v12470_v31 = vcombine.low %v6658_v61, %v6640_v21  ;;  %v12472_v58 = vld [vmem:[#allocation2 + $0x44] sm:$0x1]  ;;  %v7208_v19 = vshll.u32 %v12230_v39, 16  ;;  %v12484_v11 = vld [vmem:[#allocation2 + $0x1c] sm:$0x1]  ;;  %vm13870_vm14 = vmmov %vm13863_vm0 }
 0x468   :  { %13849 = vst [vmem:[#allocation36_spill] sm:$0xff] %v12453_v38  ;;  %v8225_v47 = vcombine.low %v6159_v27, %v6173_v30  ;;  %4050 = vst.msk [vmem:[%s13358_s3 + $0x58] sm:$0xff] %vm13850_vm6, %v12453_v38  ;;  %v7201_v41 = vshll.u32 %v12247_v57, 16  ;;  %v5881_v3 = vshrl.u32 %v12420_v34, 16  ;;  %v12482_v12 = vcombine.low %v6657_v6, %v6638_v48  ;;  %v12488_v17 = vld [vmem:[#allocation2 + $0x14] sm:$0x1] }
 0x469   :  { %5918 = vrot.lane.b32.xlu0 %v5872_v28, %s8882_s28  ;;  %v12476_v63 = vpop.f32.mrf.mxu1  ;;  %v12498_v39 = vld [vmem:[#allocation2 + $0x28] sm:$0xe]  ;;  %v12500_v57 = vld [vmem:[#allocation2 + $0x24] sm:$0x1]  ;;  %v6644_v13 = vld [vmem:[#allocation2 + $0x9c] sm:$0x1]  ;;  %v12504_v62 = vcombine.low %v6659_v23, %v6642_v16  ;;  %v7210_v18 = vor.u32 %v7208_v19, %v7207_v49 }
 0x46a   :  { %v12474_v32 = vpop.permute.xlu0 %5742  ;;  %13851 = vst [vmem:[#allocation37_spill] sm:$0xff] %v12476_v63  ;;  %8545 = vmatmul.mubr.msk.bf16.vlgmr.msra.gmra.mxu0 %vm13852_vm13, %v8225_v47  ;;  %4048 = vst.msk [vmem:[%s13358_s3 + $0x48] sm:$0xff] %vm13853_vm15, %v12476_v63  ;;  %v6660_v33 = vld [vmem:[#allocation2 + $0x98] sm:$0xf]  ;;  %v12506_v60 = vld [vmem:[#allocation2 + $0x84] sm:$0x1]  ;;  %v7203_v27 = vor.u32 %v7201_v41, %v7200_v56 }
 0x46b   :  { %7083 = vrot.lane.b32.xlu1 %v8301_v40, %s8880_s25  ;;  %v12508_v29 = vld [vmem:[#allocation2 + $0x38] sm:$0xf]  ;;  %v12513_v46 = vpop.permute.xlu1 %6955  ;;  %v5890_v28 = vrot.slane %v5888_v36, 7  ;;  %v7221_v21 = vrot.slane %v7219_v25, 7  ;;  %v6706_v61 = vld [vmem:[#allocation2 + $0x80] sm:$0xf]  ;;  %v12529_v19 = vcombine.low %v6660_v33, %v6644_v13  ;;  %vm13871_vm6 = vmmov %vm13856_vm8 }
 0x46c   :  { %v12515_v40 = vld [vmem:[#allocation2 + $0x7c] sm:$0x1]  ;;  %v12517_v48 = vld [vmem:[#allocation2 + $0x30] sm:$0xf]  ;;  %v7214_v16 = vrot.slane %v7212_v15, 7  ;;  %v6929_v23 = vshrl.u32 %v12470_v31, 16  ;;  %v12538_v6 = vcombine.low %v6706_v61, %v12506_v60  ;;  %vm13873_vm13 = vmmov %vm13863_vm0 }
 0x46d   :  { %7081 = vrot.lane.b32.xlu0 %v8300_v59, %s8880_s25  ;;  %v6705_v47 = vld [vmem:[#allocation2 + $0x78] sm:$0xf]  ;;  %v12522_v5 = vld [vmem:[#allocation2 + $0x94] sm:$0x1]  ;;  %v5891_v49 = vshll.u32 %v12408_v35, 16  ;;  %v5883_v36 = vrot.slane %v5881_v3, 7  ;;  %vm13874_vm15 = vmmov %vm13861_vm4 }
 0x46e   :  { %v12524_v59 = vpop.permute.xlu0 %6953  ;;  %v6922_v25 = vshrl.u32 %v12482_v12, 16  ;;  %v6708_v42 = vld [vmem:[#allocation2 + $0x90] sm:$0xf]  ;;  %v12531_v44 = vld [vmem:[#allocation2 + $0x40] sm:$0xf]  ;;  %v7222_v15 = vshll.u32 %v12411_v20, 16  ;;  %v12556_v35 = vcombine.low %v6705_v47, %v12515_v40 }
 0x46f   :  { %7271 = vrot.lane.b32.xlu1 %v7210_v18, %s8882_s28  ;;  %v6936_v41 = vshrl.u32 %v12504_v62, 16  ;;  %v12540_v18 = vld [vmem:[#allocation2 + $0x2c] sm:$0x1]  ;;  %v12545_v3 = vpop.permute.xlu1 %7063  ;;  %v5893_v13 = vor.u32 %v5891_v49, %v5890_v28  ;;  %v5884_v33 = vshll.u32 %v12420_v34, 16  ;;  %v7215_v56 = vshll.u32 %v12428_v26, 16 }
 0x470   :  { %v12549_v20 = vld [vmem:[#allocation2 + $0x8c] sm:$0x1]  ;;  %v6707_v30 = vld [vmem:[#allocation2 + $0x88] sm:$0xf]  ;;  %v7224_v38 = vor.u32 %v7222_v15, %v7221_v21  ;;  %v6931_v61 = vrot.slane %v6929_v23, 7  ;;  %v6924_v49 = vrot.slane %v6922_v25, 7 }
 0x471   :  { %7269 = vrot.lane.b32.xlu0 %v7203_v27, %s8882_s28  ;;  %v12551_v10 = vld [vmem:[#allocation2 + $0x80] sm:$0xe]  ;;  %v12553_v63 = vld [vmem:[#allocation2 + $0x78] sm:$0xe]  ;;  %v12559_v27 = vcombine.low %v6708_v42, %v12522_v5  ;;  %v5886_v34 = vor.u32 %v5884_v33, %v5883_v36  ;;  %v7217_v26 = vor.u32 %v7215_v56, %v7214_v16  ;;  %v6943_v21 = vshrl.u32 %v12529_v19, 16 }
 0x472   :  { %v12561_v28 = vpop.permute.xlu0 %7061  ;;  %v12565_v23 = vld [vmem:[#allocation2 + $0x90] sm:$0xe]  ;;  %v6932_v15 = vshll.u32 %v12470_v31, 16  ;;  %v6938_v24 = vrot.slane %v6936_v41, 7  ;;  %v12571_v47 = vcombine.low %v6707_v30, %v12549_v20  ;;  %v7233_v42 = vshrl.u32 %v12538_v6, 16 }
 0x473   :  { %5924 = vrot.lane.b32.xlu1 %v5893_v13, %s8882_s28  ;;  %v12575_v13 = vpop.permute.xlu1 %5748  ;;  %v6925_v16 = vshll.u32 %v12482_v12, 16  ;;  %v6939_v36 = vshll.u32 %v12504_v62, 16  ;;  %v7226_v41 = vshrl.u32 %v12556_v35, 16  ;;  %v7247_v33 = vshrl.u32 %v12559_v27, 16 }
 0x474   :  { %v6934_v56 = vor.u32 %v6932_v15, %v6931_v61  ;;  %v6945_v62 = vrot.slane %v6943_v21, 7  ;;  %v6946_v53 = vshll.u32 %v12529_v19, 16  ;;  %v8304_v25 = vcombine.low %v12568_v45, %v12549_v20 }
 0x475   :  { %5922 = vrot.lane.b32.xlu0 %v5886_v34, %s8882_s28  ;;  %v6927_v12 = vor.u32 %v6925_v16, %v6924_v49  ;;  %v13854_v61 = vcombine.low %v12508_v29, %v12460_v0  ;;  %v6941_v30 = vor.u32 %v6939_v36, %v6938_v24  ;;  %v7235_v31 = vrot.slane %v7233_v42, 7 }
 0x476   :  { %v12587_v34 = vpop.permute.xlu0 %5746  ;;  %v7240_v14 = vshrl.u32 %v12571_v47, 16  ;;  %v7236_v49 = vshll.u32 %v12538_v6, 16  ;;  %v7229_v21 = vshll.u32 %v12556_v35, 16  ;;  %v7250_v16 = vshll.u32 %v12559_v27, 16  ;;  %v8856_v27 = vld [vmem:[#allocation2 + $0x48] sm:$0xf] }
 0x477   :  { %7275 = vrot.lane.b32.xlu1 %v7224_v38, %s8882_s28  ;;  %v5943_v15 = vsel %vm13855_vm7, %v13854_v61, %v12367_v52  ;;  %v5905_v19 = vpop.permute.xlu1 %5904  ;;  %v13857_v52 = vcombine.low %v12517_v48, %v12462_v1  ;;  %v7228_v29 = vrot.slane %v7226_v41, 7  ;;  %v7249_v42 = vrot.slane %v7247_v33, 7  ;;  %vm13875_vm7 = vmmov %vm13871_vm6 }
 0x478   :  { %v5985_v38 = vsel %vm13856_vm8, %v5943_v15, %v12455_v50  ;;  %v6948_v6 = vor.u32 %v6946_v53, %v6945_v62  ;;  %v7243_v35 = vshll.u32 %v12571_v47, 16  ;;  %v8131_v61 = vcombine.low %v8856_v27, %v5365_v9  ;;  %vm13877_vm8 = vmmov %vm13871_vm6 }
 0x479   :  { %7273 = vrot.lane.b32.xlu0 %v7217_v26, %s8882_s28  ;;  %v5940_v24 = vsel %vm13858_vm9, %v13857_v52, %v12375_v8  ;;  %v6017_v0 = vsel %vm13859_vm10, %v5985_v38, %v5905_v19  ;;  %v12616_v48 = vor.u32 %v7236_v49, %v7235_v31  ;;  %v12618_v8 = vrot.slane %v7240_v14, 7  ;;  %vm13878_vm9 = vmmov %vm13871_vm6 }
 0x47a   :  { %v5983_v50 = vsel %vm13860_vm11, %v5940_v24, %v12474_v32  ;;  %v8198_v26 = vcombine.low %v6017_v0, %v6017_v0  ;;  %v5903_v36 = vpop.permute.xlu0 %5902  ;;  %v8199_v41 = vcombine.high %v6017_v0, %v6017_v0  ;;  %v13862_v53 = vcombine.low %v12433_v54, %v12484_v11  ;;  %vm13879_vm10 = vmmov %vm13861_vm4 }
 0x47b   :  { %6975 = vrot.lane.b32.xlu1 %v6934_v56, %s8878_s29  ;;  %v6015_v1 = vsel %vm13861_vm4, %v5983_v50, %v5903_v36  ;;  %v7068_v32 = vpop.permute.xlu1 %7067  ;;  %v12626_v62 = vor.u32 %v7229_v21, %v7228_v29  ;;  %v12628_v31 = vor.u32 %v7250_v16, %v7249_v42  ;;  %v13864_v14 = vcombine.low %v12435_v22, %v12488_v17  ;;  %vm13881_vm11 = vmmov %vm13861_vm4 }
 0x47c   :  { %v6189_v33 = vshrl.u32 %v8198_v26, 16  ;;  %v6192_v15 = vshll.u32 %v8198_v26, 16  ;;  %v8196_v38 = vcombine.low %v6015_v1, %v6015_v1  ;;  %v7290_v56 = vsel %vm13863_vm0, %v13862_v53, %v12389_v2  ;;  %vm13882_vm4 = vmmov %vm13871_vm6 }
 0x47d   :  { %6973 = vrot.lane.b32.xlu0 %v6927_v12, %s8878_s29  ;;  %v8197_v9 = vcombine.high %v6015_v1, %v6015_v1  ;;  %v7287_v19 = vsel %vm13865_vm12, %v13864_v14, %v12396_v43  ;;  %v5949_v2 = vsel %vm13866_vm2, %v8131_v61, %v12417_v51  ;;  %v13867_v54 = vcombine.low %v12531_v44, %v12472_v58  ;;  %vm13884_vm0 = vmmov %vm13879_vm10 }
 0x47e   :  { %v6191_v49 = vrot.slane %v6189_v33, 4  ;;  %v6194_v12 = vrot.slane %v6192_v15, 5  ;;  %v6175_v52 = vshrl.u32 %v8196_v38, 16  ;;  %v7066_v24 = vpop.permute.xlu0 %7065  ;;  %v13869_v22 = vcombine.low %v12498_v39, %v12540_v18  ;;  %vm13885_vm12 = vmmov %vm13884_vm0 }
 0x47f   :  { %6979 = vrot.lane.b32.xlu1 %v6948_v6, %s8878_s29  ;;  %v5946_v11 = vsel %vm13868_vm1, %v13867_v54, %v12437_v37  ;;  %v6178_v17 = vshll.u32 %v8196_v38, 16  ;;  %v7336_v21 = vsel %vm13871_vm6, %v7290_v56, %v12545_v3  ;;  %v6198_v0 = vshll.u32 %v8199_v41, 16  ;;  %v7256_v51 = vpop.permute.xlu1 %7255  ;;  %vm13886_vm2 = vmmov %vm13882_vm4 }
 0x480   :  { %v7296_v43 = vsel %vm13870_vm14, %v13869_v22, %v12513_v46  ;;  %v6195_v16 = vor.u32 %v6194_v12, %v6191_v49  ;;  %v6177_v29 = vrot.slane %v6175_v52, 4  ;;  %v13872_v37 = vcombine.low %v12442_v7, %v12500_v57  ;;  %vm13888_vm14 = vmmov %vm13884_vm0 }
 0x481   :  { %6977 = vrot.lane.b32.xlu0 %v6941_v30, %s8878_s29  ;;  %v6180_v44 = vrot.slane %v6178_v17, 5  ;;  %v6184_v39 = vshll.u32 %v8197_v9, 16  ;;  %v7368_v46 = vsel %vm13874_vm15, %v7336_v21, %v7256_v51  ;;  %v7334_v18 = vsel %vm13875_vm7, %v7287_v19, %v12561_v28 }
 0x482   :  { %v7293_v58 = vsel %vm13873_vm13, %v13872_v37, %v12524_v59  ;;  %v6196_v3 = vrot.slane %v6195_v16, 4  ;;  %v8324_v42 = vcombine.low %v7368_v46, %v7368_v46  ;;  %v8325_v50 = vcombine.high %v7368_v46, %v7368_v46  ;;  %v7254_v26 = vpop.permute.xlu0 %7253 }
 0x483   :  { %v13876_v30 = vcombine.low %v12551_v10, %v12506_v60  ;;  %v5989_v7 = vsel %vm13877_vm8, %v5949_v2, %v12575_v13  ;;  %v5987_v57 = vsel %vm13878_vm9, %v5946_v11, %v12587_v34  ;;  %v6181_v59 = vor.u32 %v6180_v44, %v6177_v29  ;;  %v5909_v10 = vpop.permute.xlu1 %5908 }
 0x484   :  { %v7366_v36 = vsel %vm13879_vm10, %v7334_v18, %v7254_v26  ;;  %v6200_v6 = vrot.slane %v6198_v0, 5  ;;  %v8355_v28 = vrot.slane %v8324_v42, 9  ;;  %v7483_v27 = vrot.slane %v8325_v50, 5 }
 0x485   :  { %7087 = vrot.lane.b32.xlu1 %v13876_v30, %s8880_s25  ;;  %v8322_v61 = vcombine.low %v7366_v36, %v7366_v36  ;;  %v13880_v1 = vcombine.low %v12553_v63, %v12515_v40  ;;  %v6182_v60 = vrot.slane %v6181_v59, 4  ;;  %v6186_v41 = vrot.slane %v6184_v39, 5 }
 0x486   :  { %v8323_v33 = vcombine.high %v7366_v36, %v7366_v36  ;;  %v6021_v13 = vsel %vm13881_vm11, %v5989_v7, %v5909_v10  ;;  %v6201_v34 = vsel %vm11304_vm3, %v6196_v3, %v6200_v6  ;;  %v7340_v15 = vsel %vm13882_vm4, %v7296_v43, %v7068_v32  ;;  %v5907_v56 = vpop.permute.xlu0 %5906  ;;  %vm13896_vm11 = vmmov %vm13886_vm2 }
 0x487   :  { %7085 = vrot.lane.b32.xlu0 %v13880_v1, %s8880_s25  ;;  %v8354_v38 = vrot.slane %v8322_v61, 9  ;;  %v8202_v53 = vcombine.low %v6021_v13, %v6021_v13  ;;  %v13883_v9 = vcombine.low %v12565_v23, %v12522_v5  ;;  %v6187_v63 = vsel %vm11304_vm3, %v6182_v60, %v6186_v41  ;;  %v7260_v5 = vpop.permute.xlu1 %7259 }
 0x488   :  { %v7479_v40 = vrot.slane %v8323_v33, 5  ;;  %v8203_v14 = vcombine.high %v6021_v13, %v6021_v13  ;;  %v6019_v19 = vsel %vm13884_vm0, %v5987_v57, %v5907_v56  ;;  %v7484_v49 = vsel %vm11695_vm5, %v8355_v28, %v7483_v27 }
 0x489   :  { %7091 = vrot.lane.b32.xlu1 %v13883_v9, %s8880_s25  ;;  %v6217_v12 = vshrl.u32 %v8202_v53, 16  ;;  %v6220_v32 = vshll.u32 %v8202_v53, 16  ;;  %v8200_v52 = vcombine.low %v6019_v19, %v6019_v19  ;;  %v8201_v2 = vcombine.high %v6019_v19, %v6019_v19  ;;  %v5367_v9 = vld [vmem:[#allocation2 + $0x64] sm:$0x1] }
 0x48a   :  { %v7480_v23 = vsel %vm11695_vm5, %v8354_v38, %v7479_v40  ;;  %v8226_v54 = vcombine.low %v6187_v63, %v6201_v34  ;;  %v7372_v11 = vsel %vm13885_vm12, %v7340_v15, %v7260_v5  ;;  %v7338_v22 = vsel %vm13886_vm2, %v7293_v58, %v7066_v24  ;;  %v7258_v16 = vpop.permute.xlu0 %7257  ;;  %v5369_v38 = vld [vmem:[#allocation2 + $0x6c] sm:$0x1]  ;;  %v8857_v40 = vld [vmem:[#allocation2 + $0x68] sm:$0xf]  ;;  %v6623_v5 = vld [vmem:[#allocation2 + $0x38] sm:$0xe] }
 0x48b   :  { %7089 = vrot.lane.b32.xlu0 %v8304_v25, %s8880_s25  ;;  %v6219_v43 = vrot.slane %v6217_v12, 4  ;;  %v6222_v17 = vrot.slane %v6220_v32, 5  ;;  %v6203_v21 = vshrl.u32 %v8200_v52, 16  ;;  %v6226_v0 = vshll.u32 %v8203_v14, 16  ;;  %v5641_v24 = vpop.permute.xlu1 %5640  ;;  %v8858_v32 = vld [vmem:[#allocation2 + $0x60] sm:$0xf] }
 0x48c   :  { %v6206_v45 = vshll.u32 %v8200_v52, 16  ;;  %vm13887_vm1 = vcmask 261120   ;;  %v8328_v20 = vcombine.low %v7372_v11, %v7372_v11  ;;  %v8329_v25 = vcombine.high %v7372_v11, %v7372_v11 }
 0x48d   :  { %7279 = vrot.lane.b32.xlu1 %v12616_v48, %s8882_s28  ;;  %8548 = vmatprep.mubr.msk.bf16.mxu0 %vm13887_vm1, %v8226_v54  ;;  %v6223_v29 = vor.u32 %v6222_v17, %v6219_v43  ;;  %v6205_v51 = vrot.slane %v6203_v21, 4  ;;  %v7370_v37 = vsel %vm13888_vm14, %v7338_v22, %v7258_v16  ;;  %v8374_v44 = vcombine.low %v7480_v23, %v7484_v49  ;;  %vm13889_vm6 = vmmov %vm13887_vm1  ;;  %v6621_v23 = vld [vmem:[#allocation2 + $0x30] sm:$0xe]  ;;  %v5373_v54 = vld [vmem:[#allocation2 + $0x7c] sm:$0x1] }
 0x48e   :  { %v6208_v58 = vrot.slane %v6206_v45, 5  ;;  %v6212_v39 = vshll.u32 %v8201_v2, 16  ;;  %v8357_v46 = vrot.slane %v8328_v20, 9  ;;  %v7491_v18 = vrot.slane %v8329_v25, 5  ;;  %v5639_v50 = vpop.permute.xlu0 %5638  ;;  %vm13890_vm13 = vmmov %vm13887_vm1  ;;  %v6627_v22 = vld [vmem:[#allocation2 + $0x48] sm:$0xe] }
 0x48f   :  { %7277 = vrot.lane.b32.xlu0 %v12626_v62, %s8882_s28  ;;  %v6224_v48 = vrot.slane %v6223_v29, 4  ;;  %v8326_v3 = vcombine.low %v7370_v37, %v7370_v37  ;;  %v8327_v42 = vcombine.high %v7370_v37, %v7370_v37  ;;  %8564 = vmatprep.mubr.msk.bf16.mxu1 %vm13889_vm6, %v8374_v44  ;;  %v7245_v26 = vor.u32 %v7243_v35, %v12618_v8  ;;  %v12708_v36 = vpop.permute.xlu1 %6959  ;;  %vm13891_vm15 = vmmov %vm13887_vm1  ;;  %v6625_v43 = vld [vmem:[#allocation2 + $0x40] sm:$0xe]  ;;  %v8860_v20 = vld [vmem:[#allocation2 + $0x34] sm:$0x1] }
 0x490   :  { %v6228_v30 = vrot.slane %v6226_v0, 5  ;;  %v6209_v62 = vor.u32 %v6208_v58, %v6205_v51  ;;  %v7492_v7 = vsel %vm11695_vm5, %v8357_v46, %v7491_v18  ;;  %vm13892_vm7 = vcmask 31744   ;;  %v8859_v0 = vld [vmem:[#allocation2 + $0x3c] sm:$0x1]  ;;  %v5371_v29 = vld [vmem:[#allocation2 + $0x74] sm:$0x1]  ;;  %vm13899_vm1 = vmmov %vm13885_vm12 }
 0x491   :  { %7283 = vrot.lane.b32.xlu1 %v12628_v31, %s8882_s28  ;;  %v8356_v57 = vrot.slane %v8326_v3, 9  ;;  %v7487_v59 = vrot.slane %v8327_v42, 5  ;;  %v6214_v31 = vrot.slane %v6212_v39, 5  ;;  %vm13893_vm8 = vmmov %vm13892_vm7  ;;  %v8133_v14 = vcombine.low %v8857_v40, %v5369_v38  ;;  %v8862_v39 = vld [vmem:[#allocation2 + $0x4c] sm:$0x1] }
 0x492   :  { %v6229_v6 = vsel %vm11304_vm3, %v6224_v48, %v6228_v30  ;;  %v6210_v28 = vrot.slane %v6209_v62, 4  ;;  %v6958_v35 = vpop.permute.xlu0 %6957  ;;  %vm13894_vm9 = vmmov %vm13892_vm7  ;;  %vm13895_vm10 = vcmask 64512   ;;  %v8132_v52 = vcombine.low %v8858_v32, %v5367_v9  ;;  %v8863_v18 = vld [vmem:[#allocation2 + $0x44] sm:$0x1] }
 0x493   :  { %7281 = vrot.lane.b32.xlu0 %v7245_v26, %s8882_s28  ;;  %v7488_v47 = vsel %vm11695_vm5, %v8356_v57, %v7487_v59  ;;  %v5645_v1 = vpop.permute.xlu1 %5644  ;;  %v5955_v12 = vsel %vm13895_vm10, %v8133_v14, %v5641_v24  ;;  %vm13897_vm4 = vmmov %vm13892_vm7  ;;  %v8263_v45 = vcombine.low %v6623_v5, %v8859_v0  ;;  %v8262_v25 = vcombine.low %v6621_v23, %v8860_v20  ;;  %v8861_v24 = vld [vmem:[#allocation2 + $0x78] sm:$0xf]  ;;  %v8864_v59 = vld [vmem:[#allocation2 + $0x70] sm:$0xf] }
 0x494   :  { %v6215_v8 = vsel %vm11304_vm3, %v6210_v28, %v6214_v31  ;;  %v8375_v27 = vcombine.low %v7488_v47, %v7492_v7  ;;  %vm13898_vm0 = vmmov %vm13895_vm10  ;;  %v8135_v58 = vcombine.low %v8861_v24, %v5373_v54  ;;  %v8265_v46 = vcombine.low %v6627_v22, %v8862_v39 }
 0x495   :  { %v8227_v61 = vcombine.low %v6215_v8, %v6229_v6  ;;  %v5952_v21 = vsel %vm13898_vm0, %v8132_v52, %v5639_v50  ;;  %v8264_v48 = vcombine.low %v6625_v43, %v8863_v18  ;;  %vm13900_vm14 = vmmov %vm13898_vm0  ;;  %v8134_v6 = vcombine.low %v8864_v59, %v5371_v29 }
 0x496   :  { %8565 = vmatmul.mubr.msk.bf16.vlgmr.msra.gmra.mxu1 %vm13890_vm13, %v8375_v27  ;;  %v12718_v10 = vpop.permute.xlu0 %5642  ;;  %v7302_v7 = vsel %vm13900_vm14, %v8263_v45, %v12708_v36  ;;  %vm13901_vm6 = vmmov %vm13898_vm0 }
 0x497   :  { %8549 = vmatmul.mubr.msk.bf16.gmra.mxu0 %vm13891_vm15, %v8227_v61  ;;  %v5753_v60 = vpop.permute.xlu1 %5752  ;;  %v7299_v57 = vsel %vm13901_vm6, %v8262_v25, %v6958_v35  ;;  %vm13902_vm13 = vmmov %vm13898_vm0 }
 0x498   :  { %v5993_v11 = vsel %vm13896_vm11, %v5955_v12, %v5753_v60  ;;  %v5961_v31 = vsel %vm13902_vm13, %v8135_v58, %v5645_v1  ;;  %vm13903_vm15 = vmmov %vm13898_vm0 }
 0x499   :  { %v5958_v60 = vsel %vm13903_vm15, %v8134_v6, %v12718_v10  ;;  %vm13907_vm10 = vmmov %vm13886_vm2 }
 0x49a   :  { %v5751_v41 = vpop.permute.xlu0 %5750  ;;  %vm13908_vm11 = vmmov %vm13899_vm1 }
 0x49b   :  { %v6964_v33 = vpop.permute.xlu1 %6963  ;;  %v5991_v51 = vsel %vm13886_vm2, %v5952_v21, %v5751_v41 }
 0x49e   :  { %v6962_v13 = vpop.permute.xlu0 %6961 }
 0x49f   :  { %v12720_v34 = vpop.permute.xlu1 %7071 }
 0x4a0   :  { %v12722_v15 = vpop.f32.mrf.mxu1 }
 0x4a1   :  { %4053 = vst.msk [vmem:[%s13358_s3 + $0x70] sm:$0xff] %vm13892_vm7, %v12722_v15  ;;  %vm13904_vm7 = vmmov %vm13898_vm0 }
 0x4a2   :  { %v12731_v56 = vpop.f32.mrf.mxu1  ;;  %v7308_v41 = vsel %vm13904_vm7, %v8265_v46, %v6964_v33 }
 0x4a3   :  { %v12729_v53 = vpop.permute.xlu0 %7069  ;;  %4051 = vst.msk [vmem:[%s13358_s3 + $0x60] sm:$0xff] %vm13893_vm8, %v12731_v56  ;;  %v12738_v63 = vpop.permute.xlu1 %5756  ;;  %vm13905_vm8 = vmmov %vm13898_vm0 }
 0x4a4   :  { %v12740_v19 = vpop.f32.mrf.mxu1  ;;  %v7305_v38 = vsel %vm13905_vm8, %v8264_v48, %v6962_v13  ;;  %v7342_v1 = vsel %vm13907_vm10, %v7299_v57, %v12729_v53  ;;  %vm13910_vm0 = vmmov %vm13886_vm2 }
 0x4a5   :  { %4054 = vst.msk [vmem:[%s13358_s3 + $0x78] sm:$0xff] %vm13894_vm9, %v12740_v19  ;;  %vm13906_vm9 = vmmov %vm13886_vm2 }
 0x4a6   :  { %v12750_v2 = vpop.f32.mrf.mxu1  ;;  %v7344_v36 = vsel %vm13906_vm9, %v7302_v7, %v12720_v34  ;;  %vm13914_vm14 = vmmov %vm13910_vm0 }
 0x4a7   :  { %v12747_v49 = vpop.permute.xlu0 %5754  ;;  %4052 = vst.msk [vmem:[%s13358_s3 + $0x68] sm:$0xff] %vm13897_vm4, %v12750_v2  ;;  %vm13909_vm4 = vmmov %vm13886_vm2 }
 0x4a8   :  { %v5913_v17 = vpop.permute.xlu1 %5912  ;;  %v5997_v10 = vsel %vm13909_vm4, %v5961_v31, %v12738_v63  ;;  %v5995_v34 = vsel %vm13910_vm0, %v5958_v60, %v12747_v49  ;;  %vm13912_vm2 = vmmov %vm13899_vm1 }
 0x4a9   :  { %v6025_v16 = vsel %vm13885_vm12, %v5993_v11, %v5913_v17  ;;  %vm13911_vm12 = vmmov %vm13910_vm0 }
 0x4aa   :  { %v8206_v37 = vcombine.low %v6025_v16, %v6025_v16  ;;  %v8207_v42 = vcombine.high %v6025_v16, %v6025_v16  ;;  %vm13917_vm15 = vmmov %vm13912_vm2 }
 0x4ab   :  { %v5911_v44 = vpop.permute.xlu0 %5910  ;;  %vm13919_vm8 = vmmov %vm13912_vm2 }
 0x4ac   :  { %v6023_v3 = vsel %vm13899_vm1, %v5991_v51, %v5911_v44  ;;  %v6245_v50 = vshrl.u32 %v8206_v37, 16  ;;  %v6248_v26 = vshll.u32 %v8206_v37, 16  ;;  %v7076_v62 = vpop.permute.xlu1 %7075  ;;  %v6254_v40 = vshll.u32 %v8207_v42, 16  ;;  %vm13924_vm0 = vmmov %vm13912_vm2 }
 0x4ad   :  { %v8204_v30 = vcombine.low %v6023_v3, %v6023_v3  ;;  %v8205_v28 = vcombine.high %v6023_v3, %v6023_v3  ;;  %v7348_v22 = vsel %vm13911_vm12, %v7308_v41, %v7076_v62  ;;  %vm13913_vm1 = vcmask 31744  }
 0x4ae   :  { %v6247_v47 = vrot.slane %v6245_v50, 4  ;;  %v6250_v8 = vrot.slane %v6248_v26, 5  ;;  %v6256_v17 = vrot.slane %v6254_v40, 5  ;;  %vm13915_vm6 = vmmov %vm13913_vm1 }
 0x4af   :  { %v6231_v27 = vshrl.u32 %v8204_v30, 16  ;;  %v7074_v61 = vpop.permute.xlu0 %7073  ;;  %v6234_v9 = vshll.u32 %v8204_v30, 16  ;;  %v6240_v52 = vshll.u32 %v8205_v28, 16  ;;  %vm13916_vm13 = vmmov %vm13913_vm1 }
 0x4b0   :  { %v6251_v35 = vor.u32 %v6250_v8, %v6247_v47  ;;  %v7264_v12 = vpop.permute.xlu1 %7263  ;;  %v7346_v20 = vsel %vm13914_vm14, %v7305_v38, %v7074_v61  ;;  %vm13918_vm7 = vmmov %vm13913_vm1 }
 0x4b1   :  { %v6233_v14 = vrot.slane %v6231_v27, 4  ;;  %v6236_v32 = vrot.slane %v6234_v9, 5  ;;  %v7376_v5 = vsel %vm13908_vm11, %v7344_v36, %v7264_v12  ;;  %v6242_v49 = vrot.slane %v6240_v52, 5  ;;  %vm13920_vm9 = vmmov %vm13913_vm1 }
 0x4b2   :  { %v6252_v33 = vrot.slane %v6251_v35, 4  ;;  %v8332_v13 = vcombine.low %v7376_v5, %v7376_v5  ;;  %v8333_v23 = vcombine.high %v7376_v5, %v7376_v5  ;;  %vm13921_vm10 = vmmov %vm13913_vm1 }
 0x4b3   :  { %v7262_v54 = vpop.permute.xlu0 %7261  ;;  %v6237_v11 = vor.u32 %v6236_v32, %v6233_v14  ;;  %v8526_v53 = vpop.f32.mrf.mxu1  ;;  %vm13922_vm11 = vmmov %vm13913_vm1 }
 0x4b4   :  { %v7374_v43 = vsel %vm13912_vm2, %v7342_v1, %v7262_v54  ;;  %v12781_v21 = vrot.slane %v8332_v13, 9  ;;  %v12783_v16 = vrot.slane %v8333_v23, 5  ;;  %8110 = vst.msk [vmem:[%s13358_s3 + $0x90] sm:$0xff] %vm13913_vm1, %v8526_v53  ;;  %v5917_v63 = vpop.permute.xlu1 %5916  ;;  %v6257_v51 = vsel %vm11304_vm3, %v6252_v33, %v6256_v17  ;;  %vm13923_vm4 = vmmov %vm13913_vm1 }
 0x4b5   :  { %v8330_v0 = vcombine.low %v7374_v43, %v7374_v43  ;;  %v6238_v45 = vrot.slane %v6237_v11, 4  ;;  %v8331_v25 = vcombine.high %v7374_v43, %v7374_v43  ;;  %v5177_v29 = vpop.f32.mrf.mxu1  ;;  %v5260_v44 = vsel %vm13915_vm6, %v8526_v53, 0.0  ;;  %vm13925_vm12 = vmmov %vm13913_vm1 }
 0x4b6   :  { %8108 = vst.msk [vmem:[%s13358_s3 + $0x80] sm:$0xff] %vm13916_vm13, %v5177_v29  ;;  %v5295_v24 = vmul.f32 %v5177_v29, %v5177_v29  ;;  %v7500_v39 = vsel %vm11695_vm5, %v12781_v21, %v12783_v16  ;;  %v5297_v18 = vmul.f32 %v8526_v53, %v8526_v53  ;;  %v6029_v48 = vsel %vm13917_vm15, %v5997_v10, %v5917_v63  ;;  %vm13927_vm1 = vmmov %vm13924_vm0 }
 0x4b7   :  { %v8358_v37 = vrot.slane %v8330_v0, 9  ;;  %v5915_v58 = vpop.permute.xlu0 %5914  ;;  %v7495_v46 = vrot.slane %v8331_v25, 5  ;;  %v8527_v3 = vpop.f32.mrf.mxu1  ;;  %v5257_v42 = vsel %vm13918_vm7, %v5177_v29, 0.0  ;;  %v8210_v50 = vcombine.low %v6029_v48, %v6029_v48  ;;  %vm13928_vm14 = vmmov %vm13923_vm4 }
 0x4b8   :  { %v8211_v26 = vcombine.high %v6029_v48, %v6029_v48  ;;  %v6027_v30 = vsel %vm13919_vm8, %v5995_v34, %v5915_v58  ;;  %8111 = vst.msk [vmem:[%s13358_s3 + $0x98] sm:$0xff] %vm13920_vm9, %v8527_v3  ;;  %v7268_v62 = vpop.permute.xlu1 %7267  ;;  %v6243_v7 = vsel %vm11304_vm3, %v6238_v45, %v6242_v49  ;;  %v5311_v57 = vsel %vm13921_vm10, %v5295_v24, 0.0  ;;  %vm13930_vm13 = vmmov %vm13923_vm4 }
 0x4b9   :  { %v8208_v59 = vcombine.low %v6027_v30, %v6027_v30  ;;  %v8209_v6 = vcombine.high %v6027_v30, %v6027_v30  ;;  %v5180_v28 = vpop.f32.mrf.mxu1  ;;  %v7496_v31 = vsel %vm11695_vm5, %v8358_v37, %v7495_v46  ;;  %v6273_v47 = vshrl.u32 %v8210_v50, 16  ;;  %vm13931_vm15 = vmmov %vm13923_vm4 }
 0x4ba   :  { %v6276_v8 = vshll.u32 %v8210_v50, 16  ;;  %v6282_v27 = vshll.u32 %v8211_v26, 16  ;;  %8109 = vst.msk [vmem:[%s13358_s3 + $0x88] sm:$0xff] %vm13922_vm11, %v5180_v28  ;;  %v5258_v9 = vsel %vm13923_vm4, %v5180_v28, 0.0  ;;  %v5298_v14 = vmul.f32 %v8527_v3, %v8527_v3  ;;  %vm13934_vm9 = vmmov %vm13923_vm4 }
 0x4bb   :  { %v7266_v61 = vpop.permute.xlu0 %7265  ;;  %v6259_v60 = vshrl.u32 %v8208_v59, 16  ;;  %v6262_v41 = vshll.u32 %v8208_v59, 16  ;;  %v6268_v38 = vshll.u32 %v8209_v6, 16  ;;  %v6275_v36 = vrot.slane %v6273_v47, 4  ;;  %vm13935_vm10 = vmmov %vm13923_vm4 }
 0x4bc   :  { %v6278_v35 = vrot.slane %v6276_v8, 5  ;;  %v6284_v40 = vrot.slane %v6282_v27, 5  ;;  %v12818_v12 = vpop.permute.xlu1 %5648  ;;  %v5259_v5 = vadd.f32 %v5258_v9, %v5257_v42  ;;  %v5296_v33 = vmul.f32 %v5180_v28, %v5180_v28  ;;  %vm13936_vm11 = vmmov %vm13923_vm4 }
 0x4bd   :  { %v6261_v1 = vrot.slane %v6259_v60, 4  ;;  %v6264_v32 = vrot.slane %v6262_v41, 5  ;;  %v6270_v52 = vrot.slane %v6268_v38, 5  ;;  %v8228_v13 = vcombine.low %v6243_v7, %v6257_v51 }
 0x4be   :  { %v6279_v10 = vor.u32 %v6278_v35, %v6275_v36  ;;  %v7380_v23 = vsel %vm13924_vm0, %v7348_v22, %v7268_v62  ;;  %v5261_v11 = vadd.f32 %v5260_v44, %v5259_v5  ;;  %v5312_v21 = vsel %vm13925_vm12, %v5296_v33, 0.0  ;;  %vm13937_vm0 = vmmov %vm13923_vm4 }
 0x4bf   :  { %v12821_v54 = vpop.permute.xlu0 %5646  ;;  %v6265_v34 = vor.u32 %v6264_v32, %v6261_v1  ;;  %v8336_v43 = vcombine.low %v7380_v23, %v7380_v23  ;;  %v8337_v53 = vcombine.high %v7380_v23, %v7380_v23  ;;  %vm13926_vm2 = vcmask 261120   ;;  %vm13938_vm12 = vmmov %vm13937_vm0 }
 0x4c0   :  { %v6280_v17 = vrot.slane %v6279_v10, 4  ;;  %8552 = vmatprep.mubr.msk.bf16.mxu0 %vm13926_vm2, %v8228_v13  ;;  %v7378_v16 = vsel %vm13927_vm1, %v7346_v20, %v7266_v61  ;;  %v8376_v0 = vcombine.low %v7496_v31, %v7500_v39  ;;  %v12826_v63 = vpop.permute.xlu1 %6967  ;;  %v5313_v49 = vadd.f32 %v5312_v21, %v5311_v57  ;;  %vm13929_vm6 = vmmov %vm13926_vm2  ;;  %v5375_v10 = vld [vmem:[#allocation2 + $0x84] sm:$0x1] }
 0x4c1   :  { %v6266_v45 = vrot.slane %v6265_v34, 4  ;;  %v8361_v25 = vrot.slane %v8336_v43, 9  ;;  %v7507_v22 = vrot.slane %v8337_v53, 5  ;;  %v5314_v29 = vsel %vm13928_vm14, %v5297_v18, 0.0  ;;  %vm13932_vm7 = vmmov %vm13926_vm2 }
 0x4c2   :  { %v6285_v51 = vsel %vm11304_vm3, %v6280_v17, %v6284_v40  ;;  %v8334_v37 = vcombine.low %v7378_v16, %v7378_v16  ;;  %v8335_v44 = vcombine.high %v7378_v16, %v7378_v16  ;;  %8568 = vmatprep.mubr.msk.bf16.mxu1 %vm13929_vm6, %v8376_v0  ;;  %v5262_v58 = vsel %vm13930_vm13, %v8527_v3, 0.0  ;;  %vm13933_vm8 = vmmov %vm13926_vm2  ;;  %v5377_v40 = vld [vmem:[#allocation2 + $0x8c] sm:$0x1] }
 0x4c3   :  { %v12832_v24 = vpop.permute.xlu0 %6965  ;;  %v6271_v20 = vsel %vm11304_vm3, %v6266_v45, %v6270_v52  ;;  %v5315_v39 = vadd.f32 %v5314_v29, %v5313_v49  ;;  %v5316_v46 = vsel %vm13931_vm15, %v5298_v14, 0.0  ;;  %v7508_v18 = vsel %vm11695_vm5, %v8361_v25, %v7507_v22  ;;  %vm13939_vm2 = vmmov %vm13937_vm0  ;;  %v8866_v49 = vld [vmem:[#allocation2 + $0x80] sm:$0xf]  ;;  %v6631_v22 = vld [vmem:[#allocation2 + $0x68] sm:$0xe] }
 0x4c4   :  { %v8360_v48 = vrot.slane %v8334_v37, 9  ;;  %v7503_v42 = vrot.slane %v8335_v44, 5  ;;  %v12840_v50 = vpop.permute.xlu1 %5652  ;;  %v8229_v26 = vcombine.low %v6271_v20, %v6285_v51  ;;  %v5263_v30 = vadd.f32 %v5262_v58, %v5261_v11  ;;  %vm13940_vm1 = vmmov %vm13937_vm0  ;;  %v8865_v11 = vld [vmem:[#allocation2 + $0x88] sm:$0xf]  ;;  %v6629_v29 = vld [vmem:[#allocation2 + $0x60] sm:$0xe] }
 0x4c5   :  { %v5317_v62 = vadd.f32 %v5316_v46, %v5315_v39  ;;  %vm13941_vm14 = vmmov %vm13937_vm0  ;;  %v8137_v43 = vcombine.low %v8865_v11, %v5377_v40  ;;  %vm13944_vm15 = vcmask 64512   ;;  %v8136_v25 = vcombine.low %v8866_v49, %v5375_v10  ;;  %v5381_v44 = vld [vmem:[#allocation2 + $0x9c] sm:$0x1]  ;;  %v6633_v58 = vld [vmem:[#allocation2 + $0x70] sm:$0xe] }
 0x4c6   :  { %v7504_v7 = vsel %vm11695_vm5, %v8360_v48, %v7503_v42  ;;  %8553 = vmatmul.mubr.msk.bf16.gmra.mxu0 %vm13932_vm7, %v8229_v26  ;;  %vm13942_vm6 = vmmov %vm13937_vm0  ;;  %vm13945_vm7 = vcmask 130048   ;;  %v8867_v42 = vld [vmem:[#allocation2 + $0x6c] sm:$0x1] }
 0x4c7   :  { %v12844_v57 = vpop.permute.xlu0 %5650  ;;  %v8377_v59 = vcombine.low %v7504_v7, %v7508_v18  ;;  %vm13943_vm13 = vmmov %vm13937_vm0  ;;  %v5967_v45 = vsel %vm13944_vm15, %v8137_v43, %v12818_v12  ;;  %v8267_v26 = vcombine.low %v6631_v22, %v8867_v42  ;;  %v6635_v7 = vld [vmem:[#allocation2 + $0x78] sm:$0xe] }
 0x4c8   :  { %v5761_v3 = vpop.permute.xlu1 %5760 }
 0x4c9   :  { %8569 = vmatmul.mubr.msk.bf16.gmra.mxu1 %vm13933_vm8, %v8377_v59  ;;  %v6001_v20 = vsel %vm13945_vm7, %v5967_v45, %v5761_v3  ;;  %vm13946_vm8 = vmmov %vm13937_vm0  ;;  %v8868_v3 = vld [vmem:[#allocation2 + $0x64] sm:$0x1] }
 0x4ca   :  { %v8530_v28 = vpop.f32.mrf.mxu1 }
 0x4cb   :  { %v5759_v6 = vpop.permute.xlu0 %5758  ;;  %8114 = vst.msk [vmem:[%s13358_s3 + $0xb0] sm:$0xff] %vm13934_vm9, %v8530_v28  ;;  %v5301_v14 = vmul.f32 %v8530_v28, %v8530_v28  ;;  %v5268_v33 = vsel %vm13940_vm1, %v8530_v28, 0.0  ;;  %vm13947_vm9 = vmmov %vm13944_vm15 }
 0x4cc   :  { %v12852_v31 = vpop.permute.xlu1 %6971  ;;  %v5193_v47 = vpop.f32.mrf.mxu1  ;;  %v5964_v18 = vsel %vm13947_vm9, %v8136_v25, %v12821_v54 }
 0x4cd   :  { %8112 = vst.msk [vmem:[%s13358_s3 + $0xa0] sm:$0xff] %vm13935_vm10, %v5193_v47  ;;  %v5264_v8 = vsel %vm13936_vm11, %v5193_v47, 0.0  ;;  %v5299_v27 = vmul.f32 %v5193_v47, %v5193_v47  ;;  %v5322_v21 = vsel %vm13942_vm6, %v5301_v14, 0.0  ;;  %vm13948_vm10 = vcmask 195584   ;;  %vm13949_vm11 = vmmov %vm13945_vm7 }
 0x4ce   :  { %v5265_v60 = vadd.f32 %v5264_v8, %v5263_v30  ;;  %v8531_v41 = vpop.f32.mrf.mxu1  ;;  %v5379_v30 = vld [vmem:[#allocation2 + $0x94] sm:$0x1]  ;;  %v8266_v47 = vcombine.low %v6629_v29, %v8868_v3  ;;  %v8869_v8 = vld [vmem:[#allocation2 + $0x98] sm:$0xf]  ;;  %vm13956_vm6 = vmmov %vm13945_vm7 }
 0x4cf   :  { %v12859_v61 = vpop.permute.xlu0 %6969  ;;  %v5318_v38 = vsel %vm13923_vm4, %v5299_v27, 0.0  ;;  %8115 = vst.msk [vmem:[%s13358_s3 + $0xb8] sm:$0xff] %vm13937_vm0, %v8531_v41  ;;  %v5302_v13 = vmul.f32 %v8531_v41, %v8531_v41  ;;  %v5270_v16 = vsel %vm13943_vm13, %v8531_v41, 0.0  ;;  %v8139_v27 = vcombine.low %v8869_v8, %v5381_v44  ;;  %vm13950_vm4 = vmmov %vm13948_vm10 }
 0x4d0   :  { %v5319_v36 = vadd.f32 %v5318_v38, %v5317_v62  ;;  %v5196_v35 = vpop.f32.mrf.mxu1  ;;  %v5999_v62 = vsel %vm13949_vm11, %v5964_v18, %v5759_v6  ;;  %vm13951_vm0 = vmmov %vm13947_vm9  ;;  %v8871_v6 = vld [vmem:[#allocation2 + $0x90] sm:$0xf] }
 0x4d1   :  { %v12866_v9 = vpop.permute.xlu1 %7079  ;;  %8113 = vst.msk [vmem:[%s13358_s3 + $0xa8] sm:$0xff] %vm13938_vm12, %v5196_v35  ;;  %v5266_v1 = vsel %vm13939_vm2, %v5196_v35, 0.0  ;;  %v5300_v32 = vmul.f32 %v5196_v35, %v5196_v35  ;;  %v5324_v39 = vsel %vm13946_vm8, %v5302_v13, 0.0  ;;  %vm13952_vm12 = vmmov %vm13951_vm0 }
 0x4d2   :  { %v5267_v5 = vadd.f32 %v5266_v1, %v5265_v60  ;;  %v8870_v60 = vld [vmem:[#allocation2 + $0x74] sm:$0x1]  ;;  %v7314_v1 = vsel %vm13951_vm0, %v8267_v26, %v12826_v63  ;;  %v7311_v13 = vsel %vm13952_vm12, %v8266_v47, %v12832_v24  ;;  %vm13953_vm2 = vmmov %vm13951_vm0 }
 0x4d3   :  { %v12873_v52 = vpop.permute.xlu0 %7077  ;;  %v5320_v23 = vsel %vm13941_vm14, %v5300_v32, 0.0  ;;  %v8268_v41 = vcombine.low %v6633_v58, %v8870_v60  ;;  %v8138_v32 = vcombine.low %v8871_v6, %v5379_v30  ;;  %vm13954_vm1 = vmmov %vm13951_vm0  ;;  %v7352_v45 = vsel %vm13956_vm6, %v7314_v1, %v12866_v9 }
 0x4d4   :  { %v5269_v53 = vadd.f32 %v5268_v33, %v5267_v5  ;;  %v5321_v17 = vadd.f32 %v5320_v23, %v5319_v36  ;;  %v8872_v5 = vld [vmem:[#allocation2 + $0x7c] sm:$0x1]  ;;  %vm13955_vm14 = vmmov %vm13951_vm0 }
 0x4d5   :  { %v12877_v34 = vpop.permute.xlu1 %5764  ;;  %v8269_v10 = vcombine.low %v6635_v7, %v8872_v5  ;;  %vm13957_vm13 = vmmov %vm13951_vm0 }
 0x4d6   :  { %v5323_v51 = vadd.f32 %v5322_v21, %v5321_v17  ;;  %v12885_v37 = vadd.f32 %v5270_v16, %v5269_v53  ;;  %v5973_v17 = vsel %vm13953_vm2, %v8139_v27, %v12840_v50  ;;  %v5970_v21 = vsel %vm13954_vm1, %v8138_v32, %v12844_v57  ;;  %vm13958_vm15 = vmmov %vm13950_vm4 }
 0x4d7   :  { %v12881_v0 = vpop.permute.xlu0 %5762  ;;  %v7320_v63 = vsel %vm13955_vm14, %v8269_v10, %v12852_v31  ;;  %v7317_v29 = vsel %vm13957_vm13, %v8268_v41, %v12859_v61  ;;  %vm13959_vm7 = vmmov %vm13956_vm6  ;;  %vm13968_vm1 = vcmask 261120   ;;  %vm13973_vm13 = vcmask 31744  }
 0x4d8   :  { %v12892_v12 = vadd.f32 %v5324_v39, %v5323_v51  ;;  %v7350_v57 = vsel %vm13959_vm7, %v7311_v13, %v12873_v52  ;;  %vm13960_vm8 = vmmov %vm13956_vm6 }
 0x4d9   :  { %v5921_v46 = vpop.permute.xlu1 %5920  ;;  %v6005_v9 = vsel %vm13960_vm8, %v5973_v17, %v12877_v34  ;;  %vm13961_vm9 = vmmov %vm13956_vm6 }
 0x4da   :  { %v6033_v48 = vsel %vm13948_vm10, %v6001_v20, %v5921_v46  ;;  %v6003_v46 = vsel %vm13961_vm9, %v5970_v21, %v12881_v0  ;;  %vm13962_vm10 = vmmov %vm13950_vm4  ;;  %vm13980_vm9 = vcmask 64512  }
 0x4db   :  { %v8214_v59 = vcombine.low %v6033_v48, %v6033_v48  ;;  %v5919_v28 = vpop.permute.xlu0 %5918  ;;  %v8215_v38 = vcombine.high %v6033_v48, %v6033_v48  ;;  %vm13963_vm11 = vmmov %vm13950_vm4 }
 0x4dc   :  { %v6031_v54 = vsel %vm13950_vm4, %v5999_v62, %v5919_v28  ;;  %vm13964_vm4 = vmmov %vm13956_vm6 }
 0x4dd   :  { %v6301_v36 = vshrl.u32 %v8214_v59, 16  ;;  %v6304_v35 = vshll.u32 %v8214_v59, 16  ;;  %v8212_v40 = vcombine.low %v6031_v54, %v6031_v54  ;;  %v7084_v14 = vpop.permute.xlu1 %7083  ;;  %v8213_v33 = vcombine.high %v6031_v54, %v6031_v54  ;;  %vm13965_vm0 = vmmov %vm13962_vm10 }
 0x4de   :  { %v6310_v25 = vshll.u32 %v8215_v38, 16  ;;  %v7356_v34 = vsel %vm13964_vm4, %v7320_v63, %v7084_v14  ;;  %vm13966_vm12 = vmmov %vm13965_vm0 }
 0x4df   :  { %v6303_v23 = vrot.slane %v6301_v36, 4  ;;  %v6306_v11 = vrot.slane %v6304_v35, 5  ;;  %v6287_v43 = vshrl.u32 %v8212_v40, 16  ;;  %v7082_v53 = vpop.permute.xlu0 %7081  ;;  %v6290_v16 = vshll.u32 %v8212_v40, 16  ;;  %vm13967_vm2 = vmmov %vm13964_vm4 }
 0x4e0   :  { %v6296_v44 = vshll.u32 %v8213_v33, 16  ;;  %v6312_v48 = vrot.slane %v6310_v25, 5  ;;  %v7354_v10 = vsel %vm13967_vm2, %v7317_v29, %v7082_v53  ;;  %vm13969_vm14 = vmmov %vm13965_vm0 }
 0x4e1   :  { %v6307_v49 = vor.u32 %v6306_v11, %v6303_v23  ;;  %v6289_v24 = vrot.slane %v6287_v43, 4  ;;  %v7272_v22 = vpop.permute.xlu1 %7271  ;;  %v6292_v51 = vrot.slane %v6290_v16, 5  ;;  %vm13970_vm6 = vmmov %vm13968_vm1 }
 0x4e2   :  { %v7384_v50 = vsel %vm13958_vm15, %v7352_v45, %v7272_v22  ;;  %v6298_v52 = vrot.slane %v6296_v44, 5  ;;  %vm13974_vm15 = vmmov %vm13973_vm13 }
 0x4e3   :  { %v6308_v20 = vrot.slane %v6307_v49, 4  ;;  %v8340_v31 = vcombine.low %v7384_v50, %v7384_v50  ;;  %v8341_v58 = vcombine.high %v7384_v50, %v7384_v50  ;;  %v7270_v39 = vpop.permute.xlu0 %7269  ;;  %v6293_v18 = vor.u32 %v6292_v51, %v6289_v24  ;;  %vm13979_vm8 = vmmov %vm13968_vm1 }
 0x4e4   :  { %v7382_v61 = vsel %vm13962_vm10, %v7350_v57, %v7270_v39  ;;  %v6639_v39 = vld [vmem:[#allocation2 + $0x88] sm:$0xe]  ;;  %vm13981_vm10 = vmmov %vm13980_vm9 }
 0x4e5   :  { %v8363_v42 = vrot.slane %v8340_v31, 9  ;;  %v7515_v26 = vrot.slane %v8341_v58, 5  ;;  %v8338_v30 = vcombine.low %v7382_v61, %v7382_v61  ;;  %v5925_v62 = vpop.permute.xlu1 %5924  ;;  %v6294_v7 = vrot.slane %v6293_v18, 4 }
 0x4e6   :  { %v8339_v59 = vcombine.high %v7382_v61, %v7382_v61  ;;  %v6037_v28 = vsel %vm13963_vm11, %v6005_v9, %v5925_v62  ;;  %v6313_v3 = vsel %vm11304_vm3, %v6308_v20, %v6312_v48  ;;  %v6643_v9 = vld [vmem:[#allocation2 + $0x98] sm:$0xe]  ;;  %v6637_v48 = vld [vmem:[#allocation2 + $0x80] sm:$0xe]  ;;  %vm13982_vm11 = vmmov %vm13980_vm9 }
 0x4e7   :  { %v8362_v47 = vrot.slane %v8338_v30, 9  ;;  %v8218_v0 = vcombine.low %v6037_v28, %v6037_v28  ;;  %v5923_v8 = vpop.permute.xlu0 %5922  ;;  %v6299_v27 = vsel %vm11304_vm3, %v6294_v7, %v6298_v52  ;;  %v8219_v41 = vcombine.high %v6037_v28, %v6037_v28  ;;  %v13971_v30 = vld [vmem:[#allocation4_spill] sm:$0xff] }
 0x4e8   :  { %v7511_v60 = vrot.slane %v8339_v59, 5  ;;  %v6035_v54 = vsel %vm13965_vm0, %v6003_v46, %v5923_v8  ;;  %v7516_v38 = vsel %vm11695_vm5, %v8363_v42, %v7515_v26  ;;  %v8230_v32 = vcombine.low %v6299_v27, %v6313_v3  ;;  %v6641_v26 = vld [vmem:[#allocation2 + $0x90] sm:$0xe]  ;;  %v8873_v3 = vld [vmem:[#allocation2 + $0x8c] sm:$0x1]  ;;  %vm13984_vm0 = vmmov %vm13968_vm1 }
 0x4e9   :  { %v6329_v36 = vshrl.u32 %v8218_v0, 16  ;;  %v6332_v35 = vshll.u32 %v8218_v0, 16  ;;  %v8216_v40 = vcombine.low %v6035_v54, %v6035_v54  ;;  %v7276_v1 = vpop.permute.xlu1 %7275  ;;  %v8217_v6 = vcombine.high %v6035_v54, %v6035_v54  ;;  %v8876_v54 = vld [vmem:[#allocation2 + $0x94] sm:$0x1] }
 0x4ea   :  { %v7512_v14 = vsel %vm11695_vm5, %v8362_v47, %v7511_v60  ;;  %v7388_v5 = vsel %vm13966_vm12, %v7356_v34, %v7276_v1  ;;  %v6338_v43 = vshll.u32 %v8219_v41, 16  ;;  %8556 = vmatprep.mubr.msk.bf16.mxu0 %vm13968_vm1, %v8230_v32  ;;  %v4097_v62 = vmul.f32 %v13971_v30, %v13971_v30  ;;  %v8874_v47 = vld [vmem:[#allocation2 + $0x9c] sm:$0x1]  ;;  %v8875_v60 = vld [vmem:[#allocation2 + $0x84] sm:$0x1]  ;;  %vm13985_vm12 = vmmov %vm13980_vm9 }
 0x4eb   :  { %v6331_v33 = vrot.slane %v6329_v36, 4  ;;  %v6334_v13 = vrot.slane %v6332_v35, 5  ;;  %v6315_v23 = vshrl.u32 %v8216_v40, 16  ;;  %v7274_v11 = vpop.permute.xlu0 %7273  ;;  %v6318_v17 = vshll.u32 %v8216_v40, 16  ;;  %v13972_v35 = vld [vmem:[#allocation32_spill] sm:$0xff] }
 0x4ec   :  { %v8344_v21 = vcombine.low %v7388_v5, %v7388_v5  ;;  %v8345_v63 = vcombine.high %v7388_v5, %v7388_v5  ;;  %v7386_v49 = vsel %vm13969_vm14, %v7354_v10, %v7274_v11  ;;  %v8378_v25 = vcombine.low %v7512_v14, %v7516_v38  ;;  %v13976_v5 = vld [vmem:[#allocation5_spill] sm:$0xff] }
 0x4ed   :  { %v6335_v16 = vor.u32 %v6334_v13, %v6331_v33  ;;  %v6317_v45 = vrot.slane %v6315_v23, 4  ;;  %v6976_v24 = vpop.permute.xlu1 %6975  ;;  %v6320_v22 = vrot.slane %v6318_v17, 5  ;;  %v6324_v51 = vshll.u32 %v8217_v6, 16  ;;  %v13977_v33 = vld [vmem:[#allocation17_spill] sm:$0xff] }
 0x4ee   :  { %v8365_v44 = vrot.slane %v8344_v21, 9  ;;  %v7523_v53 = vrot.slane %v8345_v63, 5  ;;  %v8342_v50 = vcombine.low %v7386_v49, %v7386_v49  ;;  %v8343_v57 = vcombine.high %v7386_v49, %v7386_v49  ;;  %8572 = vmatprep.mubr.msk.bf16.mxu1 %vm13970_vm6, %v8378_v25 }
 0x4ef   :  { %v6336_v29 = vrot.slane %v6335_v16, 4  ;;  %v6974_v20 = vpop.permute.xlu0 %6973  ;;  %v6340_v31 = vrot.slane %v6338_v43, 5  ;;  %v6321_v58 = vor.u32 %v6320_v22, %v6317_v45  ;;  %v6326_v59 = vrot.slane %v6324_v51, 5 }
 0x4f0   :  { %v7524_v46 = vsel %vm11695_vm5, %v8365_v44, %v7523_v53  ;;  %v8364_v18 = vrot.slane %v8342_v50, 9  ;;  %v7519_v61 = vrot.slane %v8343_v57, 5  ;;  %v8271_v34 = vcombine.low %v6639_v39, %v8873_v3 }
 0x4f1   :  { %v6980_v42 = vpop.permute.xlu1 %6979  ;;  %v6341_v7 = vsel %vm11304_vm3, %v6336_v29, %v6340_v31  ;;  %v6322_v52 = vrot.slane %v6321_v58, 4  ;;  %v8273_v0 = vcombine.low %v6643_v9, %v8874_v47  ;;  %v8270_v41 = vcombine.low %v6637_v48, %v8875_v60 }
 0x4f2   :  { %v7520_v28 = vsel %vm11695_vm5, %v8364_v18, %v7519_v61  ;;  %v8272_v38 = vcombine.low %v6641_v26, %v8876_v54  ;;  %v12946_v40 = vsel %vm13973_vm13, %v13972_v35, 0.0  ;;  %v12950_v1 = vmul.f32 %v13972_v35, %v13972_v35 }
 0x4f3   :  { %v6978_v8 = vpop.permute.xlu0 %6977  ;;  %v6327_v27 = vsel %vm11304_vm3, %v6322_v52, %v6326_v59  ;;  %v8379_v36 = vcombine.low %v7520_v28, %v7524_v46  ;;  %v12954_v14 = vsel %vm13974_vm15, %v13971_v30, 0.0  ;;  %vm13975_vm3 = vmmov %vm13973_vm13  ;;  %v12961_v10 = vmul.f32 %v13976_v5, %v13976_v5  ;;  %v8534_v11 = vpop.f32.mrf.mxu1 }
 0x4f4   :  { %v8231_v6 = vcombine.low %v6327_v27, %v6341_v7  ;;  %v12957_v32 = vsel %vm13975_vm3, %v4097_v62, 0.0  ;;  %vm13978_vm7 = vmmov %vm13975_vm3  ;;  %v12969_v23 = vmul.f32 %v13977_v33, %v13977_v33  ;;  %v7326_v43 = vsel %vm13980_vm9, %v8271_v34, %v6976_v24 }
 0x4f5   :  { %v12965_v13 = vsel %vm13978_vm7, %v13977_v33, 0.0  ;;  %8573 = vmatmul.mubr.msk.bf16.gmra.mxu1 %vm13979_vm8, %v8379_v36  ;;  %v7323_v17 = vsel %vm13981_vm10, %v8270_v41, %v6974_v20  ;;  %v7332_v21 = vsel %vm13982_vm11, %v8273_v0, %v6980_v42  ;;  %vm13983_vm4 = vmmov %vm13975_vm3  ;;  %v5305_v63 = vmul.f32 %v8534_v11, %v8534_v11  ;;  %v8506_v16 = vpop.f32.mrf.mxu0  ;;  %v5209_v22 = vpop.f32.mrf.mxu1 }
 0x4f6   :  { %8118 = vst.msk [vmem:[%s13358_s3 + $0xd0] sm:$0xff] %vm13983_vm4, %v8534_v11  ;;  %8557 = vmatmul.mubr.msk.bf16.gmra.mxu0 %vm13984_vm0, %v8231_v6  ;;  %v7329_v49 = vsel %vm13985_vm12, %v8272_v38, %v6978_v8  ;;  %vm13986_vm2 = vmmov %vm13975_vm3  ;;  %v4095_v24 = vmul.f32 %v8506_v16, %v8506_v16  ;;  %vm13988_vm14 = vcmask 130048   ;;  %v5303_v29 = vmul.f32 %v5209_v22, %v5209_v22 }
 0x4f7   :  { %v7088_v55 = vpop.permute.xlu1 %7087  ;;  %v5276_v25 = vsel %vm13986_vm2, %v8534_v11, 0.0  ;;  %vm13987_vm1 = vmmov %vm13986_vm2  ;;  %v3976_v57 = vpop.f32.mrf.mxu0 }
 0x4f8   :  { %4041 = vst.msk [vmem:[%s13358_s3 + $0x10] sm:$0xff] %vm13987_vm1, %v8506_v16  ;;  %v7360_v51 = vsel %vm13988_vm14, %v7326_v43, %v7088_v55  ;;  %vm13989_vm6 = vmmov %vm13987_vm1  ;;  %v4093_v9 = vmul.f32 %v3976_v57, %v3976_v57  ;;  %v8535_v46 = vpop.f32.mrf.mxu1 }
 0x4f9   :  { %v7086_v45 = vpop.permute.xlu0 %7085  ;;  %v4058_v44 = vsel %vm13989_vm6, %v8506_v16, 0.0  ;;  %vm13990_vm13 = vmmov %vm13987_vm1  ;;  %v8507_v42 = vpop.f32.mrf.mxu0 }
 0x4fa   :  { %8116 = vst.msk [vmem:[%s13358_s3 + $0xc0] sm:$0xff] %vm13990_vm13, %v5209_v22  ;;  %vm13991_vm15 = vmmov %vm13987_vm1  ;;  %v4096_v7 = vmul.f32 %v8507_v42, %v8507_v42  ;;  %v5212_v52 = vpop.f32.mrf.mxu1 }
 0x4fb   :  { %v5272_v53 = vsel %vm13991_vm15, %v5209_v22, 0.0  ;;  %vm13992_vm3 = vmmov %vm13988_vm14  ;;  %v7092_v20 = vpop.permute.xlu1 %7091  ;;  %v5304_v34 = vmul.f32 %v5212_v52, %v5212_v52  ;;  %v3979_v47 = vpop.f32.mrf.mxu0 }
 0x4fc   :  { %v7358_v50 = vsel %vm13992_vm3, %v7323_v17, %v7086_v45  ;;  %vm13993_vm7 = vmmov %vm13987_vm1  ;;  %v5273_v39 = vadd.f32 %v5272_v53, %v12885_v37  ;;  %v5306_v37 = vmul.f32 %v8535_v46, %v8535_v46  ;;  %v4094_v41 = vmul.f32 %v3979_v47, %v3979_v47 }
 0x4fd   :  { %v5330_v31 = vsel %vm13993_vm7, %v5305_v63, 0.0  ;;  %vm13994_vm8 = vmmov %vm13987_vm1  ;;  %v7090_v26 = vpop.permute.xlu0 %7089 }
 0x4fe   :  { %v4112_v58 = vsel %vm13994_vm8, %v4095_v24, 0.0  ;;  %vm13995_vm9 = vmmov %vm13987_vm1 }
 0x4ff   :  { %4039 = vst.msk [vmem:[%s13358_s3] sm:$0xff] %vm13995_vm9, %v3976_v57  ;;  %vm13996_vm10 = vmmov %vm13987_vm1  ;;  %v7280_v0 = vpop.permute.xlu1 %7279 }
 0x500   :  { %v5326_v18 = vsel %vm13996_vm10, %v5303_v29, 0.0  ;;  %vm13997_vm11 = vmmov %vm13987_vm1 }
 0x501   :  { %v4055_v61 = vsel %vm13997_vm11, %v3976_v57, 0.0  ;;  %vm13998_vm4 = vmmov %vm13987_vm1  ;;  %v5327_v30 = vadd.f32 %v5326_v18, %v12892_v12  ;;  %vm14012_vm11 = vcmask 195584   ;;  %v7278_v6 = vpop.permute.xlu0 %7277 }
 0x502   :  { %8119 = vst.msk [vmem:[%s13358_s3 + $0xd8] sm:$0xff] %vm13998_vm4, %v8535_v46  ;;  %vm13999_vm0 = vmmov %vm13987_vm1  ;;  %v7392_v35 = vsel %vm14012_vm11, %v7360_v51, %v7280_v0 }
 0x503   :  { %v13008_v48 = vsel %vm13999_vm0, %v8535_v46, 0.0  ;;  %vm14000_vm12 = vmmov %vm13999_vm0  ;;  %v8348_v43 = vcombine.low %v7392_v35, %v7392_v35  ;;  %v8349_v63 = vcombine.high %v7392_v35, %v7392_v35  ;;  %v7284_v45 = vpop.permute.xlu1 %7283  ;;  %v14025_v35 = vld [vmem:[#allocation19_spill] sm:$0xff] }
 0x504   :  { %v4109_v62 = vsel %vm14000_vm12, %v4093_v9, 0.0  ;;  %vm14001_vm2 = vmmov %vm13999_vm0 }
 0x505   :  { %4042 = vst.msk [vmem:[%s13358_s3 + $0x18] sm:$0xff] %vm14001_vm2, %v8507_v42  ;;  %vm14002_vm1 = vmmov %vm13992_vm3  ;;  %v8367_v24 = vrot.slane %v8348_v43, 9  ;;  %v14030_v43 = vld [vmem:[#allocation36_spill] sm:$0xff] }
 0x506   :  { %v7364_v59 = vsel %vm14002_vm1, %v7332_v21, %v7092_v20  ;;  %vm14003_vm14 = vmmov %vm13999_vm0  ;;  %v7531_v20 = vrot.slane %v8349_v63, 5 }
 0x507   :  { %v5332_v28 = vsel %vm14003_vm14, %v5306_v37, 0.0  ;;  %vm14004_vm6 = vmmov %vm13999_vm0  ;;  %vm14018_vm14 = vcmask 261120  }
 0x508   :  { %v4060_v3 = vsel %vm14004_vm6, %v8507_v42, 0.0  ;;  %vm14005_vm13 = vmmov %vm13999_vm0 }
 0x509   :  { %8117 = vst.msk [vmem:[%s13358_s3 + $0xc8] sm:$0xff] %vm14005_vm13, %v5212_v52  ;;  %vm14006_vm15 = vmmov %vm13999_vm0 }
 0x50a   :  { %v5274_v12 = vsel %vm14006_vm15, %v5212_v52, 0.0  ;;  %vm14007_vm3 = vmmov %vm14002_vm1 }
 0x50b   :  { %v5275_v8 = vadd.f32 %v5274_v12, %v5273_v39  ;;  %v7362_v27 = vsel %vm14007_vm3, %v7329_v49, %v7090_v26  ;;  %vm14008_vm7 = vmmov %vm13999_vm0 }
 0x50c   :  { %4040 = vst.msk [vmem:[%s13358_s3 + $0x8] sm:$0xff] %vm14008_vm7, %v3979_v47  ;;  %vm14009_vm8 = vmmov %vm13999_vm0 }
 0x50d   :  { %v4056_v60 = vsel %vm14009_vm8, %v3979_v47, 0.0  ;;  %vm14010_vm9 = vmmov %vm13999_vm0  ;;  %v5277_v55 = vadd.f32 %v5276_v25, %v5275_v8  ;;  %v7282_v25 = vpop.permute.xlu0 %7281  ;;  %v14021_v8 = vld [vmem:[#allocation21_spill] sm:$0xff] }
 0x50e   :  { %v4114_v54 = vsel %vm14010_vm9, %v4096_v7, 0.0  ;;  %vm14011_vm10 = vmmov %vm13999_vm0  ;;  %v4057_v36 = vadd.f32 %v4056_v60, %v4055_v61 }
 0x50f   :  { %v5328_v38 = vsel %vm14011_vm10, %v5304_v34, 0.0  ;;  %vm14013_vm4 = vmmov %vm13999_vm0 }
 0x510   :  { %v5329_v33 = vadd.f32 %v5328_v38, %v5327_v30  ;;  %v4110_v11 = vsel %vm14013_vm4, %v4094_v41, 0.0  ;;  %v4059_v17 = vadd.f32 %v4058_v44, %v4057_v36  ;;  %vm14014_vm0 = vmmov %vm14012_vm11 }
 0x511   :  { %v4111_v21 = vadd.f32 %v4110_v11, %v4109_v62  ;;  %v7390_v16 = vsel %vm14014_vm0, %v7358_v50, %v7278_v6  ;;  %vm14015_vm12 = vmmov %vm14014_vm0  ;;  %v7532_v50 = vsel %vm11695_vm5, %v8367_v24, %v7531_v20  ;;  %v4103_v6 = vmul.f32 %v14025_v35, %v14025_v35 }
 0x512   :  { %v5331_v49 = vadd.f32 %v5330_v31, %v5329_v33  ;;  %v8346_v22 = vcombine.low %v7390_v16, %v7390_v16  ;;  %v8347_v53 = vcombine.high %v7390_v16, %v7390_v16  ;;  %v4061_v29 = vadd.f32 %v4060_v3, %v4059_v17  ;;  %vm14016_vm2 = vmmov %vm14014_vm0 }
 0x513   :  { %v4113_v57 = vadd.f32 %v4112_v58, %v4111_v21  ;;  %v7396_v51 = vsel %vm14015_vm12, %v7364_v59, %v7284_v45  ;;  %v7394_v31 = vsel %vm14016_vm2, %v7362_v27, %v7282_v25  ;;  %vm14017_vm1 = vmmov %vm14013_vm4  ;;  %v13047_v3 = vadd.f32 %v13008_v48, %v5277_v55 }
 0x514   :  { %v8366_v39 = vrot.slane %v8346_v22, 9  ;;  %v7527_v9 = vrot.slane %v8347_v53, 5  ;;  %v8352_v46 = vcombine.low %v7396_v51, %v7396_v51  ;;  %v8353_v18 = vcombine.high %v7396_v51, %v7396_v51  ;;  %vm14019_vm6 = vmmov %vm14017_vm1 }
 0x515   :  { %v4063_v44 = vadd.f32 %v12954_v14, %v4061_v29  ;;  %v4115_v61 = vadd.f32 %v4114_v54, %v4113_v57  ;;  %v8350_v26 = vcombine.low %v7394_v31, %v7394_v31  ;;  %v8351_v7 = vcombine.high %v7394_v31, %v7394_v31  ;;  %vm14020_vm13 = vmmov %vm14017_vm1  ;;  %v14024_v54 = vld [vmem:[#allocation37_spill] sm:$0xff] }
 0x516   :  { %v7528_v37 = vsel %vm11695_vm5, %v8366_v39, %v7527_v9  ;;  %v8369_v58 = vrot.slane %v8352_v46, 9  ;;  %v7539_v42 = vrot.slane %v8353_v18, 5  ;;  %v4118_v14 = vsel %vm14017_vm1, %v12969_v23, 0.0  ;;  %vm14022_vm15 = vmmov %vm14017_vm1 }
 0x517   :  { %v4065_v30 = vadd.f32 %v12965_v13, %v4063_v44  ;;  %v4117_v62 = vadd.f32 %v12957_v32, %v4115_v61  ;;  %v8380_v52 = vcombine.low %v7528_v37, %v7532_v50  ;;  %v8368_v59 = vrot.slane %v8350_v26, 9  ;;  %vm14023_vm3 = vmmov %vm14017_vm1 }
 0x518   :  { %v13049_v12 = vadd.f32 %v5332_v28, %v5331_v49  ;;  %v7540_v0 = vsel %vm11695_vm5, %v8369_v58, %v7539_v42  ;;  %v7535_v13 = vrot.slane %v8351_v7, 5  ;;  %v4120_v32 = vsel %vm14019_vm6, %v12950_v1, 0.0  ;;  %vm14026_vm7 = vmmov %vm14017_vm1 }
 0x519   :  { %v4067_v34 = vadd.f32 %v12946_v40, %v4065_v30  ;;  %v4119_v47 = vadd.f32 %v4118_v14, %v4117_v62  ;;  %8576 = vmatprep.mubr.msk.bf16.mxu1 %vm14018_vm14, %v8380_v52  ;;  %v4068_v23 = vsel %vm14020_vm13, %v13976_v5, 0.0  ;;  %v4101_v48 = vmul.f32 %v14021_v8, %v14021_v8  ;;  %vm14027_vm8 = vmmov %vm14017_vm1 }
 0x51a   :  { %v7536_v40 = vsel %vm11695_vm5, %v8368_v59, %v7535_v13  ;;  %v4122_v60 = vsel %vm14022_vm15, %v12961_v10, 0.0  ;;  %v4070_v41 = vsel %vm14023_vm3, %v14021_v8, 0.0  ;;  %v4102_v1 = vmul.f32 %v14024_v54, %v14024_v54  ;;  %vm14028_vm5 = vmmov %vm14018_vm14 }
 0x51b   :  { %v4069_v28 = vadd.f32 %v4068_v23, %v4067_v34  ;;  %v4121_v27 = vadd.f32 %v4120_v32, %v4119_v47  ;;  %v8381_v38 = vcombine.low %v7536_v40, %v7540_v0  ;;  %v4124_v55 = vsel %vm14026_vm7, %v4101_v48, 0.0  ;;  %vm14029_vm9 = vmmov %vm14017_vm1 }
 0x51c   :  { %v4072_v4 = vsel %vm14027_vm8, %v14024_v54, 0.0  ;;  %v4074_v11 = vsel %vm14029_vm9, %v14025_v35, 0.0  ;;  %v4104_v17 = vmul.f32 %v14030_v43, %v14030_v43  ;;  %vm14031_vm10 = vmmov %vm14017_vm1  ;;  %v4105_v24 = vmul.f32 %v12731_v56, %v12731_v56 }
 0x51d   :  { %v4071_v36 = vadd.f32 %v4070_v41, %v4069_v28  ;;  %v4123_v5 = vadd.f32 %v4122_v60, %v4121_v27  ;;  %8577 = vmatmul.mubr.msk.bf16.gmra.mxu1 %vm14028_vm5, %v8381_v38  ;;  %v4126_v21 = vsel %vm14031_vm10, %v4102_v1, 0.0  ;;  %vm14032_vm11 = vmmov %vm14017_vm1  ;;  %v4106_v20 = vmul.f32 %v12750_v2, %v12750_v2 }
 0x51e   :  { %v4128_v45 = vsel %vm14032_vm11, %v4103_v6, 0.0  ;;  %vm14033_vm4 = vmmov %vm14017_vm1  ;;  %v4107_v39 = vmul.f32 %v12722_v15, %v12722_v15 }
 0x51f   :  { %v4073_v10 = vadd.f32 %v4072_v4, %v4071_v36  ;;  %v4125_v33 = vadd.f32 %v4124_v55, %v4123_v5  ;;  %v4076_v49 = vsel %vm14033_vm4, %v14030_v43, 0.0  ;;  %vm14034_vm0 = vmmov %vm14017_vm1 }
 0x520   :  { %v4130_v29 = vsel %vm14034_vm0, %v4104_v17, 0.0  ;;  %vm14035_vm12 = vmmov %vm14034_vm0 }
 0x521   :  { %v4075_v63 = vadd.f32 %v4074_v11, %v4073_v10  ;;  %v4127_v16 = vadd.f32 %v4126_v21, %v4125_v33  ;;  %v4078_v57 = vsel %vm14035_vm12, %v12731_v56, 0.0  ;;  %vm14036_vm2 = vmmov %vm14034_vm0  ;;  %v4108_v56 = vmul.f32 %v12740_v19, %v12740_v19  ;;  %v8538_v7 = vpop.f32.mrf.mxu1 }
 0x522   :  { %v4132_v9 = vsel %vm14036_vm2, %v4105_v24, 0.0  ;;  %vm14037_vm1 = vmmov %vm14034_vm0  ;;  %v5309_v8 = vmul.f32 %v8538_v7, %v8538_v7  ;;  %v5284_v60 = vsel %vm14034_vm0, %v8538_v7, 0.0 }
 0x523   :  { %v4077_v22 = vadd.f32 %v4076_v49, %v4075_v63  ;;  %v4129_v53 = vadd.f32 %v4128_v45, %v4127_v16  ;;  %v4080_v46 = vsel %vm14037_vm1, %v12750_v2, 0.0  ;;  %vm14038_vm14 = vmmov %vm14034_vm0 }
 0x524   :  { %v4082_v61 = vsel %vm14038_vm14, %v12722_v15, 0.0  ;;  %vm14039_vm6 = vmmov %vm14034_vm0  ;;  %v5225_v15 = vpop.f32.mrf.mxu1 }
 0x525   :  { %v4079_v51 = vadd.f32 %v4078_v57, %v4077_v22  ;;  %v4131_v25 = vadd.f32 %v4130_v29, %v4129_v53  ;;  %v4134_v50 = vsel %vm14039_vm6, %v4106_v20, 0.0  ;;  %vm14040_vm13 = vmmov %vm14034_vm0  ;;  %v5307_v14 = vmul.f32 %v5225_v15, %v5225_v15 }
 0x526   :  { %v4136_v58 = vsel %vm14040_vm13, %v4107_v39, 0.0  ;;  %vm14041_vm15 = vmmov %vm14034_vm0  ;;  %v8539_v34 = vpop.f32.mrf.mxu1 }
 0x527   :  { %v4133_v18 = vadd.f32 %v4132_v9, %v4131_v25  ;;  %v4081_v44 = vadd.f32 %v4080_v46, %v4079_v51  ;;  %v4084_v42 = vsel %vm14041_vm15, %v12740_v19, 0.0  ;;  %vm14042_vm3 = vmmov %vm14034_vm0  ;;  %v5310_v41 = vmul.f32 %v8539_v34, %v8539_v34 }
 0x528   :  { %v4138_v2 = vsel %vm14042_vm3, %v4108_v56, 0.0  ;;  %vm14043_vm7 = vmmov %vm14034_vm0  ;;  %v5228_v23 = vpop.f32.mrf.mxu1 }
 0x529   :  { %v4083_v31 = vadd.f32 %v4082_v61, %v4081_v44  ;;  %v4135_v37 = vadd.f32 %v4134_v50, %v4133_v18  ;;  %8122 = vst.msk [vmem:[%s13358_s3 + $0xf0] sm:$0xff] %vm14043_vm7, %v8538_v7  ;;  %vm14044_vm8 = vmmov %vm14034_vm0  ;;  %v5308_v48 = vmul.f32 %v5228_v23, %v5228_v23 }
 0x52a   :  { %8120 = vst.msk [vmem:[%s13358_s3 + $0xe0] sm:$0xff] %vm14044_vm8, %v5225_v15  ;;  %vm14045_vm5 = vmmov %vm14034_vm0  ;;  %v8546_v40 = vpop.f32.mrf.mxu0 }
 0x52b   :  { %v4085_v26 = vadd.f32 %v4084_v42, %v4083_v31  ;;  %v4137_v30 = vadd.f32 %v4136_v58, %v4135_v37  ;;  %v5280_v19 = vsel %vm14045_vm5, %v5225_v15, 0.0  ;;  %vm14046_vm9 = vmmov %vm14034_vm0  ;;  %v6561_v16 = vmul.f32 %v8546_v40, %v8546_v40 }
 0x52c   :  { %v5281_v59 = vadd.f32 %v5280_v19, %v13047_v3  ;;  %v5334_v0 = vsel %vm14046_vm9, %v5307_v14, 0.0  ;;  %vm14047_vm10 = vmmov %vm14034_vm0  ;;  %v6441_v36 = vpop.f32.mrf.mxu0 }
 0x52d   :  { %v4139_v62 = vadd.f32 %v4138_v2, %v4137_v30  ;;  %v4086_v52 = vrot.slane %v4085_v26, 4  ;;  %8123 = vst.msk [vmem:[%s13358_s3 + $0xf8] sm:$0xff] %vm14047_vm10, %v8539_v34  ;;  %v5335_v13 = vadd.f32 %v5334_v0, %v13049_v12  ;;  %vm14048_vm11 = vmmov %vm14034_vm0  ;;  %v6559_v11 = vmul.f32 %v6441_v36, %v6441_v36 }
 0x52e   :  { %8121 = vst.msk [vmem:[%s13358_s3 + $0xe8] sm:$0xff] %vm14048_vm11, %v5228_v23  ;;  %vm14049_vm4 = vmmov %vm14034_vm0  ;;  %v8547_v10 = vpop.f32.mrf.mxu0 }
 0x52f   :  { %v4140_v47 = vrot.slane %v4139_v62, 4  ;;  %v4087_v32 = vadd.f32 %v4086_v52, %v4085_v26  ;;  %v5282_v3 = vsel %vm14049_vm4, %v5228_v23, 0.0  ;;  %vm14050_vm12 = vmmov %vm14034_vm0  ;;  %v6562_v25 = vmul.f32 %v8547_v10, %v8547_v10 }
 0x530   :  { %v5283_v27 = vadd.f32 %v5282_v3, %v5281_v59  ;;  %v5336_v54 = vsel %vm14050_vm12, %v5308_v48, 0.0  ;;  %vm14051_vm2 = vmmov %vm14034_vm0  ;;  %v6444_v63 = vpop.f32.mrf.mxu0 }
 0x531   :  { %v4141_v28 = vadd.f32 %v4140_v47, %v4139_v62  ;;  %8244 = vst.msk [vmem:[%s13358_s3 + $0x110] sm:$0xff] %vm14051_vm2, %v8546_v40  ;;  %v4088_v12 = vrot.slane %v4087_v32, 2  ;;  %v5337_v38 = vadd.f32 %v5336_v54, %v5335_v13  ;;  %vm14052_vm1 = vmmov %vm14034_vm0  ;;  %v6560_v24 = vmul.f32 %v6444_v63, %v6444_v63 }
 0x532   :  { %v5285_v1 = vadd.f32 %v5284_v60, %v5283_v27  ;;  %v5338_v5 = vsel %vm14052_vm1, %v5309_v8, 0.0  ;;  %vm14053_vm14 = vmmov %vm14034_vm0  ;;  %v6580_v26 = vsel %vm14034_vm0, %v6562_v25, 0.0 }
 0x533   :  { %v5286_v35 = vsel %vm14053_vm14, %v8539_v34, 0.0  ;;  %vm14054_vm6 = vmmov %vm14034_vm0  ;;  %v4142_v6 = vrot.slane %v4141_v28, 2  ;;  %v5339_v4 = vadd.f32 %v5338_v5, %v5337_v38  ;;  %v4089_v43 = vadd.f32 %v4088_v12, %v4087_v32 }
 0x534   :  { %8242 = vst.msk [vmem:[%s13358_s3 + $0x100] sm:$0xff] %vm14054_vm6, %v6441_v36  ;;  %v5287_v55 = vadd.f32 %v5286_v35, %v5285_v1  ;;  %vm14055_vm13 = vmmov %vm14034_vm0 }
 0x535   :  { %v5340_v33 = vsel %vm14055_vm13, %v5310_v41, 0.0  ;;  %vm14056_vm15 = vmmov %vm14034_vm0  ;;  %v4143_v22 = vadd.f32 %v4142_v6, %v4141_v28  ;;  %v4090_v61 = vrot.slane %v4089_v43, 1 }
 0x536   :  { %8245 = vst.msk [vmem:[%s13358_s3 + $0x118] sm:$0xff] %vm14056_vm15, %v8547_v10  ;;  %v5288_v17 = vrot.slane %v5287_v55, 4  ;;  %v5341_v21 = vadd.f32 %v5340_v33, %v5339_v4  ;;  %vm14057_vm3 = vmmov %vm14034_vm0 }
 0x537   :  { %v6521_v45 = vsel %vm14057_vm3, %v6441_v36, 0.0  ;;  %vm14058_vm7 = vmmov %vm14034_vm0  ;;  %v4144_v30 = vrot.slane %v4143_v22, 1  ;;  %v4091_v15 = vadd.f32 %v4090_v61, %v4089_v43 }
 0x538   :  { %8243 = vst.msk [vmem:[%s13358_s3 + $0x108] sm:$0xff] %vm14058_vm7, %v6444_v63  ;;  %vm14059_vm8 = vmmov %vm14034_vm0  ;;  %v5289_v53 = vadd.f32 %v5288_v17, %v5287_v55  ;;  %v5342_v29 = vrot.slane %v5341_v21, 4 }
 0x539   :  { %v6522_v49 = vsel %vm14059_vm8, %v6444_v63, 0.0  ;;  %vm14060_vm5 = vmmov %vm14034_vm0  ;;  %v4145_v14 = vadd.f32 %v4144_v30, %v4143_v22 }
 0x53a   :  { %v6523_v57 = vadd.f32 %v6522_v49, %v6521_v45  ;;  %v6524_v20 = vsel %vm14060_vm5, %v8546_v40, 0.0  ;;  %vm14061_vm9 = vmmov %vm14034_vm0  ;;  %v5290_v9 = vrot.slane %v5289_v53, 2  ;;  %v5343_v46 = vadd.f32 %v5342_v29, %v5341_v21 }
 0x53b   :  { %v6575_v51 = vsel %vm14061_vm9, %v6559_v11, 0.0  ;;  %vm14062_vm10 = vmmov %vm14034_vm0 }
 0x53c   :  { %v6576_v39 = vsel %vm14062_vm10, %v6560_v24, 0.0  ;;  %v6525_v18 = vadd.f32 %v6524_v20, %v6523_v57  ;;  %vm14063_vm11 = vmmov %vm14034_vm0  ;;  %v5291_v31 = vadd.f32 %v5290_v9, %v5289_v53  ;;  %v5344_v37 = vrot.slane %v5343_v46, 2 }
 0x53d   :  { %v6577_v44 = vadd.f32 %v6576_v39, %v6575_v51  ;;  %v6578_v56 = vsel %vm14063_vm11, %v6561_v16, 0.0  ;;  %vm14064_vm4 = vmmov %vm14034_vm0 }
 0x53e   :  { %v6526_v50 = vsel %vm14064_vm4, %v8547_v10, 0.0  ;;  %v5292_v2 = vrot.slane %v5291_v31, 1  ;;  %v5345_v62 = vadd.f32 %v5344_v37, %v5343_v46  ;;  %vm14065_vm12 = vmmov %vm14034_vm0 }
 0x53f   :  { %v6579_v58 = vadd.f32 %v6578_v56, %v6577_v44  ;;  %v6527_v42 = vadd.f32 %v6526_v50, %v6525_v18  ;;  %vm14066_vm2 = vmmov %vm14034_vm0 }
 0x540   :  { %v5293_v52 = vadd.f32 %v5292_v2, %v5291_v31  ;;  %v5346_v19 = vrot.slane %v5345_v62, 1  ;;  %vm14067_vm1 = vmmov %vm14034_vm0 }
 0x541   :  { %v6581_v7 = vadd.f32 %v6580_v26, %v6579_v58  ;;  %vm14068_vm14 = vmmov %vm14034_vm0 }
 0x542   :  { %v13154_v59 = vadd.f32 %v5293_v52, %v4091_v15  ;;  %v5347_v34 = vadd.f32 %v5346_v19, %v5345_v62  ;;  %vm14069_vm6 = vmmov %vm14034_vm0 }
 0x543   :  { %vm14070_vm13 = vmmov %vm14034_vm0 }
 0x544   :  { %v13156_v47 = vadd.f32 %v5347_v34, %v4145_v14  ;;  %vm14071_vm15 = vmmov %vm14034_vm0 }
 0x545   :  { %vm14072_vm3 = vmmov %vm14034_vm0 }
 0x546   :  { %vm14073_vm7 = vmmov %vm14034_vm0 }
 0x547   :  { %vm14074_vm8 = vmmov %vm14034_vm0 }
 0x548   :  { %vm14075_vm5 = vmmov %vm14034_vm0 }
 0x549   :  { %vm14076_vm9 = vmmov %vm14034_vm0 }
 0x54a   :  { %vm14077_vm10 = vmmov %vm14034_vm0 }
 0x54b   :  { %vm14078_vm11 = vmmov %vm14034_vm0 }
 0x54c   :  { %vm14079_vm4 = vmmov %vm14034_vm0 }
 0x556   :  { %v8566_v0 = vpop.f32.mrf.mxu1 }
 0x557   :  { %8394 = vst.msk [vmem:[%s13358_s3 + $0x190] sm:$0xff] %vm14065_vm12, %v8566_v0  ;;  %v8550_v13 = vpop.f32.mrf.mxu0  ;;  %v7723_v60 = vsel %vm14071_vm15, %v8566_v0, 0.0  ;;  %v7760_v41 = vmul.f32 %v8566_v0, %v8566_v0  ;;  %vm14080_vm12 = vmmov %vm14034_vm0 }
 0x558   :  { %8248 = vst.msk [vmem:[%s13358_s3 + $0x130] sm:$0xff] %vm14066_vm2, %v8550_v13  ;;  %v7640_v32 = vpop.f32.mrf.mxu1  ;;  %v6532_v54 = vsel %vm14072_vm3, %v8550_v13, 0.0  ;;  %v6565_v55 = vmul.f32 %v8550_v13, %v8550_v13  ;;  %vm14081_vm2 = vmmov %vm14034_vm0 }
 0x559   :  { %8392 = vst.msk [vmem:[%s13358_s3 + $0x180] sm:$0xff] %vm14067_vm1, %v7640_v32  ;;  %v6457_v23 = vpop.f32.mrf.mxu0  ;;  %v7758_v28 = vmul.f32 %v7640_v32, %v7640_v32  ;;  %v7720_v38 = vsel %vm14075_vm5, %v7640_v32, 0.0  ;;  %vm14082_vm1 = vmmov %vm14034_vm0 }
 0x55a   :  { %8246 = vst.msk [vmem:[%s13358_s3 + $0x120] sm:$0xff] %vm14068_vm14, %v6457_v23  ;;  %v6528_v8 = vsel %vm14069_vm6, %v6457_v23, 0.0  ;;  %v6563_v3 = vmul.f32 %v6457_v23, %v6457_v23  ;;  %v8567_v48 = vpop.f32.mrf.mxu1  ;;  %v7777_v24 = vsel %vm14082_vm1, %v7760_v41, 0.0  ;;  %vm14083_vm14 = vmmov %vm14034_vm0 }
 0x55b   :  { %v6529_v27 = vadd.f32 %v6528_v8, %v6527_v42  ;;  %8395 = vst.msk [vmem:[%s13358_s3 + $0x198] sm:$0xff] %vm14070_vm13, %v8567_v48  ;;  %v8551_v40 = vpop.f32.mrf.mxu0  ;;  %v7774_v11 = vsel %vm14034_vm0, %v7758_v28, 0.0  ;;  %v7761_v43 = vmul.f32 %v8567_v48, %v8567_v48  ;;  %v7725_v22 = vsel %vm14083_vm14, %v8567_v48, 0.0  ;;  %vm14084_vm6 = vmmov %vm14034_vm0 }
 0x55c   :  { %v6582_v12 = vsel %vm14073_vm7, %v6563_v3, 0.0  ;;  %8249 = vst.msk [vmem:[%s13358_s3 + $0x138] sm:$0xff] %vm14074_vm8, %v8551_v40  ;;  %v7643_v1 = vpop.f32.mrf.mxu1  ;;  %v6566_v63 = vmul.f32 %v8551_v40, %v8551_v40  ;;  %v6586_v57 = vsel %vm14084_vm6, %v6565_v55, 0.0  ;;  %vm14085_vm13 = vmmov %vm14034_vm0 }
 0x55d   :  { %v6583_v36 = vadd.f32 %v6582_v12, %v6581_v7  ;;  %8393 = vst.msk [vmem:[%s13358_s3 + $0x188] sm:$0xff] %vm14076_vm9, %v7643_v1  ;;  %v7721_v5 = vsel %vm14077_vm10, %v7643_v1, 0.0  ;;  %v7759_v35 = vmul.f32 %v7643_v1, %v7643_v1  ;;  %v6460_v6 = vpop.f32.mrf.mxu0  ;;  %v6534_v20 = vsel %vm14085_vm13, %v8551_v40, 0.0  ;;  %vm14086_vm15 = vmmov %vm14034_vm0 }
 0x55e   :  { %v7722_v4 = vadd.f32 %v7721_v5, %v7720_v38  ;;  %8247 = vst.msk [vmem:[%s13358_s3 + $0x128] sm:$0xff] %vm14078_vm11, %v6460_v6  ;;  %v6530_v10 = vsel %vm14079_vm4, %v6460_v6, 0.0  ;;  %v6564_v33 = vmul.f32 %v6460_v6, %v6460_v6  ;;  %v7779_v39 = vsel %vm14086_vm15, %v7761_v43, 0.0  ;;  %vm14087_vm3 = vmmov %vm14034_vm0 }
 0x55f   :  { %v7775_v17 = vsel %vm14080_vm12, %v7759_v35, 0.0  ;;  %v6531_v21 = vadd.f32 %v6530_v10, %v6529_v27  ;;  %v6588_v18 = vsel %vm14087_vm3, %v6566_v63, 0.0  ;;  %vm14088_vm7 = vmmov %vm14034_vm0 }
 0x560   :  { %v7724_v16 = vadd.f32 %v7723_v60, %v7722_v4  ;;  %v7776_v45 = vadd.f32 %v7775_v17, %v7774_v11  ;;  %v6584_v49 = vsel %vm14081_vm2, %v6564_v33, 0.0  ;;  %vm14089_vm8 = vmmov %vm14034_vm0 }
 0x561   :  { %v6533_v53 = vadd.f32 %v6532_v54, %v6531_v21  ;;  %v6585_v29 = vadd.f32 %v6584_v49, %v6583_v36  ;;  %vm14090_vm5 = vmmov %vm14034_vm0 }
 0x562   :  { %v7778_v51 = vadd.f32 %v7777_v24, %v7776_v45  ;;  %v7726_v25 = vadd.f32 %v7725_v22, %v7724_v16  ;;  %vm14091_vm9 = vmmov %vm14034_vm0 }
 0x563   :  { %v6587_v9 = vadd.f32 %v6586_v57, %v6585_v29  ;;  %v6535_v46 = vadd.f32 %v6534_v20, %v6533_v53  ;;  %vm14092_vm10 = vmmov %vm14034_vm0 }
 0x564   :  { %v7780_v44 = vadd.f32 %v7779_v39, %v7778_v51  ;;  %vm14093_vm11 = vmmov %vm14034_vm0 }
 0x565   :  { %v6589_v61 = vadd.f32 %v6588_v18, %v6587_v9  ;;  %vm14094_vm4 = vmmov %vm14034_vm0 }
 0x566   :  { %vm14095_vm12 = vmmov %vm14034_vm0 }
 0x567   :  { %vm14096_vm2 = vmmov %vm14034_vm0 }
 0x568   :  { %vm14097_vm1 = vmmov %vm14034_vm0 }
 0x569   :  { %vm14098_vm14 = vmmov %vm14034_vm0 }
 0x56a   :  { %vm14099_vm6 = vmmov %vm14034_vm0 }
 0x56b   :  { %vm14100_vm13 = vmmov %vm14034_vm0 }
 0x56c   :  { %vm14101_vm15 = vmmov %vm14034_vm0 }
 0x56d   :  { %vm14102_vm3 = vmmov %vm14034_vm0 }
 0x586   :  { %v8554_v56 = vpop.f32.mrf.mxu0 }
 0x587   :  { %8252 = vst.msk [vmem:[%s13358_s3 + $0x150] sm:$0xff] %vm14088_vm7, %v8554_v56  ;;  %v6569_v15 = vmul.f32 %v8554_v56, %v8554_v56  ;;  %v6540_v13 = vsel %vm14098_vm14, %v8554_v56, 0.0  ;;  %vm14103_vm7 = vmmov %vm14034_vm0 }
 0x588   :  { %v6473_v31 = vpop.f32.mrf.mxu0  ;;  %vm14113_vm14 = vmmov %vm14034_vm0 }
 0x589   :  { %v13210_v50 = vpop.f32.mrf.mxu1  ;;  %8250 = vst.msk [vmem:[%s13358_s3 + $0x140] sm:$0xff] %vm14090_vm5, %v6473_v31  ;;  %v6536_v37 = vsel %vm14091_vm9, %v6473_v31, 0.0  ;;  %v6567_v26 = vmul.f32 %v6473_v31, %v6473_v31  ;;  %v6594_v48 = vsel %vm14100_vm13, %v6569_v15, 0.0  ;;  %vm14105_vm5 = vmmov %vm14034_vm0 }
 0x58a   :  { %8398 = vst.msk [vmem:[%s13358_s3 + $0x1b0] sm:$0xff] %vm14089_vm8, %v13210_v50  ;;  %v6537_v42 = vadd.f32 %v6536_v37, %v6535_v46  ;;  %v8555_v30 = vpop.f32.mrf.mxu0  ;;  %vm14104_vm8 = vmmov %vm14034_vm0  ;;  %v7764_v57 = vmul.f32 %v13210_v50, %v13210_v50 }
 0x58b   :  { %v7656_v58 = vpop.f32.mrf.mxu1  ;;  %8253 = vst.msk [vmem:[%s13358_s3 + $0x158] sm:$0xff] %vm14093_vm11, %v8555_v30  ;;  %v6590_v2 = vsel %vm14094_vm4, %v6567_v26, 0.0  ;;  %v6570_v32 = vmul.f32 %v8555_v30, %v8555_v30  ;;  %v6542_v28 = vsel %vm14101_vm15, %v8555_v30, 0.0  ;;  %vm14106_vm9 = vmmov %vm14034_vm0 }
 0x58c   :  { %8396 = vst.msk [vmem:[%s13358_s3 + $0x1a0] sm:$0xff] %vm14092_vm10, %v7656_v58  ;;  %v6476_v7 = vpop.f32.mrf.mxu0  ;;  %v6591_v34 = vadd.f32 %v6590_v2, %v6589_v61  ;;  %v7762_v54 = vmul.f32 %v7656_v58, %v7656_v58  ;;  %v7727_v36 = vsel %vm14105_vm5, %v7656_v58, 0.0  ;;  %vm14107_vm10 = vmmov %vm14034_vm0 }
 0x58d   :  { %v13231_v62 = vpop.f32.mrf.mxu1  ;;  %8251 = vst.msk [vmem:[%s13358_s3 + $0x148] sm:$0xff] %vm14095_vm12, %v6476_v7  ;;  %v6538_v19 = vsel %vm14096_vm2, %v6476_v7, 0.0  ;;  %v6568_v14 = vmul.f32 %v6476_v7, %v6476_v7  ;;  %v6596_v60 = vsel %vm14102_vm3, %v6570_v32, 0.0  ;;  %vm14108_vm11 = vmmov %vm14034_vm0  ;;  %v7728_v43 = vadd.f32 %v7727_v36, %v7726_v25 }
 0x58e   :  { %8399 = vst.msk [vmem:[%s13358_s3 + $0x1b8] sm:$0xff] %vm14034_vm0, %v13231_v62  ;;  %v6539_v0 = vadd.f32 %v6538_v19, %v6537_v42  ;;  %v7781_v6 = vsel %vm14107_vm10, %v7762_v54, 0.0  ;;  %vm14109_vm4 = vmmov %vm14034_vm0  ;;  %v7765_v56 = vmul.f32 %v13231_v62, %v13231_v62 }
 0x58f   :  { %v7659_v52 = vpop.f32.mrf.mxu1  ;;  %v6592_v23 = vsel %vm14099_vm6, %v6568_v14, 0.0  ;;  %vm14110_vm12 = vmmov %vm14034_vm0  ;;  %v7782_v63 = vadd.f32 %v7781_v6, %v7780_v44 }
 0x590   :  { %8397 = vst.msk [vmem:[%s13358_s3 + $0x1a8] sm:$0xff] %vm14097_vm1, %v7659_v52  ;;  %v6541_v8 = vadd.f32 %v6540_v13, %v6539_v0  ;;  %v6593_v3 = vadd.f32 %v6592_v23, %v6591_v34  ;;  %v7763_v5 = vmul.f32 %v7659_v52, %v7659_v52  ;;  %v7729_v33 = vsel %vm14034_vm0, %v7659_v52, 0.0  ;;  %vm14111_vm2 = vmmov %vm14034_vm0 }
 0x591   :  { %vm14112_vm1 = vmmov %vm14034_vm0  ;;  %v7730_v24 = vadd.f32 %v7729_v33, %v7728_v43 }
 0x592   :  { %v6595_v27 = vadd.f32 %v6594_v48, %v6593_v3  ;;  %v6543_v40 = vadd.f32 %v6542_v28, %v6541_v8  ;;  %v7783_v16 = vsel %vm14113_vm14, %v7763_v5, 0.0  ;;  %vm14114_vm6 = vmmov %vm14034_vm0 }
 0x593   :  { %vm14115_vm13 = vmmov %vm14034_vm0  ;;  %v7784_v25 = vadd.f32 %v7783_v16, %v7782_v63 }
 0x594   :  { %v6597_v41 = vadd.f32 %v6596_v60, %v6595_v27  ;;  %vm14116_vm15 = vmmov %vm14034_vm0 }
 0x595   :  { %vm14117_vm3 = vmmov %vm14034_vm0 }
 0x596   :  { %vm14120_vm5 = vmmov %vm14034_vm0 }
 0x597   :  { %vm14122_vm10 = vmmov %vm14034_vm0 }
 0x598   :  { %v7785_v42 = vsel %vm14122_vm10, %v7764_v57, 0.0  ;;  %vm14128_vm14 = vmmov %vm14034_vm0 }
 0x599   :  { %v7786_v15 = vadd.f32 %v7785_v42, %v7784_v25  ;;  %vm14137_vm10 = vmmov %vm14034_vm0 }
 0x5b5   :  { %v13252_v12 = vpop.f32.mrf.mxu1 }
 0x5b6   :  { %8402 = vst.msk [vmem:[%s13358_s3 + $0x1d0] sm:$0xff] %vm14103_vm7, %v13252_v12  ;;  %v8558_v1 = vpop.f32.mrf.mxu0  ;;  %vm14118_vm7 = vmmov %vm14034_vm0  ;;  %v7768_v54 = vmul.f32 %v13252_v12, %v13252_v12 }
 0x5b7   :  { %8256 = vst.msk [vmem:[%s13358_s3 + $0x170] sm:$0xff] %vm14104_vm8, %v8558_v1  ;;  %v7672_v38 = vpop.f32.mrf.mxu1  ;;  %v6573_v22 = vmul.f32 %v8558_v1, %v8558_v1  ;;  %v6548_v39 = vsel %vm14117_vm3, %v8558_v1, 0.0  ;;  %vm14119_vm8 = vmmov %vm14034_vm0 }
 0x5b8   :  { %8400 = vst.msk [vmem:[%s13358_s3 + $0x1c0] sm:$0xff] %vm14106_vm9, %v7672_v38  ;;  %v6489_v35 = vpop.f32.mrf.mxu0  ;;  %v7731_v18 = vsel %vm14119_vm8, %v13210_v50, 0.0  ;;  %vm14121_vm9 = vmmov %vm14034_vm0  ;;  %v7766_v26 = vmul.f32 %v7672_v38, %v7672_v38  ;;  %v7735_v52 = vsel %vm14034_vm0, %v7672_v38, 0.0 }
 0x5b9   :  { %8254 = vst.msk [vmem:[%s13358_s3 + $0x160] sm:$0xff] %vm14108_vm11, %v6489_v35  ;;  %v6544_v55 = vsel %vm14109_vm4, %v6489_v35, 0.0  ;;  %v6571_v4 = vmul.f32 %v6489_v35, %v6489_v35  ;;  %v13274_v10 = vpop.f32.mrf.mxu1  ;;  %v7732_v31 = vadd.f32 %v7731_v18, %v7730_v24  ;;  %v6602_v37 = vsel %vm14120_vm5, %v6573_v22, 0.0  ;;  %vm14123_vm11 = vmmov %vm14034_vm0 }
 0x5ba   :  { %8403 = vst.msk [vmem:[%s13358_s3 + $0x1d8] sm:$0xff] %vm14110_vm12, %v13274_v10  ;;  %v8559_v11 = vpop.f32.mrf.mxu0  ;;  %v6545_v45 = vadd.f32 %v6544_v55, %v6543_v40  ;;  %v7733_v7 = vsel %vm14123_vm11, %v13231_v62, 0.0  ;;  %vm14124_vm4 = vmmov %vm14034_vm0 }
 0x5bb   :  { %v6598_v17 = vsel %vm14111_vm2, %v6571_v4, 0.0  ;;  %8257 = vst.msk [vmem:[%s13358_s3 + $0x178] sm:$0xff] %vm14112_vm1, %v8559_v11  ;;  %v7675_v21 = vpop.f32.mrf.mxu1  ;;  %v6574_v9 = vmul.f32 %v8559_v11, %v8559_v11  ;;  %v6550_v58 = vsel %vm14121_vm9, %v8559_v11, 0.0  ;;  %vm14125_vm12 = vmmov %vm14034_vm0  ;;  %v7734_v13 = vadd.f32 %v7733_v7, %v7732_v31 }
 0x5bc   :  { %8401 = vst.msk [vmem:[%s13358_s3 + $0x1c8] sm:$0xff] %vm14114_vm6, %v7675_v21  ;;  %v6492_v49 = vpop.f32.mrf.mxu0  ;;  %v6599_v20 = vadd.f32 %v6598_v17, %v6597_v41  ;;  %v7767_v19 = vmul.f32 %v7675_v21, %v7675_v21  ;;  %v7787_v0 = vsel %vm14125_vm12, %v7765_v56, 0.0  ;;  %vm14126_vm2 = vmmov %vm14034_vm0  ;;  %v7769_v11 = vmul.f32 %v13274_v10, %v13274_v10 }
 0x5bd   :  { %8255 = vst.msk [vmem:[%s13358_s3 + $0x168] sm:$0xff] %vm14115_vm13, %v6492_v49  ;;  %v6546_v53 = vsel %vm14116_vm15, %v6492_v49, 0.0  ;;  %v6572_v29 = vmul.f32 %v6492_v49, %v6492_v49  ;;  %v6604_v50 = vsel %vm14124_vm4, %v6574_v9, 0.0  ;;  %v7789_v32 = vsel %vm14126_vm2, %v7766_v26, 0.0  ;;  %vm14127_vm1 = vmmov %vm14034_vm0 }
 0x5be   :  { %v6547_v51 = vadd.f32 %v6546_v53, %v6545_v45  ;;  %v7737_v23 = vsel %vm14127_vm1, %v7675_v21, 0.0  ;;  %v7736_v48 = vadd.f32 %v7735_v52, %v7734_v13  ;;  %v7788_v28 = vadd.f32 %v7787_v0, %v7786_v15  ;;  %vm14129_vm6 = vmmov %vm14034_vm0 }
 0x5bf   :  { %v6600_v46 = vsel %vm14118_vm7, %v6572_v29, 0.0  ;;  %v7791_v62 = vsel %vm14128_vm14, %v7767_v19, 0.0  ;;  %v7739_v5 = vsel %vm14129_vm6, %v13252_v12, 0.0  ;;  %vm14130_vm13 = vmmov %vm14034_vm0  ;;  %vm7812_vm6 = vcmask 1040384  }
 0x5c0   :  { %v6549_v44 = vadd.f32 %v6548_v39, %v6547_v51  ;;  %v6601_v61 = vadd.f32 %v6600_v46, %v6599_v20  ;;  %v7790_v60 = vadd.f32 %v7789_v32, %v7788_v28  ;;  %v7738_v41 = vadd.f32 %v7737_v23, %v7736_v48  ;;  %vm14131_vm15 = vmmov %vm14034_vm0 }
 0x5c1   :  { %v7793_v33 = vsel %vm14130_vm13, %v7768_v54, 0.0  ;;  %vm14132_vm3 = vmmov %vm14034_vm0  ;;  %vm7814_vm13 = vcmask 25600  }
 0x5c2   :  { %v6551_v30 = vadd.f32 %v6550_v58, %v6549_v44  ;;  %v6603_v2 = vadd.f32 %v6602_v37, %v6601_v61  ;;  %v7792_v36 = vadd.f32 %v7791_v62, %v7790_v60  ;;  %v7740_v55 = vadd.f32 %v7739_v5, %v7738_v41  ;;  %vm14133_vm7 = vmmov %vm14034_vm0 }
 0x5c3   :  { %v7741_v12 = vsel %vm14132_vm3, %v13274_v10, 0.0  ;;  %vm14134_vm8 = vmmov %vm14034_vm0 }
 0x5c4   :  { %v6552_v14 = vrot.slane %v6551_v30, 4  ;;  %v6605_v34 = vadd.f32 %v6604_v50, %v6603_v2  ;;  %v7794_v21 = vadd.f32 %v7793_v33, %v7792_v36  ;;  %v7742_v24 = vadd.f32 %v7741_v12, %v7740_v55  ;;  %vm14135_vm5 = vmmov %vm14034_vm0 }
 0x5c5   :  { %v7795_v29 = vsel %vm14135_vm5, %v7769_v11, 0.0  ;;  %vm14136_vm9 = vmmov %vm14034_vm0 }
 0x5c6   :  { %v6553_v8 = vadd.f32 %v6552_v14, %v6551_v30  ;;  %v6606_v3 = vrot.slane %v6605_v34, 4  ;;  %v7796_v10 = vadd.f32 %v7795_v29, %v7794_v21  ;;  %vm14138_vm11 = vmmov %vm14034_vm0 }
 0x5c7   :  { %vm14139_vm4 = vmmov %vm14034_vm0 }
 0x5c8   :  { %v6554_v27 = vrot.slane %v6553_v8, 2  ;;  %v6607_v40 = vadd.f32 %v6606_v3, %v6605_v34  ;;  %vm14140_vm12 = vmmov %vm14034_vm0 }
 0x5c9   :  { %vm14141_vm2 = vmmov %vm14034_vm0 }
 0x5ca   :  { %v6555_v1 = vadd.f32 %v6554_v27, %v6553_v8  ;;  %v6608_v38 = vrot.slane %v6607_v40, 2  ;;  %vm14142_vm1 = vmmov %vm14034_vm0 }
 0x5cb   :  { %vm14143_vm14 = vmmov %vm14034_vm0 }
 0x5cc   :  { %v6556_v35 = vrot.slane %v6555_v1, 1  ;;  %v6609_v6 = vadd.f32 %v6608_v38, %v6607_v40 }
 0x5ce   :  { %v6557_v43 = vadd.f32 %v6556_v35, %v6555_v1  ;;  %v6610_v17 = vrot.slane %v6609_v6, 1 }
 0x5d0   :  { %v6558_v16 = vadd.f32 %v6557_v43, %v13154_v59  ;;  %v6611_v45 = vadd.f32 %v6610_v17, %v6609_v6 }
 0x5d2   :  { %v6612_v57 = vadd.f32 %v6611_v45, %v13156_v47 }
 0x5dd   :  { %v8578_v4 = vpop.f32.mrf.mxu1 }
 0x5de   :  { %8406 = vst.msk [vmem:[%s13358_s3 + $0x1f0] sm:$0xff] %vm14131_vm15, %v8578_v4  ;;  %v7772_v25 = vmul.f32 %v8578_v4, %v8578_v4  ;;  %v7747_v18 = vsel %vm14034_vm0, %v8578_v4, 0.0 }
 0x5df   :  { %v7688_v63 = vpop.f32.mrf.mxu1 }
 0x5e0   :  { %8404 = vst.msk [vmem:[%s13358_s3 + $0x1e0] sm:$0xff] %vm14133_vm7, %v7688_v63  ;;  %v7743_v49 = vsel %vm14134_vm8, %v7688_v63, 0.0  ;;  %v7770_v22 = vmul.f32 %v7688_v63, %v7688_v63  ;;  %v7801_v37 = vsel %vm14141_vm2, %v7772_v25, 0.0 }
 0x5e1   :  { %v8579_v53 = vpop.f32.mrf.mxu1  ;;  %v7744_v59 = vadd.f32 %v7743_v49, %v7742_v24 }
 0x5e2   :  { %8407 = vst.msk [vmem:[%s13358_s3 + $0x1f8] sm:$0xff] %vm14136_vm9, %v8579_v53  ;;  %v7797_v20 = vsel %vm14137_vm10, %v7770_v22, 0.0  ;;  %v7773_v44 = vmul.f32 %v8579_v53, %v8579_v53  ;;  %v7749_v58 = vsel %vm14142_vm1, %v8579_v53, 0.0 }
 0x5e3   :  { %v7691_v51 = vpop.f32.mrf.mxu1  ;;  %v7798_v47 = vadd.f32 %v7797_v20, %v7796_v10 }
 0x5e4   :  { %8405 = vst.msk [vmem:[%s13358_s3 + $0x1e8] sm:$0xff] %vm14138_vm11, %v7691_v51  ;;  %v7745_v39 = vsel %vm14139_vm4, %v7691_v51, 0.0  ;;  %v7771_v9 = vmul.f32 %v7691_v51, %v7691_v51  ;;  %v7803_v30 = vsel %vm14143_vm14, %v7773_v44, 0.0 }
 0x5e5   :  { %v7746_v46 = vadd.f32 %v7745_v39, %v7744_v59 }
 0x5e6   :  { %v7799_v61 = vsel %vm14140_vm12, %v7771_v9, 0.0 }
 0x5e7   :  { %v7748_v56 = vadd.f32 %v7747_v18, %v7746_v46  ;;  %v7800_v31 = vadd.f32 %v7799_v61, %v7798_v47 }
 0x5e9   :  { %v7750_v42 = vadd.f32 %v7749_v58, %v7748_v56  ;;  %v7802_v26 = vadd.f32 %v7801_v37, %v7800_v31 }
 0x5eb   :  { %v7751_v2 = vrot.slane %v7750_v42, 4  ;;  %v7804_v7 = vadd.f32 %v7803_v30, %v7802_v26 }
 0x5ed   :  { %v7752_v15 = vadd.f32 %v7751_v2, %v7750_v42  ;;  %v7805_v50 = vrot.slane %v7804_v7, 4 }
 0x5ef   :  { %v7753_v52 = vrot.slane %v7752_v15, 2  ;;  %v7806_v19 = vadd.f32 %v7805_v50, %v7804_v7 }
 0x5f1   :  { %v7754_v14 = vadd.f32 %v7753_v52, %v7752_v15  ;;  %v7807_v34 = vrot.slane %v7806_v19, 2 }
 0x5f3   :  { %v7755_v0 = vrot.slane %v7754_v14, 1  ;;  %v7808_v13 = vadd.f32 %v7807_v34, %v7806_v19 }
 0x5f5   :  { %v7756_v32 = vadd.f32 %v7755_v0, %v7754_v14  ;;  %v7809_v23 = vrot.slane %v7808_v13, 1 }
 0x5f7   :  { %v7757_v8 = vadd.f32 %v7756_v32, %v6558_v16  ;;  %v7810_v3 = vadd.f32 %v7809_v23, %v7808_v13 }
 0x5f9   :  { %v7811_v48 = vadd.f32 %v7810_v3, %v6612_v57 }
 0x5fb   :  { %v7813_v28 = vsel %vm7812_vm6, %v7757_v8, %v7811_v48 }
 0x5fc   :  { %7815 = vst.msk [vmem:[%s13359_s4] sm:$0x3] %vm7814_vm13, %v7813_v28 }

</bundles_post_ra>
